<compile_context>
chip_gen: v5e
topology: v5e:2x2
jax: 0.10.0
libtpu: 0.0.40
codegen_flags: <defaults>
</compile_context>

<pallas_src>
import numpy as np

import jax
import jax.numpy as jnp
from jax import lax
from jax.experimental import pallas as pl
from jax.experimental.pallas import tpu as pltpu

EPS = 1e-5
LANE = 128
MXU_DTYPE = jnp.bfloat16   # MXU operand dtype (accumulation is always f32)


def _round_up(x, m):
    return (x + m - 1) // m * m


# ----------------------------- Pallas kernels ------------------------------

def _conv3x3_stats_kernel(xp_ref, w_ref, y_ref, csum_ref, csq_ref):
    """One batch image: y = conv3x3(x), plus per-channel sum / sum-of-squares.

    xp_ref  : (1, H+2, W+2, Cin)  bf16, spatial halo already zero-padded
    w_ref   : (9, Cin, Ppad)      bf16, tap-major weights (t = kh*3 + kw)
    y_ref   : (1, H*W, Ppad)      f32
    csum_ref: (1, 1, Ppad)        f32
    csq_ref : (1, 1, Ppad)        f32
    """
    _, hp2, wp2, cin = xp_ref.shape
    h, w = hp2 - 2, wp2 - 2
    hw = h * w
    ppad = y_ref.shape[-1]

    acc = jnp.zeros((hw, ppad), jnp.float32)
    # 9-tap accumulation: each activation element is read from HBM exactly
    # once (no im2col).  K per dot = Cin (=128 for conv2); taps could be
    # grouped for K >= 256 on v6e/v7x, kept separate here for clarity.
    for t in range(9):
        kh, kw = t // 3, t % 3
        xs = xp_ref[0, kh:kh + h, kw:kw + w, :].reshape(hw, cin)
        acc = acc + jnp.dot(xs, w_ref[t], preferred_element_type=jnp.float32)

    y_ref[0] = acc
    # One-pass BN statistics (sum / sum-of-squares), finalized in the wrapper.
    csum_ref[0] = jnp.sum(acc, axis=0, keepdims=True)
    csq_ref[0] = jnp.sum(acc * acc, axis=0, keepdims=True)


def _bn_relu_kernel(y_ref, scale_ref, shift_ref, o_ref):
    y = y_ref[...] * scale_ref[...] + shift_ref[...]
    o_ref[...] = jnp.maximum(y, 0.0).astype(o_ref.dtype)


def _bn_add_relu_kernel(y_ref, scale_ref, shift_ref, res_ref, o_ref):
    y = y_ref[...] * scale_ref[...] + shift_ref[...] + res_ref[...]
    o_ref[...] = jnp.maximum(y, 0.0).astype(o_ref.dtype)


# --------------------------- pallas_call wrappers ---------------------------

def _conv3x3_bn_stats(xp, w_taps):
    """xp: (N, H+2, W+2, Cin) bf16 (halo padded); w_taps: (9, Cin, Ppad) bf16."""
    n, hp2, wp2, cin = xp.shape
    h, w = hp2 - 2, wp2 - 2
    hw = h * w
    ppad = w_taps.shape[-1]

    flops = 2 * n * hw * 9 * cin * ppad
    bytes_accessed = (xp.size * xp.dtype.itemsize
                      + w_taps.size * w_taps.dtype.itemsize
                      + n * hw * ppad * 4 + 2 * n * ppad * 4)

    return pl.pallas_call(
        _conv3x3_stats_kernel,
        grid=(n,),
        in_specs=[
            pl.BlockSpec((1, hp2, wp2, cin), lambda i: (i, 0, 0, 0)),
            pl.BlockSpec((9, cin, ppad), lambda i: (0, 0, 0)),  # weights stay resident
        ],
        out_specs=(
            pl.BlockSpec((1, hw, ppad), lambda i: (i, 0, 0)),
            pl.BlockSpec((1, 1, ppad), lambda i: (i, 0, 0)),
            pl.BlockSpec((1, 1, ppad), lambda i: (i, 0, 0)),
        ),
        out_shape=(
            jax.ShapeDtypeStruct((n, hw, ppad), jnp.float32),
            jax.ShapeDtypeStruct((n, 1, ppad), jnp.float32),
            jax.ShapeDtypeStruct((n, 1, ppad), jnp.float32),
        ),
        compiler_params=pltpu.CompilerParams(dimension_semantics=("parallel",)),
        cost_estimate=pl.CostEstimate(flops=flops, transcendentals=0,
                                      bytes_accessed=bytes_accessed),
    )(xp, w_taps)


def _bn_relu_apply(y, scale, shift, residual=None, out_dtype=jnp.float32):
    """Tiled element-wise: relu(y * scale + shift (+ residual))."""
    n, hw, ppad = y.shape
    row_spec = pl.BlockSpec((1, hw, ppad), lambda i: (i, 0, 0))
    vec_spec = pl.BlockSpec((1, 1, ppad), lambda i: (0, 0, 0))

    args = [y, scale, shift]
    in_specs = [row_spec, vec_spec, vec_spec]
    kernel = _bn_relu_kernel
    io_aliases = {}
    if residual is not None:
        args.append(residual)
        in_specs.append(row_spec)
        kernel = _bn_add_relu_kernel
        if residual.dtype == jnp.dtype(out_dtype) and residual.shape == (n, hw, ppad):
            io_aliases = {3: 0}   # reuse the residual's HBM buffer for the output

    bytes_accessed = (sum(a.size * a.dtype.itemsize for a in args)
                      + n * hw * ppad * jnp.dtype(out_dtype).itemsize)

    return pl.pallas_call(
        kernel,
        grid=(n,),
        in_specs=in_specs,
        out_specs=row_spec,
        out_shape=jax.ShapeDtypeStruct((n, hw, ppad), out_dtype),
        compiler_params=pltpu.CompilerParams(dimension_semantics=("parallel",)),
        cost_estimate=pl.CostEstimate(flops=4 * n * hw * ppad, transcendentals=0,
                                      bytes_accessed=bytes_accessed),
        input_output_aliases=io_aliases,
    )(*args)


# ------------------------------- JAX glue ----------------------------------

def _prep_taps(w_oihw, cin_pad, cout_pad):
    """(O, I, 3, 3) torch layout -> (9, cin_pad, cout_pad) bf16, tap-major."""
    o, i, kh, kw = w_oihw.shape
    w = jnp.transpose(w_oihw, (2, 3, 1, 0)).reshape(kh * kw, i, o)
    w = jnp.pad(w, ((0, 0), (0, cin_pad - i), (0, cout_pad - o)))
    return w.astype(MXU_DTYPE)


def _bn_scale_shift(csum, csq, count, gamma_pad, beta_pad):
    """Fold training-mode batch statistics into per-channel scale/shift (f32)."""
    total = jnp.sum(csum[:, 0, :], axis=0)
    total_sq = jnp.sum(csq[:, 0, :], axis=0)
    mean = total / count
    var = jnp.maximum(total_sq / count - mean * mean, 0.0)
    scale = gamma_pad * lax.rsqrt(var + EPS)
    shift = beta_pad - mean * scale
    ppad = scale.shape[0]
    return scale.reshape(1, 1, ppad), shift.reshape(1, 1, ppad)


@jax.jit
def basic_block_forward(x_nchw, params):
    """BasicBlock.forward (stride=1, downsample=None), training-mode BN stats."""
    w1, g1, b1, w2, g2, b2 = params
    n, c, h, w = x_nchw.shape
    p = w1.shape[0]
    assert p == c and w1.shape[1] == c and w2.shape[0] == p and w2.shape[1] == p, \
        "default BasicBlock (stride=1, downsample=None) requires inplanes == planes"
    hw = h * w
    ppad = _round_up(p, LANE)
    count = n * hw

    x_nhwc = jnp.transpose(x_nchw, (0, 2, 3, 1))                       # (N,H,W,C) f32

    # ---- conv1 -> batch stats ----
    xp1 = jnp.pad(x_nhwc.astype(MXU_DTYPE), ((0, 0), (1, 1), (1, 1), (0, 0)))
    y1, s1, q1 = _conv3x3_bn_stats(xp1, _prep_taps(w1, c, ppad))
    scale1, shift1 = _bn_scale_shift(s1, q1, count,
                                     jnp.pad(g1, (0, ppad - p)),
                                     jnp.pad(b1, (0, ppad - p)))

    # ---- bn1 + relu (bf16 activations feed conv2) ----
    a1 = _bn_relu_apply(y1, scale1, shift1, out_dtype=MXU_DTYPE)       # (N,HW,Ppad)

    # ---- conv2 -> batch stats ----
    xp2 = jnp.pad(a1.reshape(n, h, w, ppad), ((0, 0), (1, 1), (1, 1), (0, 0)))
    y2, s2, q2 = _conv3x3_bn_stats(xp2, _prep_taps(w2, ppad, ppad))
    scale2, shift2 = _bn_scale_shift(s2, q2, count,
                                     jnp.pad(g2, (0, ppad - p)),
                                     jnp.pad(b2, (0, ppad - p)))

    # ---- bn2 + residual + relu ----
    res = jnp.pad(x_nhwc, ((0, 0), (0, 0), (0, 0), (0, ppad - c))).reshape(n, hw, ppad)
    out = _bn_relu_apply(y2, scale2, shift2, residual=res, out_dtype=jnp.float32)

    out = out.reshape(n, h, w, ppad)[..., :p]
    return jnp.transpose(out, (0, 3, 1, 2))                            # NHWC -> NCHW


# --------------------------- pure-JAX reference -----------------------------

@jax.jit
def basic_block_reference(x_nchw, params):
    """Same math, same MXU numerics (bf16 operands, f32 accumulation)."""
    w1, g1, b1, w2, g2, b2 = params

    def conv(inp, wt):
        dn = lax.conv_dimension_numbers(inp.shape, wt.shape, ("NCHW", "OIHW", "NCHW"))
        return lax.conv_general_dilated(
            inp.astype(MXU_DTYPE), wt.astype(MXU_DTYPE), (1, 1), ((1, 1), (1, 1)),
            dimension_numbers=dn, preferred_element_type=jnp.float32)

    def bn(y, g, b):
        m = jnp.mean(y, axis=(0, 2, 3), keepdims=True)
        v = jnp.mean(jnp.square(y - m), axis=(0, 2, 3), keepdims=True)
        return ((y - m) * lax.rsqrt(v + EPS) * g.reshape(1, -1, 1, 1)
                + b.reshape(1, -1, 1, 1))

    y = jnp.maximum(bn(conv(x_nchw, w1), g1, b1), 0.0)
    y = bn(conv(y, w2), g2, b2) + x_nchw
    return jnp.maximum(y, 0.0)


# --------------------------------- main -------------------------------------

if __name__ == "__main__":
    N, C, H, W = 2, 4, 16, 16
    planes = C   # default BasicBlock: stride=1, downsample=None -> inplanes == planes

    key = jax.random.PRNGKey(0)
    kx, k1, k2, k3, k4 = jax.random.split(key, 5)

    x = jax.random.normal(kx, (N, C, H, W), dtype=jnp.float32)
    w1 = 0.1 * jax.random.normal(k1, (planes, C, 3, 3), dtype=jnp.float32)
    w2 = 0.1 * jax.random.normal(k2, (planes, planes, 3, 3), dtype=jnp.float32)
    g1 = 1.0 + 0.1 * jax.random.normal(k3, (planes,), dtype=jnp.float32)
    b1 = 0.1 * jax.random.normal(k4, (planes,), dtype=jnp.float32)
    g2 = jnp.ones((planes,), jnp.float32)     # BatchNorm2d default init
    b2 = jnp.zeros((planes,), jnp.float32)
    params = (w1, g1, b1, w2, g2, b2)

    out = jax.block_until_ready(basic_block_forward(x, params))
    ref = jax.block_until_ready(basic_block_reference(x, params))

    # Both paths use bf16 MXU operands with f32 accumulation; residual
    # differences are f32 accumulation-order noise plus rare one-ulp bf16
    # casts of the intermediate activation.
    np.testing.assert_allclose(np.asarray(out), np.asarray(ref), rtol=1e-3, atol=2e-3)

    print("KERNEL_OK")
</pallas_src>

<mosaic_0001>
module attributes {stable_mosaic.version = 11 : i64} {
  func.func @_conv3x3_stats_kernel(%arg0: i32, %arg1: memref<1x18x18x4xbf16, #tpu.memory_space<vmem>>, %arg2: memref<9x4x128xbf16, #tpu.memory_space<vmem>>, %arg3: memref<1x256x128xf32, #tpu.memory_space<vmem>>, %arg4: memref<1x1x128xf32, #tpu.memory_space<vmem>>, %arg5: memref<1x1x128xf32, #tpu.memory_space<vmem>>) attributes {dimension_semantics = [#tpu.dimension_semantics<parallel>], iteration_bounds = array<i64: 2>, scalar_prefetch = 0 : i64, scratch_operands = 0 : i64, tpu.core_type = #tpu.core_type<tc>, window_params = [{transform_indices = @transform_0, window_bounds = array<i64: 1, 18, 18, 4>}, {pipeline_mode = #tpu.pipeline_mode<synchronous>, transform_indices = @transform_1, window_bounds = array<i64: 9, 4, 128>}, {transform_indices = @transform_2, window_bounds = array<i64: 1, 256, 128>}, {transform_indices = @transform_3, window_bounds = array<i64: 1, 1, 128>}, {transform_indices = @transform_4, window_bounds = array<i64: 1, 1, 128>}]} {
    %cst = arith.constant 0.000000e+00 : f32
    %0 = vector.broadcast %cst : f32 to vector<256x128xf32>
    %c0 = arith.constant 0 : index
    %c0_0 = arith.constant 0 : index
    %c0_1 = arith.constant 0 : index
    %c0_2 = arith.constant 0 : index
    %1 = vector.load %arg1[%c0, %c0_0, %c0_1, %c0_2] : memref<1x18x18x4xbf16, #tpu.memory_space<vmem>>, vector<1x16x16x4xbf16>
    %2 = vector.shape_cast %1 : vector<1x16x16x4xbf16> to vector<16x16x4xbf16>
    %3 = vector.shape_cast %2 : vector<16x16x4xbf16> to vector<256x4xbf16>
    %c0_3 = arith.constant 0 : index
    %c0_4 = arith.constant 0 : index
    %c0_5 = arith.constant 0 : index
    %4 = vector.load %arg2[%c0_3, %c0_4, %c0_5] : memref<9x4x128xbf16, #tpu.memory_space<vmem>>, vector<1x4x128xbf16>
    %5 = vector.shape_cast %4 : vector<1x4x128xbf16> to vector<4x128xbf16>
    %cst_6 = arith.constant dense<0.000000e+00> : vector<256x128xf32>
    %6 = tpu.matmul %3, %5, %cst_6 {dimension_numbers = #tpu.dot_dimension_numbers<[1], [0], [0], [1], [0, 0, 1, 1], [], []>} : vector<256x4xbf16>, vector<4x128xbf16>, vector<256x128xf32> -> vector<256x128xf32>
    %7 = arith.addf %0, %6 : vector<256x128xf32>
    %c0_7 = arith.constant 0 : index
    %c0_8 = arith.constant 0 : index
    %c1 = arith.constant 1 : index
    %c0_9 = arith.constant 0 : index
    %8 = vector.load %arg1[%c0_7, %c0_8, %c1, %c0_9] : memref<1x18x18x4xbf16, #tpu.memory_space<vmem>>, vector<1x16x16x4xbf16>
    %9 = vector.shape_cast %8 : vector<1x16x16x4xbf16> to vector<16x16x4xbf16>
    %10 = vector.shape_cast %9 : vector<16x16x4xbf16> to vector<256x4xbf16>
    %c1_10 = arith.constant 1 : index
    %c0_11 = arith.constant 0 : index
    %c0_12 = arith.constant 0 : index
    %11 = vector.load %arg2[%c1_10, %c0_11, %c0_12] : memref<9x4x128xbf16, #tpu.memory_space<vmem>>, vector<1x4x128xbf16>
    %12 = vector.shape_cast %11 : vector<1x4x128xbf16> to vector<4x128xbf16>
    %cst_13 = arith.constant dense<0.000000e+00> : vector<256x128xf32>
    %13 = tpu.matmul %10, %12, %cst_13 {dimension_numbers = #tpu.dot_dimension_numbers<[1], [0], [0], [1], [0, 0, 1, 1], [], []>} : vector<256x4xbf16>, vector<4x128xbf16>, vector<256x128xf32> -> vector<256x128xf32>
    %14 = arith.addf %7, %13 : vector<256x128xf32>
    %c0_14 = arith.constant 0 : index
    %c0_15 = arith.constant 0 : index
    %c2 = arith.constant 2 : index
    %c0_16 = arith.constant 0 : index
    %15 = vector.load %arg1[%c0_14, %c0_15, %c2, %c0_16] : memref<1x18x18x4xbf16, #tpu.memory_space<vmem>>, vector<1x16x16x4xbf16>
    %16 = vector.shape_cast %15 : vector<1x16x16x4xbf16> to vector<16x16x4xbf16>
    %17 = vector.shape_cast %16 : vector<16x16x4xbf16> to vector<256x4xbf16>
    %c2_17 = arith.constant 2 : index
    %c0_18 = arith.constant 0 : index
    %c0_19 = arith.constant 0 : index
    %18 = vector.load %arg2[%c2_17, %c0_18, %c0_19] : memref<9x4x128xbf16, #tpu.memory_space<vmem>>, vector<1x4x128xbf16>
    %19 = vector.shape_cast %18 : vector<1x4x128xbf16> to vector<4x128xbf16>
    %cst_20 = arith.constant dense<0.000000e+00> : vector<256x128xf32>
    %20 = tpu.matmul %17, %19, %cst_20 {dimension_numbers = #tpu.dot_dimension_numbers<[1], [0], [0], [1], [0, 0, 1, 1], [], []>} : vector<256x4xbf16>, vector<4x128xbf16>, vector<256x128xf32> -> vector<256x128xf32>
    %21 = arith.addf %14, %20 : vector<256x128xf32>
    %c0_21 = arith.constant 0 : index
    %c1_22 = arith.constant 1 : index
    %c0_23 = arith.constant 0 : index
    %c0_24 = arith.constant 0 : index
    %22 = vector.load %arg1[%c0_21, %c1_22, %c0_23, %c0_24] : memref<1x18x18x4xbf16, #tpu.memory_space<vmem>>, vector<1x16x16x4xbf16>
    %23 = vector.shape_cast %22 : vector<1x16x16x4xbf16> to vector<16x16x4xbf16>
    %24 = vector.shape_cast %23 : vector<16x16x4xbf16> to vector<256x4xbf16>
    %c3 = arith.constant 3 : index
    %c0_25 = arith.constant 0 : index
    %c0_26 = arith.constant 0 : index
    %25 = vector.load %arg2[%c3, %c0_25, %c0_26] : memref<9x4x128xbf16, #tpu.memory_space<vmem>>, vector<1x4x128xbf16>
    %26 = vector.shape_cast %25 : vector<1x4x128xbf16> to vector<4x128xbf16>
    %cst_27 = arith.constant dense<0.000000e+00> : vector<256x128xf32>
    %27 = tpu.matmul %24, %26, %cst_27 {dimension_numbers = #tpu.dot_dimension_numbers<[1], [0], [0], [1], [0, 0, 1, 1], [], []>} : vector<256x4xbf16>, vector<4x128xbf16>, vector<256x128xf32> -> vector<256x128xf32>
    %28 = arith.addf %21, %27 : vector<256x128xf32>
    %c0_28 = arith.constant 0 : index
    %c1_29 = arith.constant 1 : index
    %c1_30 = arith.constant 1 : index
    %c0_31 = arith.constant 0 : index
    %29 = vector.load %arg1[%c0_28, %c1_29, %c1_30, %c0_31] : memref<1x18x18x4xbf16, #tpu.memory_space<vmem>>, vector<1x16x16x4xbf16>
    %30 = vector.shape_cast %29 : vector<1x16x16x4xbf16> to vector<16x16x4xbf16>
    %31 = vector.shape_cast %30 : vector<16x16x4xbf16> to vector<256x4xbf16>
    %c4 = arith.constant 4 : index
    %c0_32 = arith.constant 0 : index
    %c0_33 = arith.constant 0 : index
    %32 = vector.load %arg2[%c4, %c0_32, %c0_33] : memref<9x4x128xbf16, #tpu.memory_space<vmem>>, vector<1x4x128xbf16>
    %33 = vector.shape_cast %32 : vector<1x4x128xbf16> to vector<4x128xbf16>
    %cst_34 = arith.constant dense<0.000000e+00> : vector<256x128xf32>
    %34 = tpu.matmul %31, %33, %cst_34 {dimension_numbers = #tpu.dot_dimension_numbers<[1], [0], [0], [1], [0, 0, 1, 1], [], []>} : vector<256x4xbf16>, vector<4x128xbf16>, vector<256x128xf32> -> vector<256x128xf32>
    %35 = arith.addf %28, %34 : vector<256x128xf32>
    %c0_35 = arith.constant 0 : index
    %c1_36 = arith.constant 1 : index
    %c2_37 = arith.constant 2 : index
    %c0_38 = arith.constant 0 : index
    %36 = vector.load %arg1[%c0_35, %c1_36, %c2_37, %c0_38] : memref<1x18x18x4xbf16, #tpu.memory_space<vmem>>, vector<1x16x16x4xbf16>
    %37 = vector.shape_cast %36 : vector<1x16x16x4xbf16> to vector<16x16x4xbf16>
    %38 = vector.shape_cast %37 : vector<16x16x4xbf16> to vector<256x4xbf16>
    %c5 = arith.constant 5 : index
    %c0_39 = arith.constant 0 : index
    %c0_40 = arith.constant 0 : index
    %39 = vector.load %arg2[%c5, %c0_39, %c0_40] : memref<9x4x128xbf16, #tpu.memory_space<vmem>>, vector<1x4x128xbf16>
    %40 = vector.shape_cast %39 : vector<1x4x128xbf16> to vector<4x128xbf16>
    %cst_41 = arith.constant dense<0.000000e+00> : vector<256x128xf32>
    %41 = tpu.matmul %38, %40, %cst_41 {dimension_numbers = #tpu.dot_dimension_numbers<[1], [0], [0], [1], [0, 0, 1, 1], [], []>} : vector<256x4xbf16>, vector<4x128xbf16>, vector<256x128xf32> -> vector<256x128xf32>
    %42 = arith.addf %35, %41 : vector<256x128xf32>
    %c0_42 = arith.constant 0 : index
    %c2_43 = arith.constant 2 : index
    %c0_44 = arith.constant 0 : index
    %c0_45 = arith.constant 0 : index
    %43 = vector.load %arg1[%c0_42, %c2_43, %c0_44, %c0_45] : memref<1x18x18x4xbf16, #tpu.memory_space<vmem>>, vector<1x16x16x4xbf16>
    %44 = vector.shape_cast %43 : vector<1x16x16x4xbf16> to vector<16x16x4xbf16>
    %45 = vector.shape_cast %44 : vector<16x16x4xbf16> to vector<256x4xbf16>
    %c6 = arith.constant 6 : index
    %c0_46 = arith.constant 0 : index
    %c0_47 = arith.constant 0 : index
    %46 = vector.load %arg2[%c6, %c0_46, %c0_47] : memref<9x4x128xbf16, #tpu.memory_space<vmem>>, vector<1x4x128xbf16>
    %47 = vector.shape_cast %46 : vector<1x4x128xbf16> to vector<4x128xbf16>
    %cst_48 = arith.constant dense<0.000000e+00> : vector<256x128xf32>
    %48 = tpu.matmul %45, %47, %cst_48 {dimension_numbers = #tpu.dot_dimension_numbers<[1], [0], [0], [1], [0, 0, 1, 1], [], []>} : vector<256x4xbf16>, vector<4x128xbf16>, vector<256x128xf32> -> vector<256x128xf32>
    %49 = arith.addf %42, %48 : vector<256x128xf32>
    %c0_49 = arith.constant 0 : index
    %c2_50 = arith.constant 2 : index
    %c1_51 = arith.constant 1 : index
    %c0_52 = arith.constant 0 : index
    %50 = vector.load %arg1[%c0_49, %c2_50, %c1_51, %c0_52] : memref<1x18x18x4xbf16, #tpu.memory_space<vmem>>, vector<1x16x16x4xbf16>
    %51 = vector.shape_cast %50 : vector<1x16x16x4xbf16> to vector<16x16x4xbf16>
    %52 = vector.shape_cast %51 : vector<16x16x4xbf16> to vector<256x4xbf16>
    %c7 = arith.constant 7 : index
    %c0_53 = arith.constant 0 : index
    %c0_54 = arith.constant 0 : index
    %53 = vector.load %arg2[%c7, %c0_53, %c0_54] : memref<9x4x128xbf16, #tpu.memory_space<vmem>>, vector<1x4x128xbf16>
    %54 = vector.shape_cast %53 : vector<1x4x128xbf16> to vector<4x128xbf16>
    %cst_55 = arith.constant dense<0.000000e+00> : vector<256x128xf32>
    %55 = tpu.matmul %52, %54, %cst_55 {dimension_numbers = #tpu.dot_dimension_numbers<[1], [0], [0], [1], [0, 0, 1, 1], [], []>} : vector<256x4xbf16>, vector<4x128xbf16>, vector<256x128xf32> -> vector<256x128xf32>
    %56 = arith.addf %49, %55 : vector<256x128xf32>
    %c0_56 = arith.constant 0 : index
    %c2_57 = arith.constant 2 : index
    %c2_58 = arith.constant 2 : index
    %c0_59 = arith.constant 0 : index
    %57 = vector.load %arg1[%c0_56, %c2_57, %c2_58, %c0_59] : memref<1x18x18x4xbf16, #tpu.memory_space<vmem>>, vector<1x16x16x4xbf16>
    %58 = vector.shape_cast %57 : vector<1x16x16x4xbf16> to vector<16x16x4xbf16>
    %59 = vector.shape_cast %58 : vector<16x16x4xbf16> to vector<256x4xbf16>
    %c8 = arith.constant 8 : index
    %c0_60 = arith.constant 0 : index
    %c0_61 = arith.constant 0 : index
    %60 = vector.load %arg2[%c8, %c0_60, %c0_61] : memref<9x4x128xbf16, #tpu.memory_space<vmem>>, vector<1x4x128xbf16>
    %61 = vector.shape_cast %60 : vector<1x4x128xbf16> to vector<4x128xbf16>
    %cst_62 = arith.constant dense<0.000000e+00> : vector<256x128xf32>
    %62 = tpu.matmul %59, %61, %cst_62 {dimension_numbers = #tpu.dot_dimension_numbers<[1], [0], [0], [1], [0, 0, 1, 1], [], []>} : vector<256x4xbf16>, vector<4x128xbf16>, vector<256x128xf32> -> vector<256x128xf32>
    %63 = arith.addf %56, %62 : vector<256x128xf32>
    %c0_63 = arith.constant 0 : index
    %c0_64 = arith.constant 0 : index
    %c0_65 = arith.constant 0 : index
    %64 = vector.load %arg3[%c0_63, %c0_64, %c0_65] : memref<1x256x128xf32, #tpu.memory_space<vmem>>, vector<1x256x128xf32>
    %65 = vector.shape_cast %64 : vector<1x256x128xf32> to vector<256x128xf32>
    %66 = vector.shape_cast %63 : vector<256x128xf32> to vector<1x256x128xf32>
    tpu.vector_store %arg3[%c0_63, %c0_64, %c0_65], %66 {strides = array<i32>} : memref<1x256x128xf32, #tpu.memory_space<vmem>>, vector<1x256x128xf32>,
    %cst_66 = arith.constant dense<0.000000e+00> : vector<128xf32>
    %67 = vector.multi_reduction <add>, %63, %cst_66 [0] : vector<256x128xf32> to vector<128xf32>
    %68 = vector.shape_cast %67 : vector<128xf32> to vector<1x128xf32>
    %c0_67 = arith.constant 0 : index
    %c0_68 = arith.constant 0 : index
    %c0_69 = arith.constant 0 : index
    %69 = vector.load %arg4[%c0_67, %c0_68, %c0_69] : memref<1x1x128xf32, #tpu.memory_space<vmem>>, vector<1x1x128xf32>
    %70 = vector.shape_cast %69 : vector<1x1x128xf32> to vector<1x128xf32>
    %71 = vector.shape_cast %68 : vector<1x128xf32> to vector<1x1x128xf32>
    tpu.vector_store %arg4[%c0_67, %c0_68, %c0_69], %71 {strides = array<i32>} : memref<1x1x128xf32, #tpu.memory_space<vmem>>, vector<1x1x128xf32>,
    %72 = arith.mulf %63, %63 : vector<256x128xf32>
    %cst_70 = arith.constant dense<0.000000e+00> : vector<128xf32>
    %73 = vector.multi_reduction <add>, %72, %cst_70 [0] : vector<256x128xf32> to vector<128xf32>
    %74 = vector.shape_cast %73 : vector<128xf32> to vector<1x128xf32>
    %c0_71 = arith.constant 0 : index
    %c0_72 = arith.constant 0 : index
    %c0_73 = arith.constant 0 : index
    %75 = vector.load %arg5[%c0_71, %c0_72, %c0_73] : memref<1x1x128xf32, #tpu.memory_space<vmem>>, vector<1x1x128xf32>
    %76 = vector.shape_cast %75 : vector<1x1x128xf32> to vector<1x128xf32>
    %77 = vector.shape_cast %74 : vector<1x128xf32> to vector<1x1x128xf32>
    tpu.vector_store %arg5[%c0_71, %c0_72, %c0_73], %77 {strides = array<i32>} : memref<1x1x128xf32, #tpu.memory_space<vmem>>, vector<1x1x128xf32>,
    return
  }
  func.func @transform_0(%arg0: i32) -> (i32, i32, i32, i32) {
    %c0_i32 = arith.constant 0 : i32
    %c0_i32_0 = arith.constant 0 : i32
    %c0_i32_1 = arith.constant 0 : i32
    %c0_i32_2 = arith.constant 0 : i32
    return %arg0, %c0_i32, %c0_i32_0, %c0_i32_1 : i32, i32, i32, i32
  }
  func.func @transform_1(%arg0: i32) -> (i32, i32, i32) {
    %c0_i32 = arith.constant 0 : i32
    %c0_i32_0 = arith.constant 0 : i32
    %c0_i32_1 = arith.constant 0 : i32
    %c0_i32_2 = arith.constant 0 : i32
    return %c0_i32, %c0_i32_0, %c0_i32_1 : i32, i32, i32
  }
  func.func @transform_2(%arg0: i32) -> (i32, i32, i32) {
    %c0_i32 = arith.constant 0 : i32
    %c0_i32_0 = arith.constant 0 : i32
    %c0_i32_1 = arith.constant 0 : i32
    return %arg0, %c0_i32, %c0_i32_0 : i32, i32, i32
  }
  func.func @transform_3(%arg0: i32) -> (i32, i32, i32) {
    %c0_i32 = arith.constant 0 : i32
    %c0_i32_0 = arith.constant 0 : i32
    %c0_i32_1 = arith.constant 0 : i32
    return %arg0, %c0_i32, %c0_i32_0 : i32, i32, i32
  }
  func.func @transform_4(%arg0: i32) -> (i32, i32, i32) {
    %c0_i32 = arith.constant 0 : i32
    %c0_i32_0 = arith.constant 0 : i32
    %c0_i32_1 = arith.constant 0 : i32
    return %arg0, %c0_i32, %c0_i32_0 : i32, i32, i32
  }
}

module attributes {stable_mosaic.version = 11 : i64} {
  func.func @_bn_relu_kernel(%arg0: i32, %arg1: memref<1x256x128xf32, #tpu.memory_space<vmem>>, %arg2: memref<1x1x128xf32, #tpu.memory_space<vmem>>, %arg3: memref<1x1x128xf32, #tpu.memory_space<vmem>>, %arg4: memref<1x256x128xbf16, #tpu.memory_space<vmem>>) attributes {dimension_semantics = [#tpu.dimension_semantics<parallel>], iteration_bounds = array<i64: 2>, scalar_prefetch = 0 : i64, scratch_operands = 0 : i64, tpu.core_type = #tpu.core_type<tc>, window_params = [{transform_indices = @transform_0, window_bounds = array<i64: 1, 256, 128>}, {pipeline_mode = #tpu.pipeline_mode<synchronous>, transform_indices = @transform_1, window_bounds = array<i64: 1, 1, 128>}, {pipeline_mode = #tpu.pipeline_mode<synchronous>, transform_indices = @transform_2, window_bounds = array<i64: 1, 1, 128>}, {transform_indices = @transform_3, window_bounds = array<i64: 1, 256, 128>}]} {
    %c0 = arith.constant 0 : index
    %c0_0 = arith.constant 0 : index
    %c0_1 = arith.constant 0 : index
    %0 = vector.load %arg1[%c0, %c0_0, %c0_1] : memref<1x256x128xf32, #tpu.memory_space<vmem>>, vector<1x256x128xf32>
    %c0_2 = arith.constant 0 : index
    %c0_3 = arith.constant 0 : index
    %c0_4 = arith.constant 0 : index
    %1 = vector.load %arg2[%c0_2, %c0_3, %c0_4] : memref<1x1x128xf32, #tpu.memory_space<vmem>>, vector<1x1x128xf32>
    %2 = vector.broadcast %1 : vector<1x1x128xf32> to vector<1x256x128xf32>
    %3 = arith.mulf %0, %2 : vector<1x256x128xf32>
    %c0_5 = arith.constant 0 : index
    %c0_6 = arith.constant 0 : index
    %c0_7 = arith.constant 0 : index
    %4 = vector.load %arg3[%c0_5, %c0_6, %c0_7] : memref<1x1x128xf32, #tpu.memory_space<vmem>>, vector<1x1x128xf32>
    %5 = vector.broadcast %4 : vector<1x1x128xf32> to vector<1x256x128xf32>
    %6 = arith.addf %3, %5 : vector<1x256x128xf32>
    %cst = arith.constant 0.000000e+00 : f32
    %7 = vector.broadcast %cst : f32 to vector<1x256x128xf32>
    %8 = arith.maximumf %6, %7 : vector<1x256x128xf32>
    %9 = arith.truncf %8 : vector<1x256x128xf32> to vector<1x256x128xbf16>
    %c0_8 = arith.constant 0 : index
    %c0_9 = arith.constant 0 : index
    %c0_10 = arith.constant 0 : index
    %10 = vector.load %arg4[%c0_8, %c0_9, %c0_10] : memref<1x256x128xbf16, #tpu.memory_space<vmem>>, vector<1x256x128xbf16>
    tpu.vector_store %arg4[%c0_8, %c0_9, %c0_10], %9 {strides = array<i32>} : memref<1x256x128xbf16, #tpu.memory_space<vmem>>, vector<1x256x128xbf16>,
    return
  }
  func.func @transform_0(%arg0: i32) -> (i32, i32, i32) {
    %c0_i32 = arith.constant 0 : i32
    %c0_i32_0 = arith.constant 0 : i32
    %c0_i32_1 = arith.constant 0 : i32
    return %arg0, %c0_i32, %c0_i32_0 : i32, i32, i32
  }
  func.func @transform_1(%arg0: i32) -> (i32, i32, i32) {
    %c0_i32 = arith.constant 0 : i32
    %c0_i32_0 = arith.constant 0 : i32
    %c0_i32_1 = arith.constant 0 : i32
    %c0_i32_2 = arith.constant 0 : i32
    return %c0_i32, %c0_i32_0, %c0_i32_1 : i32, i32, i32
  }
  func.func @transform_2(%arg0: i32) -> (i32, i32, i32) {
    %c0_i32 = arith.constant 0 : i32
    %c0_i32_0 = arith.constant 0 : i32
    %c0_i32_1 = arith.constant 0 : i32
    %c0_i32_2 = arith.constant 0 : i32
    return %c0_i32, %c0_i32_0, %c0_i32_1 : i32, i32, i32
  }
  func.func @transform_3(%arg0: i32) -> (i32, i32, i32) {
    %c0_i32 = arith.constant 0 : i32
    %c0_i32_0 = arith.constant 0 : i32
    %c0_i32_1 = arith.constant 0 : i32
    return %arg0, %c0_i32, %c0_i32_0 : i32, i32, i32
  }
}

module attributes {stable_mosaic.version = 11 : i64} {
  func.func @_bn_add_relu_kernel(%arg0: i32, %arg1: memref<1x256x128xf32, #tpu.memory_space<vmem>>, %arg2: memref<1x1x128xf32, #tpu.memory_space<vmem>>, %arg3: memref<1x1x128xf32, #tpu.memory_space<vmem>>, %arg4: memref<1x256x128xf32, #tpu.memory_space<vmem>>, %arg5: memref<1x256x128xf32, #tpu.memory_space<vmem>>) attributes {dimension_semantics = [#tpu.dimension_semantics<parallel>], iteration_bounds = array<i64: 2>, scalar_prefetch = 0 : i64, scratch_operands = 0 : i64, tpu.core_type = #tpu.core_type<tc>, window_params = [{transform_indices = @transform_0, window_bounds = array<i64: 1, 256, 128>}, {pipeline_mode = #tpu.pipeline_mode<synchronous>, transform_indices = @transform_1, window_bounds = array<i64: 1, 1, 128>}, {pipeline_mode = #tpu.pipeline_mode<synchronous>, transform_indices = @transform_2, window_bounds = array<i64: 1, 1, 128>}, {transform_indices = @transform_3, window_bounds = array<i64: 1, 256, 128>}, {transform_indices = @transform_4, window_bounds = array<i64: 1, 256, 128>}]} {
    %c0 = arith.constant 0 : index
    %c0_0 = arith.constant 0 : index
    %c0_1 = arith.constant 0 : index
    %0 = vector.load %arg1[%c0, %c0_0, %c0_1] : memref<1x256x128xf32, #tpu.memory_space<vmem>>, vector<1x256x128xf32>
    %c0_2 = arith.constant 0 : index
    %c0_3 = arith.constant 0 : index
    %c0_4 = arith.constant 0 : index
    %1 = vector.load %arg2[%c0_2, %c0_3, %c0_4] : memref<1x1x128xf32, #tpu.memory_space<vmem>>, vector<1x1x128xf32>
    %2 = vector.broadcast %1 : vector<1x1x128xf32> to vector<1x256x128xf32>
    %3 = arith.mulf %0, %2 : vector<1x256x128xf32>
    %c0_5 = arith.constant 0 : index
    %c0_6 = arith.constant 0 : index
    %c0_7 = arith.constant 0 : index
    %4 = vector.load %arg3[%c0_5, %c0_6, %c0_7] : memref<1x1x128xf32, #tpu.memory_space<vmem>>, vector<1x1x128xf32>
    %5 = vector.broadcast %4 : vector<1x1x128xf32> to vector<1x256x128xf32>
    %6 = arith.addf %3, %5 : vector<1x256x128xf32>
    %c0_8 = arith.constant 0 : index
    %c0_9 = arith.constant 0 : index
    %c0_10 = arith.constant 0 : index
    %7 = vector.load %arg4[%c0_8, %c0_9, %c0_10] : memref<1x256x128xf32, #tpu.memory_space<vmem>>, vector<1x256x128xf32>
    %8 = arith.addf %6, %7 : vector<1x256x128xf32>
    %cst = arith.constant 0.000000e+00 : f32
    %9 = vector.broadcast %cst : f32 to vector<1x256x128xf32>
    %10 = arith.maximumf %8, %9 : vector<1x256x128xf32>
    %c0_11 = arith.constant 0 : index
    %c0_12 = arith.constant 0 : index
    %c0_13 = arith.constant 0 : index
    %11 = vector.load %arg5[%c0_11, %c0_12, %c0_13] : memref<1x256x128xf32, #tpu.memory_space<vmem>>, vector<1x256x128xf32>
    tpu.vector_store %arg5[%c0_11, %c0_12, %c0_13], %10 {strides = array<i32>} : memref<1x256x128xf32, #tpu.memory_space<vmem>>, vector<1x256x128xf32>,
    return
  }
  func.func @transform_0(%arg0: i32) -> (i32, i32, i32) {
    %c0_i32 = arith.constant 0 : i32
    %c0_i32_0 = arith.constant 0 : i32
    %c0_i32_1 = arith.constant 0 : i32
    return %arg0, %c0_i32, %c0_i32_0 : i32, i32, i32
  }
  func.func @transform_1(%arg0: i32) -> (i32, i32, i32) {
    %c0_i32 = arith.constant 0 : i32
    %c0_i32_0 = arith.constant 0 : i32
    %c0_i32_1 = arith.constant 0 : i32
    %c0_i32_2 = arith.constant 0 : i32
    return %c0_i32, %c0_i32_0, %c0_i32_1 : i32, i32, i32
  }
  func.func @transform_2(%arg0: i32) -> (i32, i32, i32) {
    %c0_i32 = arith.constant 0 : i32
    %c0_i32_0 = arith.constant 0 : i32
    %c0_i32_1 = arith.constant 0 : i32
    %c0_i32_2 = arith.constant 0 : i32
    return %c0_i32, %c0_i32_0, %c0_i32_1 : i32, i32, i32
  }
  func.func @transform_3(%arg0: i32) -> (i32, i32, i32) {
    %c0_i32 = arith.constant 0 : i32
    %c0_i32_0 = arith.constant 0 : i32
    %c0_i32_1 = arith.constant 0 : i32
    return %arg0, %c0_i32, %c0_i32_0 : i32, i32, i32
  }
  func.func @transform_4(%arg0: i32) -> (i32, i32, i32) {
    %c0_i32 = arith.constant 0 : i32
    %c0_i32_0 = arith.constant 0 : i32
    %c0_i32_1 = arith.constant 0 : i32
    return %arg0, %c0_i32, %c0_i32_0 : i32, i32, i32
  }
}

module attributes {stable_mosaic.version = 11 : i64} {
  func.func @_conv3x3_stats_kernel(%arg0: i32, %arg1: memref<1x18x18x128xbf16, #tpu.memory_space<vmem>>, %arg2: memref<9x128x128xbf16, #tpu.memory_space<vmem>>, %arg3: memref<1x256x128xf32, #tpu.memory_space<vmem>>, %arg4: memref<1x1x128xf32, #tpu.memory_space<vmem>>, %arg5: memref<1x1x128xf32, #tpu.memory_space<vmem>>) attributes {dimension_semantics = [#tpu.dimension_semantics<parallel>], iteration_bounds = array<i64: 2>, scalar_prefetch = 0 : i64, scratch_operands = 0 : i64, tpu.core_type = #tpu.core_type<tc>, window_params = [{transform_indices = @transform_0, window_bounds = array<i64: 1, 18, 18, 128>}, {pipeline_mode = #tpu.pipeline_mode<synchronous>, transform_indices = @transform_1, window_bounds = array<i64: 9, 128, 128>}, {transform_indices = @transform_2, window_bounds = array<i64: 1, 256, 128>}, {transform_indices = @transform_3, window_bounds = array<i64: 1, 1, 128>}, {transform_indices = @transform_4, window_bounds = array<i64: 1, 1, 128>}]} {
    %cst = arith.constant 0.000000e+00 : f32
    %0 = vector.broadcast %cst : f32 to vector<256x128xf32>
    %c0 = arith.constant 0 : index
    %c0_0 = arith.constant 0 : index
    %c0_1 = arith.constant 0 : index
    %c0_2 = arith.constant 0 : index
    %1 = vector.load %arg1[%c0, %c0_0, %c0_1, %c0_2] : memref<1x18x18x128xbf16, #tpu.memory_space<vmem>>, vector<1x16x16x128xbf16>
    %2 = vector.shape_cast %1 : vector<1x16x16x128xbf16> to vector<16x16x128xbf16>
    %3 = vector.shape_cast %2 : vector<16x16x128xbf16> to vector<256x128xbf16>
    %c0_3 = arith.constant 0 : index
    %c0_4 = arith.constant 0 : index
    %c0_5 = arith.constant 0 : index
    %4 = vector.load %arg2[%c0_3, %c0_4, %c0_5] : memref<9x128x128xbf16, #tpu.memory_space<vmem>>, vector<1x128x128xbf16>
    %5 = vector.shape_cast %4 : vector<1x128x128xbf16> to vector<128x128xbf16>
    %cst_6 = arith.constant dense<0.000000e+00> : vector<256x128xf32>
    %6 = tpu.matmul %3, %5, %cst_6 {dimension_numbers = #tpu.dot_dimension_numbers<[1], [0], [0], [1], [0, 0, 1, 1], [], []>} : vector<256x128xbf16>, vector<128x128xbf16>, vector<256x128xf32> -> vector<256x128xf32>
    %7 = arith.addf %0, %6 : vector<256x128xf32>
    %c0_7 = arith.constant 0 : index
    %c0_8 = arith.constant 0 : index
    %c1 = arith.constant 1 : index
    %c0_9 = arith.constant 0 : index
    %8 = vector.load %arg1[%c0_7, %c0_8, %c1, %c0_9] : memref<1x18x18x128xbf16, #tpu.memory_space<vmem>>, vector<1x16x16x128xbf16>
    %9 = vector.shape_cast %8 : vector<1x16x16x128xbf16> to vector<16x16x128xbf16>
    %10 = vector.shape_cast %9 : vector<16x16x128xbf16> to vector<256x128xbf16>
    %c1_10 = arith.constant 1 : index
    %c0_11 = arith.constant 0 : index
    %c0_12 = arith.constant 0 : index
    %11 = vector.load %arg2[%c1_10, %c0_11, %c0_12] : memref<9x128x128xbf16, #tpu.memory_space<vmem>>, vector<1x128x128xbf16>
    %12 = vector.shape_cast %11 : vector<1x128x128xbf16> to vector<128x128xbf16>
    %cst_13 = arith.constant dense<0.000000e+00> : vector<256x128xf32>
    %13 = tpu.matmul %10, %12, %cst_13 {dimension_numbers = #tpu.dot_dimension_numbers<[1], [0], [0], [1], [0, 0, 1, 1], [], []>} : vector<256x128xbf16>, vector<128x128xbf16>, vector<256x128xf32> -> vector<256x128xf32>
    %14 = arith.addf %7, %13 : vector<256x128xf32>
    %c0_14 = arith.constant 0 : index
    %c0_15 = arith.constant 0 : index
    %c2 = arith.constant 2 : index
    %c0_16 = arith.constant 0 : index
    %15 = vector.load %arg1[%c0_14, %c0_15, %c2, %c0_16] : memref<1x18x18x128xbf16, #tpu.memory_space<vmem>>, vector<1x16x16x128xbf16>
    %16 = vector.shape_cast %15 : vector<1x16x16x128xbf16> to vector<16x16x128xbf16>
    %17 = vector.shape_cast %16 : vector<16x16x128xbf16> to vector<256x128xbf16>
    %c2_17 = arith.constant 2 : index
    %c0_18 = arith.constant 0 : index
    %c0_19 = arith.constant 0 : index
    %18 = vector.load %arg2[%c2_17, %c0_18, %c0_19] : memref<9x128x128xbf16, #tpu.memory_space<vmem>>, vector<1x128x128xbf16>
    %19 = vector.shape_cast %18 : vector<1x128x128xbf16> to vector<128x128xbf16>
    %cst_20 = arith.constant dense<0.000000e+00> : vector<256x128xf32>
    %20 = tpu.matmul %17, %19, %cst_20 {dimension_numbers = #tpu.dot_dimension_numbers<[1], [0], [0], [1], [0, 0, 1, 1], [], []>} : vector<256x128xbf16>, vector<128x128xbf16>, vector<256x128xf32> -> vector<256x128xf32>
    %21 = arith.addf %14, %20 : vector<256x128xf32>
    %c0_21 = arith.constant 0 : index
    %c1_22 = arith.constant 1 : index
    %c0_23 = arith.constant 0 : index
    %c0_24 = arith.constant 0 : index
    %22 = vector.load %arg1[%c0_21, %c1_22, %c0_23, %c0_24] : memref<1x18x18x128xbf16, #tpu.memory_space<vmem>>, vector<1x16x16x128xbf16>
    %23 = vector.shape_cast %22 : vector<1x16x16x128xbf16> to vector<16x16x128xbf16>
    %24 = vector.shape_cast %23 : vector<16x16x128xbf16> to vector<256x128xbf16>
    %c3 = arith.constant 3 : index
    %c0_25 = arith.constant 0 : index
    %c0_26 = arith.constant 0 : index
    %25 = vector.load %arg2[%c3, %c0_25, %c0_26] : memref<9x128x128xbf16, #tpu.memory_space<vmem>>, vector<1x128x128xbf16>
    %26 = vector.shape_cast %25 : vector<1x128x128xbf16> to vector<128x128xbf16>
    %cst_27 = arith.constant dense<0.000000e+00> : vector<256x128xf32>
    %27 = tpu.matmul %24, %26, %cst_27 {dimension_numbers = #tpu.dot_dimension_numbers<[1], [0], [0], [1], [0, 0, 1, 1], [], []>} : vector<256x128xbf16>, vector<128x128xbf16>, vector<256x128xf32> -> vector<256x128xf32>
    %28 = arith.addf %21, %27 : vector<256x128xf32>
    %c0_28 = arith.constant 0 : index
    %c1_29 = arith.constant 1 : index
    %c1_30 = arith.constant 1 : index
    %c0_31 = arith.constant 0 : index
    %29 = vector.load %arg1[%c0_28, %c1_29, %c1_30, %c0_31] : memref<1x18x18x128xbf16, #tpu.memory_space<vmem>>, vector<1x16x16x128xbf16>
    %30 = vector.shape_cast %29 : vector<1x16x16x128xbf16> to vector<16x16x128xbf16>
    %31 = vector.shape_cast %30 : vector<16x16x128xbf16> to vector<256x128xbf16>
    %c4 = arith.constant 4 : index
    %c0_32 = arith.constant 0 : index
    %c0_33 = arith.constant 0 : index
    %32 = vector.load %arg2[%c4, %c0_32, %c0_33] : memref<9x128x128xbf16, #tpu.memory_space<vmem>>, vector<1x128x128xbf16>
    %33 = vector.shape_cast %32 : vector<1x128x128xbf16> to vector<128x128xbf16>
    %cst_34 = arith.constant dense<0.000000e+00> : vector<256x128xf32>
    %34 = tpu.matmul %31, %33, %cst_34 {dimension_numbers = #tpu.dot_dimension_numbers<[1], [0], [0], [1], [0, 0, 1, 1], [], []>} : vector<256x128xbf16>, vector<128x128xbf16>, vector<256x128xf32> -> vector<256x128xf32>
    %35 = arith.addf %28, %34 : vector<256x128xf32>
    %c0_35 = arith.constant 0 : index
    %c1_36 = arith.constant 1 : index
    %c2_37 = arith.constant 2 : index
    %c0_38 = arith.constant 0 : index
    %36 = vector.load %arg1[%c0_35, %c1_36, %c2_37, %c0_38] : memref<1x18x18x128xbf16, #tpu.memory_space<vmem>>, vector<1x16x16x128xbf16>
    %37 = vector.shape_cast %36 : vector<1x16x16x128xbf16> to vector<16x16x128xbf16>
    %38 = vector.shape_cast %37 : vector<16x16x128xbf16> to vector<256x128xbf16>
    %c5 = arith.constant 5 : index
    %c0_39 = arith.constant 0 : index
    %c0_40 = arith.constant 0 : index
    %39 = vector.load %arg2[%c5, %c0_39, %c0_40] : memref<9x128x128xbf16, #tpu.memory_space<vmem>>, vector<1x128x128xbf16>
    %40 = vector.shape_cast %39 : vector<1x128x128xbf16> to vector<128x128xbf16>
    %cst_41 = arith.constant dense<0.000000e+00> : vector<256x128xf32>
    %41 = tpu.matmul %38, %40, %cst_41 {dimension_numbers = #tpu.dot_dimension_numbers<[1], [0], [0], [1], [0, 0, 1, 1], [], []>} : vector<256x128xbf16>, vector<128x128xbf16>, vector<256x128xf32> -> vector<256x128xf32>
    %42 = arith.addf %35, %41 : vector<256x128xf32>
    %c0_42 = arith.constant 0 : index
    %c2_43 = arith.constant 2 : index
    %c0_44 = arith.constant 0 : index
    %c0_45 = arith.constant 0 : index
    %43 = vector.load %arg1[%c0_42, %c2_43, %c0_44, %c0_45] : memref<1x18x18x128xbf16, #tpu.memory_space<vmem>>, vector<1x16x16x128xbf16>
    %44 = vector.shape_cast %43 : vector<1x16x16x128xbf16> to vector<16x16x128xbf16>
    %45 = vector.shape_cast %44 : vector<16x16x128xbf16> to vector<256x128xbf16>
    %c6 = arith.constant 6 : index
    %c0_46 = arith.constant 0 : index
    %c0_47 = arith.constant 0 : index
    %46 = vector.load %arg2[%c6, %c0_46, %c0_47] : memref<9x128x128xbf16, #tpu.memory_space<vmem>>, vector<1x128x128xbf16>
    %47 = vector.shape_cast %46 : vector<1x128x128xbf16> to vector<128x128xbf16>
    %cst_48 = arith.constant dense<0.000000e+00> : vector<256x128xf32>
    %48 = tpu.matmul %45, %47, %cst_48 {dimension_numbers = #tpu.dot_dimension_numbers<[1], [0], [0], [1], [0, 0, 1, 1], [], []>} : vector<256x128xbf16>, vector<128x128xbf16>, vector<256x128xf32> -> vector<256x128xf32>
    %49 = arith.addf %42, %48 : vector<256x128xf32>
    %c0_49 = arith.constant 0 : index
    %c2_50 = arith.constant 2 : index
    %c1_51 = arith.constant 1 : index
    %c0_52 = arith.constant 0 : index
    %50 = vector.load %arg1[%c0_49, %c2_50, %c1_51, %c0_52] : memref<1x18x18x128xbf16, #tpu.memory_space<vmem>>, vector<1x16x16x128xbf16>
    %51 = vector.shape_cast %50 : vector<1x16x16x128xbf16> to vector<16x16x128xbf16>
    %52 = vector.shape_cast %51 : vector<16x16x128xbf16> to vector<256x128xbf16>
    %c7 = arith.constant 7 : index
    %c0_53 = arith.constant 0 : index
    %c0_54 = arith.constant 0 : index
    %53 = vector.load %arg2[%c7, %c0_53, %c0_54] : memref<9x128x128xbf16, #tpu.memory_space<vmem>>, vector<1x128x128xbf16>
    %54 = vector.shape_cast %53 : vector<1x128x128xbf16> to vector<128x128xbf16>
    %cst_55 = arith.constant dense<0.000000e+00> : vector<256x128xf32>
    %55 = tpu.matmul %52, %54, %cst_55 {dimension_numbers = #tpu.dot_dimension_numbers<[1], [0], [0], [1], [0, 0, 1, 1], [], []>} : vector<256x128xbf16>, vector<128x128xbf16>, vector<256x128xf32> -> vector<256x128xf32>
    %56 = arith.addf %49, %55 : vector<256x128xf32>
    %c0_56 = arith.constant 0 : index
    %c2_57 = arith.constant 2 : index
    %c2_58 = arith.constant 2 : index
    %c0_59 = arith.constant 0 : index
    %57 = vector.load %arg1[%c0_56, %c2_57, %c2_58, %c0_59] : memref<1x18x18x128xbf16, #tpu.memory_space<vmem>>, vector<1x16x16x128xbf16>
    %58 = vector.shape_cast %57 : vector<1x16x16x128xbf16> to vector<16x16x128xbf16>
    %59 = vector.shape_cast %58 : vector<16x16x128xbf16> to vector<256x128xbf16>
    %c8 = arith.constant 8 : index
    %c0_60 = arith.constant 0 : index
    %c0_61 = arith.constant 0 : index
    %60 = vector.load %arg2[%c8, %c0_60, %c0_61] : memref<9x128x128xbf16, #tpu.memory_space<vmem>>, vector<1x128x128xbf16>
    %61 = vector.shape_cast %60 : vector<1x128x128xbf16> to vector<128x128xbf16>
    %cst_62 = arith.constant dense<0.000000e+00> : vector<256x128xf32>
    %62 = tpu.matmul %59, %61, %cst_62 {dimension_numbers = #tpu.dot_dimension_numbers<[1], [0], [0], [1], [0, 0, 1, 1], [], []>} : vector<256x128xbf16>, vector<128x128xbf16>, vector<256x128xf32> -> vector<256x128xf32>
    %63 = arith.addf %56, %62 : vector<256x128xf32>
    %c0_63 = arith.constant 0 : index
    %c0_64 = arith.constant 0 : index
    %c0_65 = arith.constant 0 : index
    %64 = vector.load %arg3[%c0_63, %c0_64, %c0_65] : memref<1x256x128xf32, #tpu.memory_space<vmem>>, vector<1x256x128xf32>
    %65 = vector.shape_cast %64 : vector<1x256x128xf32> to vector<256x128xf32>
    %66 = vector.shape_cast %63 : vector<256x128xf32> to vector<1x256x128xf32>
    tpu.vector_store %arg3[%c0_63, %c0_64, %c0_65], %66 {strides = array<i32>} : memref<1x256x128xf32, #tpu.memory_space<vmem>>, vector<1x256x128xf32>,
    %cst_66 = arith.constant dense<0.000000e+00> : vector<128xf32>
    %67 = vector.multi_reduction <add>, %63, %cst_66 [0] : vector<256x128xf32> to vector<128xf32>
    %68 = vector.shape_cast %67 : vector<128xf32> to vector<1x128xf32>
    %c0_67 = arith.constant 0 : index
    %c0_68 = arith.constant 0 : index
    %c0_69 = arith.constant 0 : index
    %69 = vector.load %arg4[%c0_67, %c0_68, %c0_69] : memref<1x1x128xf32, #tpu.memory_space<vmem>>, vector<1x1x128xf32>
    %70 = vector.shape_cast %69 : vector<1x1x128xf32> to vector<1x128xf32>
    %71 = vector.shape_cast %68 : vector<1x128xf32> to vector<1x1x128xf32>
    tpu.vector_store %arg4[%c0_67, %c0_68, %c0_69], %71 {strides = array<i32>} : memref<1x1x128xf32, #tpu.memory_space<vmem>>, vector<1x1x128xf32>,
    %72 = arith.mulf %63, %63 : vector<256x128xf32>
    %cst_70 = arith.constant dense<0.000000e+00> : vector<128xf32>
    %73 = vector.multi_reduction <add>, %72, %cst_70 [0] : vector<256x128xf32> to vector<128xf32>
    %74 = vector.shape_cast %73 : vector<128xf32> to vector<1x128xf32>
    %c0_71 = arith.constant 0 : index
    %c0_72 = arith.constant 0 : index
    %c0_73 = arith.constant 0 : index
    %75 = vector.load %arg5[%c0_71, %c0_72, %c0_73] : memref<1x1x128xf32, #tpu.memory_space<vmem>>, vector<1x1x128xf32>
    %76 = vector.shape_cast %75 : vector<1x1x128xf32> to vector<1x128xf32>
    %77 = vector.shape_cast %74 : vector<1x128xf32> to vector<1x1x128xf32>
    tpu.vector_store %arg5[%c0_71, %c0_72, %c0_73], %77 {strides = array<i32>} : memref<1x1x128xf32, #tpu.memory_space<vmem>>, vector<1x1x128xf32>,
    return
  }
  func.func @transform_0(%arg0: i32) -> (i32, i32, i32, i32) {
    %c0_i32 = arith.constant 0 : i32
    %c0_i32_0 = arith.constant 0 : i32
    %c0_i32_1 = arith.constant 0 : i32
    %c0_i32_2 = arith.constant 0 : i32
    return %arg0, %c0_i32, %c0_i32_0, %c0_i32_1 : i32, i32, i32, i32
  }
  func.func @transform_1(%arg0: i32) -> (i32, i32, i32) {
    %c0_i32 = arith.constant 0 : i32
    %c0_i32_0 = arith.constant 0 : i32
    %c0_i32_1 = arith.constant 0 : i32
    %c0_i32_2 = arith.constant 0 : i32
    return %c0_i32, %c0_i32_0, %c0_i32_1 : i32, i32, i32
  }
  func.func @transform_2(%arg0: i32) -> (i32, i32, i32) {
    %c0_i32 = arith.constant 0 : i32
    %c0_i32_0 = arith.constant 0 : i32
    %c0_i32_1 = arith.constant 0 : i32
    return %arg0, %c0_i32, %c0_i32_0 : i32, i32, i32
  }
  func.func @transform_3(%arg0: i32) -> (i32, i32, i32) {
    %c0_i32 = arith.constant 0 : i32
    %c0_i32_0 = arith.constant 0 : i32
    %c0_i32_1 = arith.constant 0 : i32
    return %arg0, %c0_i32, %c0_i32_0 : i32, i32, i32
  }
  func.func @transform_4(%arg0: i32) -> (i32, i32, i32) {
    %c0_i32 = arith.constant 0 : i32
    %c0_i32_0 = arith.constant 0 : i32
    %c0_i32_1 = arith.constant 0 : i32
    return %arg0, %c0_i32, %c0_i32_0 : i32, i32, i32
  }
}

</mosaic_0001>

<bundles_post_ra>
// kernel: basic_block_forward.5
= control target key start
LH: loop header
LB: loop body
LE: loop exit
PB: predicated region body
PF: predicated region fallthrough
CT: control target
= control target key end

     0   :  { %s572_s12 = smov 0   ;;  %s719_s0 = inlined_call_operand.vmem [shape: f32[2,256,128], index: 0, kind: input, shape index: {}]   ;;  %s720_s1 = inlined_call_operand.vmem [shape: f32[1,1,128], index: 1, kind: input, shape index: {}]   ;;  %s721_s2 = inlined_call_operand.vmem [shape: f32[1,1,128], index: 2, kind: input, shape index: {}]   ;;  %s722_s3 = inlined_call_operand.vmem [shape: bf16[2,256,128], index: 3, kind: output, shape index: {}]  }
   0x1 LB: > { %s426_s13 = sadd.s32 4294967295, %s550_s12   ;;  %p430_p0 = scmp.ge.s32.totalorder %s550_s12, 1  ;;  %s550_s12 = sphi %s572_s12, %s13_s12  }
   0x2   : > { %p137_p1 = scmp.lt.s32.totalorder %s550_s12, 3 }
   0x4   : > { %p138_p2 = pnand %p430_p0, %p137_p1 }
   0x5   : > { %p161_p3 = scmp.lt.s32.totalorder (!%p138_p2), %s426_s13, 1 }
   0x6   : > { %141 = sbr.rel (%p138_p2) target bundleno = 49 (0x31), region = 32 }
   0xb   : > { %s724_s13 = smov (!%p161_p3, %s426_s13), 1  ;;  %v585_v0 = vld [vmem:[%s720_s1] ss:$0 sm:$0xff] }
   0xc   : > { %s437_s16 = sshll.u32 %s724_s13, 8  ;;  %v596_v1 = vld [vmem:[%s721_s2] ss:$0 sm:$0xff]  ;;  %s438_s22 = sshll.u32 %s724_s13, 7 }
   0xd   : > { %s591_s19 = scalar_lea.vmem %s719_s0, %s437_s16  ;;  %s628_s25 = scalar_lea.vmem %s722_s3, %s438_s22 }
   0xe   : > { %v171_v2 = vld [vmem:[%s591_s19] sm:$0xff]  ;;  %v172_v3 = vld [vmem:[%s591_s19 + $0x8] sm:$0xff]  ;;  %v173_v4 = vld [vmem:[%s591_s19 + $0x10] sm:$0xff] }
   0xf   : > { %v207_v5 = vmul.f32 %v585_v0, %v171_v2  ;;  %v208_v6 = vmul.f32 %v585_v0, %v172_v3  ;;  %v174_v7 = vld [vmem:[%s591_s19 + $0x18] sm:$0xff]  ;;  %v209_v8 = vmul.f32 %v585_v0, %v173_v4  ;;  %v175_v9 = vld [vmem:[%s591_s19 + $0x20] sm:$0xff]  ;;  %v176_v10 = vld [vmem:[%s591_s19 + $0x28] sm:$0xff] }
  0x10   : > { %v210_v11 = vmul.f32 %v585_v0, %v174_v7  ;;  %v211_v12 = vmul.f32 %v585_v0, %v175_v9  ;;  %v212_v13 = vmul.f32 %v585_v0, %v176_v10  ;;  %v177_v14 = vld [vmem:[%s591_s19 + $0x30] sm:$0xff]  ;;  %v178_v15 = vld [vmem:[%s591_s19 + $0x38] sm:$0xff]  ;;  %v179_v24 = vld [vmem:[%s591_s19 + $0x40] sm:$0xff] }
  0x11   : > { %v243_v16 = vadd.f32 %v596_v1, %v207_v5  ;;  %v244_v17 = vadd.f32 %v596_v1, %v208_v6  ;;  %v245_v18 = vadd.f32 %v596_v1, %v209_v8  ;;  %v213_v19 = vmul.f32 %v585_v0, %v177_v14  ;;  %v180_v25 = vld [vmem:[%s591_s19 + $0x48] sm:$0xff]  ;;  %v181_v30 = vld [vmem:[%s591_s19 + $0x50] sm:$0xff]  ;;  %v182_v35 = vld [vmem:[%s591_s19 + $0x58] sm:$0xff] }
  0x12   : > { %v246_v20 = vadd.f32 %v596_v1, %v210_v11  ;;  %v247_v21 = vadd.f32 %v596_v1, %v211_v12  ;;  %v248_v22 = vadd.f32 %v596_v1, %v212_v13  ;;  %v214_v23 = vmul.f32 %v585_v0, %v178_v15  ;;  %v183_v36 = vld [vmem:[%s591_s19 + $0x60] sm:$0xff]  ;;  %v184_v41 = vld [vmem:[%s591_s19 + $0x68] sm:$0xff]  ;;  %v185_v42 = vld [vmem:[%s591_s19 + $0x70] sm:$0xff] }
  0x13   : > { %v275_v26 = vmax.f32 %v243_v16, 0.0  ;;  %v276_v27 = vmax.f32 %v244_v17, 0.0  ;;  %v277_v28 = vmax.f32 %v245_v18, 0.0  ;;  %v249_v29 = vadd.f32 %v596_v1, %v213_v19  ;;  %v186_v51 = vld [vmem:[%s591_s19 + $0x78] sm:$0xff]  ;;  %v187_v56 = vld [vmem:[%s591_s19 + $0x80] sm:$0xff]  ;;  %v188_v61 = vld [vmem:[%s591_s19 + $0x88] sm:$0xff] }
  0x14   : > { %v278_v31 = vmax.f32 %v246_v20, 0.0  ;;  %v279_v32 = vmax.f32 %v247_v21, 0.0  ;;  %v280_v33 = vmax.f32 %v248_v22, 0.0  ;;  %v250_v34 = vadd.f32 %v596_v1, %v214_v23  ;;  %v189_v4 = vld [vmem:[%s591_s19 + $0x90] sm:$0xff]  ;;  %v190_v5 = vld [vmem:[%s591_s19 + $0x98] sm:$0xff]  ;;  %v191_v10 = vld [vmem:[%s591_s19 + $0xa0] sm:$0xff] }
  0x15   : > { %v442_v37 = vpack.c.bf16 %v276_v27, %v275_v26  ;;  %v281_v38 = vmax.f32 %v249_v29, 0.0  ;;  %v215_v39 = vmul.f32 %v585_v0, %v179_v24  ;;  %v216_v40 = vmul.f32 %v585_v0, %v180_v25  ;;  %v192_v15 = vld [vmem:[%s591_s19 + $0xa8] sm:$0xff]  ;;  %v193_v20 = vld [vmem:[%s591_s19 + $0xb0] sm:$0xff]  ;;  %v194_v25 = vld [vmem:[%s591_s19 + $0xb8] sm:$0xff] }
  0x16   : > { %v447_v43 = vpack.c.bf16 %v278_v31, %v277_v28  ;;  %v452_v44 = vpack.c.bf16 %v280_v33, %v279_v32  ;;  %v282_v45 = vmax.f32 %v250_v34, 0.0  ;;  %v217_v46 = vmul.f32 %v585_v0, %v181_v30  ;;  %v195_v30 = vld [vmem:[%s591_s19 + $0xc0] sm:$0xff] }
  0x17   : > { %443 = vst [vmem:[%s628_s25] sm:$0xff] %v442_v37   ;;  %v251_v47 = vadd.f32 %v596_v1, %v215_v39  ;;  %v252_v48 = vadd.f32 %v596_v1, %v216_v40  ;;  %v218_v49 = vmul.f32 %v585_v0, %v182_v35  ;;  %v219_v50 = vmul.f32 %v585_v0, %v183_v36  ;;  %v196_v35 = vld [vmem:[%s591_s19 + $0xc8] sm:$0xff]  ;;  %v197_v40 = vld [vmem:[%s591_s19 + $0xd0] sm:$0xff] }
  0x18   : > { %519 = vst [vmem:[%s628_s25 + $0x8] sm:$0xff] %v447_v43   ;;  %v457_v52 = vpack.c.bf16 %v282_v45, %v281_v38  ;;  %v253_v53 = vadd.f32 %v596_v1, %v217_v46  ;;  %v220_v54 = vmul.f32 %v585_v0, %v184_v41  ;;  %v221_v55 = vmul.f32 %v585_v0, %v185_v42  ;;  %v198_v41 = vld [vmem:[%s591_s19 + $0xd8] sm:$0xff]  ;;  %v199_v46 = vld [vmem:[%s591_s19 + $0xe0] sm:$0xff] }
  0x19   : > { %520 = vst [vmem:[%s628_s25 + $0x10] sm:$0xff] %v452_v44   ;;  %v283_v57 = vmax.f32 %v251_v47, 0.0  ;;  %v284_v58 = vmax.f32 %v252_v48, 0.0  ;;  %v254_v59 = vadd.f32 %v596_v1, %v218_v49  ;;  %v255_v60 = vadd.f32 %v596_v1, %v219_v50 }
  0x1a   : > { %521 = vst [vmem:[%s628_s25 + $0x18] sm:$0xff] %v457_v52   ;;  %v285_v62 = vmax.f32 %v253_v53, 0.0  ;;  %v256_v63 = vadd.f32 %v596_v1, %v220_v54  ;;  %v222_v2 = vmul.f32 %v585_v0, %v186_v51  ;;  %v257_v3 = vadd.f32 %v596_v1, %v221_v55  ;;  %v200_v51 = vld [vmem:[%s591_s19 + $0xe8] sm:$0xff] }
  0x1b   : > { %v462_v6 = vpack.c.bf16 %v284_v58, %v283_v57  ;;  %v286_v7 = vmax.f32 %v254_v59, 0.0  ;;  %v287_v8 = vmax.f32 %v255_v60, 0.0  ;;  %v223_v9 = vmul.f32 %v585_v0, %v187_v56  ;;  %v201_v56 = vld [vmem:[%s591_s19 + $0xf0] sm:$0xff] }
  0x1c   : > { %v288_v11 = vmax.f32 %v256_v63, 0.0  ;;  %v258_v12 = vadd.f32 %v596_v1, %v222_v2  ;;  %v289_v13 = vmax.f32 %v257_v3, 0.0  ;;  %v224_v14 = vmul.f32 %v585_v0, %v188_v61  ;;  %v202_v61 = vld [vmem:[%s591_s19 + $0xf8] sm:$0xff] }
  0x1d   : > { %522 = vst [vmem:[%s628_s25 + $0x20] sm:$0xff] %v462_v6   ;;  %v467_v16 = vpack.c.bf16 %v286_v7, %v285_v62  ;;  %v259_v17 = vadd.f32 %v596_v1, %v223_v9  ;;  %v225_v18 = vmul.f32 %v585_v0, %v189_v4  ;;  %v226_v19 = vmul.f32 %v585_v0, %v190_v5 }
  0x1e   : > { %v472_v21 = vpack.c.bf16 %v288_v11, %v287_v8  ;;  %v290_v22 = vmax.f32 %v258_v12, 0.0  ;;  %v260_v23 = vadd.f32 %v596_v1, %v224_v14  ;;  %v227_v24 = vmul.f32 %v585_v0, %v191_v10 }
  0x1f   : > { %523 = vst [vmem:[%s628_s25 + $0x28] sm:$0xff] %v467_v16   ;;  %v291_v26 = vmax.f32 %v259_v17, 0.0  ;;  %v261_v27 = vadd.f32 %v596_v1, %v225_v18  ;;  %v262_v28 = vadd.f32 %v596_v1, %v226_v19  ;;  %v228_v29 = vmul.f32 %v585_v0, %v192_v15 }
  0x20   : > { %524 = vst [vmem:[%s628_s25 + $0x30] sm:$0xff] %v472_v21   ;;  %v477_v31 = vpack.c.bf16 %v290_v22, %v289_v13  ;;  %v292_v32 = vmax.f32 %v260_v23, 0.0  ;;  %v263_v33 = vadd.f32 %v596_v1, %v227_v24  ;;  %v229_v34 = vmul.f32 %v585_v0, %v193_v20 }
  0x21   : > { %v293_v36 = vmax.f32 %v261_v27, 0.0  ;;  %v294_v37 = vmax.f32 %v262_v28, 0.0  ;;  %v264_v38 = vadd.f32 %v596_v1, %v228_v29  ;;  %v230_v39 = vmul.f32 %v585_v0, %v194_v25 }
  0x22   : > { %525 = vst [vmem:[%s628_s25 + $0x38] sm:$0xff] %v477_v31   ;;  %v482_v42 = vpack.c.bf16 %v292_v32, %v291_v26  ;;  %v295_v43 = vmax.f32 %v263_v33, 0.0  ;;  %v265_v44 = vadd.f32 %v596_v1, %v229_v34  ;;  %v231_v45 = vmul.f32 %v585_v0, %v195_v30 }
  0x23   : > { %v487_v47 = vpack.c.bf16 %v294_v37, %v293_v36  ;;  %v296_v48 = vmax.f32 %v264_v38, 0.0  ;;  %v266_v49 = vadd.f32 %v596_v1, %v230_v39  ;;  %v232_v50 = vmul.f32 %v585_v0, %v196_v35 }
  0x24   : > { %526 = vst [vmem:[%s628_s25 + $0x40] sm:$0xff] %v482_v42   ;;  %v297_v52 = vmax.f32 %v265_v44, 0.0  ;;  %v267_v53 = vadd.f32 %v596_v1, %v231_v45  ;;  %v233_v54 = vmul.f32 %v585_v0, %v197_v40  ;;  %v234_v55 = vmul.f32 %v585_v0, %v198_v41 }
  0x25   : > { %527 = vst [vmem:[%s628_s25 + $0x48] sm:$0xff] %v487_v47   ;;  %v492_v57 = vpack.c.bf16 %v296_v48, %v295_v43  ;;  %v298_v58 = vmax.f32 %v266_v49, 0.0  ;;  %v268_v59 = vadd.f32 %v596_v1, %v232_v50  ;;  %v235_v60 = vmul.f32 %v585_v0, %v199_v46 }
  0x26   : > { %v299_v62 = vmax.f32 %v267_v53, 0.0  ;;  %v269_v63 = vadd.f32 %v596_v1, %v233_v54  ;;  %v270_v2 = vadd.f32 %v596_v1, %v234_v55  ;;  %v236_v3 = vmul.f32 %v585_v0, %v200_v51 }
  0x27   : > { %528 = vst [vmem:[%s628_s25 + $0x50] sm:$0xff] %v492_v57   ;;  %v497_v4 = vpack.c.bf16 %v298_v58, %v297_v52  ;;  %v300_v5 = vmax.f32 %v268_v59, 0.0  ;;  %v271_v6 = vadd.f32 %v596_v1, %v235_v60  ;;  %v237_v7 = vmul.f32 %v585_v0, %v201_v56 }
  0x28   : > { %v301_v8 = vmax.f32 %v269_v63, 0.0  ;;  %v302_v9 = vmax.f32 %v270_v2, 0.0  ;;  %v272_v10 = vadd.f32 %v596_v1, %v236_v3  ;;  %v238_v11 = vmul.f32 %v585_v0, %v202_v61 }
  0x29   : > { %529 = vst [vmem:[%s628_s25 + $0x58] sm:$0xff] %v497_v4   ;;  %v502_v12 = vpack.c.bf16 %v300_v5, %v299_v62  ;;  %v303_v13 = vmax.f32 %v271_v6, 0.0  ;;  %v273_v14 = vadd.f32 %v596_v1, %v237_v7 }
  0x2a   : > { %v507_v15 = vpack.c.bf16 %v302_v9, %v301_v8  ;;  %v304_v16 = vmax.f32 %v272_v10, 0.0  ;;  %v274_v17 = vadd.f32 %v596_v1, %v238_v11 }
  0x2b   : > { %530 = vst [vmem:[%s628_s25 + $0x60] sm:$0xff] %v502_v12   ;;  %v305_v18 = vmax.f32 %v273_v14, 0.0 }
  0x2c   : > { %531 = vst [vmem:[%s628_s25 + $0x68] sm:$0xff] %v507_v15   ;;  %v512_v19 = vpack.c.bf16 %v304_v16, %v303_v13  ;;  %v306_v20 = vmax.f32 %v274_v17, 0.0 }
  0x2e   : > { %532 = vst [vmem:[%s628_s25 + $0x70] sm:$0xff] %v512_v19   ;;  %v517_v21 = vpack.c.bf16 %v306_v20, %v305_v18 }
  0x30   : > { %533 = vst [vmem:[%s628_s25 + $0x78] sm:$0xff] %v517_v21  }
  0x31 PF: > { %s13_s12 = sadd.s32 1, %s550_s12  }
  0x32   : > { %p10_p4 = scmp.ge.s32.totalorder %s13_s12, 4  }
  0x34   :  { %12 = sbr.rel (!%p10_p4) target bundleno = 1 (0x1), region = 62 }

// kernel: basic_block_forward.7
= control target key start
LH: loop header
LB: loop body
LE: loop exit
PB: predicated region body
PF: predicated region fallthrough
CT: control target
= control target key end

     0   :  { %s576_s15 = smov 0   ;;  %s844_s0 = inlined_call_operand.vmem [shape: f32[2,256,128], index: 0, kind: input, shape index: {}]   ;;  %s845_s1 = inlined_call_operand.vmem [shape: f32[1,1,128], index: 1, kind: input, shape index: {}]   ;;  %s846_s2 = inlined_call_operand.vmem [shape: f32[1,1,128], index: 2, kind: input, shape index: {}]   ;;  %s847_s3 = inlined_call_operand.vmem [shape: f32[2,256,128], index: 3, kind: input, shape index: {}, may-alias: {3,4}]   ;;  %s848_s4 = inlined_call_operand.vmem [shape: f32[2,256,128], index: 4, kind: output, shape index: {}, may-alias: {3,4}]  }
   0x1 LB: > { %s517_s16 = sadd.s32 4294967295, %s549_s15   ;;  %p521_p0 = scmp.ge.s32.totalorder %s549_s15, 1  ;;  %s549_s15 = sphi %s576_s15, %s14_s15  }
   0x2   : > { %p172_p1 = scmp.lt.s32.totalorder %s549_s15, 3 }
   0x4   : > { %p173_p2 = pnand %p521_p0, %p172_p1 }
   0x5   : > { %p203_p3 = scmp.lt.s32.totalorder (!%p173_p2), %s517_s16, 1 }
   0x6   : > { %176 = sbr.rel (%p173_p2) target bundleno = 65 (0x41), region = 36 }
   0xb   : > { %s850_s16 = smov (!%p203_p3, %s517_s16), 1  ;;  %v587_v0 = vld [vmem:[%s845_s1] ss:$0 sm:$0xff] }
   0xc   : > { %s530_s19 = sshll.u32 %s850_s16, 8  ;;  %v602_v1 = vld [vmem:[%s846_s2] ss:$0 sm:$0xff] }
   0xd   : > { %s592_s22 = scalar_lea.vmem %s844_s0, %s530_s19  ;;  %s597_s25 = scalar_lea.vmem %s847_s3, %s530_s19 }
   0xe   : > { %v218_v2 = vld [vmem:[%s592_s22] sm:$0xff]  ;;  %s611_s30 = scalar_lea.vmem %s848_s4, %s530_s19  ;;  %v323_v8 = vld [vmem:[%s597_s25 + $0x8] sm:$0xff]  ;;  %v324_v9 = vld [vmem:[%s597_s25 + $0x10] sm:$0xff] }
   0xf   : > { %v254_v3 = vmul.f32 %v587_v0, %v218_v2  ;;  %v322_v4 = vld [vmem:[%s597_s25] sm:$0xff]  ;;  %v325_v10 = vld [vmem:[%s597_s25 + $0x18] sm:$0xff]  ;;  %v327_v12 = vld [vmem:[%s597_s25 + $0x28] sm:$0xff] }
  0x10   : > { %v326_v11 = vld [vmem:[%s597_s25 + $0x20] sm:$0xff]  ;;  %v328_v13 = vld [vmem:[%s597_s25 + $0x30] sm:$0xff]  ;;  %v329_v14 = vld [vmem:[%s597_s25 + $0x38] sm:$0xff] }
  0x11   : > { %v290_v5 = vadd.f32 %v602_v1, %v254_v3  ;;  %v621_v15 = vld [vmem:[%s597_s25 + $0x40] sm:$0xff]  ;;  %v624_v16 = vld [vmem:[%s597_s25 + $0x48] sm:$0xff]  ;;  %v627_v17 = vld [vmem:[%s597_s25 + $0x50] sm:$0xff] }
  0x12   : > { %v630_v18 = vld [vmem:[%s597_s25 + $0x58] sm:$0xff]  ;;  %v633_v19 = vld [vmem:[%s597_s25 + $0x60] sm:$0xff]  ;;  %v636_v20 = vld [vmem:[%s597_s25 + $0x68] sm:$0xff] }
  0x13   : > { %v354_v6 = vadd.f32 %v322_v4, %v290_v5  ;;  %v639_v21 = vld [vmem:[%s597_s25 + $0x70] sm:$0xff]  ;;  %v642_v22 = vld [vmem:[%s597_s25 + $0x78] sm:$0xff]  ;;  %v645_v23 = vld [vmem:[%s597_s25 + $0x80] sm:$0xff] }
  0x14   : > { %v648_v24 = vld [vmem:[%s597_s25 + $0x88] sm:$0xff]  ;;  %v651_v25 = vld [vmem:[%s597_s25 + $0x90] sm:$0xff]  ;;  %v654_v26 = vld [vmem:[%s597_s25 + $0x98] sm:$0xff] }
  0x15   : > { %v386_v7 = vmax.f32 %v354_v6, 0.0  ;;  %v657_v27 = vld [vmem:[%s597_s25 + $0xa0] sm:$0xff]  ;;  %v660_v28 = vld [vmem:[%s597_s25 + $0xa8] sm:$0xff]  ;;  %v663_v29 = vld [vmem:[%s597_s25 + $0xb0] sm:$0xff] }
  0x16   : > { %v666_v30 = vld [vmem:[%s597_s25 + $0xb8] sm:$0xff]  ;;  %v669_v31 = vld [vmem:[%s597_s25 + $0xc0] sm:$0xff]  ;;  %v672_v32 = vld [vmem:[%s597_s25 + $0xc8] sm:$0xff] }
  0x17   : > { %v675_v33 = vld [vmem:[%s597_s25 + $0xd0] sm:$0xff]  ;;  %v678_v34 = vld [vmem:[%s597_s25 + $0xd8] sm:$0xff]  ;;  %v681_v35 = vld [vmem:[%s597_s25 + $0xe0] sm:$0xff] }
  0x18   : > { %v684_v36 = vld [vmem:[%s597_s25 + $0xe8] sm:$0xff]  ;;  %v687_v37 = vld [vmem:[%s597_s25 + $0xf0] sm:$0xff]  ;;  %v690_v38 = vld [vmem:[%s597_s25 + $0xf8] sm:$0xff] }
  0x19   : > { %418 = vst [vmem:[%s611_s30] sm:$0xff] %v386_v7  ;;  %v219_v39 = vld [vmem:[%s592_s22 + $0x8] sm:$0xff]  ;;  %v220_v40 = vld [vmem:[%s592_s22 + $0x10] sm:$0xff]  ;;  %v221_v41 = vld [vmem:[%s592_s22 + $0x18] sm:$0xff] }
  0x1a   : > { %v255_v42 = vmul.f32 %v587_v0, %v219_v39  ;;  %v256_v43 = vmul.f32 %v587_v0, %v220_v40  ;;  %v257_v44 = vmul.f32 %v587_v0, %v221_v41  ;;  %v222_v45 = vld [vmem:[%s592_s22 + $0x20] sm:$0xff]  ;;  %v223_v46 = vld [vmem:[%s592_s22 + $0x28] sm:$0xff]  ;;  %v224_v47 = vld [vmem:[%s592_s22 + $0x30] sm:$0xff] }
  0x1b   : > { %v258_v48 = vmul.f32 %v587_v0, %v222_v45  ;;  %v259_v49 = vmul.f32 %v587_v0, %v223_v46  ;;  %v260_v50 = vmul.f32 %v587_v0, %v224_v47  ;;  %v225_v51 = vld [vmem:[%s592_s22 + $0x38] sm:$0xff]  ;;  %v226_v52 = vld [vmem:[%s592_s22 + $0x40] sm:$0xff]  ;;  %v227_v7 = vld [vmem:[%s592_s22 + $0x48] sm:$0xff] }
  0x1c   : > { %v291_v53 = vadd.f32 %v602_v1, %v255_v42  ;;  %v292_v54 = vadd.f32 %v602_v1, %v256_v43  ;;  %v293_v55 = vadd.f32 %v602_v1, %v257_v44  ;;  %v261_v56 = vmul.f32 %v587_v0, %v225_v51  ;;  %v228_v39 = vld [vmem:[%s592_s22 + $0x50] sm:$0xff]  ;;  %v229_v40 = vld [vmem:[%s592_s22 + $0x58] sm:$0xff]  ;;  %v230_v43 = vld [vmem:[%s592_s22 + $0x60] sm:$0xff] }
  0x1d   : > { %v294_v57 = vadd.f32 %v602_v1, %v258_v48  ;;  %v295_v58 = vadd.f32 %v602_v1, %v259_v49  ;;  %v296_v59 = vadd.f32 %v602_v1, %v260_v50  ;;  %v262_v60 = vmul.f32 %v587_v0, %v226_v52  ;;  %v232_v44 = vld [vmem:[%s592_s22 + $0x70] sm:$0xff]  ;;  %v233_v46 = vld [vmem:[%s592_s22 + $0x78] sm:$0xff] }
  0x1e   : > { %v355_v61 = vadd.f32 %v323_v8, %v291_v53  ;;  %v356_v62 = vadd.f32 %v324_v9, %v292_v54  ;;  %v357_v63 = vadd.f32 %v325_v10, %v293_v55  ;;  %v297_v2 = vadd.f32 %v602_v1, %v261_v56  ;;  %v231_v10 = vld [vmem:[%s592_s22 + $0x68] sm:$0xff] }
  0x1f   : > { %v358_v3 = vadd.f32 %v326_v11, %v294_v57  ;;  %v359_v4 = vadd.f32 %v327_v12, %v295_v58  ;;  %v360_v5 = vadd.f32 %v328_v13, %v296_v59  ;;  %v298_v6 = vadd.f32 %v602_v1, %v262_v60 }
  0x20   : > { %v387_v41 = vmax.f32 %v355_v61, 0.0  ;;  %v388_v42 = vmax.f32 %v356_v62, 0.0  ;;  %v389_v8 = vmax.f32 %v357_v63, 0.0  ;;  %v361_v9 = vadd.f32 %v329_v14, %v297_v2  ;;  %v234_v14 = vld [vmem:[%s592_s22 + $0x80] sm:$0xff] }
  0x21   : > { %v390_v45 = vmax.f32 %v358_v3, 0.0  ;;  %v391_v11 = vmax.f32 %v359_v4, 0.0  ;;  %v392_v12 = vmax.f32 %v360_v5, 0.0  ;;  %v362_v13 = vadd.f32 %v621_v15, %v298_v6  ;;  %v235_v4 = vld [vmem:[%s592_s22 + $0x88] sm:$0xff] }
  0x22   : > { %419 = vst [vmem:[%s611_s30 + $0x8] sm:$0xff] %v387_v41  ;;  %v393_v47 = vmax.f32 %v361_v9, 0.0  ;;  %v263_v48 = vmul.f32 %v587_v0, %v227_v7  ;;  %v264_v49 = vmul.f32 %v587_v0, %v228_v39  ;;  %v265_v50 = vmul.f32 %v587_v0, %v229_v40  ;;  %v240_v9 = vld [vmem:[%s592_s22 + $0xb0] sm:$0xff] }
  0x23   : > { %420 = vst [vmem:[%s611_s30 + $0x10] sm:$0xff] %v388_v42  ;;  %v394_v51 = vmax.f32 %v362_v13, 0.0  ;;  %v266_v52 = vmul.f32 %v587_v0, %v230_v43  ;;  %v267_v53 = vmul.f32 %v587_v0, %v231_v10  ;;  %v268_v15 = vmul.f32 %v587_v0, %v232_v44  ;;  %v241_v44 = vld [vmem:[%s592_s22 + $0xb8] sm:$0xff] }
  0x24   : > { %421 = vst [vmem:[%s611_s30 + $0x18] sm:$0xff] %v389_v8  ;;  %v299_v54 = vadd.f32 %v602_v1, %v263_v48  ;;  %v300_v55 = vadd.f32 %v602_v1, %v264_v49  ;;  %v301_v56 = vadd.f32 %v602_v1, %v265_v50  ;;  %v269_v57 = vmul.f32 %v587_v0, %v233_v46 }
  0x25   : > { %422 = vst [vmem:[%s611_s30 + $0x20] sm:$0xff] %v390_v45  ;;  %v302_v58 = vadd.f32 %v602_v1, %v266_v52  ;;  %v303_v59 = vadd.f32 %v602_v1, %v267_v53  ;;  %v304_v60 = vadd.f32 %v602_v1, %v268_v15  ;;  %v270_v61 = vmul.f32 %v587_v0, %v234_v14 }
  0x26   : > { %423 = vst [vmem:[%s611_s30 + $0x28] sm:$0xff] %v391_v11  ;;  %v363_v62 = vadd.f32 %v624_v16, %v299_v54  ;;  %v364_v63 = vadd.f32 %v627_v17, %v300_v55  ;;  %v365_v2 = vadd.f32 %v630_v18, %v301_v56  ;;  %v305_v3 = vadd.f32 %v602_v1, %v269_v57  ;;  %v236_v16 = vld [vmem:[%s592_s22 + $0x90] sm:$0xff]  ;;  %v237_v17 = vld [vmem:[%s592_s22 + $0x98] sm:$0xff]  ;;  %v238_v18 = vld [vmem:[%s592_s22 + $0xa0] sm:$0xff] }
  0x27   : > { %424 = vst [vmem:[%s611_s30 + $0x30] sm:$0xff] %v392_v12  ;;  %v366_v5 = vadd.f32 %v633_v19, %v302_v58  ;;  %v367_v6 = vadd.f32 %v636_v20, %v303_v59  ;;  %v368_v7 = vadd.f32 %v639_v21, %v304_v60  ;;  %v306_v39 = vadd.f32 %v602_v1, %v270_v61  ;;  %v239_v19 = vld [vmem:[%s592_s22 + $0xa8] sm:$0xff] }
  0x28   : > { %425 = vst [vmem:[%s611_s30 + $0x38] sm:$0xff] %v393_v47  ;;  %v395_v40 = vmax.f32 %v363_v62, 0.0  ;;  %v396_v41 = vmax.f32 %v364_v63, 0.0  ;;  %v397_v42 = vmax.f32 %v365_v2, 0.0  ;;  %v369_v8 = vadd.f32 %v642_v22, %v305_v3  ;;  %v242_v22 = vld [vmem:[%s592_s22 + $0xc0] sm:$0xff]  ;;  %v243_v59 = vld [vmem:[%s592_s22 + $0xc8] sm:$0xff] }
  0x29   : > { %426 = vst [vmem:[%s611_s30 + $0x40] sm:$0xff] %v394_v51  ;;  %v398_v20 = vmax.f32 %v366_v5, 0.0  ;;  %v399_v21 = vmax.f32 %v367_v6, 0.0  ;;  %v400_v43 = vmax.f32 %v368_v7, 0.0  ;;  %v370_v10 = vadd.f32 %v645_v23, %v306_v39  ;;  %v245_v63 = vld [vmem:[%s592_s22 + $0xd8] sm:$0xff]  ;;  %v247_v6 = vld [vmem:[%s592_s22 + $0xe8] sm:$0xff] }
  0x2a   : > { %427 = vst [vmem:[%s611_s30 + $0x48] sm:$0xff] %v395_v40  ;;  %v401_v45 = vmax.f32 %v369_v8, 0.0  ;;  %v271_v11 = vmul.f32 %v587_v0, %v235_v4  ;;  %v272_v12 = vmul.f32 %v587_v0, %v236_v16  ;;  %v273_v13 = vmul.f32 %v587_v0, %v237_v17  ;;  %v249_v39 = vld [vmem:[%s592_s22 + $0xf8] sm:$0xff] }
  0x2b   : > { %428 = vst [vmem:[%s611_s30 + $0x50] sm:$0xff] %v396_v41  ;;  %v402_v46 = vmax.f32 %v370_v10, 0.0  ;;  %v274_v47 = vmul.f32 %v587_v0, %v238_v18  ;;  %v275_v48 = vmul.f32 %v587_v0, %v239_v19  ;;  %v276_v23 = vmul.f32 %v587_v0, %v240_v9 }
  0x2c   : > { %429 = vst [vmem:[%s611_s30 + $0x58] sm:$0xff] %v397_v42  ;;  %v307_v49 = vadd.f32 %v602_v1, %v271_v11  ;;  %v308_v50 = vadd.f32 %v602_v1, %v272_v12  ;;  %v309_v14 = vadd.f32 %v602_v1, %v273_v13  ;;  %v277_v51 = vmul.f32 %v587_v0, %v241_v44 }
  0x2d   : > { %430 = vst [vmem:[%s611_s30 + $0x60] sm:$0xff] %v398_v20  ;;  %v310_v52 = vadd.f32 %v602_v1, %v274_v47  ;;  %v311_v53 = vadd.f32 %v602_v1, %v275_v48  ;;  %v312_v15 = vadd.f32 %v602_v1, %v276_v23  ;;  %v278_v54 = vmul.f32 %v587_v0, %v242_v22 }
  0x2e   : > { %431 = vst [vmem:[%s611_s30 + $0x68] sm:$0xff] %v399_v21  ;;  %v371_v55 = vadd.f32 %v648_v24, %v307_v49  ;;  %v372_v56 = vadd.f32 %v651_v25, %v308_v50  ;;  %v373_v57 = vadd.f32 %v654_v26, %v309_v14  ;;  %v313_v58 = vadd.f32 %v602_v1, %v277_v51  ;;  %v244_v25 = vld [vmem:[%s592_s22 + $0xd0] sm:$0xff]  ;;  %v246_v26 = vld [vmem:[%s592_s22 + $0xe0] sm:$0xff] }
  0x2f   : > { %432 = vst [vmem:[%s611_s30 + $0x70] sm:$0xff] %v400_v43  ;;  %v374_v60 = vadd.f32 %v657_v27, %v310_v52  ;;  %v375_v61 = vadd.f32 %v660_v28, %v311_v53  ;;  %v376_v62 = vadd.f32 %v663_v29, %v312_v15  ;;  %v314_v24 = vadd.f32 %v602_v1, %v278_v54  ;;  %v248_v27 = vld [vmem:[%s592_s22 + $0xf0] sm:$0xff] }
  0x30   : > { %433 = vst [vmem:[%s611_s30 + $0x78] sm:$0xff] %v401_v45  ;;  %v403_v2 = vmax.f32 %v371_v55, 0.0  ;;  %v404_v3 = vmax.f32 %v372_v56, 0.0  ;;  %v405_v4 = vmax.f32 %v373_v57, 0.0  ;;  %v377_v5 = vadd.f32 %v666_v30, %v313_v58 }
  0x31   : > { %434 = vst [vmem:[%s611_s30 + $0x80] sm:$0xff] %v402_v46  ;;  %v406_v28 = vmax.f32 %v374_v60, 0.0  ;;  %v407_v29 = vmax.f32 %v375_v61, 0.0  ;;  %v378_v7 = vadd.f32 %v669_v31, %v314_v24  ;;  %v408_v16 = vmax.f32 %v376_v62, 0.0 }
  0x32   : > { %435 = vst [vmem:[%s611_s30 + $0x88] sm:$0xff] %v403_v2  ;;  %v279_v17 = vmul.f32 %v587_v0, %v243_v59  ;;  %v280_v18 = vmul.f32 %v587_v0, %v244_v25  ;;  %v281_v40 = vmul.f32 %v587_v0, %v245_v63  ;;  %v409_v30 = vmax.f32 %v377_v5, 0.0 }
  0x33   : > { %436 = vst [vmem:[%s611_s30 + $0x90] sm:$0xff] %v404_v3  ;;  %v282_v41 = vmul.f32 %v587_v0, %v246_v26  ;;  %v283_v42 = vmul.f32 %v587_v0, %v247_v6  ;;  %v284_v8 = vmul.f32 %v587_v0, %v248_v27  ;;  %v285_v20 = vmul.f32 %v587_v0, %v249_v39 }
  0x34   : > { %437 = vst [vmem:[%s611_s30 + $0x98] sm:$0xff] %v405_v4  ;;  %v315_v31 = vadd.f32 %v602_v1, %v279_v17  ;;  %v316_v19 = vadd.f32 %v602_v1, %v280_v18  ;;  %v317_v9 = vadd.f32 %v602_v1, %v281_v40  ;;  %v410_v21 = vmax.f32 %v378_v7, 0.0 }
  0x35   : > { %438 = vst [vmem:[%s611_s30 + $0xa0] sm:$0xff] %v406_v28  ;;  %v318_v43 = vadd.f32 %v602_v1, %v282_v41  ;;  %v319_v10 = vadd.f32 %v602_v1, %v283_v42  ;;  %v320_v44 = vadd.f32 %v602_v1, %v284_v8  ;;  %v321_v0 = vadd.f32 %v602_v1, %v285_v20 }
  0x36   : > { %439 = vst [vmem:[%s611_s30 + $0xa8] sm:$0xff] %v407_v29  ;;  %v379_v45 = vadd.f32 %v672_v32, %v315_v31  ;;  %v380_v11 = vadd.f32 %v675_v33, %v316_v19  ;;  %v381_v12 = vadd.f32 %v678_v34, %v317_v9 }
  0x37   : > { %440 = vst [vmem:[%s611_s30 + $0xb0] sm:$0xff] %v408_v16  ;;  %v382_v13 = vadd.f32 %v681_v35, %v318_v43  ;;  %v383_v22 = vadd.f32 %v684_v36, %v319_v10  ;;  %v384_v46 = vadd.f32 %v687_v37, %v320_v44  ;;  %v385_v34 = vadd.f32 %v690_v38, %v321_v0 }
  0x38   : > { %441 = vst [vmem:[%s611_s30 + $0xb8] sm:$0xff] %v409_v30  ;;  %v411_v32 = vmax.f32 %v379_v45, 0.0  ;;  %v412_v33 = vmax.f32 %v380_v11, 0.0  ;;  %v413_v47 = vmax.f32 %v381_v12, 0.0 }
  0x39   : > { %442 = vst [vmem:[%s611_s30 + $0xc0] sm:$0xff] %v410_v21  ;;  %v414_v1 = vmax.f32 %v382_v13, 0.0  ;;  %v415_v48 = vmax.f32 %v383_v22, 0.0  ;;  %v416_v35 = vmax.f32 %v384_v46, 0.0  ;;  %v417_v23 = vmax.f32 %v385_v34, 0.0 }
  0x3a   : > { %443 = vst [vmem:[%s611_s30 + $0xc8] sm:$0xff] %v411_v32 }
  0x3b   : > { %444 = vst [vmem:[%s611_s30 + $0xd0] sm:$0xff] %v412_v33 }
  0x3c   : > { %445 = vst [vmem:[%s611_s30 + $0xd8] sm:$0xff] %v413_v47 }
  0x3d   : > { %446 = vst [vmem:[%s611_s30 + $0xe0] sm:$0xff] %v414_v1 }
  0x3e   : > { %447 = vst [vmem:[%s611_s30 + $0xe8] sm:$0xff] %v415_v48 }
  0x3f   : > { %448 = vst [vmem:[%s611_s30 + $0xf0] sm:$0xff] %v416_v35 }
  0x40   : > { %449 = vst [vmem:[%s611_s30 + $0xf8] sm:$0xff] %v417_v23 }
  0x41 PF: > { %s14_s15 = sadd.s32 1, %s549_s15  }
  0x42   : > { %p11_p4 = scmp.ge.s32.totalorder %s14_s15, 4  }
  0x44   :  { %13 = sbr.rel (!%p11_p4) target bundleno = 1 (0x1), region = 69 }

// kernel: basic_block_forward.4
= control target key start
LH: loop header
LB: loop body
LE: loop exit
PB: predicated region body
PF: predicated region fallthrough
CT: control target
= control target key end

     0   :  { %s5110_s15 = smov 0   ;;  %s6469_s0 = inlined_call_operand.vmem [shape: bf16[2,18,18,4], index: 0, kind: input, shape index: {}]   ;;  %s6470_s1 = inlined_call_operand.vmem [shape: bf16[9,4,128], index: 1, kind: input, shape index: {}]   ;;  %s6471_s2 = inlined_call_operand.vmem [shape: f32[2,256,128], index: 2, kind: output, shape index: {0}]   ;;  %s6472_s3 = inlined_call_operand.vmem [shape: f32[2,1,128], index: 3, kind: output, shape index: {1}]   ;;  %s6473_s4 = inlined_call_operand.vmem [shape: f32[2,1,128], index: 4, kind: output, shape index: {2}]  }
   0x1 LB: > { %s4372_s16 = sadd.s32 4294967295, %s5083_s15   ;;  %p4376_p0 = scmp.ge.s32.totalorder %s5083_s15, 1  ;;  %s5083_s15 = sphi %s5110_s15, %s15_s15  }
   0x2   : > { %p167_p1 = scmp.lt.s32.totalorder %s5083_s15, 3 }
   0x4   : > { %p168_p2 = pnand %p4376_p0, %p167_p1 }
   0x6   : > { %171 = sbr.rel (%p168_p2) target bundleno = 770 (0x302), region = 28 }
   0xb   : > { %v4380_v0 = vld [vmem:[%s6470_s1 + $0x2] sm:$0x3]  ;;  %vm751_vm0 = vcmask 1041408   ;;  %p199_p3 = scmp.lt.s32.totalorder %s4372_s16, 1  ;;  %v4493_v2 = vld [vmem:[%s6470_s1 + $0x4] sm:$0x3] }
   0xc   : > { %v753_v1 = vsel %vm751_vm0, %v4380_v0, 0  ;;  %v1326_v3 = vsel %vm751_vm0, %v4493_v2, 0  ;;  %v4542_v4 = vld [vmem:[%s6470_s1 + $0x6] sm:$0x3]  ;;  %v248_v5 = vld [vmem:[%s6470_s1] sm:$0x3] }
   0xd   : > { %5015 = vmatpush.bf16.msra.mxu1 %v753_v1  ;;  %5016 = vmatpush.bf16.msra.mxu2 %v753_v1  ;;  %s6483_s16 = smov (!%p199_p3, %s4372_s16), 1  ;;  %v4671_v6 = vld [vmem:[%s6470_s1 + $0x8] sm:$0x3]  ;;  %v1613_v7 = vsel %vm751_vm0, %v4542_v4, 0  ;;  %v973_v8 = vsel %vm751_vm0, %v248_v5, 0  ;;  %vm702_vm4 = vcmask 31744  }
   0xe   : > { %5017 = vmatpush.bf16.msra.mxu3 %v753_v1  ;;  %762 = vmatpush.bf16.msra.mxu0 %v753_v1  ;;  %s5018_s27 = smul.u32 216, %s6483_s16  ;;  %v2267_v9 = vsel %vm751_vm0, %v4671_v6, 0  ;;  %vm265_vm1 = vsmask.f32 3328  ;;  %vm266_vm2 = vsmask.f32 7440  ;;  %s211_s21 = scalar_lea.vmem %s6472_s3, %s6483_s16 }
   0xf   : > { %vm5156_vm3 = vmor %vm265_vm1, %vm266_vm2  ;;  %vm1112_vm5 = vcmask 1042432   ;;  %vm1113_vm6 = vcmask 1046532   ;;  %s4966_s13 = sshll.u32 %s6483_s16, 8  ;;  %s214_s24 = scalar_lea.vmem %s6473_s4, %s6483_s16 }
  0x10   : > { %s5144_s30 = scalar_lea.vmem %s6469_s0, %s5018_s27  ;;  %vm5330_vm7 = vmor %vm1112_vm5, %vm1113_vm6  ;;  %s6188_s18 = scalar_lea.vmem %s6471_s2, %s4966_s13 }
  0x11   : > { %1335 = vmatpush.bf16.msrb.mxu2 %v1326_v3  ;;  %982 = vmatpush.bf16.msrb.mxu1 %v973_v8  ;;  %v224_v10 = vld [vmem:[%s5144_s30 + $0x30] sm:$0xf]  ;;  %v225_v11 = vld [vmem:[%s5144_s30 + $0x34] sm:$0xf]  ;;  %v253_v12 = vld [vmem:[%s5144_s30 + $0x38] sm:$0x1] }
  0x12   : > { %1622 = vmatpush.bf16.msrb.mxu3 %v1613_v7  ;;  %2276 = vmatpush.bf16.msrb.mxu0 %v2267_v9  ;;  %v365_v13 = vshrl.u32 %v224_v10, 16  ;;  %v368_v14 = vshll.u32 %v224_v10, 16  ;;  %v374_v15 = vshll.u32 %v225_v11, 16  ;;  %v378_v16 = vshrl.u32 %v225_v11, 16  ;;  %v232_v17 = vld [vmem:[%s5144_s30 + $0x60] sm:$0xf] }
  0x13   : > { %v384_v18 = vshll.u32 %v253_v12, 16  ;;  %v233_v19 = vld [vmem:[%s5144_s30 + $0x64] sm:$0xf]  ;;  %v257_v20 = vld [vmem:[%s5144_s30 + $0x68] sm:$0x1]  ;;  %v461_v21 = vshrl.u32 %v232_v17, 16 }
  0x14   : > { %v367_v22 = vrot.slane %v365_v13, 4  ;;  %v370_v23 = vrot.slane %v368_v14, 5  ;;  %v376_v24 = vrot.slane %v374_v15, 5  ;;  %v380_v25 = vrot.slane %v378_v16, 4  ;;  %v240_v26 = vld [vmem:[%s5144_s30 + $0x90] sm:$0xf] }
  0x15   : > { %v386_v27 = vrot.slane %v384_v18, 5  ;;  %v463_v28 = vrot.slane %v461_v21, 4  ;;  %v464_v29 = vshll.u32 %v232_v17, 16  ;;  %v470_v30 = vshll.u32 %v233_v19, 16  ;;  %v241_v35 = vld [vmem:[%s5144_s30 + $0x94] sm:$0xf] }
  0x16   : > { %v371_v31 = vor.u32 %v370_v23, %v367_v22  ;;  %v381_v32 = vor.u32 %v380_v25, %v376_v24  ;;  %v474_v33 = vshrl.u32 %v233_v19, 16  ;;  %v480_v34 = vshll.u32 %v257_v20, 16  ;;  %v261_v45 = vld [vmem:[%s5144_s30 + $0x98] sm:$0x1]  ;;  %v216_v61 = vld [vmem:[%s5144_s30] sm:$0xf] }
  0x17   : > { %v466_v37 = vrot.slane %v464_v29, 5  ;;  %v472_v38 = vrot.slane %v470_v30, 5  ;;  %v557_v39 = vshrl.u32 %v240_v26, 16  ;;  %v560_v47 = vshll.u32 %v240_v26, 16  ;;  %v5169_v1 = vld [vmem:[%s5144_s30 + $0x4] sm:$0xf] }
  0x18   : > { %v372_v40 = vrot.slane %v371_v31, 4  ;;  %v382_v41 = vrot.slane %v381_v32, 4  ;;  %v476_v42 = vrot.slane %v474_v33, 4  ;;  %v482_v43 = vrot.slane %v480_v34, 5  ;;  %v5172_v2 = vld [vmem:[%s5144_s30 + $0x8] sm:$0x1] }
  0x19   : > { %v467_v44 = vor.u32 %v466_v37, %v463_v28  ;;  %v559_v46 = vrot.slane %v557_v39, 4  ;;  %v566_v48 = vshll.u32 %v241_v35, 16  ;;  %v570_v52 = vshrl.u32 %v241_v35, 16  ;;  %v226_v19 = vld [vmem:[%s5144_s30 + $0x3c] sm:$0xf] }
  0x1a   : > { %v377_v49 = vsel %vm5156_vm3, %v372_v40, %v376_v24  ;;  %v387_v50 = vsel %vm5156_vm3, %v382_v41, %v386_v27  ;;  %v477_v51 = vor.u32 %v476_v42, %v472_v38  ;;  %v562_v56 = vrot.slane %v560_v47, 5  ;;  %v5184_v20 = vld [vmem:[%s5144_s30 + $0x40] sm:$0xf]  ;;  %v5189_v25 = vld [vmem:[%s5144_s30 + $0x44] sm:$0x1] }
  0x1b   : > { %v662_v53 = vunpack.c.l.b16 %v377_v49  ;;  %v663_v54 = vunpack.c.l.b16 %v387_v50  ;;  %v468_v55 = vrot.slane %v467_v44, 4  ;;  %v568_v58 = vrot.slane %v566_v48, 5  ;;  %v234_v33 = vld [vmem:[%s5144_s30 + $0x6c] sm:$0xf]  ;;  %v258_v47 = vld [vmem:[%s5144_s30 + $0x74] sm:$0x1] }
  0x1c   : > { %v478_v57 = vrot.slane %v477_v51, 4  ;;  %v572_v59 = vrot.slane %v570_v52, 4  ;;  %v576_v60 = vshll.u32 %v261_v45, 16  ;;  %v563_v0 = vor.u32 %v562_v56, %v559_v46 }
  0x1d   : > { %v690_v62 = vpack.c.b16 %v663_v54, %v662_v53  ;;  %v473_v63 = vsel %vm5156_vm3, %v468_v55, %v472_v38  ;;  %v269_v9 = vshrl.u32 %v216_v61, 16  ;;  %v272_v10 = vshll.u32 %v216_v61, 16  ;;  %v242_v61 = vld [vmem:[%s5144_s30 + $0x9c] sm:$0xf] }
  0x1e   : > { %v483_v3 = vsel %vm5156_vm3, %v478_v57, %v482_v43  ;;  %v670_v4 = vunpack.c.l.b16 %v473_v63  ;;  %v573_v5 = vor.u32 %v572_v59, %v568_v58  ;;  %v578_v6 = vrot.slane %v576_v60, 5  ;;  %v235_v43 = vld [vmem:[%s5144_s30 + $0x70] sm:$0xf] }
  0x1f   : > { %4385 = vmatmul.msk.bf16.vlgmr.msra.gmra.mxu1 %vm702_vm4, %v690_v62  ;;  %v671_v7 = vunpack.c.l.b16 %v483_v3  ;;  %v564_v8 = vrot.slane %v563_v0, 4  ;;  %v278_v12 = vshll.u32 %v5169_v1, 16  ;;  %v282_v13 = vshrl.u32 %v5169_v1, 16  ;;  %v243_v3 = vld [vmem:[%s5144_s30 + $0xa0] sm:$0xf] }
  0x20   : > { %v574_v11 = vrot.slane %v573_v5, 4  ;;  %v288_v14 = vshll.u32 %v5172_v2, 16  ;;  %v271_v17 = vrot.slane %v269_v9, 4  ;;  %v274_v18 = vrot.slane %v272_v10, 5 }
  0x21   : > { %v694_v15 = vpack.c.b16 %v671_v7, %v670_v4  ;;  %v569_v16 = vsel %vm5156_vm3, %v564_v8, %v568_v58  ;;  %v280_v23 = vrot.slane %v278_v12, 5  ;;  %v284_v24 = vrot.slane %v282_v13, 4  ;;  %v262_v8 = vld [vmem:[%s5144_s30 + $0xa4] sm:$0x1] }
  0x22   : > { %v579_v21 = vsel %vm5156_vm3, %v574_v11, %v578_v6  ;;  %v678_v22 = vunpack.c.l.b16 %v569_v16  ;;  %v275_v27 = vor.u32 %v274_v18, %v271_v17  ;;  %v290_v28 = vrot.slane %v288_v14, 5 }
  0x23   : > { %4389 = vmatmul.msk.bf16.vlgmr.msra.gmra.mxu2 %vm702_vm4, %v694_v15  ;;  %v679_v26 = vunpack.c.l.b16 %v579_v21  ;;  %v285_v29 = vor.u32 %v284_v24, %v280_v23  ;;  %v389_v30 = vshrl.u32 %v226_v19, 16  ;;  %v392_v31 = vshll.u32 %v226_v19, 16 }
  0x24   : > { %v398_v32 = vshll.u32 %v5184_v20, 16  ;;  %v276_v35 = vrot.slane %v275_v27, 4  ;;  %v402_v37 = vshrl.u32 %v5184_v20, 16  ;;  %v408_v38 = vshll.u32 %v5189_v25, 16 }
  0x25   : > { %v698_v34 = vpack.c.b16 %v679_v26, %v678_v22  ;;  %v286_v39 = vrot.slane %v285_v29, 4  ;;  %v391_v40 = vrot.slane %v389_v30, 4  ;;  %v394_v41 = vrot.slane %v392_v31, 5  ;;  %v218_v22 = vld [vmem:[%s5144_s30 + $0xc] sm:$0xf] }
  0x26   : > { %v400_v42 = vrot.slane %v398_v32, 5  ;;  %v281_v44 = vsel %vm5156_vm3, %v276_v35, %v280_v23  ;;  %v404_v45 = vrot.slane %v402_v37, 4  ;;  %v410_v46 = vrot.slane %v408_v38, 5  ;;  %v5218_v32 = vld [vmem:[%s5144_s30 + $0x14] sm:$0x1] }
  0x27   : > { %4393 = vmatmul.msk.bf16.vlgmr.msra.gmra.mxu3 %vm702_vm4, %v698_v34  ;;  %v485_v48 = vshrl.u32 %v234_v33, 16  ;;  %v291_v49 = vsel %vm5156_vm3, %v286_v39, %v290_v28  ;;  %v654_v50 = vunpack.c.l.b16 %v281_v44  ;;  %v395_v51 = vor.u32 %v394_v41, %v391_v40  ;;  %v5215_v28 = vld [vmem:[%s5144_s30 + $0x10] sm:$0xf] }
  0x28   : > { %v488_v52 = vshll.u32 %v234_v33, 16  ;;  %v655_v53 = vunpack.c.l.b16 %v291_v49  ;;  %v405_v54 = vor.u32 %v404_v45, %v400_v42  ;;  %v494_v56 = vshll.u32 %v235_v43, 16 }
  0x29   : > { %v487_v55 = vrot.slane %v485_v48, 4  ;;  %v396_v57 = vrot.slane %v395_v51, 4  ;;  %v498_v59 = vshrl.u32 %v235_v43, 16  ;;  %v504_v60 = vshll.u32 %v258_v47, 16  ;;  %v5228_v47 = vld [vmem:[%s5144_s30 + $0x4c] sm:$0xf] }
  0x2a   : > { %v490_v58 = vrot.slane %v488_v52, 5  ;;  %v686_v62 = vpack.c.b16 %v655_v53, %v654_v50  ;;  %v406_v63 = vrot.slane %v405_v54, 4  ;;  %v496_v0 = vrot.slane %v494_v56, 5  ;;  %v5233_v56 = vld [vmem:[%s5144_s30 + $0x50] sm:$0x1] }
  0x2b   : > { %v401_v4 = vsel %vm5156_vm3, %v396_v57, %v400_v42  ;;  %v500_v6 = vrot.slane %v498_v59, 4  ;;  %v506_v7 = vrot.slane %v504_v60, 5  ;;  %v581_v11 = vshrl.u32 %v242_v61, 16  ;;  %v228_v42 = vld [vmem:[%s5144_s30 + $0x48] sm:$0xf] }
  0x2c   : > { %v491_v5 = vor.u32 %v490_v58, %v487_v55  ;;  %4381 = vmatmul.msk.bf16.vlgmr.msra.gmra.mxu0 %vm702_vm4, %v686_v62  ;;  %v411_v9 = vsel %vm5156_vm3, %v406_v63, %v410_v46  ;;  %v664_v10 = vunpack.c.l.b16 %v401_v4  ;;  %v584_v12 = vshll.u32 %v242_v61, 16 }
  0x2d   : > { %v665_v13 = vunpack.c.l.b16 %v411_v9  ;;  %v501_v15 = vor.u32 %v500_v6, %v496_v0  ;;  %v590_v16 = vshll.u32 %v243_v3, 16  ;;  %v583_v17 = vrot.slane %v581_v11, 4 }
  0x2e   : > { %v492_v14 = vrot.slane %v491_v5, 4  ;;  %v586_v18 = vrot.slane %v584_v12, 5  ;;  %v594_v19 = vshrl.u32 %v243_v3, 16  ;;  %v600_v21 = vshll.u32 %v262_v8, 16  ;;  %v236_v3 = vld [vmem:[%s5144_s30 + $0x78] sm:$0xf] }
  0x2f   : > { %v691_v23 = vpack.c.b16 %v665_v13, %v664_v10  ;;  %v502_v26 = vrot.slane %v501_v15, 4  ;;  %v592_v27 = vrot.slane %v590_v16, 5  ;;  %v293_v35 = vshrl.u32 %v218_v22, 16  ;;  %v237_v8 = vld [vmem:[%s5144_s30 + $0x7c] sm:$0xf] }
  0x30   : > { %v497_v24 = vsel %vm5156_vm3, %v492_v14, %v496_v0  ;;  %v587_v30 = vor.u32 %v586_v18, %v583_v17  ;;  %v596_v31 = vrot.slane %v594_v19, 4  ;;  %v602_v34 = vrot.slane %v600_v21, 5  ;;  %v259_v16 = vld [vmem:[%s5144_s30 + $0x80] sm:$0x1] }
  0x31   : > { %v672_v29 = vunpack.c.l.b16 %v497_v24  ;;  %4386 = vmatmul.msk.bf16.gmra.mxu1 %vm702_vm4, %v691_v23  ;;  %v507_v33 = vsel %vm5156_vm3, %v502_v26, %v506_v7  ;;  %v296_v37 = vshll.u32 %v218_v22, 16  ;;  %v302_v41 = vshll.u32 %v5215_v28, 16 }
  0x32   : > { %v673_v38 = vunpack.c.l.b16 %v507_v33  ;;  %v588_v39 = vrot.slane %v587_v30, 4  ;;  %v597_v40 = vor.u32 %v596_v31, %v592_v27  ;;  %v295_v43 = vrot.slane %v293_v35, 4 }
  0x33   : > { %v298_v44 = vrot.slane %v296_v37, 5  ;;  %v306_v45 = vshrl.u32 %v5215_v28, 16  ;;  %v312_v46 = vshll.u32 %v5218_v32, 16  ;;  %v304_v51 = vrot.slane %v302_v41, 5 }
  0x34   : > { %v695_v48 = vpack.c.b16 %v673_v38, %v672_v29  ;;  %v593_v49 = vsel %vm5156_vm3, %v588_v39, %v592_v27  ;;  %v598_v50 = vrot.slane %v597_v40, 4  ;;  %v413_v58 = vshrl.u32 %v228_v42, 16  ;;  %v245_v39 = vld [vmem:[%s5144_s30 + $0xac] sm:$0xf]  ;;  %v263_v40 = vld [vmem:[%s5144_s30 + $0xb0] sm:$0x1] }
  0x35   : > { %v680_v52 = vunpack.c.l.b16 %v593_v49  ;;  %v299_v53 = vor.u32 %v298_v44, %v295_v43  ;;  %v308_v54 = vrot.slane %v306_v45, 4  ;;  %v314_v55 = vrot.slane %v312_v46, 5 }
  0x36   : > { %4390 = vmatmul.msk.bf16.gmra.mxu2 %vm702_vm4, %v695_v48  ;;  %v603_v57 = vsel %vm5156_vm3, %v598_v50, %v602_v34  ;;  %v416_v59 = vshll.u32 %v228_v42, 16  ;;  %v422_v60 = vshll.u32 %v5228_v47, 16  ;;  %v426_v0 = vshrl.u32 %v5228_v47, 16  ;;  %v244_v34 = vld [vmem:[%s5144_s30 + $0xa8] sm:$0xf] }
  0x37   : > { %v681_v61 = vunpack.c.l.b16 %v603_v57  ;;  %v300_v62 = vrot.slane %v299_v53, 4  ;;  %v309_v63 = vor.u32 %v308_v54, %v304_v51  ;;  %v415_v4 = vrot.slane %v413_v58, 4 }
  0x38   : > { %v418_v5 = vrot.slane %v416_v59, 5  ;;  %v424_v6 = vrot.slane %v422_v60, 5  ;;  %v432_v7 = vshll.u32 %v5233_v56, 16  ;;  %v428_v12 = vrot.slane %v426_v0, 4  ;;  %v220_v59 = vld [vmem:[%s5144_s30 + $0x18] sm:$0xf] }
  0x39   : > { %v699_v9 = vpack.c.b16 %v681_v61, %v680_v52  ;;  %v305_v10 = vsel %vm5156_vm3, %v300_v62, %v304_v51  ;;  %v310_v11 = vrot.slane %v309_v63, 4  ;;  %v509_v17 = vshrl.u32 %v236_v3, 16  ;;  %v5261_v63 = vld [vmem:[%s5144_s30 + $0x1c] sm:$0xf]  ;;  %v5264_v0 = vld [vmem:[%s5144_s30 + $0x20] sm:$0x1] }
  0x3a   : > { %v656_v13 = vunpack.c.l.b16 %v305_v10  ;;  %v419_v14 = vor.u32 %v418_v5, %v415_v4  ;;  %v434_v15 = vrot.slane %v432_v7, 5  ;;  %v429_v19 = vor.u32 %v428_v12, %v424_v6 }
  0x3b   : > { %4394 = vmatmul.msk.bf16.gmra.mxu3 %vm702_vm4, %v699_v9  ;;  %v315_v18 = vsel %vm5156_vm3, %v310_v11, %v314_v55  ;;  %v512_v21 = vshll.u32 %v236_v3, 16  ;;  %v518_v22 = vshll.u32 %v237_v8, 16  ;;  %v511_v26 = vrot.slane %v509_v17, 4 }
  0x3c   : > { %v657_v23 = vunpack.c.l.b16 %v315_v18  ;;  %v420_v24 = vrot.slane %v419_v14, 4  ;;  %v522_v27 = vshrl.u32 %v237_v8, 16  ;;  %v430_v29 = vrot.slane %v429_v19, 4 }
  0x3d   : > { %v514_v30 = vrot.slane %v512_v21, 5  ;;  %v520_v31 = vrot.slane %v518_v22, 5  ;;  %v528_v33 = vshll.u32 %v259_v16, 16  ;;  %v605_v48 = vshrl.u32 %v244_v34, 16  ;;  %v5274_v21 = vld [vmem:[%s5144_s30 + $0x58] sm:$0xf] }
  0x3e   : > { %v687_v35 = vpack.c.b16 %v657_v23, %v656_v13  ;;  %v425_v37 = vsel %vm5156_vm3, %v420_v24, %v424_v6  ;;  %v524_v38 = vrot.slane %v522_v27, 4  ;;  %v435_v41 = vsel %vm5156_vm3, %v430_v29, %v434_v15  ;;  %v230_v15 = vld [vmem:[%s5144_s30 + $0x54] sm:$0xf]  ;;  %v5279_v27 = vld [vmem:[%s5144_s30 + $0x5c] sm:$0x1] }
  0x3f   : > { %v666_v42 = vunpack.c.l.b16 %v425_v37  ;;  %v515_v43 = vor.u32 %v514_v30, %v511_v26  ;;  %v530_v44 = vrot.slane %v528_v33, 5  ;;  %v667_v45 = vunpack.c.l.b16 %v435_v41 }
  0x40   : > { %4382 = vmatmul.msk.bf16.gmra.mxu0 %vm702_vm4, %v687_v35  ;;  %v525_v46 = vor.u32 %v524_v38, %v520_v31  ;;  %v608_v49 = vshll.u32 %v244_v34, 16  ;;  %v614_v51 = vshll.u32 %v245_v39, 16  ;;  %v618_v52 = vshrl.u32 %v245_v39, 16  ;;  %v238_v39 = vld [vmem:[%s5144_s30 + $0x84] sm:$0xf] }
  0x41   : > { %v516_v50 = vrot.slane %v515_v43, 4  ;;  %v624_v53 = vshll.u32 %v263_v40, 16  ;;  %v692_v54 = vpack.c.b16 %v667_v45, %v666_v42  ;;  %v607_v57 = vrot.slane %v605_v48, 4 }
  0x42   : > { %v526_v55 = vrot.slane %v525_v46, 4  ;;  %v610_v58 = vrot.slane %v608_v49, 5  ;;  %v616_v61 = vrot.slane %v614_v51, 5  ;;  %v620_v62 = vrot.slane %v618_v52, 4  ;;  %v239_v49 = vld [vmem:[%s5144_s30 + $0x88] sm:$0xf] }
  0x43   : > { %v521_v60 = vsel %vm5156_vm3, %v516_v50, %v520_v31  ;;  %4387 = vmatmul.msk.bf16.gmra.mxu1 %vm702_vm4, %v692_v54  ;;  %v626_v6 = vrot.slane %v624_v53, 5  ;;  %v317_v9 = vshrl.u32 %v220_v59, 16  ;;  %v320_v10 = vshll.u32 %v220_v59, 16  ;;  %v260_v53 = vld [vmem:[%s5144_s30 + $0x8c] sm:$0x1] }
  0x44   : > { %v531_v3 = vsel %vm5156_vm3, %v526_v55, %v530_v44  ;;  %v674_v4 = vunpack.c.l.b16 %v521_v60  ;;  %v611_v5 = vor.u32 %v610_v58, %v607_v57  ;;  %v621_v8 = vor.u32 %v620_v62, %v616_v61 }
  0x45   : > { %v675_v7 = vunpack.c.l.b16 %v531_v3  ;;  %v326_v12 = vshll.u32 %v5261_v63, 16  ;;  %v330_v13 = vshrl.u32 %v5261_v63, 16  ;;  %v336_v14 = vshll.u32 %v5264_v0, 16 }
  0x46   : > { %v612_v11 = vrot.slane %v611_v5, 4  ;;  %v622_v17 = vrot.slane %v621_v8, 4  ;;  %v319_v18 = vrot.slane %v317_v9, 4  ;;  %v322_v19 = vrot.slane %v320_v10, 5  ;;  %v246_v8 = vld [vmem:[%s5144_s30 + $0xb4] sm:$0xf] }
  0x47   : > { %v696_v16 = vpack.c.b16 %v675_v7, %v674_v4  ;;  %v328_v23 = vrot.slane %v326_v12, 5  ;;  %v332_v24 = vrot.slane %v330_v13, 4  ;;  %v338_v26 = vrot.slane %v336_v14, 5  ;;  %v247_v12 = vld [vmem:[%s5144_s30 + $0xb8] sm:$0xf] }
  0x48   : > { %v617_v22 = vsel %vm5156_vm3, %v612_v11, %v616_v61  ;;  %v627_v29 = vsel %vm5156_vm3, %v622_v17, %v626_v6  ;;  %v323_v31 = vor.u32 %v322_v19, %v319_v18  ;;  %v437_v33 = vshrl.u32 %v230_v15, 16  ;;  %v264_v17 = vld [vmem:[%s5144_s30 + $0xbc] sm:$0x1] }
  0x49   : > { %4391 = vmatmul.msk.bf16.gmra.mxu2 %vm702_vm4, %v696_v16  ;;  %v682_v30 = vunpack.c.l.b16 %v617_v22  ;;  %v683_v34 = vunpack.c.l.b16 %v627_v29  ;;  %v333_v35 = vor.u32 %v332_v24, %v328_v23  ;;  %v440_v37 = vshll.u32 %v230_v15, 16 }
  0x4a   : > { %v446_v38 = vshll.u32 %v5274_v21, 16  ;;  %v324_v40 = vrot.slane %v323_v31, 4  ;;  %v439_v41 = vrot.slane %v437_v33, 4  ;;  %v450_v42 = vshrl.u32 %v5274_v21, 16 }
  0x4b   : > { %v456_v43 = vshll.u32 %v5279_v27, 16  ;;  %v700_v44 = vpack.c.b16 %v683_v34, %v682_v30  ;;  %v334_v45 = vrot.slane %v333_v35, 4  ;;  %v442_v46 = vrot.slane %v440_v37, 5  ;;  %v222_v37 = vld [vmem:[%s5144_s30 + $0x24] sm:$0xf] }
  0x4c   : > { %v448_v48 = vrot.slane %v446_v38, 5  ;;  %v329_v50 = vsel %vm5156_vm3, %v324_v40, %v328_v23  ;;  %v452_v51 = vrot.slane %v450_v42, 4  ;;  %v533_v54 = vshrl.u32 %v238_v39, 16  ;;  %v5307_v42 = vld [vmem:[%s5144_s30 + $0x28] sm:$0xf] }
  0x4d   : > { %v458_v52 = vrot.slane %v456_v43, 5  ;;  %4395 = vmatmul.msk.bf16.gmra.mxu3 %vm702_vm4, %v700_v44  ;;  %v339_v55 = vsel %vm5156_vm3, %v334_v45, %v338_v26  ;;  %v658_v57 = vunpack.c.l.b16 %v329_v50  ;;  %v443_v58 = vor.u32 %v442_v46, %v439_v41 }
  0x4e   : > { %v536_v59 = vshll.u32 %v238_v39, 16  ;;  %v659_v60 = vunpack.c.l.b16 %v339_v55  ;;  %v453_v61 = vor.u32 %v452_v51, %v448_v48  ;;  %v535_v62 = vrot.slane %v533_v54, 4 }
  0x4f   : > { %v542_v3 = vshll.u32 %v239_v49, 16  ;;  %v444_v4 = vrot.slane %v443_v58, 4  ;;  %v546_v6 = vshrl.u32 %v239_v49, 16  ;;  %v552_v7 = vshll.u32 %v260_v53, 16 }
  0x50   : > { %v538_v5 = vrot.slane %v536_v59, 5  ;;  %v688_v9 = vpack.c.b16 %v659_v60, %v658_v57  ;;  %v454_v10 = vrot.slane %v453_v61, 4  ;;  %v629_v22 = vshrl.u32 %v246_v8, 16  ;;  %v1064_v61 = vld [vmem:[%s5144_s30] sm:$0xe] }
  0x51   : > { %v544_v11 = vrot.slane %v542_v3, 5  ;;  %v449_v13 = vsel %vm5156_vm3, %v444_v4, %v448_v48  ;;  %v548_v15 = vrot.slane %v546_v6, 4  ;;  %v554_v16 = vrot.slane %v552_v7, 5  ;;  %v5311_v48 = vld [vmem:[%s5144_s30 + $0x2c] sm:$0x1] }
  0x52   : > { %v539_v14 = vor.u32 %v538_v5, %v535_v62  ;;  %4383 = vmatmul.msk.bf16.gmra.mxu0 %vm702_vm4, %v688_v9  ;;  %v459_v18 = vsel %vm5156_vm3, %v454_v10, %v458_v52  ;;  %v668_v19 = vunpack.c.l.b16 %v449_v13  ;;  %v632_v23 = vshll.u32 %v246_v8, 16  ;;  %v4623_v6 = vld [vmem:[%s5144_s30 + $0xc] sm:$0xf] }
  0x53   : > { %v669_v24 = vunpack.c.l.b16 %v459_v18  ;;  %v549_v29 = vor.u32 %v548_v15, %v544_v11  ;;  %v638_v30 = vshll.u32 %v247_v12, 16  ;;  %v631_v31 = vrot.slane %v629_v22, 4 }
  0x54   : > { %v540_v26 = vrot.slane %v539_v14, 4  ;;  %v634_v33 = vrot.slane %v632_v23, 5  ;;  %v642_v34 = vshrl.u32 %v247_v12, 16  ;;  %v648_v35 = vshll.u32 %v264_v17, 16  ;;  %v4624_v12 = vld [vmem:[%s5144_s30 + $0x10] sm:$0xf] }
  0x55   : > { %v693_v38 = vpack.c.b16 %v669_v24, %v668_v19  ;;  %v550_v40 = vrot.slane %v549_v29, 4  ;;  %v640_v41 = vrot.slane %v638_v30, 5  ;;  %v1120_v43 = vrot.slane %v5172_v2, 5 }
  0x56   : > { %v545_v39 = vsel %vm5156_vm3, %v540_v26, %v544_v11  ;;  %v635_v45 = vor.u32 %v634_v33, %v631_v31  ;;  %v644_v46 = vrot.slane %v642_v34, 4  ;;  %v650_v50 = vrot.slane %v648_v35, 5  ;;  %v4769_v11 = vld [vmem:[%s6470_s1 + $0xc] sm:$0x3] }
  0x57   : > { %v676_v44 = vunpack.c.l.b16 %v545_v39  ;;  %4388 = vmatmul.msk.bf16.gmra.mxu1 %vm702_vm4, %v693_v38  ;;  %v555_v49 = vsel %vm5156_vm3, %v550_v40, %v554_v16  ;;  %v341_v51 = vshrl.u32 %v222_v37, 16  ;;  %v344_v52 = vshll.u32 %v222_v37, 16  ;;  %v4625_v38 = vld [vmem:[%s5144_s30 + $0x14] sm:$0x1] }
  0x58   : > { %v677_v53 = vunpack.c.l.b16 %v555_v49  ;;  %v636_v54 = vrot.slane %v635_v45, 4  ;;  %v645_v55 = vor.u32 %v644_v46, %v640_v41  ;;  %v350_v2 = vshll.u32 %v5307_v42, 16  ;;  %v4898_v45 = vld [vmem:[%s6470_s1 + $0xe] sm:$0x3] }
  0x59   : > { %v343_v57 = vrot.slane %v341_v51, 4  ;;  %v346_v58 = vrot.slane %v344_v52, 5  ;;  %v354_v59 = vshrl.u32 %v5307_v42, 16  ;;  %v360_v60 = vshll.u32 %v5311_v48, 16  ;;  %v4967_v51 = vld [vmem:[%s5144_s30] sm:$0xff] }
  0x5a   : > { %v697_v62 = vpack.c.b16 %v677_v53, %v676_v44  ;;  %v641_v3 = vsel %vm5156_vm3, %v636_v54, %v640_v41  ;;  %v646_v4 = vrot.slane %v645_v55, 4  ;;  %v352_v5 = vrot.slane %v350_v2, 5  ;;  %v4947_v2 = vld [vmem:[%s6470_s1 + $0x10] sm:$0x3] }
  0x5b   : > { %v684_v7 = vunpack.c.l.b16 %v641_v3  ;;  %v347_v8 = vor.u32 %v346_v58, %v343_v57  ;;  %v356_v9 = vrot.slane %v354_v59, 4  ;;  %v362_v10 = vrot.slane %v360_v60, 5 }
  0x5c   : > { %4392 = vmatmul.msk.bf16.gmra.mxu2 %vm702_vm4, %v697_v62  ;;  %v651_v13 = vsel %vm5156_vm3, %v646_v4, %v650_v50  ;;  %v4477_v14 = vrot.slane %v1064_v61, 9  ;;  %v1117_v19 = vrot.slane %v5169_v1, 5  ;;  %v2952_v22 = vsel %vm751_vm0, %v4769_v11, 0  ;;  %v4720_v50 = vld [vmem:[%s6470_s1 + $0xa] sm:$0x3] }
  0x5d   : > { %v685_v15 = vunpack.c.l.b16 %v651_v13  ;;  %v348_v16 = vrot.slane %v347_v8, 4  ;;  %v357_v17 = vor.u32 %v356_v9, %v352_v5  ;;  %v1785_v23 = vshrl.u32 %v4623_v6, 16  ;;  %2961 = vmatpush.bf16.msra.mxu2 %v2952_v22  ;;  %v1065_v8 = vld [vmem:[%s5144_s30 + $0xc] sm:$0xe] }
  0x5e   : > { %v1788_v24 = vshll.u32 %v4623_v6, 16  ;;  %v1794_v26 = vshll.u32 %v4624_v12, 16  ;;  %v1118_v33 = vsel %vm5330_vm7, %v4477_v14, %v1117_v19  ;;  %v1119_v35 = vrot.slane %v1117_v19, 4  ;;  %v4627_v6 = vld [vmem:[%s5144_s30 + $0x1c] sm:$0xf] }
  0x5f   : > { %v701_v29 = vpack.c.b16 %v685_v15, %v684_v7  ;;  %v353_v30 = vsel %vm5156_vm3, %v348_v16, %v352_v5  ;;  %v358_v31 = vrot.slane %v357_v17, 4  ;;  %v1229_v37 = vunpack.c.l.b16 %v1118_v33  ;;  %v4626_v5 = vld [vmem:[%s5144_s30 + $0x18] sm:$0xf]  ;;  %v4983_v15 = vld [vmem:[%s5144_s30 + $0xc] sm:$0xff] }
  0x60   : > { %v660_v34 = vunpack.c.l.b16 %v353_v30  ;;  %v1787_v1 = vrot.slane %v1785_v23, 4  ;;  %v1790_v40 = vrot.slane %v1788_v24, 5  ;;  %v1796_v41 = vrot.slane %v1794_v26, 5  ;;  %v4628_v30 = vld [vmem:[%s5144_s30 + $0x20] sm:$0x1] }
  0x61   : > { %4396 = vmatmul.msk.bf16.gmra.mxu3 %vm702_vm4, %v701_v29  ;;  %v363_v39 = vsel %vm5156_vm3, %v358_v31, %v362_v10  ;;  %v1798_v44 = vshrl.u32 %v4624_v12, 16  ;;  %v1121_v49 = vsel %vm5330_vm7, %v1119_v35, %v1120_v43  ;;  %v1804_v55 = vshll.u32 %v4625_v38, 16  ;;  %v4968_v35 = vld [vmem:[%s5144_s30 + $0xc] sm:$0xff] }
  0x62   : > { %v661_v46 = vunpack.c.l.b16 %v363_v39  ;;  %v1230_v52 = vunpack.c.l.b16 %v1121_v49  ;;  %v1791_v53 = vor.u32 %v1790_v40, %v1787_v1  ;;  %v3606_v58 = vsel %vm751_vm0, %v4898_v45, 0 }
  0x63   : > { %v1800_v54 = vrot.slane %v1798_v44, 4  ;;  %3615 = vmatpush.bf16.msra.mxu3 %v3606_v58  ;;  %v2665_v60 = vsel %vm751_vm0, %v4720_v50, 0  ;;  %v4004_v61 = vsel %vm751_vm0, %v4947_v2, 0  ;;  %v1806_v4 = vrot.slane %v1804_v55, 5  ;;  %v1066_v50 = vld [vmem:[%s5144_s30 + $0x18] sm:$0xe] }
  0x64   : > { %v689_v57 = vpack.c.b16 %v661_v46, %v660_v34  ;;  %v1261_v43 = vpack.c.b16 %v1230_v52, %v1229_v37  ;;  %2674 = vmatpush.bf16.msra.mxu1 %v2665_v60  ;;  %v1792_v62 = vrot.slane %v1791_v53, 4  ;;  %4013 = vmatpush.bf16.msra.mxu0 %v4004_v61  ;;  %v1124_v7 = vrot.slane %v5215_v28, 5  ;;  %v4630_v46 = vld [vmem:[%s5144_s30 + $0x28] sm:$0xf] }
  0x65   : > { %v1801_v59 = vor.u32 %v1800_v54, %v1796_v41  ;;  %v1809_v9 = vshrl.u32 %v4626_v5, 16  ;;  %v1812_v10 = vshll.u32 %v4626_v5, 16  ;;  %v1818_v13 = vshll.u32 %v4627_v6, 16 }
  0x66   : > { %4384 = vmatmul.msk.bf16.gmra.mxu0 %vm702_vm4, %v689_v57  ;;  %v1797_v11 = vsel %vm5156_vm3, %v1792_v62, %v1796_v41  ;;  %v1822_v14 = vshrl.u32 %v4627_v6, 16  ;;  %v4478_v16 = vrot.slane %v1065_v8, 9  ;;  %v1126_v17 = vrot.slane %v1124_v7, 4  ;;  %v4629_v41 = vld [vmem:[%s5144_s30 + $0x24] sm:$0xf] }
  0x67   : > { %4461 = vmatmul.msk.bf16.vlgmr.msrb.gmra.mxu1 %vm702_vm4, %v4967_v51  ;;  %v1802_v3 = vrot.slane %v1801_v59, 4  ;;  %v1127_v28 = vrot.slane %v5218_v32, 5  ;;  %v2170_v19 = vunpack.c.l.b16 %v1797_v11  ;;  %v1811_v23 = vrot.slane %v1809_v9, 4  ;;  %v4631_v6 = vld [vmem:[%s5144_s30 + $0x2c] sm:$0x1] }
  0x68   : > { %v1814_v24 = vrot.slane %v1812_v10, 5  ;;  %v1820_v26 = vrot.slane %v1818_v13, 5  ;;  %v1824_v29 = vrot.slane %v1822_v14, 4  ;;  %v1125_v31 = vsel %vm5330_vm7, %v4478_v16, %v1124_v7 }
  0x69   : > { %v1807_v12 = vsel %vm5156_vm3, %v1802_v3, %v1806_v4  ;;  %v1128_v33 = vsel %vm5330_vm7, %v1126_v17, %v1127_v28  ;;  %v1828_v38 = vshll.u32 %v4628_v30, 16  ;;  %v1231_v1 = vunpack.c.l.b16 %v1125_v31 }
  0x6a   : > { %v2171_v22 = vunpack.c.l.b16 %v1807_v12  ;;  %v1815_v32 = vor.u32 %v1814_v24, %v1811_v23  ;;  %v1825_v37 = vor.u32 %v1824_v29, %v1820_v26  ;;  %v1232_v39 = vunpack.c.l.b16 %v1128_v33  ;;  %v4969_v12 = vld [vmem:[%s5144_s30 + $0x18] sm:$0xff]  ;;  %v1067_v29 = vld [vmem:[%s5144_s30 + $0x24] sm:$0xe] }
  0x6b   : > { %v1830_v45 = vrot.slane %v1828_v38, 5  ;;  %v1131_v51 = vrot.slane %v5261_v63, 5  ;;  %v1833_v52 = vshrl.u32 %v4629_v41, 16  ;;  %v1836_v54 = vshll.u32 %v4629_v41, 16 }
  0x6c   : > { %4494 = vmatmul.msk.bf16.vlgmr.msrb.gmra.mxu2 %vm702_vm4, %v1261_v43  ;;  %v2202_v34 = vpack.c.b16 %v2171_v22, %v2170_v19  ;;  %v1816_v40 = vrot.slane %v1815_v32, 4  ;;  %v1826_v44 = vrot.slane %v1825_v37, 4  ;;  %v1262_v49 = vpack.c.b16 %v1232_v39, %v1231_v1  ;;  %v4984_v43 = vld [vmem:[%s5144_s30 + $0x18] sm:$0xff]  ;;  %v4632_v19 = vld [vmem:[%s5144_s30 + $0x30] sm:$0xf]  ;;  %v4985_v32 = vld [vmem:[%s5144_s30 + $0x24] sm:$0xff] }
  0x6d   : > { %v1842_v55 = vshll.u32 %v4630_v46, 16  ;;  %v1846_v2 = vshrl.u32 %v4630_v46, 16  ;;  %v4479_v58 = vrot.slane %v1066_v50, 9  ;;  %v1133_v60 = vrot.slane %v1131_v51, 4  ;;  %v4633_v22 = vld [vmem:[%s5144_s30 + $0x34] sm:$0xf] }
  0x6e   : > { %v1821_v53 = vsel %vm5156_vm3, %v1816_v40, %v1820_v26  ;;  %v1831_v57 = vsel %vm5156_vm3, %v1826_v44, %v1830_v45  ;;  %v1134_v63 = vrot.slane %v5264_v0, 5  ;;  %v1835_v61 = vrot.slane %v1833_v52, 4  ;;  %v4634_v45 = vld [vmem:[%s5144_s30 + $0x38] sm:$0x1] }
  0x6f   : > { %v2172_v59 = vunpack.c.l.b16 %v1821_v53  ;;  %v2173_v62 = vunpack.c.l.b16 %v1831_v57  ;;  %v1838_v3 = vrot.slane %v1836_v54, 5  ;;  %v1844_v4 = vrot.slane %v1842_v55, 5  ;;  %v4636_v57 = vld [vmem:[%s5144_s30 + $0x40] sm:$0xf] }
  0x70   : > { %v1848_v5 = vrot.slane %v1846_v2, 4  ;;  %v1132_v7 = vsel %vm5330_vm7, %v4479_v58, %v1131_v51  ;;  %v1135_v8 = vsel %vm5330_vm7, %v1133_v60, %v1134_v63  ;;  %v1852_v0 = vshll.u32 %v4631_v6, 16  ;;  %v4635_v2 = vld [vmem:[%s5144_s30 + $0x3c] sm:$0xf]  ;;  %v5027_v63 = vld [vmem:[%s5144_s30 + $0x34] sm:$0xf] }
  0x71   : > { %4607 = vmatmul.msk.bf16.vlgmr.msrb.gmra.mxu3 %vm702_vm4, %v4983_v15  ;;  %v2203_v9 = vpack.c.b16 %v2173_v62, %v2172_v59  ;;  %v1839_v10 = vor.u32 %v1838_v3, %v1835_v61  ;;  %v1233_v13 = vunpack.c.l.b16 %v1132_v7  ;;  %v1234_v14 = vunpack.c.l.b16 %v1135_v8  ;;  %v1068_v62 = vld [vmem:[%s5144_s30 + $0x30] sm:$0xe] }
  0x72   : > { %v1849_v11 = vor.u32 %v1848_v5, %v1844_v4  ;;  %v1854_v17 = vrot.slane %v1852_v0, 5  ;;  %v1138_v23 = vrot.slane %v5307_v42, 5  ;;  %v1857_v30 = vshrl.u32 %v4632_v19, 16  ;;  %v5028_v0 = vld [vmem:[%s5144_s30 + $0x38] sm:$0x1] }
  0x73   : > { %v1840_v15 = vrot.slane %v1839_v10, 4  ;;  %v1263_v28 = vpack.c.b16 %v1234_v14, %v1233_v13  ;;  %v1860_v31 = vshll.u32 %v4632_v19, 16  ;;  %v1866_v33 = vshll.u32 %v4633_v22, 16  ;;  %v4986_v13 = vld [vmem:[%s5144_s30 + $0x30] sm:$0xff] }
  0x74   : > { %v1850_v16 = vrot.slane %v1849_v11, 4  ;;  %v1140_v37 = vrot.slane %v1138_v23, 4  ;;  %v1141_v42 = vrot.slane %v5311_v48, 5  ;;  %v1859_v39 = vrot.slane %v1857_v30, 4  ;;  %v4970_v48 = vld [vmem:[%s5144_s30 + $0x24] sm:$0xff] }
  0x75   : > { %v1845_v24 = vsel %vm5156_vm3, %v1840_v15, %v1844_v4  ;;  %v1862_v40 = vrot.slane %v1860_v31, 5  ;;  %v1868_v41 = vrot.slane %v1866_v33, 5  ;;  %v1876_v53 = vshll.u32 %v4634_v45, 16  ;;  %v4971_v33 = vld [vmem:[%s5144_s30 + $0x30] sm:$0xff] }
  0x76   : > { %4672 = vmatmul.msk.bf16.vlgmr.msrb.gmra.mxu0 %vm702_vm4, %v2202_v34  ;;  %v1855_v26 = vsel %vm5156_vm3, %v1850_v16, %v1854_v17  ;;  %v1870_v34 = vshrl.u32 %v4633_v22, 16  ;;  %v2174_v38 = vunpack.c.l.b16 %v1845_v24  ;;  %v1145_v61 = vrot.slane %v5027_v63, 5  ;;  %v4637_v22 = vld [vmem:[%s5144_s30 + $0x44] sm:$0x1] }
  0x77   : > { %4462 = vmatmul.msk.bf16.gmra.mxu1 %vm702_vm4, %v4968_v35  ;;  %v4480_v35 = vrot.slane %v1067_v29, 9  ;;  %v2175_v1 = vunpack.c.l.b16 %v1855_v26  ;;  %v1863_v51 = vor.u32 %v1862_v40, %v1859_v39  ;;  %v1878_v59 = vrot.slane %v1876_v53, 5  ;;  %v4638_v39 = vld [vmem:[%s5144_s30 + $0x48] sm:$0xf]  ;;  %v4639_v40 = vld [vmem:[%s5144_s30 + $0x4c] sm:$0xf] }
  0x78   : > { %v1872_v44 = vrot.slane %v1870_v34, 4  ;;  %v1881_v3 = vshrl.u32 %v4635_v2, 16  ;;  %v1884_v4 = vshll.u32 %v4635_v2, 16  ;;  %v1890_v5 = vshll.u32 %v4636_v57, 16  ;;  %v4987_v2 = vld [vmem:[%s5144_s30 + $0x3c] sm:$0xff] }
  0x79   : > { %v1139_v46 = vsel %vm5330_vm7, %v4480_v35, %v1138_v23  ;;  %v2204_v50 = vpack.c.b16 %v2175_v1, %v2174_v38  ;;  %v1864_v58 = vrot.slane %v1863_v51, 4  ;;  %v1894_v6 = vshrl.u32 %v4636_v57, 16 }
  0x7a   : > { %v1873_v52 = vor.u32 %v1872_v44, %v1868_v41  ;;  %v1235_v54 = vunpack.c.l.b16 %v1139_v46  ;;  %v4481_v10 = vrot.slane %v1068_v62, 9  ;;  %v1147_v11 = vrot.slane %v1145_v61, 4 }
  0x7b   : > { %v1869_v8 = vsel %vm5156_vm3, %v1864_v58, %v1868_v41  ;;  %v1883_v14 = vrot.slane %v1881_v3, 4  ;;  %v1886_v15 = vrot.slane %v1884_v4, 5  ;;  %v1892_v16 = vrot.slane %v1890_v5, 5  ;;  %v4640_v4 = vld [vmem:[%s5144_s30 + $0x50] sm:$0x1] }
  0x7c   : > { %4495 = vmatmul.msk.bf16.gmra.mxu2 %vm702_vm4, %v1262_v49  ;;  %v1142_v49 = vsel %vm5330_vm7, %v1140_v37, %v1141_v42  ;;  %v1896_v17 = vrot.slane %v1894_v6, 4  ;;  %v1146_v23 = vsel %vm5330_vm7, %v4481_v10, %v1145_v61  ;;  %v1900_v30 = vshll.u32 %v4637_v22, 16 }
  0x7d   : > { %v1236_v55 = vunpack.c.l.b16 %v1142_v49  ;;  %v1887_v26 = vor.u32 %v1886_v15, %v1883_v14  ;;  %v1905_v51 = vshrl.u32 %v4638_v39, 16  ;;  %v1914_v53 = vshll.u32 %v4639_v40, 16 }
  0x7e   : > { %v1897_v29 = vor.u32 %v1896_v17, %v1892_v16  ;;  %v1902_v1 = vrot.slane %v1900_v30, 5 }
  0x7f   : > { %v1264_v60 = vpack.c.b16 %v1236_v55, %v1235_v54  ;;  %v1888_v42 = vrot.slane %v1887_v26, 4  ;;  %v1918_v54 = vshrl.u32 %v4639_v40, 16  ;;  %v1916_v62 = vrot.slane %v1914_v53, 5 }
  0x80   : > { %v1898_v38 = vrot.slane %v1897_v29, 4  ;;  %v1159_v26 = vrot.slane %v5228_v47, 5 }
  0x81   : > { %4608 = vmatmul.msk.bf16.gmra.mxu3 %vm702_vm4, %v4984_v43  ;;  %v1874_v43 = vrot.slane %v1873_v52, 4  ;;  %v1893_v45 = vsel %vm5156_vm3, %v1888_v42, %v1892_v16  ;;  %v1908_v52 = vshll.u32 %v4638_v39, 16  ;;  %v1920_v3 = vrot.slane %v1918_v54, 4  ;;  %v4643_v54 = vld [vmem:[%s5144_s30 + $0x5c] sm:$0x1] }
  0x82   : > { %v1903_v46 = vsel %vm5156_vm3, %v1898_v38, %v1902_v1  ;;  %v2178_v55 = vunpack.c.l.b16 %v1893_v45  ;;  %v4988_v1 = vld [vmem:[%s5144_s30 + $0x48] sm:$0xff]  ;;  %v1161_v40 = vrot.slane %v1159_v26, 4 }
  0x83   : > { %v2179_v57 = vunpack.c.l.b16 %v1903_v46  ;;  %v1910_v61 = vrot.slane %v1908_v52, 5  ;;  %v1921_v10 = vor.u32 %v1920_v3, %v1916_v62 }
  0x85   : > { %v1922_v16 = vrot.slane %v1921_v10, 4 }
  0x86   : > { %4673 = vmatmul.msk.bf16.gmra.mxu0 %vm702_vm4, %v2203_v9  ;;  %v1879_v9 = vsel %vm5156_vm3, %v1874_v43, %v1878_v59 }
  0x87   : > { %4463 = vmatmul.msk.bf16.gmra.mxu1 %vm702_vm4, %v4969_v12  ;;  %v1148_v12 = vrot.slane %v5028_v0, 5  ;;  %v2177_v19 = vunpack.c.l.b16 %v1879_v9 }
  0x89   : > { %v1149_v24 = vsel %vm5330_vm7, %v1147_v11, %v1148_v12  ;;  %v1924_v11 = vshll.u32 %v4640_v4, 16  ;;  %v4972_v12 = vld [vmem:[%s5144_s30 + $0x3c] sm:$0xff] }
  0x8a   : > { %v1238_v35 = vunpack.c.l.b16 %v1149_v24  ;;  %v4642_v24 = vld [vmem:[%s5144_s30 + $0x58] sm:$0xf]  ;;  %v4644_v4 = vld [vmem:[%s5144_s30 + $0x60] sm:$0xf] }
  0x8b   : > { %v1926_v17 = vrot.slane %v1924_v11, 5  ;;  %v1942_v42 = vshrl.u32 %v4642_v24, 16 }
  0x8c   : > { %4496 = vmatmul.msk.bf16.gmra.mxu2 %vm702_vm4, %v1263_v28  ;;  %v2176_v28 = vunpack.c.l.b16 %v1869_v8  ;;  %v2206_v8 = vpack.c.b16 %v2179_v57, %v2178_v55 }
  0x8d   : > { %v1927_v30 = vsel %vm5156_vm3, %v1922_v16, %v1926_v17  ;;  %v1944_v52 = vrot.slane %v1942_v42, 4 }
  0x8e   : > { %v2205_v31 = vpack.c.b16 %v2177_v19, %v2176_v28  ;;  %v2181_v46 = vunpack.c.l.b16 %v1927_v30 }
  0x91   : > { %4609 = vmatmul.msk.bf16.gmra.mxu3 %vm702_vm4, %v4985_v32  ;;  %v1237_v32 = vunpack.c.l.b16 %v1146_v23  ;;  %v4641_v23 = vld [vmem:[%s5144_s30 + $0x54] sm:$0xf] }
  0x93   : > { %v1265_v44 = vpack.c.b16 %v1238_v35, %v1237_v32  ;;  %v1932_v32 = vshll.u32 %v4641_v23, 16  ;;  %v1938_v35 = vshll.u32 %v4642_v24, 16 }
  0x96   : > { %4674 = vmatmul.msk.bf16.gmra.mxu0 %vm702_vm4, %v2204_v50  ;;  %v1152_v50 = vrot.slane %v5184_v20, 5  ;;  %v1907_v20 = vrot.slane %v1905_v51, 4  ;;  %v1940_v51 = vrot.slane %v1938_v35, 5  ;;  %v1169_v35 = vrot.slane %v5279_v27, 5 }
  0x97   : > { %4464 = vmatmul.msk.bf16.gmra.mxu1 %vm702_vm4, %v4970_v48  ;;  %v1069_v48 = vld [vmem:[%s5144_s30 + $0x3c] sm:$0xe] }
  0x98   : > { %v4482_v43 = vrot.slane %v1069_v48, 9  ;;  %v1154_v59 = vrot.slane %v1152_v50, 4  ;;  %v1934_v48 = vrot.slane %v1932_v32, 5 }
  0x9a   : > { %v1153_v5 = vsel %vm5330_vm7, %v4482_v43, %v1152_v50  ;;  %v4973_v43 = vld [vmem:[%s5144_s30 + $0x48] sm:$0xff] }
  0x9c   : > { %v5425_v7 = vpop.f32.mrf.mxu1  ;;  %4497 = vmatmul.msk.bf16.gmra.mxu2 %vm702_vm4, %v1264_v60  ;;  %v1155_v60 = vrot.slane %v5189_v25, 5  ;;  %v1911_v25 = vor.u32 %v1910_v61, %v1907_v20  ;;  %v1948_v20 = vshll.u32 %v4643_v54, 16  ;;  %v4974_v54 = vld [vmem:[%s5144_s30 + $0x54] sm:$0xff] }
  0x9e   : > { %v1156_v6 = vsel %vm5330_vm7, %v1154_v59, %v1155_v60  ;;  %v1912_v15 = vrot.slane %v1911_v25, 4  ;;  %v1945_v60 = vor.u32 %v1944_v52, %v1940_v51  ;;  %v1950_v10 = vrot.slane %v1948_v20, 5 }
  0x9f   : > { %v1240_v14 = vunpack.c.l.b16 %v1156_v6 }
  0xa0   : > { %v1917_v29 = vsel %vm5156_vm3, %v1912_v15, %v1916_v62  ;;  %v1946_v25 = vrot.slane %v1945_v60, 4  ;;  %v1166_v15 = vrot.slane %v5274_v21, 5 }
  0xa1   : > { %4610 = vmatmul.msk.bf16.gmra.mxu3 %vm702_vm4, %v4986_v13  ;;  %v1239_v13 = vunpack.c.l.b16 %v1153_v5  ;;  %v2180_v45 = vunpack.c.l.b16 %v1917_v29  ;;  %v4645_v5 = vld [vmem:[%s5144_s30 + $0x64] sm:$0xf] }
  0xa2   : > { %v1966_v16 = vshrl.u32 %v4645_v5, 16  ;;  %v1951_v24 = vsel %vm5156_vm3, %v1946_v25, %v1950_v10  ;;  %v1168_v32 = vrot.slane %v1166_v15, 4  ;;  %v5029_v10 = vld [vmem:[%s5144_s30 + $0x64] sm:$0xf] }
  0xa3   : > { %v1266_v19 = vpack.c.b16 %v1240_v14, %v1239_v13  ;;  %v2207_v57 = vpack.c.b16 %v2181_v46, %v2180_v45  ;;  %v1956_v13 = vshll.u32 %v4644_v4, 16  ;;  %v1962_v14 = vshll.u32 %v4645_v5, 16 }
  0xa4   : > { %v5441_v34 = vpop.f32.mrf.mxu1  ;;  %v1968_v42 = vrot.slane %v1966_v16, 4 }
  0xa5   : > { %v1958_v30 = vrot.slane %v1956_v13, 5  ;;  %v1072_v13 = vld [vmem:[%s5144_s30 + $0x60] sm:$0xe] }
  0xa6   : > { %v5443_v37 = vpop.f32.mrf.mxu2  ;;  %4675 = vmatmul.msk.bf16.gmra.mxu0 %vm702_vm4, %v2205_v31  ;;  %v1070_v31 = vld [vmem:[%s5144_s30 + $0x48] sm:$0xe] }
  0xa7   : > { %4465 = vmatmul.msk.bf16.gmra.mxu1 %vm702_vm4, %v4971_v33  ;;  %v1929_v33 = vshrl.u32 %v4641_v23, 16  ;;  %v4483_v47 = vrot.slane %v1070_v31, 9  ;;  %v1964_v31 = vrot.slane %v1962_v14, 5 }
  0xa9   : > { %v5449_v41 = vpop.f32.mrf.mxu0  ;;  %v1931_v50 = vrot.slane %v1929_v33, 4  ;;  %v4989_v33 = vld [vmem:[%s5144_s30 + $0x54] sm:$0xff]  ;;  %v1969_v27 = vor.u32 %v1968_v42, %v1964_v31 }
  0xaa   : > { %v5455_v49 = vpop.f32.mrf.mxu3 }
  0xab   : > { %v1935_v59 = vor.u32 %v1934_v48, %v1931_v50  ;;  %v1170_v48 = vsel %vm5330_vm7, %v1168_v32, %v1169_v35  ;;  %v1970_v60 = vrot.slane %v1969_v27, 4 }
  0xac   : > { %4498 = vmatmul.msk.bf16.gmra.mxu2 %vm702_vm4, %v1265_v44  ;;  %v1162_v44 = vrot.slane %v5233_v56, 5 }
  0xae   : > { %v5461_v58 = vpop.f32.mrf.mxu1  ;;  %v5464_v63 = vpop.f32.mrf.mxu2  ;;  %v1163_v56 = vsel %vm5330_vm7, %v1161_v40, %v1162_v44  ;;  %v4646_v40 = vld [vmem:[%s5144_s30 + $0x68] sm:$0x1] }
  0xaf   : > { %v1242_v62 = vunpack.c.l.b16 %v1163_v56 }
  0xb1   : > { %4611 = vmatmul.msk.bf16.gmra.mxu3 %vm702_vm4, %v4987_v2  ;;  %v5472_v9 = vpop.f32.mrf.mxu0  ;;  %v1160_v2 = vsel %vm5330_vm7, %v4483_v47, %v1159_v26  ;;  %v2183_v47 = vunpack.c.l.b16 %v1951_v24 }
  0xb2   : > { %v5474_v0 = vpop.f32.mrf.mxu3  ;;  %v1241_v61 = vunpack.c.l.b16 %v1160_v2 }
  0xb4   : > { %v1267_v11 = vpack.c.b16 %v1242_v62, %v1241_v61  ;;  %v4647_v61 = vld [vmem:[%s5144_s30 + $0x6c] sm:$0xf]  ;;  %v4648_v62 = vld [vmem:[%s5144_s30 + $0x70] sm:$0xf] }
  0xb5   : > { %v1977_v14 = vshrl.u32 %v4647_v61, 16  ;;  %v1986_v16 = vshll.u32 %v4648_v62, 16 }
  0xb6   : > { %4676 = vmatmul.msk.bf16.gmra.mxu0 %vm702_vm4, %v2206_v8  ;;  %v5478_v28 = vpop.f32.mrf.mxu1  ;;  %v1936_v8 = vrot.slane %v1935_v59, 4 }
  0xb7   : > { %4466 = vmatmul.msk.bf16.gmra.mxu1 %vm702_vm4, %v4972_v12  ;;  %v1953_v12 = vshrl.u32 %v4644_v4, 16  ;;  %v1979_v35 = vrot.slane %v1977_v14, 4  ;;  %v4651_v14 = vld [vmem:[%s5144_s30 + $0x7c] sm:$0xf] }
  0xb8   : > { %v1941_v23 = vsel %vm5156_vm3, %v1936_v8, %v1940_v51  ;;  %v1972_v51 = vshll.u32 %v4646_v40, 16 }
  0xb9   : > { %v5481_v22 = vpop.f32.mrf.mxu2  ;;  %v1955_v29 = vrot.slane %v1953_v12, 4 }
  0xba   : > { %v1974_v20 = vrot.slane %v1972_v51, 5 }
  0xbb   : > { %v1959_v46 = vor.u32 %v1958_v30, %v1955_v29  ;;  %v4990_v30 = vld [vmem:[%s5144_s30 + $0x60] sm:$0xff] }
  0xbc   : > { %4499 = vmatmul.msk.bf16.gmra.mxu2 %vm702_vm4, %v1266_v19  ;;  %v1071_v19 = vld [vmem:[%s5144_s30 + $0x54] sm:$0xe]  ;;  %v1975_v25 = vsel %vm5156_vm3, %v1970_v60, %v1974_v20 }
  0xbd   : > { %v5491_v38 = vpop.f32.mrf.mxu0  ;;  %v4484_v21 = vrot.slane %v1071_v19, 9  ;;  %v1960_v59 = vrot.slane %v1959_v46, 4  ;;  %v1990_v19 = vshrl.u32 %v4648_v62, 16  ;;  %v4649_v46 = vld [vmem:[%s5144_s30 + $0x74] sm:$0x1] }
  0xbe   : > { %v5495_v39 = vpop.f32.mrf.mxu3 }
  0xbf   : > { %v1167_v50 = vsel %vm5330_vm7, %v4484_v21, %v1166_v15  ;;  %v1965_v8 = vsel %vm5156_vm3, %v1960_v59, %v1964_v31  ;;  %v1980_v15 = vshll.u32 %v4647_v61, 16  ;;  %v4485_v21 = vrot.slane %v1072_v13, 9  ;;  %v4650_v13 = vld [vmem:[%s5144_s30 + $0x78] sm:$0xf] }
  0xc0   : > { %v5498_v53 = vpop.f32.mrf.mxu1  ;;  %v1243_v56 = vunpack.c.l.b16 %v1167_v50  ;;  %v2184_v31 = vunpack.c.l.b16 %v1965_v8 }
  0xc1   : > { %4612 = vmatmul.msk.bf16.gmra.mxu3 %vm702_vm4, %v4988_v1  ;;  %v5502_v55 = vpop.f32.mrf.mxu2  ;;  %v2182_v1 = vunpack.c.l.b16 %v1941_v23  ;;  %v5030_v23 = vld [vmem:[%s5144_s30 + $0x68] sm:$0x1]  ;;  %v1982_v42 = vrot.slane %v1980_v15, 5  ;;  %v5031_v15 = vld [vmem:[%s5144_s30 + $0x70] sm:$0xf] }
  0xc2   : > { %v1176_v24 = vrot.slane %v5030_v23, 5  ;;  %v1073_v23 = vld [vmem:[%s5144_s30 + $0x6c] sm:$0xe] }
  0xc3   : > { %v2208_v52 = vpack.c.b16 %v2183_v47, %v2182_v1  ;;  %v1988_v1 = vrot.slane %v1986_v16, 5  ;;  %v1992_v47 = vrot.slane %v1990_v19, 4  ;;  %v1983_v51 = vor.u32 %v1982_v42, %v1979_v35  ;;  %v5032_v42 = vld [vmem:[%s5144_s30 + $0x74] sm:$0x1] }
  0xc4   : > { %v1180_v16 = vrot.slane %v5031_v15, 5 }
  0xc5   : > { %v5509_v3 = vpop.f32.mrf.mxu0 }
  0xc6   : > { %4677 = vmatmul.msk.bf16.gmra.mxu0 %vm702_vm4, %v2207_v57  ;;  %v5514_v6 = vpop.f32.mrf.mxu3  ;;  %v1244_v57 = vunpack.c.l.b16 %v1170_v48 }
  0xc7   : > { %4467 = vmatmul.msk.bf16.gmra.mxu1 %vm702_vm4, %v4973_v43 }
  0xc8   : > { %v5518_v17 = vpop.f32.mrf.mxu1  ;;  %v1268_v4 = vpack.c.b16 %v1244_v57, %v1243_v56  ;;  %v4975_v57 = vld [vmem:[%s5144_s30 + $0x60] sm:$0xff] }
  0xcc   : > { %v5525_v26 = vpop.f32.mrf.mxu2  ;;  %4500 = vmatmul.msk.bf16.gmra.mxu2 %vm702_vm4, %v1267_v11  ;;  %v1173_v11 = vrot.slane %v5029_v10, 5 }
  0xce   : > { %v1175_v32 = vrot.slane %v1173_v11, 4  ;;  %v1174_v50 = vsel %vm5330_vm7, %v4485_v21, %v1173_v11  ;;  %v2014_v21 = vshrl.u32 %v4651_v14, 16 }
  0xcf   : > { %v5531_v44 = vpop.f32.mrf.mxu0  ;;  %v1245_v20 = vunpack.c.l.b16 %v1174_v50  ;;  %v4486_v50 = vrot.slane %v1073_v23, 9 }
  0xd0   : > { %v5533_v45 = vpop.f32.mrf.mxu3  ;;  %v1177_v48 = vsel %vm5330_vm7, %v1175_v32, %v1176_v24 }
  0xd1   : > { %4613 = vmatmul.msk.bf16.gmra.mxu3 %vm702_vm4, %v4989_v33  ;;  %v2185_v33 = vunpack.c.l.b16 %v1975_v25  ;;  %v1246_v61 = vunpack.c.l.b16 %v1177_v48  ;;  %v1182_v48 = vrot.slane %v1180_v16, 4 }
  0xd3   : > { %v2209_v27 = vpack.c.b16 %v2185_v33, %v2184_v31  ;;  %v1269_v11 = vpack.c.b16 %v1246_v61, %v1245_v20  ;;  %v2004_v31 = vshll.u32 %v4650_v13, 16  ;;  %v2010_v33 = vshll.u32 %v4651_v14, 16 }
  0xd4   : > { %v5541_v2 = vpop.f32.mrf.mxu1  ;;  %v5543_v43 = vpop.f32.mrf.mxu2  ;;  %v2016_v20 = vrot.slane %v2014_v21, 4 }
  0xd6   : > { %4678 = vmatmul.msk.bf16.gmra.mxu0 %vm702_vm4, %v2208_v52  ;;  %v1993_v52 = vor.u32 %v1992_v47, %v1988_v1  ;;  %v1183_v47 = vrot.slane %v5032_v42, 5 }
  0xd7   : > { %4468 = vmatmul.msk.bf16.gmra.mxu1 %vm702_vm4, %v4974_v54  ;;  %v5549_v5 = vpop.f32.mrf.mxu0  ;;  %v1996_v54 = vshll.u32 %v4649_v46, 16  ;;  %v4991_v46 = vld [vmem:[%s5144_s30 + $0x6c] sm:$0xff] }
  0xd8   : > { %v5556_v12 = vpop.f32.mrf.mxu3  ;;  %v1994_v8 = vrot.slane %v1993_v52, 4 }
  0xd9   : > { %v1998_v25 = vrot.slane %v1996_v54, 5 }
  0xdc   : > { %4501 = vmatmul.msk.bf16.gmra.mxu2 %vm702_vm4, %v1268_v4  ;;  %v5561_v29 = vpop.f32.mrf.mxu1  ;;  %v1984_v4 = vrot.slane %v1983_v51, 4 }
  0xde   : > { %v1989_v19 = vsel %vm5156_vm3, %v1984_v4, %v1988_v1  ;;  %v4652_v4 = vld [vmem:[%s5144_s30 + $0x80] sm:$0x1] }
  0xdf   : > { %v5564_v40 = vpop.f32.mrf.mxu2 }
  0xe1   : > { %4614 = vmatmul.msk.bf16.gmra.mxu3 %vm702_vm4, %v4990_v30  ;;  %v2001_v30 = vshrl.u32 %v4650_v13, 16  ;;  %v4976_v13 = vld [vmem:[%s5144_s30 + $0x6c] sm:$0xff] }
  0xe3   : > { %v5572_v56 = vpop.f32.mrf.mxu0  ;;  %v2003_v54 = vrot.slane %v2001_v30, 4 }
  0xe4   : > { %v5575_v59 = vpop.f32.mrf.mxu3  ;;  %v984_v60 = vpop.f32.mrf.mxu1 }
  0xe5   : > { %v985_v62 = vadd.f32 %v984_v60, %v5449_v41  ;;  %v1999_v41 = vsel %vm5156_vm3, %v1994_v8, %v1998_v25  ;;  %v2012_v60 = vrot.slane %v2010_v33, 5  ;;  %v1181_v8 = vsel %vm5330_vm7, %v4486_v50, %v1180_v16 }
  0xe6   : > { %4679 = vmatmul.msk.bf16.gmra.mxu0 %vm702_vm4, %v2209_v27  ;;  %v2186_v27 = vunpack.c.l.b16 %v1989_v19  ;;  %v2187_v51 = vunpack.c.l.b16 %v1999_v41  ;;  %v2020_v19 = vshll.u32 %v4652_v4, 16 }
  0xe7   : > { %v5579_v10 = vpop.f32.mrf.mxu2  ;;  %4469 = vmatmul.msk.bf16.gmra.mxu1 %vm702_vm4, %v4975_v57  ;;  %v2006_v57 = vrot.slane %v2004_v31, 5  ;;  %v2017_v15 = vor.u32 %v2016_v20, %v2012_v60 }
  0xe8   : > { %v2210_v25 = vpack.c.b16 %v2187_v51, %v2186_v27  ;;  %v2022_v42 = vrot.slane %v2020_v19, 5  ;;  %v4654_v27 = vld [vmem:[%s5144_s30 + $0x88] sm:$0xf]  ;;  %v5033_v51 = vld [vmem:[%s5144_s30 + $0x7c] sm:$0xf] }
  0xe9   : > { %v2007_v14 = vor.u32 %v2006_v57, %v2003_v54  ;;  %v1074_v54 = vld [vmem:[%s5144_s30 + $0x78] sm:$0xe] }
  0xeb   : > { %v5590_v24 = vpop.f32.mrf.mxu0  ;;  %v2008_v21 = vrot.slane %v2007_v14, 4 }
  0xec   : > { %v5592_v32 = vpop.f32.mrf.mxu3  ;;  %4502 = vmatmul.msk.bf16.gmra.mxu2 %vm702_vm4, %v1269_v11  ;;  %v986_v35 = vpop.f32.mrf.mxu1 }
  0xed   : > { %v987_v1 = vadd.f32 %v986_v35, %v5472_v9  ;;  %v1184_v9 = vsel %vm5330_vm7, %v1182_v48, %v1183_v47  ;;  %v2018_v35 = vrot.slane %v2017_v15, 4  ;;  %v4653_v47 = vld [vmem:[%s5144_s30 + $0x84] sm:$0xf]  ;;  %v4992_v15 = vld [vmem:[%s5144_s30 + $0x78] sm:$0xff] }
  0xee   : > { %v1248_v30 = vunpack.c.l.b16 %v1184_v9  ;;  %v2028_v57 = vshll.u32 %v4653_v47, 16  ;;  %v2038_v9 = vshrl.u32 %v4654_v27, 16 }
  0xef   : > { %v1337_v52 = vpop.f32.mrf.mxu2  ;;  %v2023_v4 = vsel %vm5156_vm3, %v2018_v35, %v2022_v42 }
  0xf0   : > { %v1417_v61 = vadd.f32 %v1337_v52, %v985_v62  ;;  %v1247_v62 = vunpack.c.l.b16 %v1181_v8  ;;  %v1187_v52 = vrot.slane %v5033_v51, 5  ;;  %v2034_v8 = vshll.u32 %v4654_v27, 16 }
  0xf1   : > { %4615 = vmatmul.msk.bf16.gmra.mxu3 %vm702_vm4, %v4991_v46  ;;  %v2040_v35 = vrot.slane %v2038_v9, 4 }
  0xf2   : > { %v1270_v48 = vpack.c.b16 %v1248_v30, %v1247_v62 }
  0xf3   : > { %v2278_v11 = vpop.f32.mrf.mxu0 }
  0xf4   : > { %v1624_v41 = vpop.f32.mrf.mxu3  ;;  %v989_v23 = vpop.f32.mrf.mxu1 }
  0xf5   : > { %v1704_v31 = vadd.f32 %v1624_v41, %v1417_v61  ;;  %v990_v16 = vadd.f32 %v989_v23, %v5491_v38  ;;  %v2025_v38 = vshrl.u32 %v4653_v47, 16  ;;  %v2013_v61 = vsel %vm5156_vm3, %v2008_v21, %v2012_v60 }
  0xf6   : > { %4680 = vmatmul.msk.bf16.gmra.mxu0 %vm702_vm4, %v2210_v25  ;;  %v5034_v25 = vld [vmem:[%s5144_s30 + $0x80] sm:$0x1]  ;;  %v4487_v41 = vrot.slane %v1074_v54, 9  ;;  %v1189_v23 = vrot.slane %v1187_v52, 4  ;;  %v2188_v62 = vunpack.c.l.b16 %v2013_v61  ;;  %v2189_v60 = vunpack.c.l.b16 %v2023_v4 }
  0xf7   : > { %v1339_v33 = vpop.f32.mrf.mxu2  ;;  %4470 = vmatmul.msk.bf16.gmra.mxu1 %vm702_vm4, %v4976_v13  ;;  %v5609_v46 = vadd.f32 %v2278_v11, %v1704_v31  ;;  %v1190_v11 = vrot.slane %v5034_v25, 5  ;;  %v2027_v30 = vrot.slane %v2025_v38, 4  ;;  %v2030_v31 = vrot.slane %v2028_v57, 5  ;;  %v4977_v38 = vld [vmem:[%s5144_s30 + $0x78] sm:$0xff] }
  0xf8   : > { %v1418_v50 = vadd.f32 %v1339_v33, %v987_v1  ;;  %v2036_v21 = vrot.slane %v2034_v8, 5  ;;  %v2211_v27 = vpack.c.b16 %v2189_v60, %v2188_v62  ;;  %v4657_v62 = vld [vmem:[%s5144_s30 + $0x94] sm:$0xf]  ;;  %v5035_v60 = vld [vmem:[%s5144_s30 + $0x88] sm:$0xf] }
  0xf9   : > { %v2031_v51 = vor.u32 %v2030_v31, %v2027_v30  ;;  %v1194_v30 = vrot.slane %v5035_v60, 5  ;;  %v1075_v31 = vld [vmem:[%s5144_s30 + $0x84] sm:$0xe] }
  0xfa   : > { %v2041_v57 = vor.u32 %v2040_v35, %v2036_v21 }
  0xfb   : > { %v2280_v20 = vpop.f32.mrf.mxu0  ;;  %v2032_v25 = vrot.slane %v2031_v51, 4 }
  0xfc   : > { %v1626_v1 = vpop.f32.mrf.mxu3  ;;  %4503 = vmatmul.msk.bf16.gmra.mxu2 %vm702_vm4, %v1270_v48  ;;  %v991_v13 = vpop.f32.mrf.mxu1  ;;  %v4655_v48 = vld [vmem:[%s5144_s30 + $0x8c] sm:$0x1] }
  0xfd   : > { %v1705_v14 = vadd.f32 %v1626_v1, %v1418_v50  ;;  %v992_v19 = vadd.f32 %v991_v13, %v5509_v3  ;;  %v1188_v50 = vsel %vm5330_vm7, %v4487_v41, %v1187_v52  ;;  %v1191_v3 = vsel %vm5330_vm7, %v1189_v23, %v1190_v11 }
  0xfe   : > { %v2044_v61 = vshll.u32 %v4655_v48, 16  ;;  %v1250_v8 = vunpack.c.l.b16 %v1191_v3  ;;  %v2042_v1 = vrot.slane %v2041_v57, 4  ;;  %v2062_v3 = vshrl.u32 %v4657_v62, 16  ;;  %v4993_v57 = vld [vmem:[%s5144_s30 + $0x84] sm:$0xff] }
  0xff   : > { %v1342_v33 = vpop.f32.mrf.mxu2  ;;  %v5622_v42 = vadd.f32 %v2280_v20, %v1705_v14  ;;  %v4656_v14 = vld [vmem:[%s5144_s30 + $0x90] sm:$0xf] }
 0x100   : > { %v1419_v47 = vadd.f32 %v1342_v33, %v990_v16  ;;  %v1249_v16 = vunpack.c.l.b16 %v1188_v50  ;;  %v2046_v13 = vrot.slane %v2044_v61, 5  ;;  %v2049_v33 = vshrl.u32 %v4656_v14, 16 }
 0x101   : > { %4616 = vmatmul.msk.bf16.gmra.mxu3 %vm702_vm4, %v4992_v15  ;;  %v2052_v48 = vshll.u32 %v4656_v14, 16  ;;  %v2058_v50 = vshll.u32 %v4657_v62, 16  ;;  %v4488_v61 = vrot.slane %v1075_v31, 9 }
 0x102   : > { %v1271_v23 = vpack.c.b16 %v1250_v8, %v1249_v16  ;;  %v2051_v8 = vrot.slane %v2049_v33, 4 }
 0x103   : > { %v2283_v54 = vpop.f32.mrf.mxu0 }
 0x104   : > { %v1629_v4 = vpop.f32.mrf.mxu3  ;;  %v994_v20 = vpop.f32.mrf.mxu1 }
 0x105   : > { %v1706_v9 = vadd.f32 %v1629_v4, %v1419_v47  ;;  %v995_v52 = vadd.f32 %v994_v20, %v5531_v44  ;;  %v2037_v44 = vsel %vm5156_vm3, %v2032_v25, %v2036_v21  ;;  %v2047_v47 = vsel %vm5156_vm3, %v2042_v1, %v2046_v13 }
 0x106   : > { %4681 = vmatmul.msk.bf16.gmra.mxu0 %vm702_vm4, %v2211_v27  ;;  %v5036_v27 = vld [vmem:[%s5144_s30 + $0x8c] sm:$0x1]  ;;  %v1196_v4 = vrot.slane %v1194_v30, 4  ;;  %v2190_v20 = vunpack.c.l.b16 %v2037_v44  ;;  %v2191_v16 = vunpack.c.l.b16 %v2047_v47  ;;  %v2054_v25 = vrot.slane %v2052_v48, 5  ;;  %v4978_v44 = vld [vmem:[%s5144_s30 + $0x84] sm:$0xff] }
 0x107   : > { %v1344_v11 = vpop.f32.mrf.mxu2  ;;  %4471 = vmatmul.msk.bf16.gmra.mxu1 %vm702_vm4, %v4977_v38  ;;  %v5635_v15 = vadd.f32 %v2283_v54, %v1706_v9  ;;  %v1197_v51 = vrot.slane %v5036_v27, 5  ;;  %v2064_v1 = vrot.slane %v2062_v3, 4 }
 0x108   : > { %v1420_v41 = vadd.f32 %v1344_v11, %v992_v19  ;;  %v2060_v11 = vrot.slane %v2058_v50, 5  ;;  %v2212_v62 = vpack.c.b16 %v2191_v16, %v2190_v20  ;;  %v2055_v31 = vor.u32 %v2054_v25, %v2051_v8  ;;  %v4660_v20 = vld [vmem:[%s5144_s30 + $0xa0] sm:$0xf]  ;;  %v5037_v16 = vld [vmem:[%s5144_s30 + $0x94] sm:$0xf] }
 0x109   : > { %v1201_v8 = vrot.slane %v5037_v16, 5 }
 0x10a   : > { %v2065_v33 = vor.u32 %v2064_v1, %v2060_v11 }
 0x10b   : > { %v2285_v35 = vpop.f32.mrf.mxu0 }
 0x10c   : > { %v1631_v19 = vpop.f32.mrf.mxu3  ;;  %4504 = vmatmul.msk.bf16.gmra.mxu2 %vm702_vm4, %v1271_v23  ;;  %v996_v54 = vpop.f32.mrf.mxu1  ;;  %v4658_v23 = vld [vmem:[%s5144_s30 + $0x98] sm:$0x1] }
 0x10d   : > { %v1707_v38 = vadd.f32 %v1631_v19, %v1420_v41  ;;  %v997_v21 = vadd.f32 %v996_v54, %v5549_v5  ;;  %v1195_v41 = vsel %vm5330_vm7, %v4488_v61, %v1194_v30  ;;  %v1198_v5 = vsel %vm5330_vm7, %v1196_v4, %v1197_v51 }
 0x10e   : > { %v2068_v47 = vshll.u32 %v4658_v23, 16  ;;  %v1252_v50 = vunpack.c.l.b16 %v1198_v5  ;;  %v2056_v51 = vrot.slane %v2055_v31, 4  ;;  %v2066_v19 = vrot.slane %v2065_v33, 4  ;;  %v4994_v33 = vld [vmem:[%s5144_s30 + $0x90] sm:$0xff] }
 0x10f   : > { %v1347_v9 = vpop.f32.mrf.mxu2  ;;  %v5648_v13 = vadd.f32 %v2285_v35, %v1707_v38  ;;  %v4659_v38 = vld [vmem:[%s5144_s30 + $0x9c] sm:$0xf]  ;;  %v2086_v5 = vshrl.u32 %v4660_v20, 16 }
 0x110   : > { %v1421_v14 = vadd.f32 %v1347_v9, %v995_v52  ;;  %v1251_v52 = vunpack.c.l.b16 %v1195_v41  ;;  %v2070_v54 = vrot.slane %v2068_v47, 5  ;;  %v1076_v9 = vld [vmem:[%s5144_s30 + $0x90] sm:$0xe]  ;;  %v2076_v25 = vshll.u32 %v4659_v38, 16 }
 0x111   : > { %4617 = vmatmul.msk.bf16.gmra.mxu3 %vm702_vm4, %v4993_v57  ;;  %v2082_v41 = vshll.u32 %v4660_v20, 16 }
 0x112   : > { %v1272_v4 = vpack.c.b16 %v1252_v50, %v1251_v52  ;;  %v2071_v23 = vsel %vm5156_vm3, %v2066_v19, %v2070_v54  ;;  %v2088_v19 = vrot.slane %v2086_v5, 4 }
 0x113   : > { %v2288_v60 = vpop.f32.mrf.mxu0 }
 0x114   : > { %v1634_v48 = vpop.f32.mrf.mxu3  ;;  %v999_v35 = vpop.f32.mrf.mxu1 }
 0x115   : > { %v1708_v3 = vadd.f32 %v1634_v48, %v1421_v14  ;;  %v1000_v30 = vadd.f32 %v999_v35, %v5572_v56  ;;  %v2073_v56 = vshrl.u32 %v4659_v38, 16  ;;  %v2061_v14 = vsel %vm5156_vm3, %v2056_v51, %v2060_v11 }
 0x116   : > { %4682 = vmatmul.msk.bf16.gmra.mxu0 %vm702_vm4, %v2212_v62  ;;  %v5038_v62 = vld [vmem:[%s5144_s30 + $0x98] sm:$0x1]  ;;  %v4489_v48 = vrot.slane %v1076_v9, 9  ;;  %v1203_v35 = vrot.slane %v1201_v8, 4  ;;  %v2192_v52 = vunpack.c.l.b16 %v2061_v14  ;;  %v2193_v11 = vunpack.c.l.b16 %v2071_v23 }
 0x117   : > { %v1349_v27 = vpop.f32.mrf.mxu2  ;;  %4472 = vmatmul.msk.bf16.gmra.mxu1 %vm702_vm4, %v4978_v44  ;;  %v5661_v57 = vadd.f32 %v2288_v60, %v1708_v3  ;;  %v1204_v60 = vrot.slane %v5038_v62, 5  ;;  %v2075_v50 = vrot.slane %v2073_v56, 4  ;;  %v2078_v3 = vrot.slane %v2076_v25, 5  ;;  %v4979_v56 = vld [vmem:[%s5144_s30 + $0x90] sm:$0xff] }
 0x118   : > { %v1422_v61 = vadd.f32 %v1349_v27, %v997_v21  ;;  %v2084_v51 = vrot.slane %v2082_v41, 5  ;;  %v2213_v20 = vpack.c.b16 %v2193_v11, %v2192_v52  ;;  %v4663_v11 = vld [vmem:[%s5144_s30 + $0xac] sm:$0xf] }
 0x119   : > { %v2079_v16 = vor.u32 %v2078_v3, %v2075_v50  ;;  %v1077_v50 = vld [vmem:[%s5144_s30 + $0x9c] sm:$0xe] }
 0x11a   : > { %v2089_v25 = vor.u32 %v2088_v19, %v2084_v51 }
 0x11b   : > { %v2290_v1 = vpop.f32.mrf.mxu0 }
 0x11c   : > { %v1636_v21 = vpop.f32.mrf.mxu3  ;;  %4505 = vmatmul.msk.bf16.gmra.mxu2 %vm702_vm4, %v1272_v4  ;;  %v1001_v44 = vpop.f32.mrf.mxu1  ;;  %v4661_v4 = vld [vmem:[%s5144_s30 + $0xa4] sm:$0x1] }
 0x11d   : > { %v1709_v31 = vadd.f32 %v1636_v21, %v1422_v61  ;;  %v1002_v47 = vadd.f32 %v1001_v44, %v5590_v24  ;;  %v1202_v61 = vsel %vm5330_vm7, %v4489_v48, %v1201_v8  ;;  %v1205_v24 = vsel %vm5330_vm7, %v1203_v35, %v1204_v60  ;;  %v4662_v44 = vld [vmem:[%s5144_s30 + $0xa8] sm:$0xf]  ;;  %v5039_v35 = vld [vmem:[%s5144_s30 + $0xa0] sm:$0xf] }
 0x11e   : > { %v2092_v14 = vshll.u32 %v4661_v4, 16  ;;  %v1254_v41 = vunpack.c.l.b16 %v1205_v24  ;;  %v2080_v8 = vrot.slane %v2079_v16, 4  ;;  %v2090_v60 = vrot.slane %v2089_v25, 4 }
 0x11f   : > { %v1352_v27 = vpop.f32.mrf.mxu2  ;;  %v5674_v54 = vadd.f32 %v2290_v1, %v1709_v31  ;;  %v1208_v52 = vrot.slane %v5039_v35, 5  ;;  %v2100_v19 = vshll.u32 %v4662_v44, 16  ;;  %v2110_v24 = vshrl.u32 %v4663_v11, 16 }
 0x120   : > { %v1423_v38 = vadd.f32 %v1352_v27, %v1000_v30  ;;  %v1253_v30 = vunpack.c.l.b16 %v1202_v61  ;;  %v2094_v21 = vrot.slane %v2092_v14, 5  ;;  %v2085_v3 = vsel %vm5156_vm3, %v2080_v8, %v2084_v51 }
 0x121   : > { %4618 = vmatmul.msk.bf16.gmra.mxu3 %vm702_vm4, %v4994_v33  ;;  %v2097_v27 = vshrl.u32 %v4662_v44, 16  ;;  %v2106_v61 = vshll.u32 %v4663_v11, 16  ;;  %v1210_v25 = vrot.slane %v1208_v52, 4  ;;  %v2194_v51 = vunpack.c.l.b16 %v2085_v3  ;;  %v4664_v11 = vld [vmem:[%s5144_s30 + $0xb0] sm:$0x1]  ;;  %v4980_v3 = vld [vmem:[%s5144_s30 + $0x9c] sm:$0xff] }
 0x122   : > { %v1273_v48 = vpack.c.b16 %v1254_v41, %v1253_v30  ;;  %v2095_v4 = vsel %vm5156_vm3, %v2090_v60, %v2094_v21  ;;  %v2102_v8 = vrot.slane %v2100_v19, 5  ;;  %v2112_v21 = vrot.slane %v2110_v24, 4 }
 0x123   : > { %v2293_v9 = vpop.f32.mrf.mxu0  ;;  %v2195_v41 = vunpack.c.l.b16 %v2095_v4  ;;  %v2108_v60 = vrot.slane %v2106_v61, 5  ;;  %v2116_v4 = vshll.u32 %v4664_v11, 16 }
 0x124   : > { %v1639_v1 = vpop.f32.mrf.mxu3  ;;  %v1004_v23 = vpop.f32.mrf.mxu1 }
 0x125   : > { %v1710_v5 = vadd.f32 %v1639_v1, %v1423_v38  ;;  %v4995_v1 = vld [vmem:[%s5144_s30 + $0x9c] sm:$0xff]  ;;  %v1005_v30 = vadd.f32 %v1004_v23, %v5425_v7  ;;  %v2214_v7 = vpack.c.b16 %v2195_v41, %v2194_v51  ;;  %v2118_v51 = vrot.slane %v2116_v4, 5 }
 0x126   : > { %4683 = vmatmul.msk.bf16.gmra.mxu0 %vm702_vm4, %v2213_v20  ;;  %v5040_v20 = vld [vmem:[%s5144_s30 + $0xa4] sm:$0x1] }
 0x127   : > { %v1354_v62 = vpop.f32.mrf.mxu2  ;;  %4473 = vmatmul.msk.bf16.gmra.mxu1 %vm702_vm4, %v4979_v56  ;;  %v5686_v31 = vadd.f32 %v2293_v9, %v1710_v5  ;;  %v1211_v16 = vrot.slane %v5040_v20, 5  ;;  %v4490_v56 = vrot.slane %v1077_v50, 9  ;;  %v2099_v5 = vrot.slane %v2097_v27, 4 }
 0x128   : > { %v1424_v33 = vadd.f32 %v1354_v62, %v1002_v47 }
 0x129   : > { %v2103_v23 = vor.u32 %v2102_v8, %v2099_v5 }
 0x12b   : > { %v2295_v38 = vpop.f32.mrf.mxu0 }
 0x12c   : > { %v1641_v47 = vpop.f32.mrf.mxu3  ;;  %4506 = vmatmul.msk.bf16.gmra.mxu2 %vm702_vm4, %v1273_v48  ;;  %v1006_v9 = vpop.f32.mrf.mxu1  ;;  %v1209_v48 = vsel %vm5330_vm7, %v4490_v56, %v1208_v52  ;;  %v4665_v52 = vld [vmem:[%s5144_s30 + $0xb4] sm:$0xf]  ;;  %v2104_v56 = vrot.slane %v2103_v23, 4 }
 0x12d   : > { %v1711_v14 = vadd.f32 %v1641_v47, %v1424_v33  ;;  %v1212_v33 = vsel %vm5330_vm7, %v1210_v25, %v1211_v16  ;;  %v1255_v27 = vunpack.c.l.b16 %v1209_v48  ;;  %v4666_v47 = vld [vmem:[%s5144_s30 + $0xb8] sm:$0xf]  ;;  %v1007_v16 = vadd.f32 %v1006_v9, %v5441_v34 }
 0x12e   : > { %v1256_v19 = vunpack.c.l.b16 %v1212_v33  ;;  %v2121_v5 = vshrl.u32 %v4665_v52, 16  ;;  %v2124_v8 = vshll.u32 %v4665_v52, 16  ;;  %v2134_v48 = vshrl.u32 %v4666_v47, 16  ;;  %v1078_v33 = vld [vmem:[%s5144_s30 + $0xa8] sm:$0xe] }
 0x12f   : > { %v1357_v62 = vpop.f32.mrf.mxu2  ;;  %v5699_v44 = vadd.f32 %v2295_v38, %v1711_v14  ;;  %v2113_v38 = vor.u32 %v2112_v21, %v2108_v60  ;;  %v5041_v21 = vld [vmem:[%s5144_s30 + $0xac] sm:$0xf]  ;;  %v2109_v9 = vsel %vm5156_vm3, %v2104_v56, %v2108_v60 }
 0x130   : > { %v1425_v35 = vadd.f32 %v1357_v62, %v1005_v30  ;;  %v1274_v14 = vpack.c.b16 %v1256_v19, %v1255_v27  ;;  %v2130_v62 = vshll.u32 %v4666_v47, 16  ;;  %v2123_v27 = vrot.slane %v2121_v5, 4 }
 0x131   : > { %4619 = vmatmul.msk.bf16.gmra.mxu3 %vm702_vm4, %v4995_v1  ;;  %v2114_v1 = vrot.slane %v2113_v38, 4  ;;  %v2126_v19 = vrot.slane %v2124_v8, 5  ;;  %v2136_v47 = vrot.slane %v2134_v48, 4  ;;  %v4981_v48 = vld [vmem:[%s5144_s30 + $0xa8] sm:$0xff] }
 0x132   : > { %v2132_v38 = vrot.slane %v2130_v62, 5 }
 0x133   : > { %v2298_v50 = vpop.f32.mrf.mxu0  ;;  %v2119_v11 = vsel %vm5156_vm3, %v2114_v1, %v2118_v51 }
 0x134   : > { %v1644_v61 = vpop.f32.mrf.mxu3  ;;  %v1009_v24 = vpop.f32.mrf.mxu1  ;;  %v2197_v56 = vunpack.c.l.b16 %v2119_v11  ;;  %v2137_v8 = vor.u32 %v2136_v47, %v2132_v38 }
 0x135   : > { %v1712_v20 = vadd.f32 %v1644_v61, %v1425_v35  ;;  %v1215_v35 = vrot.slane %v5041_v21, 5  ;;  %v4996_v61 = vld [vmem:[%s5144_s30 + $0xa8] sm:$0xff]  ;;  %v1010_v60 = vadd.f32 %v1009_v24, %v5461_v58 }
 0x136   : > { %4684 = vmatmul.msk.bf16.gmra.mxu0 %vm702_vm4, %v2214_v7  ;;  %v5042_v7 = vld [vmem:[%s5144_s30 + $0xb0] sm:$0x1] }
 0x137   : > { %v1359_v25 = vpop.f32.mrf.mxu2  ;;  %4474 = vmatmul.msk.bf16.gmra.mxu1 %vm702_vm4, %v4980_v3  ;;  %v5713_v30 = vadd.f32 %v2298_v50, %v1712_v20  ;;  %v1218_v23 = vrot.slane %v5042_v7, 5  ;;  %v4491_v20 = vrot.slane %v1078_v33, 9  ;;  %v1217_v52 = vrot.slane %v1215_v35, 4 }
 0x138   : > { %v1426_v41 = vadd.f32 %v1359_v25, %v1007_v16  ;;  %v2196_v16 = vunpack.c.l.b16 %v2109_v9  ;;  %v4667_v25 = vld [vmem:[%s5144_s30 + $0xbc] sm:$0x1] }
 0x139   : > { %v1219_v5 = vsel %vm5330_vm7, %v1217_v52, %v1218_v23  ;;  %v2140_v58 = vshll.u32 %v4667_v25, 16  ;;  %v4669_v52 = vld [vmem:[%s5144_s30 + $0xc4] sm:$0xf] }
 0x13a   : > { %v2215_v24 = vpack.c.b16 %v2197_v56, %v2196_v16  ;;  %v1258_v11 = vunpack.c.l.b16 %v1219_v5  ;;  %v1079_v16 = vld [vmem:[%s5144_s30 + $0xb4] sm:$0xe]  ;;  %v5044_v56 = vld [vmem:[%s5144_s30 + $0xb8] sm:$0xf]  ;;  %v2158_v5 = vshrl.u32 %v4669_v52, 16 }
 0x13b   : > { %v2300_v34 = vpop.f32.mrf.mxu0  ;;  %v1222_v25 = vrot.slane %v5044_v56, 5 }
 0x13c   : > { %v1646_v50 = vpop.f32.mrf.mxu3  ;;  %4507 = vmatmul.msk.bf16.gmra.mxu2 %vm702_vm4, %v1274_v14  ;;  %v1011_v3 = vpop.f32.mrf.mxu1  ;;  %v2127_v14 = vor.u32 %v2126_v19, %v2123_v27  ;;  %v2142_v27 = vrot.slane %v2140_v58, 5  ;;  %v4668_v19 = vld [vmem:[%s5144_s30 + $0xc0] sm:$0xf]  ;;  %v5045_v58 = vld [vmem:[%s5144_s30 + $0x14] sm:$0x1] }
 0x13d   : > { %v1713_v4 = vadd.f32 %v1646_v50, %v1426_v41  ;;  %v1216_v41 = vsel %vm5330_vm7, %v4491_v20, %v1215_v35  ;;  %v2138_v35 = vrot.slane %v2137_v8, 4  ;;  %v1012_v23 = vadd.f32 %v1011_v3, %v5478_v28 }
 0x13e   : > { %v1257_v9 = vunpack.c.l.b16 %v1216_v41  ;;  %v2128_v50 = vrot.slane %v2127_v14, 4  ;;  %v2145_v3 = vshrl.u32 %v4668_v19, 16  ;;  %v2148_v14 = vshll.u32 %v4668_v19, 16  ;;  %v4997_v19 = vld [vmem:[%s5144_s30 + $0xb4] sm:$0xff] }
 0x13f   : > { %v1362_v1 = vpop.f32.mrf.mxu2  ;;  %v5726_v51 = vadd.f32 %v2300_v34, %v1713_v4  ;;  %v5043_v4 = vld [vmem:[%s5144_s30 + $0x10] sm:$0xf]  ;;  %v2143_v28 = vsel %vm5156_vm3, %v2138_v35, %v2142_v27  ;;  %v2154_v41 = vshll.u32 %v4669_v52, 16  ;;  %v1224_v35 = vrot.slane %v1222_v25, 4  ;;  %v4688_v27 = vld [vmem:[%s5144_s30 + $0xc] sm:$0xe] }
 0x140   : > { %v1427_v21 = vadd.f32 %v1362_v1, %v1010_v60  ;;  %v1275_v60 = vpack.c.b16 %v1258_v11, %v1257_v9  ;;  %v5046_v9 = vld [vmem:[%s5144_s30 + $0xbc] sm:$0x1]  ;;  %v4704_v52 = vrot.slane %v4688_v27, 9 }
 0x141   : > { %4620 = vmatmul.msk.bf16.gmra.mxu3 %vm702_vm4, %v4996_v61  ;;  %v2456_v61 = vrot.slane %v5043_v4, 5  ;;  %v2147_v4 = vrot.slane %v2145_v3, 4 }
 0x143   : > { %v2303_v62 = vpop.f32.mrf.mxu0  ;;  %v2458_v8 = vrot.slane %v2456_v61, 4 }
 0x144   : > { %v1649_v33 = vpop.f32.mrf.mxu3  ;;  %v1014_v34 = vpop.f32.mrf.mxu1 }
 0x145   : > { %v1714_v7 = vadd.f32 %v1649_v33, %v1427_v21  ;;  %v2133_v21 = vsel %vm5156_vm3, %v2128_v50, %v2132_v38  ;;  %v4492_v33 = vrot.slane %v1079_v16, 9  ;;  %v1015_v56 = vadd.f32 %v1014_v34, %v5498_v53 }
 0x146   : > { %4685 = vmatmul.msk.bf16.gmra.mxu0 %vm702_vm4, %v2215_v24  ;;  %v2459_v24 = vrot.slane %v5045_v58, 5  ;;  %v2198_v38 = vunpack.c.l.b16 %v2133_v21  ;;  %v2156_v16 = vrot.slane %v2154_v41, 5  ;;  %v2160_v58 = vrot.slane %v2158_v5, 4  ;;  %v4670_v21 = vld [vmem:[%s5144_s30 + $0xc8] sm:$0x1] }
 0x147   : > { %v1364_v20 = vpop.f32.mrf.mxu2  ;;  %4475 = vmatmul.msk.bf16.gmra.mxu1 %vm702_vm4, %v4981_v48  ;;  %v5742_v1 = vadd.f32 %v2303_v62, %v1714_v7  ;;  %v1225_v62 = vrot.slane %v5046_v9, 5  ;;  %v2199_v7 = vunpack.c.l.b16 %v2143_v28  ;;  %v2457_v28 = vsel %vm5330_vm7, %v4704_v52, %v2456_v61  ;;  %v4850_v41 = vld [vmem:[%s5144_s30 + $0x18] sm:$0xf] }
 0x148   : > { %v1428_v47 = vadd.f32 %v1364_v20, %v1012_v23  ;;  %v2150_v20 = vrot.slane %v2148_v14, 5  ;;  %v2568_v53 = vunpack.c.l.b16 %v2457_v28  ;;  %v2164_v27 = vshll.u32 %v4670_v21, 16 }
 0x149   : > { %v1226_v14 = vsel %vm5330_vm7, %v1224_v35, %v1225_v62  ;;  %v2216_v5 = vpack.c.b16 %v2199_v7, %v2198_v38  ;;  %v3124_v62 = vshrl.u32 %v4850_v41, 16  ;;  %v3127_v35 = vshll.u32 %v4850_v41, 16 }
 0x14b   : > { %v2305_v48 = vpop.f32.mrf.mxu0  ;;  %v3126_v21 = vrot.slane %v3124_v62, 4 }
 0x14c   : > { %v1651_v11 = vpop.f32.mrf.mxu3  ;;  %4508 = vmatmul.msk.bf16.gmra.mxu2 %vm702_vm4, %v1275_v60  ;;  %v1016_v50 = vpop.f32.mrf.mxu1  ;;  %v1223_v60 = vsel %vm5330_vm7, %v4492_v33, %v1222_v25  ;;  %v5766_v25 = vld [vmem:[%s5144_s30 + $0x1c] sm:$0xf]  ;;  %v2161_v33 = vor.u32 %v2160_v58, %v2156_v16 }
 0x14d   : > { %v1715_v23 = vadd.f32 %v1651_v11, %v1428_v47  ;;  %v2460_v47 = vsel %vm5330_vm7, %v2458_v8, %v2459_v24  ;;  %v2151_v11 = vor.u32 %v2150_v20, %v2147_v4  ;;  %v4982_v24 = vld [vmem:[%s5144_s30 + $0xb4] sm:$0xff]  ;;  %v3137_v38 = vshrl.u32 %v5766_v25, 16 }
 0x14e   : > { %v2569_v34 = vunpack.c.l.b16 %v2460_v47  ;;  %v1017_v4 = vadd.f32 %v1016_v50, %v5518_v17 }
 0x14f   : > { %v1367_v9 = vpop.f32.mrf.mxu2  ;;  %v5770_v52 = vadd.f32 %v2305_v48, %v1715_v23  ;;  %v2152_v48 = vrot.slane %v2151_v11, 4  ;;  %v2162_v23 = vrot.slane %v2161_v33, 4  ;;  %v3139_v41 = vrot.slane %v3137_v38, 4 }
 0x150   : > { %v1429_v3 = vadd.f32 %v1367_v9, %v1015_v56  ;;  %v5768_v61 = vpack.c.b16 %v2569_v34, %v2568_v53  ;;  %v1259_v56 = vunpack.c.l.b16 %v1223_v60  ;;  %v1260_v9 = vunpack.c.l.b16 %v1226_v14 }
 0x151   : > { %4621 = vmatmul.msk.bf16.gmra.mxu3 %vm702_vm4, %v4997_v19  ;;  %6478 = vst [vmem:[#allocation2_spill] sm:$0xff] %v5770_v52  ;;  %v3133_v19 = vshll.u32 %v5766_v25, 16  ;;  %v2166_v60 = vrot.slane %v2164_v27, 5  ;;  %v3129_v14 = vrot.slane %v3127_v35, 5  ;;  %v2157_v17 = vsel %vm5156_vm3, %v2152_v48, %v2156_v16  ;;  %v4915_v48 = vld [vmem:[%s5144_s30 + $0x18] sm:$0xe] }
 0x152   : > { %v1276_v58 = vpack.c.b16 %v1260_v9, %v1259_v56  ;;  %v4998_v9 = vld [vmem:[%s5144_s30 + $0xc0] sm:$0xff]  ;;  %v2200_v16 = vunpack.c.l.b16 %v2157_v17 }
 0x153   : > { %v2308_v8 = vpop.f32.mrf.mxu0  ;;  %v3135_v34 = vrot.slane %v3133_v19, 5  ;;  %v2167_v50 = vsel %vm5156_vm3, %v2162_v23, %v2166_v60  ;;  %v3130_v27 = vor.u32 %v3129_v14, %v3126_v21  ;;  %v4853_v23 = vld [vmem:[%s5144_s30 + $0x24] sm:$0xf]  ;;  %v5796_v60 = vld [vmem:[%s5144_s30 + $0x28] sm:$0xf] }
 0x154   : > { %v1654_v28 = vpop.f32.mrf.mxu3  ;;  %v1019_v47 = vpop.f32.mrf.mxu1  ;;  %v2201_v35 = vunpack.c.l.b16 %v2167_v50 }
 0x155   : > { %v1716_v7 = vadd.f32 %v1654_v28, %v1429_v3  ;;  %v5781_v3 = vld [vmem:[%s5144_s30 + $0x20] sm:$0x1]  ;;  %v1020_v62 = vadd.f32 %v1019_v47, %v5541_v2  ;;  %v3131_v38 = vrot.slane %v3130_v27, 4  ;;  %v5047_v47 = vld [vmem:[%s5144_s30 + $0x1c] sm:$0xf] }
 0x156   : > { %4686 = vmatmul.msk.bf16.gmra.mxu0 %vm702_vm4, %v2216_v5  ;;  %v2463_v14 = vrot.slane %v5047_v47, 5  ;;  %v4689_v27 = vld [vmem:[%s5144_s30 + $0x18] sm:$0xe] }
 0x157   : > { %v1369_v20 = vpop.f32.mrf.mxu2  ;;  %4476 = vmatmul.msk.bf16.gmra.mxu1 %vm702_vm4, %v4982_v24  ;;  %v5778_v52 = vadd.f32 %v2308_v8, %v1716_v7  ;;  %v3140_v24 = vor.u32 %v3139_v41, %v3135_v34  ;;  %v3143_v8 = vshll.u32 %v5781_v3, 16  ;;  %v3136_v17 = vsel %vm5156_vm3, %v3131_v38, %v3135_v34 }
 0x158   : > { %v1430_v53 = vadd.f32 %v1369_v20, %v1017_v4  ;;  %v2217_v20 = vpack.c.b16 %v2201_v35, %v2200_v16  ;;  %v3798_v34 = vrot.slane %v5781_v3, 5  ;;  %v5048_v16 = vld [vmem:[%s5144_s30 + $0x20] sm:$0x1]  ;;  %v4705_v38 = vrot.slane %v4689_v27, 9 }
 0x159   : > { %v3141_v7 = vrot.slane %v3140_v24, 4  ;;  %v3145_v4 = vrot.slane %v3143_v8, 5  ;;  %v3148_v24 = vshrl.u32 %v4853_v23, 16  ;;  %v3151_v8 = vshll.u32 %v4853_v23, 16 }
 0x15a   : > { %v2466_v35 = vrot.slane %v5048_v16, 5  ;;  %v2464_v27 = vsel %vm5330_vm7, %v4705_v38, %v2463_v14  ;;  %v4856_v38 = vld [vmem:[%s5144_s30 + $0x30] sm:$0xf] }
 0x15b   : > { %v2310_v5 = vpop.f32.mrf.mxu0  ;;  %v3146_v50 = vsel %vm5156_vm3, %v3141_v7, %v3145_v4  ;;  %v2465_v7 = vrot.slane %v2463_v14, 4  ;;  %v3153_v3 = vrot.slane %v3151_v8, 5 }
 0x15c   : > { %v1656_v11 = vpop.f32.mrf.mxu3  ;;  %4509 = vmatmul.msk.bf16.gmra.mxu2 %vm702_vm4, %v1276_v58  ;;  %v1021_v33 = vpop.f32.mrf.mxu1  ;;  %v3795_v58 = vrot.slane %v5766_v25, 5  ;;  %v3510_v23 = vunpack.c.l.b16 %v3146_v50 }
 0x15d   : > { %v1717_v56 = vadd.f32 %v1656_v11, %v1430_v53  ;;  %v4931_v11 = vrot.slane %v4915_v48, 9  ;;  %v4999_v48 = vld [vmem:[%s5144_s30 + $0x18] sm:$0xff]  ;;  %v2467_v50 = vsel %vm5330_vm7, %v2465_v7, %v2466_v35  ;;  %v5836_v7 = vld [vmem:[%s5144_s30 + $0x34] sm:$0xf] }
 0x15f   : > { %v1372_v28 = vpop.f32.mrf.mxu2  ;;  %v5798_v21 = vadd.f32 %v2310_v5, %v1717_v56  ;;  %v3157_v5 = vshll.u32 %v5796_v60, 16  ;;  %v3161_v56 = vshrl.u32 %v5796_v60, 16 }
 0x160   : > { %v1431_v19 = vadd.f32 %v1372_v28, %v1020_v62  ;;  %v3797_v62 = vrot.slane %v3795_v58, 4 }
 0x161   : > { %4622 = vmatmul.msk.bf16.gmra.mxu3 %vm702_vm4, %v4998_v9  ;;  %v1022_v9 = vadd.f32 %v1021_v33, %v5561_v29  ;;  %v3150_v33 = vrot.slane %v3148_v24, 4  ;;  %v5819_v47 = vrot.slane %v3157_v5, 5 }
 0x163   : > { %v2313_v2 = vpop.f32.mrf.mxu0  ;;  %v3154_v5 = vor.u32 %v3153_v3, %v3150_v33  ;;  %v4916_v33 = vld [vmem:[%s5144_s30 + $0x24] sm:$0xe] }
 0x164   : > { %v1659_v53 = vpop.f32.mrf.mxu3  ;;  %v1024_v41 = vpop.f32.mrf.mxu1 }
 0x165   : > { %v1718_v25 = vadd.f32 %v1659_v53, %v1431_v19  ;;  %v3509_v19 = vunpack.c.l.b16 %v3136_v17  ;;  %v3163_v53 = vrot.slane %v3161_v56, 4  ;;  %v1025_v14 = vadd.f32 %v1024_v41, %v5443_v37 }
 0x166   : > { %4687 = vmatmul.msk.bf16.gmra.mxu0 %vm702_vm4, %v2217_v20  ;;  %v3796_v20 = vsel %vm5330_vm7, %v4931_v11, %v3795_v58  ;;  %v3802_v37 = vrot.slane %v5796_v60, 5 }
 0x167   : > { %v1374_v28 = vpop.f32.mrf.mxu2  ;;  %4721 = vmatmul.msk.bf16.vlgmr.msra.gmra.mxu1 %vm702_vm4, %v5768_v61  ;;  %v5817_v29 = vadd.f32 %v2313_v2, %v1718_v25  ;;  %v3799_v61 = vsel %vm5330_vm7, %v3797_v62, %v3798_v34  ;;  %v3541_v2 = vpack.c.b16 %v3510_v23, %v3509_v19  ;;  %v3907_v11 = vunpack.c.l.b16 %v3796_v20 }
 0x168   : > { %v1432_v4 = vadd.f32 %v1374_v28, %v1022_v9  ;;  %v5828_v9 = vld [vmem:[%s5144_s30 + $0x2c] sm:$0x1]  ;;  %v3908_v8 = vunpack.c.l.b16 %v3799_v61  ;;  %v3164_v56 = vor.u32 %v3163_v53, %v5819_v47  ;;  %v2570_v62 = vunpack.c.l.b16 %v2464_v27 }
 0x169   : > { %v2571_v34 = vunpack.c.l.b16 %v2467_v50  ;;  %v3167_v16 = vshll.u32 %v5828_v9, 16  ;;  %v3172_v53 = vshrl.u32 %v4856_v38, 16  ;;  %v3175_v61 = vshll.u32 %v4856_v38, 16 }
 0x16a   : > { %v3939_v19 = vpack.c.b16 %v3908_v8, %v3907_v11  ;;  %v3181_v27 = vshll.u32 %v5836_v7, 16  ;;  %v3185_v50 = vshrl.u32 %v5836_v7, 16  ;;  %v5049_v11 = vld [vmem:[%s5144_s30 + $0x28] sm:$0xf]  ;;  %v3805_v60 = vrot.slane %v5828_v9, 5 }
 0x16b   : > { %v2315_v17 = vpop.f32.mrf.mxu0  ;;  %v2601_v23 = vpack.c.b16 %v2571_v34, %v2570_v62  ;;  %v3169_v20 = vrot.slane %v3167_v16, 5  ;;  %v2470_v8 = vrot.slane %v5049_v11, 5  ;;  %v4932_v62 = vrot.slane %v4916_v33, 9  ;;  %v5000_v11 = vld [vmem:[%s5144_s30 + $0x24] sm:$0xff] }
 0x16c   : > { %v1661_v58 = vpop.f32.mrf.mxu3  ;;  %4834 = vmatmul.msk.bf16.vlgmr.msra.gmra.mxu2 %vm702_vm4, %v4999_v48  ;;  %v1026_v24 = vpop.f32.mrf.mxu1  ;;  %v3165_v48 = vrot.slane %v3164_v56, 4  ;;  %v3177_v33 = vrot.slane %v3175_v61, 5  ;;  %v5857_v9 = vrot.slane %v3181_v27, 5 }
 0x16d   : > { %v1719_v25 = vadd.f32 %v1661_v58, %v1432_v4  ;;  %v3155_v4 = vrot.slane %v3154_v5, 4  ;;  %v5050_v5 = vld [vmem:[%s5144_s30 + $0x2c] sm:$0x1] }
 0x16e   : > { %v2473_v56 = vrot.slane %v5050_v5, 5  ;;  %v3170_v16 = vsel %vm5156_vm3, %v3165_v48, %v3169_v20  ;;  %v3803_v20 = vsel %vm5330_vm7, %v4932_v62, %v3802_v37 }
 0x16f   : > { %v1377_v35 = vpop.f32.mrf.mxu2  ;;  %v5841_v41 = vadd.f32 %v2315_v17, %v1719_v25  ;;  %v4690_v17 = vld [vmem:[%s5144_s30 + $0x24] sm:$0xe]  ;;  %v1027_v25 = vadd.f32 %v1026_v24, %v5464_v63  ;;  %v3160_v34 = vsel %vm5156_vm3, %v3155_v4, %v5819_v47  ;;  %v2472_v24 = vrot.slane %v2470_v8, 4 }
 0x170   : > { %v1433_v28 = vadd.f32 %v1377_v35, %v1025_v14  ;;  %v3804_v35 = vrot.slane %v3802_v37, 4  ;;  %v4706_v63 = vrot.slane %v4690_v17, 9  ;;  %v3511_v47 = vunpack.c.l.b16 %v3160_v34 }
 0x171   : > { %4899 = vmatmul.msk.bf16.vlgmr.msra.gmra.mxu3 %vm702_vm4, %v3541_v2  ;;  %6479 = vst [vmem:[#allocation3_spill] sm:$0xff] %v5841_v41  ;;  %v3512_v4 = vunpack.c.l.b16 %v3170_v16  ;;  %v5863_v41 = vld [vmem:[%s5144_s30 + $0x38] sm:$0x1] }
 0x172   : > { %v3191_v37 = vshll.u32 %v5863_v41, 16 }
 0x173   : > { %v2318_v3 = vpop.f32.mrf.mxu0  ;;  %v3542_v17 = vpack.c.b16 %v3512_v4, %v3511_v47  ;;  %v5051_v4 = vld [vmem:[%s5144_s30 + $0x34] sm:$0xf] }
 0x174   : > { %v1664_v58 = vpop.f32.mrf.mxu3  ;;  %v1029_v2 = vpop.f32.mrf.mxu1 }
 0x175   : > { %v1720_v14 = vadd.f32 %v1664_v58, %v1433_v28  ;;  %v3174_v28 = vrot.slane %v3172_v53, 4  ;;  %v3187_v58 = vrot.slane %v3185_v50, 4  ;;  %v2474_v50 = vsel %vm5330_vm7, %v2472_v24, %v2473_v56  ;;  %v5882_v24 = vld [vmem:[%s5144_s30 + $0x40] sm:$0xf] }
 0x176   : > { %4948 = vmatmul.msk.bf16.vlgmr.msra.gmra.mxu0 %vm702_vm4, %v3939_v19 }
 0x177   : > { %v1379_v38 = vpop.f32.mrf.mxu2  ;;  %4722 = vmatmul.msk.bf16.gmra.mxu1 %vm702_vm4, %v2601_v23  ;;  %v5860_v5 = vadd.f32 %v2318_v3, %v1720_v14  ;;  %v3806_v23 = vsel %vm5330_vm7, %v3804_v35, %v3805_v60  ;;  %v3178_v53 = vor.u32 %v3177_v33, %v3174_v28  ;;  %v2471_v3 = vsel %vm5330_vm7, %v4706_v63, %v2470_v8 }
 0x178   : > { %v1434_v19 = vadd.f32 %v1379_v38, %v1027_v25  ;;  %v3188_v14 = vor.u32 %v3187_v58, %v5857_v9  ;;  %v1030_v60 = vadd.f32 %v1029_v2, %v5481_v22  ;;  %v3909_v25 = vunpack.c.l.b16 %v3803_v20  ;;  %v4917_v58 = vld [vmem:[%s5144_s30 + $0x30] sm:$0xe] }
 0x179   : > { %v3910_v34 = vunpack.c.l.b16 %v3806_v23  ;;  %v2572_v35 = vunpack.c.l.b16 %v2471_v3  ;;  %v2573_v8 = vunpack.c.l.b16 %v2474_v50  ;;  %v3179_v28 = vrot.slane %v3178_v53, 4 }
 0x17a   : > { %v3189_v56 = vrot.slane %v3188_v14, 4  ;;  %v3193_v33 = vrot.slane %v3191_v37, 5  ;;  %v3809_v63 = vrot.slane %v5836_v7, 5  ;;  %v2477_v20 = vrot.slane %v5051_v4, 5  ;;  %v4691_v7 = vld [vmem:[%s5144_s30 + $0x30] sm:$0xe] }
 0x17b   : > { %v2320_v48 = vpop.f32.mrf.mxu0  ;;  %v2602_v47 = vpack.c.b16 %v2573_v8, %v2572_v35  ;;  %v4933_v50 = vrot.slane %v4917_v58, 9 }
 0x17c   : > { %v1666_v61 = vpop.f32.mrf.mxu3  ;;  %4835 = vmatmul.msk.bf16.gmra.mxu2 %vm702_vm4, %v5000_v11  ;;  %v1031_v27 = vpop.f32.mrf.mxu1  ;;  %v4859_v11 = vld [vmem:[%s5144_s30 + $0x3c] sm:$0xf]  ;;  %v3194_v3 = vsel %vm5156_vm3, %v3189_v56, %v3193_v33  ;;  %v5001_v33 = vld [vmem:[%s5144_s30 + $0x30] sm:$0xff] }
 0x17d   : > { %v1721_v62 = vadd.f32 %v1666_v61, %v1434_v19  ;;  %v3940_v19 = vpack.c.b16 %v3910_v34, %v3909_v25  ;;  %v3184_v61 = vsel %vm5156_vm3, %v3179_v28, %v5857_v9  ;;  %v3196_v14 = vshrl.u32 %v4859_v11, 16  ;;  %v5052_v34 = vld [vmem:[%s5144_s30 + $0x38] sm:$0x1] }
 0x17e   : > { %v3811_v25 = vrot.slane %v3809_v63, 4  ;;  %v3812_v9 = vrot.slane %v5863_v41, 5  ;;  %v3513_v8 = vunpack.c.l.b16 %v3184_v61  ;;  %v2479_v28 = vrot.slane %v2477_v20, 4 }
 0x17f   : > { %v1382_v16 = vpop.f32.mrf.mxu2  ;;  %v5884_v22 = vadd.f32 %v2320_v48, %v1721_v62  ;;  %v3199_v48 = vshll.u32 %v4859_v11, 16  ;;  %v3205_v62 = vshll.u32 %v5882_v24, 16  ;;  %v3514_v58 = vunpack.c.l.b16 %v3194_v3 }
 0x180   : > { %v1435_v38 = vadd.f32 %v1382_v16, %v1030_v60  ;;  %v1032_v60 = vadd.f32 %v1031_v27, %v5502_v55  ;;  %v2480_v16 = vrot.slane %v5052_v34, 5  ;;  %v3810_v11 = vsel %vm5330_vm7, %v4933_v50, %v3809_v63 }
 0x181   : > { %4900 = vmatmul.msk.bf16.gmra.mxu3 %vm702_vm4, %v3542_v17  ;;  %v3209_v17 = vshrl.u32 %v5882_v24, 16  ;;  %v3198_v55 = vrot.slane %v3196_v14, 4  ;;  %v3201_v27 = vrot.slane %v3199_v48, 5  ;;  %v5905_v41 = vrot.slane %v3205_v62, 5 }
 0x182   : > { %v2481_v3 = vsel %vm5330_vm7, %v2479_v28, %v2480_v16  ;;  %v3911_v50 = vunpack.c.l.b16 %v3810_v11  ;;  %v4918_v11 = vld [vmem:[%s5144_s30 + $0x3c] sm:$0xe] }
 0x183   : > { %v2323_v2 = vpop.f32.mrf.mxu0  ;;  %v3211_v4 = vrot.slane %v3209_v17, 4  ;;  %v3202_v62 = vor.u32 %v3201_v27, %v3198_v55 }
 0x184   : > { %v1669_v23 = vpop.f32.mrf.mxu3  ;;  %v1034_v53 = vpop.f32.mrf.mxu1 }
 0x185   : > { %v1722_v37 = vadd.f32 %v1669_v23, %v1435_v38  ;;  %v4707_v38 = vrot.slane %v4691_v7, 9  ;;  %v5914_v7 = vld [vmem:[%s5144_s30 + $0x44] sm:$0x1]  ;;  %v3212_v17 = vor.u32 %v3211_v4, %v5905_v41  ;;  %v3203_v28 = vrot.slane %v3202_v62, 4 }
 0x186   : > { %4949 = vmatmul.msk.bf16.gmra.mxu0 %vm702_vm4, %v3940_v19 }
 0x187   : > { %v1384_v35 = vpop.f32.mrf.mxu2  ;;  %4723 = vmatmul.msk.bf16.gmra.mxu1 %vm702_vm4, %v2602_v47  ;;  %v5903_v19 = vadd.f32 %v2323_v2, %v1722_v37  ;;  %v3813_v47 = vsel %vm5330_vm7, %v3811_v25, %v3812_v9  ;;  %v2478_v61 = vsel %vm5330_vm7, %v4707_v38, %v2477_v20  ;;  %v3543_v2 = vpack.c.b16 %v3514_v58, %v3513_v8  ;;  %v5922_v38 = vld [vmem:[%s5144_s30 + $0x4c] sm:$0xf] }
 0x188   : > { %v1436_v56 = vadd.f32 %v1384_v35, %v1032_v60  ;;  %v3912_v48 = vunpack.c.l.b16 %v3813_v47  ;;  %v1035_v20 = vadd.f32 %v1034_v53, %v5525_v26  ;;  %v2574_v60 = vunpack.c.l.b16 %v2478_v61  ;;  %v4862_v35 = vld [vmem:[%s5144_s30 + $0x48] sm:$0xf] }
 0x189   : > { %v2575_v25 = vunpack.c.l.b16 %v2481_v3  ;;  %v3215_v9 = vshll.u32 %v5914_v7, 16  ;;  %v3816_v26 = vrot.slane %v5882_v24, 5  ;;  %v3220_v27 = vshrl.u32 %v4862_v35, 16 }
 0x18a   : > { %v3941_v8 = vpack.c.b16 %v3912_v48, %v3911_v50  ;;  %v3223_v4 = vshll.u32 %v4862_v35, 16  ;;  %v3229_v47 = vshll.u32 %v5922_v38, 16  ;;  %v3233_v61 = vshrl.u32 %v5922_v38, 16  ;;  %v5054_v48 = vld [vmem:[%s5144_s30 + $0x44] sm:$0x1] }
 0x18b   : > { %v2325_v23 = vpop.f32.mrf.mxu0  ;;  %v3217_v58 = vrot.slane %v3215_v9, 5  ;;  %v2487_v62 = vrot.slane %v5054_v48, 5  ;;  %v3819_v24 = vrot.slane %v5914_v7, 5  ;;  %v3818_v9 = vrot.slane %v3816_v26, 4  ;;  %v5949_v48 = vld [vmem:[%s5144_s30 + $0x50] sm:$0x1] }
 0x18c   : > { %v1671_v63 = vpop.f32.mrf.mxu3  ;;  %4836 = vmatmul.msk.bf16.gmra.mxu2 %vm702_vm4, %v5001_v33  ;;  %v1036_v14 = vpop.f32.mrf.mxu1  ;;  %v2603_v33 = vpack.c.b16 %v2575_v25, %v2574_v60  ;;  %v3208_v60 = vsel %vm5156_vm3, %v3203_v28, %v5905_v41  ;;  %v3225_v35 = vrot.slane %v3223_v4, 5  ;;  %v5943_v7 = vrot.slane %v3229_v47, 5 }
 0x18d   : > { %v1723_v37 = vadd.f32 %v1671_v63, %v1436_v56  ;;  %v3213_v56 = vrot.slane %v3212_v17, 4  ;;  %v3515_v41 = vunpack.c.l.b16 %v3208_v60 }
 0x18f   : > { %v1387_v34 = vpop.f32.mrf.mxu2  ;;  %v5927_v53 = vadd.f32 %v2325_v23, %v1723_v37  ;;  %v4692_v23 = vld [vmem:[%s5144_s30 + $0x3c] sm:$0xe]  ;;  %v1037_v37 = vadd.f32 %v1036_v14, %v5543_v43  ;;  %v3218_v25 = vsel %vm5156_vm3, %v3213_v56, %v3217_v58 }
 0x190   : > { %v1437_v16 = vadd.f32 %v1387_v34, %v1035_v20  ;;  %v4934_v20 = vrot.slane %v4918_v11, 9  ;;  %v3235_v11 = vrot.slane %v3233_v61, 4  ;;  %v4708_v43 = vrot.slane %v4692_v23, 9 }
 0x191   : > { %4901 = vmatmul.msk.bf16.gmra.mxu3 %vm702_vm4, %v3543_v2  ;;  %v5053_v2 = vld [vmem:[%s5144_s30 + $0x40] sm:$0xf]  ;;  %v3516_v28 = vunpack.c.l.b16 %v3218_v25 }
 0x192   : > { %v2484_v50 = vrot.slane %v5053_v2, 5  ;;  %v3817_v58 = vsel %vm5330_vm7, %v4934_v20, %v3816_v26  ;;  %v3239_v26 = vshll.u32 %v5949_v48, 16 }
 0x193   : > { %v2328_v55 = vpop.f32.mrf.mxu0  ;;  %v3544_v23 = vpack.c.b16 %v3516_v28, %v3515_v41  ;;  %v5055_v28 = vld [vmem:[%s5144_s30 + $0x4c] sm:$0xf] }
 0x194   : > { %v1674_v3 = vpop.f32.mrf.mxu3  ;;  %v1039_v63 = vpop.f32.mrf.mxu1  ;;  %v2486_v14 = vrot.slane %v2484_v50, 4 }
 0x195   : > { %v1724_v17 = vadd.f32 %v1674_v3, %v1437_v16  ;;  %v3222_v16 = vrot.slane %v3220_v27, 4  ;;  %v5002_v3 = vld [vmem:[%s5144_s30 + $0x3c] sm:$0xff] }
 0x196   : > { %4950 = vmatmul.msk.bf16.gmra.mxu0 %vm702_vm4, %v3941_v8  ;;  %v2488_v61 = vsel %vm5330_vm7, %v2486_v14, %v2487_v62  ;;  %v5968_v14 = vld [vmem:[%s5144_s30 + $0x58] sm:$0xf] }
 0x197   : > { %v1389_v34 = vpop.f32.mrf.mxu2  ;;  %4724 = vmatmul.msk.bf16.gmra.mxu1 %vm702_vm4, %v2603_v33  ;;  %v5946_v2 = vadd.f32 %v2328_v55, %v1724_v17  ;;  %v3820_v33 = vsel %vm5330_vm7, %v3818_v9, %v3819_v24  ;;  %v3226_v27 = vor.u32 %v3225_v35, %v3222_v16  ;;  %v2485_v55 = vsel %vm5330_vm7, %v4708_v43, %v2484_v50 }
 0x198   : > { %v1438_v8 = vadd.f32 %v1389_v34, %v1037_v37  ;;  %v3236_v17 = vor.u32 %v3235_v11, %v5943_v7  ;;  %v1040_v24 = vadd.f32 %v1039_v63, %v5564_v40  ;;  %v3913_v37 = vunpack.c.l.b16 %v3817_v58  ;;  %v4919_v11 = vld [vmem:[%s5144_s30 + $0x48] sm:$0xe] }
 0x199   : > { %v3914_v60 = vunpack.c.l.b16 %v3820_v33  ;;  %v2576_v9 = vunpack.c.l.b16 %v2485_v55  ;;  %v2577_v50 = vunpack.c.l.b16 %v2488_v61  ;;  %v3227_v16 = vrot.slane %v3226_v27, 4 }
 0x19a   : > { %v3237_v62 = vrot.slane %v3236_v17, 4  ;;  %v3241_v35 = vrot.slane %v3239_v26, 5  ;;  %v3823_v43 = vrot.slane %v5922_v38, 5  ;;  %v2491_v58 = vrot.slane %v5055_v28, 5  ;;  %v4693_v38 = vld [vmem:[%s5144_s30 + $0x48] sm:$0xe] }
 0x19b   : > { %v2330_v56 = vpop.f32.mrf.mxu0  ;;  %v2604_v41 = vpack.c.b16 %v2577_v50, %v2576_v9  ;;  %v4935_v61 = vrot.slane %v4919_v11, 9 }
 0x19c   : > { %v1676_v4 = vpop.f32.mrf.mxu3  ;;  %4837 = vmatmul.msk.bf16.gmra.mxu2 %vm702_vm4, %v5002_v3  ;;  %v1041_v47 = vpop.f32.mrf.mxu1  ;;  %v4865_v3 = vld [vmem:[%s5144_s30 + $0x54] sm:$0xf]  ;;  %v3242_v55 = vsel %vm5156_vm3, %v3237_v62, %v3241_v35  ;;  %v5003_v35 = vld [vmem:[%s5144_s30 + $0x48] sm:$0xff] }
 0x19d   : > { %v1725_v20 = vadd.f32 %v1676_v4, %v1438_v8  ;;  %v3942_v8 = vpack.c.b16 %v3914_v60, %v3913_v37  ;;  %v3232_v4 = vsel %vm5156_vm3, %v3227_v16, %v5943_v7  ;;  %v3244_v17 = vshrl.u32 %v4865_v3, 16  ;;  %v5056_v60 = vld [vmem:[%s5144_s30 + $0x50] sm:$0x1] }
 0x19e   : > { %v3825_v37 = vrot.slane %v3823_v43, 4  ;;  %v3826_v7 = vrot.slane %v5949_v48, 5  ;;  %v3517_v50 = vunpack.c.l.b16 %v3232_v4  ;;  %v2493_v16 = vrot.slane %v2491_v58, 4 }
 0x19f   : > { %v1392_v25 = vpop.f32.mrf.mxu2  ;;  %v5970_v40 = vadd.f32 %v2330_v56, %v1725_v20  ;;  %v3247_v56 = vshll.u32 %v4865_v3, 16  ;;  %v3253_v20 = vshll.u32 %v5968_v14, 16  ;;  %v3518_v11 = vunpack.c.l.b16 %v3242_v55 }
 0x1a0   : > { %v1439_v34 = vadd.f32 %v1392_v25, %v1040_v24  ;;  %v1042_v24 = vadd.f32 %v1041_v47, %v5579_v10  ;;  %v2494_v25 = vrot.slane %v5056_v60, 5  ;;  %v3824_v3 = vsel %vm5330_vm7, %v4935_v61, %v3823_v43 }
 0x1a1   : > { %4902 = vmatmul.msk.bf16.gmra.mxu3 %vm702_vm4, %v3544_v23  ;;  %v3257_v23 = vshrl.u32 %v5968_v14, 16  ;;  %v3246_v10 = vrot.slane %v3244_v17, 4  ;;  %v3249_v47 = vrot.slane %v3247_v56, 5  ;;  %v5991_v48 = vrot.slane %v3253_v20, 5 }
 0x1a2   : > { %v2495_v55 = vsel %vm5330_vm7, %v2493_v16, %v2494_v25  ;;  %v3915_v61 = vunpack.c.l.b16 %v3824_v3  ;;  %v4920_v3 = vld [vmem:[%s5144_s30 + $0x54] sm:$0xe] }
 0x1a3   : > { %v2333_v63 = vpop.f32.mrf.mxu0  ;;  %v3259_v28 = vrot.slane %v3257_v23, 4  ;;  %v3250_v20 = vor.u32 %v3249_v47, %v3246_v10 }
 0x1a4   : > { %v1679_v33 = vpop.f32.mrf.mxu3  ;;  %v1044_v27 = vpop.f32.mrf.mxu1 }
 0x1a5   : > { %v1726_v26 = vadd.f32 %v1679_v33, %v1439_v34  ;;  %v4709_v34 = vrot.slane %v4693_v38, 9  ;;  %v6000_v38 = vld [vmem:[%s5144_s30 + $0x5c] sm:$0x1]  ;;  %v3260_v23 = vor.u32 %v3259_v28, %v5991_v48  ;;  %v3251_v16 = vrot.slane %v3250_v20, 4 }
 0x1a6   : > { %4951 = vmatmul.msk.bf16.gmra.mxu0 %vm702_vm4, %v3942_v8 }
 0x1a7   : > { %v1394_v9 = vpop.f32.mrf.mxu2  ;;  %4725 = vmatmul.msk.bf16.gmra.mxu1 %vm702_vm4, %v2604_v41  ;;  %v5989_v8 = vadd.f32 %v2333_v63, %v1726_v26  ;;  %v3827_v41 = vsel %vm5330_vm7, %v3825_v37, %v3826_v7  ;;  %v2492_v4 = vsel %vm5330_vm7, %v4709_v34, %v2491_v58  ;;  %v3545_v63 = vpack.c.b16 %v3518_v11, %v3517_v50  ;;  %v6008_v34 = vld [vmem:[%s5144_s30 + $0x64] sm:$0xf] }
 0x1a8   : > { %v1440_v62 = vadd.f32 %v1394_v9, %v1042_v24  ;;  %v3916_v56 = vunpack.c.l.b16 %v3827_v41  ;;  %v1045_v58 = vadd.f32 %v1044_v27, %v5455_v49  ;;  %v2578_v24 = vunpack.c.l.b16 %v2492_v4  ;;  %v4868_v9 = vld [vmem:[%s5144_s30 + $0x60] sm:$0xf] }
 0x1a9   : > { %v2579_v37 = vunpack.c.l.b16 %v2495_v55  ;;  %v3263_v7 = vshll.u32 %v6000_v38, 16  ;;  %v3830_v49 = vrot.slane %v5968_v14, 5  ;;  %v3268_v47 = vshrl.u32 %v4868_v9, 16 }
 0x1aa   : > { %v3943_v50 = vpack.c.b16 %v3916_v56, %v3915_v61  ;;  %v3271_v28 = vshll.u32 %v4868_v9, 16  ;;  %v3277_v41 = vshll.u32 %v6008_v34, 16  ;;  %v3281_v4 = vshrl.u32 %v6008_v34, 16  ;;  %v5058_v56 = vld [vmem:[%s5144_s30 + $0x5c] sm:$0x1] }
 0x1ab   : > { %v2335_v33 = vpop.f32.mrf.mxu0  ;;  %v3265_v11 = vrot.slane %v3263_v7, 5  ;;  %v2501_v20 = vrot.slane %v5058_v56, 5  ;;  %v3833_v14 = vrot.slane %v6000_v38, 5  ;;  %v3832_v7 = vrot.slane %v3830_v49, 4  ;;  %v6035_v56 = vld [vmem:[%s5144_s30 + $0x68] sm:$0x1] }
 0x1ac   : > { %v1681_v43 = vpop.f32.mrf.mxu3  ;;  %4838 = vmatmul.msk.bf16.gmra.mxu2 %vm702_vm4, %v5003_v35  ;;  %v1046_v17 = vpop.f32.mrf.mxu1  ;;  %v2605_v35 = vpack.c.b16 %v2579_v37, %v2578_v24  ;;  %v3256_v24 = vsel %vm5156_vm3, %v3251_v16, %v5991_v48  ;;  %v3273_v9 = vrot.slane %v3271_v28, 5  ;;  %v6029_v38 = vrot.slane %v3277_v41, 5 }
 0x1ad   : > { %v1727_v26 = vadd.f32 %v1681_v43, %v1440_v62  ;;  %v3261_v62 = vrot.slane %v3260_v23, 4  ;;  %v3519_v48 = vunpack.c.l.b16 %v3256_v24 }
 0x1af   : > { %v1397_v60 = vpop.f32.mrf.mxu2  ;;  %v6013_v27 = vadd.f32 %v2335_v33, %v1727_v26  ;;  %v4694_v33 = vld [vmem:[%s5144_s30 + $0x54] sm:$0xe]  ;;  %v1047_v26 = vadd.f32 %v1046_v17, %v5474_v0  ;;  %v3266_v37 = vsel %vm5156_vm3, %v3261_v62, %v3265_v11 }
 0x1b0   : > { %v1441_v25 = vadd.f32 %v1397_v60, %v1045_v58  ;;  %v4936_v58 = vrot.slane %v4920_v3, 9  ;;  %v3283_v3 = vrot.slane %v3281_v4, 4  ;;  %v4710_v0 = vrot.slane %v4694_v33, 9 }
 0x1b1   : > { %4903 = vmatmul.msk.bf16.gmra.mxu3 %vm702_vm4, %v3545_v63  ;;  %v5057_v63 = vld [vmem:[%s5144_s30 + $0x58] sm:$0xf]  ;;  %v3520_v16 = vunpack.c.l.b16 %v3266_v37 }
 0x1b2   : > { %v2498_v61 = vrot.slane %v5057_v63, 5  ;;  %v3831_v11 = vsel %vm5330_vm7, %v4936_v58, %v3830_v49  ;;  %v3287_v49 = vshll.u32 %v6035_v56, 16 }
 0x1b3   : > { %v2338_v10 = vpop.f32.mrf.mxu0  ;;  %v3546_v33 = vpack.c.b16 %v3520_v16, %v3519_v48 }
 0x1b4   : > { %v1684_v55 = vpop.f32.mrf.mxu3  ;;  %v1049_v43 = vpop.f32.mrf.mxu1  ;;  %v2500_v17 = vrot.slane %v2498_v61, 4 }
 0x1b5   : > { %v1728_v23 = vadd.f32 %v1684_v55, %v1441_v25  ;;  %v3270_v25 = vrot.slane %v3268_v47, 4  ;;  %v5004_v55 = vld [vmem:[%s5144_s30 + $0x54] sm:$0xff] }
 0x1b6   : > { %4952 = vmatmul.msk.bf16.gmra.mxu0 %vm702_vm4, %v3943_v50  ;;  %v2502_v4 = vsel %vm5330_vm7, %v2500_v17, %v2501_v20  ;;  %v3289_v20 = vrot.slane %v3287_v49, 5  ;;  %v6054_v17 = vld [vmem:[%s5144_s30 + $0x70] sm:$0xf]  ;;  %v4695_v49 = vld [vmem:[%s5144_s30 + $0x60] sm:$0xe] }
 0x1b7   : > { %v1399_v60 = vpop.f32.mrf.mxu2  ;;  %4726 = vmatmul.msk.bf16.gmra.mxu1 %vm702_vm4, %v2605_v35  ;;  %v6032_v63 = vadd.f32 %v2338_v10, %v1728_v23  ;;  %v3834_v35 = vsel %vm5330_vm7, %v3832_v7, %v3833_v14  ;;  %v3274_v47 = vor.u32 %v3273_v9, %v3270_v25  ;;  %v2499_v10 = vsel %vm5330_vm7, %v4710_v0, %v2498_v61 }
 0x1b8   : > { %v1442_v50 = vadd.f32 %v1399_v60, %v1047_v26  ;;  %v3284_v23 = vor.u32 %v3283_v3, %v6029_v38  ;;  %v1050_v14 = vadd.f32 %v1049_v43, %v5495_v39  ;;  %v3917_v26 = vunpack.c.l.b16 %v3831_v11  ;;  %v4871_v3 = vld [vmem:[%s5144_s30 + $0x6c] sm:$0xf] }
 0x1b9   : > { %v3918_v24 = vunpack.c.l.b16 %v3834_v35  ;;  %v2580_v7 = vunpack.c.l.b16 %v2499_v10  ;;  %v2581_v60 = vunpack.c.l.b16 %v2502_v4  ;;  %v3275_v25 = vrot.slane %v3274_v47, 4  ;;  %v5059_v10 = vld [vmem:[%s5144_s30 + $0x64] sm:$0xf] }
 0x1ba   : > { %v3285_v9 = vrot.slane %v3284_v23, 4  ;;  %v3837_v0 = vrot.slane %v6008_v34, 5  ;;  %v2505_v4 = vrot.slane %v5059_v10, 5  ;;  %v3292_v34 = vshrl.u32 %v4871_v3, 16 }
 0x1bb   : > { %v2340_v62 = vpop.f32.mrf.mxu0  ;;  %v2606_v48 = vpack.c.b16 %v2581_v60, %v2580_v7  ;;  %v3280_v47 = vsel %vm5156_vm3, %v3275_v25, %v6029_v38  ;;  %v3840_v38 = vrot.slane %v6035_v56, 5 }
 0x1bc   : > { %v1686_v28 = vpop.f32.mrf.mxu3  ;;  %4839 = vmatmul.msk.bf16.gmra.mxu2 %vm702_vm4, %v5004_v55  ;;  %v1051_v41 = vpop.f32.mrf.mxu1  ;;  %v4921_v55 = vld [vmem:[%s5144_s30 + $0x60] sm:$0xe]  ;;  %v3521_v60 = vunpack.c.l.b16 %v3280_v47  ;;  %v6082_v47 = vld [vmem:[%s5144_s30 + $0x74] sm:$0x1] }
 0x1bd   : > { %v1729_v58 = vadd.f32 %v1686_v28, %v1442_v50  ;;  %v3944_v50 = vpack.c.b16 %v3918_v24, %v3917_v26  ;;  %v4937_v16 = vrot.slane %v4921_v55, 9  ;;  %v3290_v28 = vsel %vm5156_vm3, %v3285_v9, %v3289_v20  ;;  %v5060_v24 = vld [vmem:[%s5144_s30 + $0x68] sm:$0x1]  ;;  %v5005_v20 = vld [vmem:[%s5144_s30 + $0x60] sm:$0xff] }
 0x1be   : > { %v3839_v26 = vrot.slane %v3837_v0, 4  ;;  %v4711_v55 = vrot.slane %v4695_v49, 9 }
 0x1bf   : > { %v1402_v37 = vpop.f32.mrf.mxu2  ;;  %v6056_v39 = vadd.f32 %v2340_v62, %v1729_v58  ;;  %v3295_v62 = vshll.u32 %v4871_v3, 16  ;;  %v3301_v58 = vshll.u32 %v6054_v17, 16  ;;  %v3838_v25 = vsel %vm5330_vm7, %v4937_v16, %v3837_v0 }
 0x1c0   : > { %v1443_v61 = vadd.f32 %v1402_v37, %v1050_v14  ;;  %v1052_v14 = vadd.f32 %v1051_v41, %v5514_v6  ;;  %v2508_v37 = vrot.slane %v5060_v24, 5  ;;  %v2507_v3 = vrot.slane %v2505_v4, 4 }
 0x1c1   : > { %4904 = vmatmul.msk.bf16.gmra.mxu3 %vm702_vm4, %v3546_v33  ;;  %v3305_v33 = vshrl.u32 %v6054_v17, 16  ;;  %v3294_v6 = vrot.slane %v3292_v34, 4  ;;  %v3297_v41 = vrot.slane %v3295_v62, 5  ;;  %v6077_v56 = vrot.slane %v3301_v58, 5 }
 0x1c2   : > { %v3841_v10 = vsel %vm5330_vm7, %v3839_v26, %v3840_v38  ;;  %v3919_v16 = vunpack.c.l.b16 %v3838_v25  ;;  %v2506_v34 = vsel %vm5330_vm7, %v4711_v55, %v2505_v4  ;;  %v3311_v26 = vshll.u32 %v6082_v47, 16  ;;  %v6094_v25 = vld [vmem:[%s5144_s30 + $0x7c] sm:$0xf]  ;;  %v4922_v55 = vld [vmem:[%s5144_s30 + $0x6c] sm:$0xe] }
 0x1c3   : > { %v2343_v43 = vpop.f32.mrf.mxu0  ;;  %v3920_v62 = vunpack.c.l.b16 %v3841_v10  ;;  %v3298_v58 = vor.u32 %v3297_v41, %v3294_v6  ;;  %v2582_v24 = vunpack.c.l.b16 %v2506_v34  ;;  %v3325_v10 = vshll.u32 %v6094_v25, 16 }
 0x1c4   : > { %v1689_v11 = vpop.f32.mrf.mxu3  ;;  %v1054_v35 = vpop.f32.mrf.mxu1 }
 0x1c5   : > { %v1730_v23 = vadd.f32 %v1689_v11, %v1443_v61  ;;  %v3522_v61 = vunpack.c.l.b16 %v3290_v28  ;;  %v3307_v11 = vrot.slane %v3305_v33, 4  ;;  %v3945_v4 = vpack.c.b16 %v3920_v62, %v3919_v16  ;;  %v4696_v16 = vld [vmem:[%s5144_s30 + $0x6c] sm:$0xe] }
 0x1c6   : > { %4953 = vmatmul.msk.bf16.gmra.mxu0 %vm702_vm4, %v3944_v50 }
 0x1c7   : > { %v1404_v7 = vpop.f32.mrf.mxu2  ;;  %4727 = vmatmul.msk.bf16.gmra.mxu1 %vm702_vm4, %v2606_v48  ;;  %v6075_v50 = vadd.f32 %v2343_v43, %v1730_v23  ;;  %v3547_v0 = vpack.c.b16 %v3522_v61, %v3521_v60  ;;  %v2509_v23 = vsel %vm5330_vm7, %v2507_v3, %v2508_v37  ;;  %v3308_v33 = vor.u32 %v3307_v11, %v6077_v56  ;;  %v4874_v60 = vld [vmem:[%s5144_s30 + $0x78] sm:$0xf] }
 0x1c8   : > { %v1444_v9 = vadd.f32 %v1404_v7, %v1052_v14  ;;  %v1055_v14 = vadd.f32 %v1054_v35, %v5533_v45  ;;  %v2583_v7 = vunpack.c.l.b16 %v2509_v23  ;;  %v3299_v37 = vrot.slane %v3298_v58, 4  ;;  %v5061_v23 = vld [vmem:[%s5144_s30 + $0x70] sm:$0xf] }
 0x1c9   : > { %v3844_v45 = vrot.slane %v6054_v17, 5  ;;  %v3316_v35 = vshrl.u32 %v4874_v60, 16  ;;  %v3319_v11 = vshll.u32 %v4874_v60, 16  ;;  %v2512_v62 = vrot.slane %v5061_v23, 5 }
 0x1ca   : > { %v2607_v41 = vpack.c.b16 %v2583_v7, %v2582_v24  ;;  %v3304_v17 = vsel %vm5156_vm3, %v3299_v37, %v6077_v56  ;;  %v4712_v7 = vrot.slane %v4696_v16, 9  ;;  %v3327_v56 = vrot.slane %v3325_v10, 5 }
 0x1cb   : > { %v2345_v48 = vpop.f32.mrf.mxu0  ;;  %v3321_v60 = vrot.slane %v3319_v11, 5 }
 0x1cc   : > { %v1691_v28 = vpop.f32.mrf.mxu3  ;;  %4840 = vmatmul.msk.bf16.gmra.mxu2 %vm702_vm4, %v5005_v20  ;;  %v1056_v43 = vpop.f32.mrf.mxu1  ;;  %v3313_v20 = vrot.slane %v3311_v26, 5  ;;  %v3846_v26 = vrot.slane %v3844_v45, 4 }
 0x1cd   : > { %v1731_v49 = vadd.f32 %v1691_v28, %v1444_v9  ;;  %v3309_v9 = vrot.slane %v3308_v33, 4  ;;  %v3329_v28 = vshrl.u32 %v6094_v25, 16  ;;  %v1057_v33 = vadd.f32 %v1056_v43, %v5556_v12 }
 0x1ce   : > { %v3523_v12 = vunpack.c.l.b16 %v3304_v17 }
 0x1cf   : > { %v1407_v38 = vpop.f32.mrf.mxu2  ;;  %v6099_v3 = vadd.f32 %v2345_v48, %v1731_v49  ;;  %v4938_v48 = vrot.slane %v4922_v55, 9  ;;  %v3847_v49 = vrot.slane %v6082_v47, 5  ;;  %v5006_v55 = vld [vmem:[%s5144_s30 + $0x6c] sm:$0xff]  ;;  %v2514_v47 = vrot.slane %v2512_v62, 4 }
 0x1d0   : > { %v1445_v61 = vadd.f32 %v1407_v38, %v1055_v14  ;;  %v3314_v14 = vsel %vm5156_vm3, %v3309_v9, %v3313_v20  ;;  %v3318_v38 = vrot.slane %v3316_v35, 4  ;;  %v4876_v9 = vld [vmem:[%s5144_s30 + $0x80] sm:$0x1] }
 0x1d1   : > { %4905 = vmatmul.msk.bf16.gmra.mxu3 %vm702_vm4, %v3547_v0  ;;  %v3524_v43 = vunpack.c.l.b16 %v3314_v14  ;;  %v3845_v35 = vsel %vm5330_vm7, %v4938_v48, %v3844_v45  ;;  %v3335_v17 = vshll.u32 %v4876_v9, 16 }
 0x1d2   : > { %v3322_v11 = vor.u32 %v3321_v60, %v3318_v38 }
 0x1d3   : > { %v2348_v6 = vpop.f32.mrf.mxu0  ;;  %v3548_v45 = vpack.c.b16 %v3524_v43, %v3523_v12 }
 0x1d4   : > { %v1694_v0 = vpop.f32.mrf.mxu3  ;;  %v1059_v34 = vpop.f32.mrf.mxu1  ;;  %v3323_v60 = vrot.slane %v3322_v11, 4 }
 0x1d5   : > { %v1732_v58 = vadd.f32 %v1694_v0, %v1445_v61  ;;  %v3331_v61 = vrot.slane %v3329_v28, 4  ;;  %v5062_v0 = vld [vmem:[%s5144_s30 + $0x74] sm:$0x1]  ;;  %v1060_v48 = vadd.f32 %v1059_v34, %v5575_v59  ;;  %v6134_v34 = vld [vmem:[%s5144_s30 + $0x88] sm:$0xf] }
 0x1d6   : > { %4954 = vmatmul.msk.bf16.gmra.mxu0 %vm702_vm4, %v3945_v4  ;;  %v2515_v4 = vrot.slane %v5062_v0, 5 }
 0x1d7   : > { %v1409_v24 = vpop.f32.mrf.mxu2  ;;  %4728 = vmatmul.msk.bf16.gmra.mxu1 %vm702_vm4, %v2607_v41  ;;  %v6116_v23 = vadd.f32 %v2348_v6, %v1732_v58  ;;  %v3848_v41 = vsel %vm5330_vm7, %v3846_v26, %v3847_v49  ;;  %v2513_v6 = vsel %vm5330_vm7, %v4712_v7, %v2512_v62  ;;  %v3332_v58 = vor.u32 %v3331_v61, %v3327_v56 }
 0x1d8   : > { %v1446_v37 = vadd.f32 %v1409_v24, %v1057_v33  ;;  %v2516_v16 = vsel %vm5330_vm7, %v2514_v47, %v2515_v4  ;;  %v3921_v49 = vunpack.c.l.b16 %v3845_v35  ;;  %v3922_v14 = vunpack.c.l.b16 %v3848_v41 }
 0x1d9   : > { %v2584_v38 = vunpack.c.l.b16 %v2513_v6  ;;  %v2585_v24 = vunpack.c.l.b16 %v2516_v16  ;;  %v3851_v62 = vrot.slane %v6094_v25, 5  ;;  %v3333_v0 = vrot.slane %v3332_v58, 4  ;;  %v4697_v16 = vld [vmem:[%s5144_s30 + $0x78] sm:$0xe]  ;;  %v5063_v58 = vld [vmem:[%s5144_s30 + $0x7c] sm:$0xf] }
 0x1da   : > { %v3337_v61 = vrot.slane %v3335_v17, 5  ;;  %v3946_v47 = vpack.c.b16 %v3922_v14, %v3921_v49  ;;  %v3328_v35 = vsel %vm5156_vm3, %v3323_v60, %v3327_v56  ;;  %v3854_v41 = vrot.slane %v4876_v9, 5 }
 0x1db   : > { %v2350_v20 = vpop.f32.mrf.mxu0  ;;  %v2608_v43 = vpack.c.b16 %v2585_v24, %v2584_v38  ;;  %v3853_v25 = vrot.slane %v3851_v62, 4  ;;  %v2519_v17 = vrot.slane %v5063_v58, 5  ;;  %v3353_v49 = vshrl.u32 %v6134_v34, 16 }
 0x1dc   : > { %v1696_v10 = vpop.f32.mrf.mxu3  ;;  %4841 = vmatmul.msk.bf16.gmra.mxu2 %vm702_vm4, %v5006_v55  ;;  %v1061_v28 = vpop.f32.mrf.mxu1  ;;  %v4923_v55 = vld [vmem:[%s5144_s30 + $0x78] sm:$0xe]  ;;  %v3338_v6 = vsel %vm5156_vm3, %v3333_v0, %v3337_v61  ;;  %v3525_v9 = vunpack.c.l.b16 %v3328_v35  ;;  %v4713_v60 = vrot.slane %v4697_v16, 9  ;;  %v5064_v61 = vld [vmem:[%s5144_s30 + $0x80] sm:$0x1] }
 0x1dd   : > { %v1733_v33 = vadd.f32 %v1696_v10, %v1446_v37  ;;  %v4877_v37 = vld [vmem:[%s5144_s30 + $0x84] sm:$0xf]  ;;  %v4939_v59 = vrot.slane %v4923_v55, 9  ;;  %v1062_v56 = vadd.f32 %v1061_v28, %v5592_v32  ;;  %v3855_v24 = vsel %vm5330_vm7, %v3853_v25, %v3854_v41 }
 0x1de   : > { %v2521_v0 = vrot.slane %v2519_v17, 4  ;;  %v3924_v25 = vunpack.c.l.b16 %v3855_v24  ;;  %v4880_v24 = vld [vmem:[%s5144_s30 + $0x90] sm:$0xf] }
 0x1df   : > { %v1412_v26 = vpop.f32.mrf.mxu2  ;;  %v6136_v4 = vadd.f32 %v2350_v20, %v1733_v33  ;;  %v3343_v20 = vshll.u32 %v4877_v37, 16  ;;  %v3349_v33 = vshll.u32 %v6134_v34, 16  ;;  %v3852_v38 = vsel %vm5330_vm7, %v4939_v59, %v3851_v62 }
 0x1e0   : > { %v1447_v7 = vadd.f32 %v1412_v26, %v1060_v48  ;;  %v3526_v26 = vunpack.c.l.b16 %v3338_v6  ;;  %v3923_v58 = vunpack.c.l.b16 %v3852_v38 }
 0x1e1   : > { %4906 = vmatmul.msk.bf16.gmra.mxu3 %vm702_vm4, %v3548_v45  ;;  %v3340_v45 = vshrl.u32 %v4877_v37, 16  ;;  %v2522_v37 = vrot.slane %v5064_v61, 5  ;;  %v3345_v28 = vrot.slane %v3343_v20, 5  ;;  %v6157_v35 = vrot.slane %v3349_v33, 5 }
 0x1e2   : > { %v3549_v59 = vpack.c.b16 %v3526_v26, %v3525_v9  ;;  %v4924_v9 = vld [vmem:[%s5144_s30 + $0x84] sm:$0xe]  ;;  %v3858_v26 = vrot.slane %v6134_v34, 5 }
 0x1e3   : > { %v2353_v12 = vpop.f32.mrf.mxu0  ;;  %v3342_v32 = vrot.slane %v3340_v45, 4  ;;  %v2523_v16 = vsel %vm5330_vm7, %v2521_v0, %v2522_v37  ;;  %v4940_v37 = vrot.slane %v4924_v9, 9 }
 0x1e4   : > { %v1699_v11 = vpop.f32.mrf.mxu3  ;;  %v2676_v10 = vpop.f32.mrf.mxu1  ;;  %v2587_v38 = vunpack.c.l.b16 %v2523_v16 }
 0x1e5   : > { %v1734_v48 = vadd.f32 %v1699_v11, %v1447_v7  ;;  %v5007_v7 = vld [vmem:[%s5144_s30 + $0x78] sm:$0xff]  ;;  %v4879_v11 = vld [vmem:[%s5144_s30 + $0x8c] sm:$0x1] }
 0x1e6   : > { %4955 = vmatmul.msk.bf16.gmra.mxu0 %vm702_vm4, %v3946_v47  ;;  %v3359_v33 = vshll.u32 %v4879_v11, 16 }
 0x1e7   : > { %v1414_v14 = vpop.f32.mrf.mxu2  ;;  %4729 = vmatmul.msk.bf16.gmra.mxu1 %vm702_vm4, %v2608_v43  ;;  %v6155_v47 = vadd.f32 %v2353_v12, %v1734_v48  ;;  %v3355_v43 = vrot.slane %v3353_v49, 4  ;;  %v2520_v12 = vsel %vm5330_vm7, %v4713_v60, %v2519_v17  ;;  %v3346_v48 = vor.u32 %v3345_v28, %v3342_v32  ;;  %v6171_v17 = vld [vmem:[%s5144_s30 + $0x94] sm:$0xf] }
 0x1e8   : > { %v1448_v55 = vadd.f32 %v1414_v14, %v1062_v56  ;;  %v2756_v49 = vadd.f32 %v2676_v10, %v5609_v46  ;;  %v2586_v14 = vunpack.c.l.b16 %v2520_v12  ;;  %v3361_v61 = vrot.slane %v3359_v33, 5  ;;  %v5065_v12 = vld [vmem:[%s5144_s30 + $0x88] sm:$0xf] }
 0x1e9   : > { %v3356_v20 = vor.u32 %v3355_v43, %v6157_v35  ;;  %v3364_v46 = vshrl.u32 %v4880_v24, 16  ;;  %v3367_v10 = vshll.u32 %v4880_v24, 16  ;;  %v3860_v43 = vrot.slane %v3858_v26, 4 }
 0x1ea   : > { %v2609_v34 = vpack.c.b16 %v2587_v38, %v2586_v14  ;;  %v2526_v16 = vrot.slane %v5065_v12, 5  ;;  %v3859_v33 = vsel %vm5330_vm7, %v4940_v37, %v3858_v26 }
 0x1eb   : > { %v2355_v6 = vpop.f32.mrf.mxu0  ;;  %v3357_v0 = vrot.slane %v3356_v20, 4 }
 0x1ec   : > { %v1701_v62 = vpop.f32.mrf.mxu3  ;;  %4842 = vmatmul.msk.bf16.gmra.mxu2 %vm702_vm4, %v5007_v7  ;;  %v2678_v41 = vpop.f32.mrf.mxu1  ;;  %v3947_v7 = vpack.c.b16 %v3924_v25, %v3923_v58  ;;  %v3861_v58 = vrot.slane %v4879_v11, 5 }
 0x1ed   : > { %v1735_v45 = vadd.f32 %v1701_v62, %v1448_v55  ;;  %v3347_v55 = vrot.slane %v3346_v48, 4  ;;  %v3373_v62 = vshll.u32 %v6171_v17, 16  ;;  %v3377_v48 = vshrl.u32 %v6171_v17, 16 }
 0x1ee   : > { %v3362_v11 = vsel %vm5156_vm3, %v3357_v0, %v3361_v61  ;;  %v3862_v9 = vsel %vm5330_vm7, %v3860_v43, %v3861_v58  ;;  %v5066_v0 = vld [vmem:[%s5144_s30 + $0x8c] sm:$0x1] }
 0x1ef   : > { %v2963_v56 = vpop.f32.mrf.mxu2  ;;  %v6174_v32 = vadd.f32 %v2355_v6, %v1735_v45  ;;  %v3352_v6 = vsel %vm5156_vm3, %v3347_v55, %v6157_v35  ;;  %v4698_v45 = vld [vmem:[%s5144_s30 + $0x84] sm:$0xe]  ;;  %v2757_v35 = vadd.f32 %v2678_v41, %v5622_v42  ;;  %v6198_v24 = vrot.slane %v3373_v62, 5  ;;  %v4882_v42 = vld [vmem:[%s5144_s30 + $0x98] sm:$0x1] }
 0x1f0   : > { %v3043_v60 = vadd.f32 %v2963_v56, %v2756_v49  ;;  %v3366_v49 = vrot.slane %v3364_v46, 4  ;;  %v3369_v56 = vrot.slane %v3367_v10, 5  ;;  %v2528_v55 = vrot.slane %v2526_v16, 4 }
 0x1f1   : > { %4907 = vmatmul.msk.bf16.gmra.mxu3 %vm702_vm4, %v3549_v59  ;;  %v2529_v61 = vrot.slane %v5066_v0, 5  ;;  %v3379_v26 = vrot.slane %v3377_v48, 4  ;;  %v3527_v46 = vunpack.c.l.b16 %v3352_v6  ;;  %v3528_v10 = vunpack.c.l.b16 %v3362_v11 }
 0x1f2   : > { %v3370_v41 = vor.u32 %v3369_v56, %v3366_v49  ;;  %v3865_v49 = vrot.slane %v6171_v17, 5 }
 0x1f3   : > { %v4015_v28 = vpop.f32.mrf.mxu0  ;;  %v2530_v62 = vsel %vm5330_vm7, %v2528_v55, %v2529_v61  ;;  %v3380_v48 = vor.u32 %v3379_v26, %v6198_v24  ;;  %v6215_v26 = vld [vmem:[%s5144_s30 + $0xa0] sm:$0xf] }
 0x1f4   : > { %v3617_v25 = vpop.f32.mrf.mxu3  ;;  %v2681_v59 = vpop.f32.mrf.mxu1  ;;  %v3371_v11 = vrot.slane %v3370_v41, 4 }
 0x1f5   : > { %v3697_v20 = vadd.f32 %v3617_v25, %v3043_v60  ;;  %v4714_v60 = vrot.slane %v4698_v45, 9  ;;  %v3926_v25 = vunpack.c.l.b16 %v3862_v9  ;;  %v3550_v45 = vpack.c.b16 %v3528_v10, %v3527_v46 }
 0x1f6   : > { %4956 = vmatmul.msk.bf16.gmra.mxu0 %vm702_vm4, %v3947_v7  ;;  %v5008_v7 = vld [vmem:[%s5144_s30 + $0x84] sm:$0xff]  ;;  %v3381_v0 = vrot.slane %v3380_v48, 4 }
 0x1f7   : > { %v4095_v14 = vadd.f32 %v4015_v28, %v3697_v20  ;;  %v2965_v38 = vpop.f32.mrf.mxu2  ;;  %4730 = vmatmul.msk.bf16.gmra.mxu1 %vm702_vm4, %v2609_v34  ;;  %v3925_v34 = vunpack.c.l.b16 %v3859_v33  ;;  %v2527_v58 = vsel %vm5330_vm7, %v4714_v60, %v2526_v16  ;;  %v3383_v20 = vshll.u32 %v4882_v42, 16  ;;  %v4925_v33 = vld [vmem:[%s5144_s30 + $0x90] sm:$0xe] }
 0x1f8   : > { %v3044_v37 = vadd.f32 %v2965_v38, %v2757_v35  ;;  %v2758_v35 = vadd.f32 %v2681_v59, %v5635_v15  ;;  %v2588_v9 = vunpack.c.l.b16 %v2527_v58  ;;  %v2589_v16 = vunpack.c.l.b16 %v2530_v62 }
 0x1f9   : > { %4127 = vst [vmem:[%s6188_s18] sm:$0xff] %v4095_v14  ;;  %v4197_v60 = vmul.f32 %v4095_v14, %v4095_v14  ;;  %v3948_v55 = vpack.c.b16 %v3926_v25, %v3925_v34  ;;  %v3385_v61 = vrot.slane %v3383_v20, 5  ;;  %v4941_v10 = vrot.slane %v4925_v33, 9  ;;  %v5067_v20 = vld [vmem:[%s5144_s30 + $0x94] sm:$0xf] }
 0x1fa   : > { %v3376_v15 = vsel %vm5156_vm3, %v3371_v11, %v6198_v24  ;;  %v3868_v59 = vrot.slane %v4882_v42, 5  ;;  %v3867_v58 = vrot.slane %v3865_v49, 4  ;;  %v4699_v42 = vld [vmem:[%s5144_s30 + $0x90] sm:$0xe] }
 0x1fb   : > { %v4017_v28 = vpop.f32.mrf.mxu0  ;;  %v3386_v24 = vsel %vm5156_vm3, %v3381_v0, %v3385_v61  ;;  %v3529_v11 = vunpack.c.l.b16 %v3376_v15  ;;  %v4715_v61 = vrot.slane %v4699_v42, 9 }
 0x1fc   : > { %v3619_v12 = vpop.f32.mrf.mxu3  ;;  %4843 = vmatmul.msk.bf16.gmra.mxu2 %vm702_vm4, %v5008_v7  ;;  %v2683_v43 = vpop.f32.mrf.mxu1  ;;  %v4883_v7 = vld [vmem:[%s5144_s30 + $0x9c] sm:$0xf] }
 0x1fd   : > { %v3698_v6 = vadd.f32 %v3619_v12, %v3044_v37  ;;  %v3388_v41 = vshrl.u32 %v4883_v7, 16  ;;  %v2610_v12 = vpack.c.b16 %v2589_v16, %v2588_v9  ;;  %v2759_v16 = vadd.f32 %v2683_v43, %v5648_v13  ;;  %v4885_v43 = vld [vmem:[%s5144_s30 + $0xa4] sm:$0x1] }
 0x1fe   : > { %v3530_v13 = vunpack.c.l.b16 %v3386_v24  ;;  %v3407_v24 = vshll.u32 %v4885_v43, 16 }
 0x1ff   : > { %v4096_v56 = vadd.f32 %v4017_v28, %v3698_v6  ;;  %v2968_v38 = vpop.f32.mrf.mxu2  ;;  %v3391_v28 = vshll.u32 %v4883_v7, 16  ;;  %v2533_v6 = vrot.slane %v5067_v20, 5 }
 0x200   : > { %v3045_v17 = vadd.f32 %v2968_v38, %v2758_v35  ;;  %v3390_v35 = vrot.slane %v3388_v41, 4  ;;  %v3551_v42 = vpack.c.b16 %v3530_v13, %v3529_v11 }
 0x201   : > { %4128 = vst [vmem:[%s6188_s18 + $0x8] sm:$0xff] %v4096_v56  ;;  %v4159_v37 = vadd.f32 %v4096_v56, %v4095_v14  ;;  %v4198_v46 = vmul.f32 %v4096_v56, %v4096_v56  ;;  %4908 = vmatmul.msk.bf16.gmra.mxu3 %vm702_vm4, %v3550_v45  ;;  %v3397_v14 = vshll.u32 %v6215_v26, 16  ;;  %v3401_v45 = vshrl.u32 %v6215_v26, 16 }
 0x202   : > { %v3866_v56 = vsel %vm5330_vm7, %v4941_v10, %v3865_v49  ;;  %v3393_v38 = vrot.slane %v3391_v28, 5 }
 0x203   : > { %v4229_v34 = vadd.f32 %v4198_v46, %v4197_v60  ;;  %v4020_v25 = vpop.f32.mrf.mxu0  ;;  %v3869_v60 = vsel %vm5330_vm7, %v3867_v58, %v3868_v59  ;;  %v6235_v0 = vrot.slane %v3397_v14, 5  ;;  %v2535_v46 = vrot.slane %v2533_v6, 4 }
 0x204   : > { %v3622_v62 = vpop.f32.mrf.mxu3  ;;  %v2686_v48 = vpop.f32.mrf.mxu1  ;;  %v3403_v49 = vrot.slane %v3401_v45, 4  ;;  %v3927_v20 = vunpack.c.l.b16 %v3866_v56  ;;  %v3928_v59 = vunpack.c.l.b16 %v3869_v60  ;;  %v2534_v45 = vsel %vm5330_vm7, %v4715_v61, %v2533_v6 }
 0x205   : > { %v3699_v33 = vadd.f32 %v3622_v62, %v3045_v17  ;;  %v5068_v17 = vld [vmem:[%s5144_s30 + $0x98] sm:$0x1]  ;;  %v2590_v60 = vunpack.c.l.b16 %v2534_v45 }
 0x206   : > { %4957 = vmatmul.msk.bf16.gmra.mxu0 %vm702_vm4, %v3948_v55  ;;  %v5009_v55 = vld [vmem:[%s5144_s30 + $0x90] sm:$0xff]  ;;  %v2536_v15 = vrot.slane %v5068_v17, 5  ;;  %v3949_v61 = vpack.c.b16 %v3928_v59, %v3927_v20  ;;  %v3409_v17 = vrot.slane %v3407_v24, 5  ;;  %v3875_v59 = vrot.slane %v4885_v43, 5 }
 0x207   : > { %v4097_v9 = vadd.f32 %v4020_v25, %v3699_v33  ;;  %v2970_v7 = vpop.f32.mrf.mxu2  ;;  %4731 = vmatmul.msk.bf16.gmra.mxu1 %vm702_vm4, %v2610_v12  ;;  %v3394_v25 = vor.u32 %v3393_v38, %v3390_v35  ;;  %v3404_v33 = vor.u32 %v3403_v49, %v6235_v0  ;;  %v4926_v35 = vld [vmem:[%s5144_s30 + $0x9c] sm:$0xe]  ;;  %v3872_v38 = vrot.slane %v6215_v26, 5 }
 0x208   : > { %v3046_v28 = vadd.f32 %v2970_v7, %v2759_v16  ;;  %v2760_v16 = vadd.f32 %v2686_v48, %v5661_v57  ;;  %v4942_v26 = vrot.slane %v4926_v35, 9 }
 0x209   : > { %4129 = vst [vmem:[%s6188_s18 + $0x10] sm:$0xff] %v4097_v9  ;;  %v4160_v10 = vadd.f32 %v4159_v37, %v4097_v9  ;;  %v4199_v41 = vmul.f32 %v4097_v9, %v4097_v9  ;;  %v2537_v37 = vsel %vm5330_vm7, %v2535_v46, %v2536_v15  ;;  %v3395_v56 = vrot.slane %v3394_v25, 4  ;;  %v6252_v15 = vld [vmem:[%s5144_s30 + $0xac] sm:$0xf] }
 0x20a   : > { %v2591_v6 = vunpack.c.l.b16 %v2537_v37  ;;  %v3405_v46 = vrot.slane %v3404_v33, 4  ;;  %v3874_v48 = vrot.slane %v3872_v38, 4  ;;  %v5069_v37 = vld [vmem:[%s5144_s30 + $0xa0] sm:$0xf]  ;;  %v3425_v24 = vshrl.u32 %v6252_v15, 16 }
 0x20b   : > { %v4230_v12 = vadd.f32 %v4229_v34, %v4199_v41  ;;  %v4022_v62 = vpop.f32.mrf.mxu0  ;;  %v3400_v57 = vsel %vm5156_vm3, %v3395_v56, %v6235_v0  ;;  %v2540_v33 = vrot.slane %v5069_v37, 5  ;;  %v3873_v43 = vsel %vm5330_vm7, %v4942_v26, %v3872_v38 }
 0x20c   : > { %v3624_v58 = vpop.f32.mrf.mxu3  ;;  %4844 = vmatmul.msk.bf16.gmra.mxu2 %vm702_vm4, %v5009_v55  ;;  %v2688_v14 = vpop.f32.mrf.mxu1  ;;  %v4886_v55 = vld [vmem:[%s5144_s30 + $0xa8] sm:$0xf]  ;;  %v2611_v20 = vpack.c.b16 %v2591_v6, %v2590_v60  ;;  %v3410_v0 = vsel %vm5156_vm3, %v3405_v46, %v3409_v17  ;;  %v3876_v60 = vsel %vm5330_vm7, %v3874_v48, %v3875_v59  ;;  %v5070_v17 = vld [vmem:[%s5144_s30 + $0xa4] sm:$0x1]  ;;  %v3427_v38 = vrot.slane %v3425_v24, 4 }
 0x20d   : > { %v3700_v34 = vadd.f32 %v3624_v58, %v3046_v28  ;;  %v3412_v28 = vshrl.u32 %v4886_v55, 16  ;;  %v3415_v13 = vshll.u32 %v4886_v55, 16  ;;  %v5010_v55 = vld [vmem:[%s5144_s30 + $0x9c] sm:$0xff]  ;;  %v2542_v46 = vrot.slane %v2540_v33, 4 }
 0x20e   : > { %v3930_v48 = vunpack.c.l.b16 %v3876_v60 }
 0x20f   : > { %v4098_v9 = vadd.f32 %v4022_v62, %v3700_v34  ;;  %v2973_v7 = vpop.f32.mrf.mxu2  ;;  %v3414_v56 = vrot.slane %v3412_v28, 4  ;;  %v3417_v35 = vrot.slane %v3415_v13, 5 }
 0x210   : > { %v3047_v41 = vadd.f32 %v2973_v7, %v2760_v16  ;;  %v2761_v16 = vadd.f32 %v2688_v14, %v5674_v54  ;;  %v3532_v54 = vunpack.c.l.b16 %v3410_v0  ;;  %v4888_v14 = vld [vmem:[%s5144_s30 + $0xb0] sm:$0x1] }
 0x211   : > { %4130 = vst [vmem:[%s6188_s18 + $0x18] sm:$0xff] %v4098_v9  ;;  %v4161_v49 = vadd.f32 %v4160_v10, %v4098_v9  ;;  %v4200_v11 = vmul.f32 %v4098_v9, %v4098_v9  ;;  %4909 = vmatmul.msk.bf16.gmra.mxu3 %vm702_vm4, %v3551_v42  ;;  %v3421_v10 = vshll.u32 %v6252_v15, 16  ;;  %v4700_v42 = vld [vmem:[%s5144_s30 + $0x9c] sm:$0xe]  ;;  %v3418_v28 = vor.u32 %v3417_v35, %v3414_v56 }
 0x212   : > { %v3431_v24 = vshll.u32 %v4888_v14, 16 }
 0x213   : > { %v4231_v25 = vadd.f32 %v4230_v12, %v4200_v11  ;;  %v4025_v62 = vpop.f32.mrf.mxu0  ;;  %v3531_v12 = vunpack.c.l.b16 %v3400_v57  ;;  %v6272_v6 = vrot.slane %v3421_v10, 5  ;;  %v2543_v11 = vrot.slane %v5070_v17, 5 }
 0x214   : > { %v3627_v58 = vpop.f32.mrf.mxu3  ;;  %v2691_v45 = vpop.f32.mrf.mxu1  ;;  %v3419_v0 = vrot.slane %v3418_v28, 4 }
 0x215   : > { %v3701_v34 = vadd.f32 %v3627_v58, %v3047_v41  ;;  %v3428_v37 = vor.u32 %v3427_v38, %v6272_v6  ;;  %v2762_v35 = vadd.f32 %v2691_v45, %v5686_v31  ;;  %v3882_v38 = vrot.slane %v4888_v14, 5  ;;  %v4701_v14 = vld [vmem:[%s5144_s30 + $0xa8] sm:$0xe] }
 0x216   : > { %4958 = vmatmul.msk.bf16.gmra.mxu0 %vm702_vm4, %v3949_v61  ;;  %v4716_v61 = vrot.slane %v4700_v42, 9  ;;  %v4927_v42 = vld [vmem:[%s5144_s30 + $0xa8] sm:$0xe]  ;;  %v3424_v31 = vsel %vm5156_vm3, %v3419_v0, %v6272_v6 }
 0x217   : > { %v4099_v9 = vadd.f32 %v4025_v62, %v3701_v34  ;;  %v2975_v7 = vpop.f32.mrf.mxu2  ;;  %4732 = vmatmul.msk.bf16.gmra.mxu1 %vm702_vm4, %v2611_v20  ;;  %v3929_v20 = vunpack.c.l.b16 %v3873_v43  ;;  %v3552_v34 = vpack.c.b16 %v3532_v54, %v3531_v12  ;;  %v3879_v43 = vrot.slane %v6252_v15, 5 }
 0x218   : > { %v3048_v57 = vadd.f32 %v2975_v7, %v2761_v16  ;;  %v2541_v58 = vsel %vm5330_vm7, %v4716_v61, %v2540_v33  ;;  %v4889_v7 = vld [vmem:[%s5144_s30 + $0xb4] sm:$0xf]  ;;  %v3433_v61 = vrot.slane %v3431_v24, 5  ;;  %v4943_v15 = vrot.slane %v4927_v42, 9 }
 0x219   : > { %4131 = vst [vmem:[%s6188_s18 + $0x20] sm:$0xff] %v4099_v9  ;;  %v4162_v41 = vadd.f32 %v4161_v49, %v4099_v9  ;;  %v4201_v26 = vmul.f32 %v4099_v9, %v4099_v9  ;;  %v2544_v49 = vsel %vm5330_vm7, %v2542_v46, %v2543_v11  ;;  %v2592_v16 = vunpack.c.l.b16 %v2541_v58  ;;  %v6289_v46 = vld [vmem:[%s5144_s30 + $0xb8] sm:$0xf] }
 0x21a   : > { %v2593_v33 = vunpack.c.l.b16 %v2544_v49  ;;  %v3950_v60 = vpack.c.b16 %v3930_v48, %v3929_v20  ;;  %v3881_v45 = vrot.slane %v3879_v43, 4  ;;  %v3449_v49 = vshrl.u32 %v6289_v46, 16 }
 0x21b   : > { %v4232_v13 = vadd.f32 %v4231_v25, %v4201_v26  ;;  %v4027_v62 = vpop.f32.mrf.mxu0  ;;  %v3436_v26 = vshrl.u32 %v4889_v7, 16  ;;  %v3880_v24 = vsel %vm5330_vm7, %v4943_v15, %v3879_v43 }
 0x21c   : > { %v3629_v59 = vpop.f32.mrf.mxu3  ;;  %4845 = vmatmul.msk.bf16.gmra.mxu2 %vm702_vm4, %v5010_v55  ;;  %v2693_v10 = vpop.f32.mrf.mxu1  ;;  %v3429_v55 = vrot.slane %v3428_v37, 4  ;;  %v2612_v28 = vpack.c.b16 %v2593_v33, %v2592_v16  ;;  %v5011_v16 = vld [vmem:[%s5144_s30 + $0xa8] sm:$0xff]  ;;  %v4717_v33 = vrot.slane %v4701_v14, 9  ;;  %v3451_v43 = vrot.slane %v3449_v49, 4 }
 0x21d   : > { %v3702_v25 = vadd.f32 %v3629_v59, %v3048_v57  ;;  %v5071_v59 = vld [vmem:[%s5144_s30 + $0xac] sm:$0xf]  ;;  %v2763_v42 = vadd.f32 %v2693_v10, %v5699_v44 }
 0x21e   : > { %v2547_v58 = vrot.slane %v5071_v59, 5  ;;  %v3434_v6 = vsel %vm5156_vm3, %v3429_v55, %v3433_v61 }
 0x21f   : > { %v4100_v56 = vadd.f32 %v4027_v62, %v3702_v25  ;;  %v2978_v9 = vpop.f32.mrf.mxu2  ;;  %v3439_v62 = vshll.u32 %v4889_v7, 16  ;;  %v3883_v25 = vsel %vm5330_vm7, %v3881_v45, %v3882_v38  ;;  %v3534_v15 = vunpack.c.l.b16 %v3434_v6 }
 0x220   : > { %v3049_v11 = vadd.f32 %v2978_v9, %v2762_v35  ;;  %v2549_v7 = vrot.slane %v2547_v58, 4  ;;  %v3931_v45 = vunpack.c.l.b16 %v3880_v24  ;;  %v3932_v38 = vunpack.c.l.b16 %v3883_v25  ;;  %v4892_v25 = vld [vmem:[%s5144_s30 + $0xc0] sm:$0xf] }
 0x221   : > { %4132 = vst [vmem:[%s6188_s18 + $0x28] sm:$0xff] %v4100_v56  ;;  %v4163_v17 = vadd.f32 %v4162_v41, %v4100_v56  ;;  %v4202_v12 = vmul.f32 %v4100_v56, %v4100_v56  ;;  %4910 = vmatmul.msk.bf16.gmra.mxu3 %vm702_vm4, %v3552_v34  ;;  %v3445_v41 = vshll.u32 %v6289_v46, 16  ;;  %v3438_v34 = vrot.slane %v3436_v26, 4 }
 0x222   : > { %v3441_v35 = vrot.slane %v3439_v62, 5 }
 0x223   : > { %v4233_v57 = vadd.f32 %v4232_v13, %v4202_v12  ;;  %v4030_v54 = vpop.f32.mrf.mxu0  ;;  %v3533_v13 = vunpack.c.l.b16 %v3424_v31  ;;  %v6309_v9 = vrot.slane %v3445_v41, 5  ;;  %v6315_v31 = vld [vmem:[%s5144_s30 + $0xbc] sm:$0x1] }
 0x224   : > { %v3632_v20 = vpop.f32.mrf.mxu3  ;;  %v2696_v48 = vpop.f32.mrf.mxu1  ;;  %v3442_v62 = vor.u32 %v3441_v35, %v3438_v34  ;;  %v3455_v59 = vshll.u32 %v6315_v31, 16 }
 0x225   : > { %v3703_v37 = vadd.f32 %v3632_v20, %v3049_v11  ;;  %v3452_v41 = vor.u32 %v3451_v43, %v6309_v9  ;;  %v3553_v20 = vpack.c.b16 %v3534_v15, %v3533_v13 }
 0x226   : > { %4959 = vmatmul.msk.bf16.gmra.mxu0 %vm702_vm4, %v3950_v60  ;;  %v5072_v60 = vld [vmem:[%s5144_s30 + $0xb0] sm:$0x1] }
 0x227   : > { %v4101_v0 = vadd.f32 %v4030_v54, %v3703_v37  ;;  %v2980_v56 = vpop.f32.mrf.mxu2  ;;  %4733 = vmatmul.msk.bf16.gmra.mxu1 %vm702_vm4, %v2612_v28  ;;  %v2550_v55 = vrot.slane %v5072_v60, 5  ;;  %v2548_v28 = vsel %vm5330_vm7, %v4717_v33, %v2547_v58  ;;  %v2764_v37 = vadd.f32 %v2696_v48, %v5713_v30  ;;  %v6327_v58 = vld [vmem:[%s5144_s30 + $0xc4] sm:$0xf]  ;;  %v4928_v33 = vld [vmem:[%s5144_s30 + $0xb4] sm:$0xe] }
 0x228   : > { %v3050_v11 = vadd.f32 %v2980_v56, %v2763_v42  ;;  %v2594_v14 = vunpack.c.l.b16 %v2548_v28  ;;  %v3443_v42 = vrot.slane %v3442_v62, 4  ;;  %v3453_v56 = vrot.slane %v3452_v41, 4 }
 0x229   : > { %4133 = vst [vmem:[%s6188_s18 + $0x30] sm:$0xff] %v4101_v0  ;;  %v4164_v61 = vadd.f32 %v4163_v17, %v4101_v0  ;;  %v4203_v12 = vmul.f32 %v4101_v0, %v4101_v0  ;;  %v2551_v17 = vsel %vm5330_vm7, %v2549_v7, %v2550_v55  ;;  %v3951_v0 = vpack.c.b16 %v3932_v38, %v3931_v45 }
 0x22a   : > { %v2595_v24 = vunpack.c.l.b16 %v2551_v17  ;;  %v3460_v7 = vshrl.u32 %v4892_v25, 16  ;;  %v3463_v30 = vshll.u32 %v4892_v25, 16  ;;  %v3469_v48 = vshll.u32 %v6327_v58, 16 }
 0x22b   : > { %v4234_v44 = vadd.f32 %v4233_v57, %v4203_v12  ;;  %v4032_v10 = vpop.f32.mrf.mxu0  ;;  %v3473_v60 = vshrl.u32 %v6327_v58, 16  ;;  %v4944_v17 = vrot.slane %v4928_v33, 9 }
 0x22c   : > { %v3634_v26 = vpop.f32.mrf.mxu3  ;;  %4846 = vmatmul.msk.bf16.gmra.mxu2 %vm702_vm4, %v5011_v16  ;;  %v2698_v54 = vpop.f32.mrf.mxu1  ;;  %v3457_v16 = vrot.slane %v3455_v59, 5  ;;  %v2613_v12 = vpack.c.b16 %v2595_v24, %v2594_v14  ;;  %v3465_v62 = vrot.slane %v3463_v30, 5  ;;  %v6343_v41 = vrot.slane %v3469_v48, 5  ;;  %v5012_v14 = vld [vmem:[%s5144_s30 + $0xb4] sm:$0xff] }
 0x22d   : > { %v3704_v57 = vadd.f32 %v3634_v26, %v3050_v11  ;;  %v3886_v11 = vrot.slane %v6289_v46, 5  ;;  %v3448_v26 = vsel %vm5156_vm3, %v3443_v42, %v6309_v9  ;;  %v3462_v46 = vrot.slane %v3460_v7, 4  ;;  %v5074_v42 = vld [vmem:[%s5144_s30 + $0xbc] sm:$0x1] }
 0x22e   : > { %v3458_v28 = vsel %vm5156_vm3, %v3453_v56, %v3457_v16  ;;  %v2765_v59 = vadd.f32 %v2698_v54, %v5726_v51  ;;  %v3535_v24 = vunpack.c.l.b16 %v3448_v26  ;;  %v2557_v56 = vrot.slane %v5074_v42, 5 }
 0x22f   : > { %v4102_v49 = vadd.f32 %v4032_v10, %v3704_v57  ;;  %v2983_v6 = vpop.f32.mrf.mxu2  ;;  %v5073_v10 = vld [vmem:[%s5144_s30 + $0xb8] sm:$0xf]  ;;  %v3475_v57 = vrot.slane %v3473_v60, 4  ;;  %v3888_v9 = vrot.slane %v3886_v11, 4  ;;  %v3536_v33 = vunpack.c.l.b16 %v3458_v28 }
 0x230   : > { %v3051_v13 = vadd.f32 %v2983_v6, %v2764_v37  ;;  %v2554_v45 = vrot.slane %v5073_v10, 5  ;;  %v3889_v37 = vrot.slane %v6315_v31, 5  ;;  %v6349_v6 = vld [vmem:[%s5144_s30 + $0xc8] sm:$0x1]  ;;  %v3887_v51 = vsel %vm5330_vm7, %v4944_v17, %v3886_v11 }
 0x231   : > { %4134 = vst [vmem:[%s6188_s18 + $0x38] sm:$0xff] %v4102_v49  ;;  %v4165_v34 = vadd.f32 %v4164_v61, %v4102_v49  ;;  %v4204_v35 = vmul.f32 %v4102_v49, %v4102_v49  ;;  %4911 = vmatmul.msk.bf16.gmra.mxu3 %vm702_vm4, %v3553_v20  ;;  %v3466_v54 = vor.u32 %v3465_v62, %v3462_v46  ;;  %v3479_v31 = vshll.u32 %v6349_v6, 16 }
 0x232   : > { %v3476_v7 = vor.u32 %v3475_v57, %v6343_v41  ;;  %v3890_v60 = vsel %vm5330_vm7, %v3888_v9, %v3889_v37  ;;  %v3554_v10 = vpack.c.b16 %v3536_v33, %v3535_v24  ;;  %v4895_v9 = vld [vmem:[%s5144_s30 + $0xcc] sm:$0xf]  ;;  %v3893_v24 = vrot.slane %v6327_v58, 5 }
 0x233   : > { %v4235_v55 = vadd.f32 %v4234_v44, %v4204_v35  ;;  %v4035_v43 = vpop.f32.mrf.mxu0  ;;  %v4702_v44 = vld [vmem:[%s5144_s30 + $0xb4] sm:$0xe]  ;;  %v3467_v26 = vrot.slane %v3466_v54, 4  ;;  %v3481_v17 = vrot.slane %v3479_v31, 5  ;;  %v3487_v31 = vshll.u32 %v4895_v9, 16 }
 0x234   : > { %v3637_v61 = vpop.f32.mrf.mxu3  ;;  %v2701_v15 = vpop.f32.mrf.mxu1  ;;  %v4718_v25 = vrot.slane %v4702_v44, 9  ;;  %v3477_v28 = vrot.slane %v3476_v7, 4  ;;  %v4703_v7 = vld [vmem:[%s5144_s30 + $0xc0] sm:$0xe] }
 0x235   : > { %v3705_v38 = vadd.f32 %v3637_v61, %v3051_v13  ;;  %v2766_v46 = vadd.f32 %v2701_v15, %v5742_v1  ;;  %v3472_v15 = vsel %vm5156_vm3, %v3467_v26, %v6343_v41  ;;  %v4719_v26 = vrot.slane %v4703_v7, 9 }
 0x236   : > { %4960 = vmatmul.msk.bf16.gmra.mxu0 %vm702_vm4, %v3951_v0  ;;  %v2556_v0 = vrot.slane %v2554_v45, 4  ;;  %v3482_v42 = vsel %vm5156_vm3, %v3477_v28, %v3481_v17  ;;  %v5076_v17 = vld [vmem:[%s5144_s30 + $0xc8] sm:$0x1] }
 0x237   : > { %v4103_v20 = vadd.f32 %v4035_v43, %v3705_v38  ;;  %v2985_v49 = vpop.f32.mrf.mxu2  ;;  %4734 = vmatmul.msk.bf16.gmra.mxu1 %vm702_vm4, %v2613_v12  ;;  %v2555_v12 = vsel %vm5330_vm7, %v4718_v25, %v2554_v45  ;;  %v3933_v38 = vunpack.c.l.b16 %v3887_v51  ;;  %v3484_v51 = vshrl.u32 %v4895_v9, 16 }
 0x238   : > { %v3052_v16 = vadd.f32 %v2985_v49, %v2765_v59  ;;  %v2558_v11 = vsel %vm5330_vm7, %v2556_v0, %v2557_v56  ;;  %v2596_v57 = vunpack.c.l.b16 %v2555_v12  ;;  %v6377_v56 = vld [vmem:[%s5144_s30 + $0xd0] sm:$0xf]  ;;  %v3538_v41 = vunpack.c.l.b16 %v3482_v42  ;;  %v6480_v12 = vld [vmem:[#allocation2_spill] sm:$0xff] }
 0x239   : > { %4135 = vst [vmem:[%s6188_s18 + $0x40] sm:$0xff] %v4103_v20  ;;  %v4166_v35 = vadd.f32 %v4165_v34, %v4103_v20  ;;  %v4205_v13 = vmul.f32 %v4103_v20, %v4103_v20  ;;  %v2597_v20 = vunpack.c.l.b16 %v2558_v11 }
 0x23b   : > { %v4236_v30 = vadd.f32 %v4235_v55, %v4205_v13  ;;  %v4037_v48 = vpop.f32.mrf.mxu0  ;;  %v3934_v55 = vunpack.c.l.b16 %v3890_v60  ;;  %v2614_v1 = vpack.c.b16 %v2597_v20, %v2596_v57  ;;  %v3497_v60 = vshrl.u32 %v6377_v56, 16 }
 0x23c   : > { %v3639_v43 = vpop.f32.mrf.mxu3  ;;  %4847 = vmatmul.msk.bf16.gmra.mxu2 %vm702_vm4, %v5012_v14  ;;  %v2703_v34 = vpop.f32.mrf.mxu1  ;;  %v4929_v14 = vld [vmem:[%s5144_s30 + $0xc0] sm:$0xe] }
 0x23d   : > { %v3706_v61 = vadd.f32 %v3639_v43, %v3052_v16  ;;  %v3952_v37 = vpack.c.b16 %v3934_v55, %v3933_v38  ;;  %v5075_v16 = vld [vmem:[%s5144_s30 + $0xc4] sm:$0xf]  ;;  %v4945_v58 = vrot.slane %v4929_v14, 9  ;;  %v2767_v11 = vadd.f32 %v2703_v34, %v6480_v12 }
 0x23e   : > { %v2561_v33 = vrot.slane %v5075_v16, 5  ;;  %v3896_v38 = vrot.slane %v6349_v6, 5  ;;  %v5013_v55 = vld [vmem:[%s5144_s30 + $0xc0] sm:$0xff]  ;;  %v3499_v34 = vrot.slane %v3497_v60, 4 }
 0x23f   : > { %v4104_v44 = vadd.f32 %v4037_v48, %v3706_v61  ;;  %v2988_v62 = vpop.f32.mrf.mxu2  ;;  %v3493_v48 = vshll.u32 %v6377_v56, 16  ;;  %v3894_v14 = vsel %vm5330_vm7, %v4945_v58, %v3893_v24 }
 0x240   : > { %v3053_v49 = vadd.f32 %v2988_v62, %v2766_v46  ;;  %v2563_v28 = vrot.slane %v2561_v33, 4  ;;  %v3486_v46 = vrot.slane %v3484_v51, 4  ;;  %v3935_v51 = vunpack.c.l.b16 %v3894_v14 }
 0x241   : > { %4136 = vst [vmem:[%s6188_s18 + $0x48] sm:$0xff] %v4104_v44  ;;  %v4167_v45 = vadd.f32 %v4166_v35, %v4104_v44  ;;  %v4206_v59 = vmul.f32 %v4104_v44, %v4104_v44  ;;  %4912 = vmatmul.msk.bf16.gmra.mxu3 %vm702_vm4, %v3554_v10  ;;  %v3895_v10 = vrot.slane %v3893_v24, 4  ;;  %v2564_v44 = vrot.slane %v5076_v17, 5 }
 0x243   : > { %v4237_v25 = vadd.f32 %v4236_v30, %v4206_v59  ;;  %v4040_v0 = vpop.f32.mrf.mxu0  ;;  %v3537_v30 = vunpack.c.l.b16 %v3472_v15  ;;  %v3489_v59 = vrot.slane %v3487_v31, 5  ;;  %v3897_v6 = vsel %vm5330_vm7, %v3895_v10, %v3896_v38 }
 0x244   : > { %v3642_v35 = vpop.f32.mrf.mxu3  ;;  %v2706_v13 = vpop.f32.mrf.mxu1  ;;  %v2565_v42 = vsel %vm5330_vm7, %v2563_v28, %v2564_v44  ;;  %v3936_v24 = vunpack.c.l.b16 %v3897_v6  ;;  %v4930_v28 = vld [vmem:[%s5144_s30 + $0xcc] sm:$0xe] }
 0x245   : > { %v3707_v54 = vadd.f32 %v3642_v35, %v3053_v49  ;;  %v3495_v49 = vrot.slane %v3493_v48, 5  ;;  %v3555_v35 = vpack.c.b16 %v3538_v41, %v3537_v30  ;;  %v3490_v16 = vor.u32 %v3489_v59, %v3486_v46 }
 0x246   : > { %4961 = vmatmul.msk.bf16.gmra.mxu0 %vm702_vm4, %v3952_v37  ;;  %v2768_v31 = vadd.f32 %v2706_v13, %v5778_v52  ;;  %v3953_v30 = vpack.c.b16 %v3936_v24, %v3935_v51  ;;  %v3900_v52 = vrot.slane %v6377_v56, 5 }
 0x247   : > { %v4105_v43 = vadd.f32 %v4040_v0, %v3707_v54  ;;  %v2990_v61 = vpop.f32.mrf.mxu2  ;;  %4735 = vmatmul.msk.bf16.gmra.mxu1 %vm702_vm4, %v2614_v1  ;;  %v4897_v0 = vld [vmem:[%s5144_s30 + $0xd4] sm:$0x1]  ;;  %v3500_v54 = vor.u32 %v3499_v34, %v3495_v49 }
 0x248   : > { %v3054_v20 = vadd.f32 %v2990_v61, %v2767_v11  ;;  %v3503_v58 = vshll.u32 %v4897_v0, 16  ;;  %v3491_v61 = vrot.slane %v3490_v16, 4  ;;  %v3902_v56 = vrot.slane %v3900_v52, 4 }
 0x249   : > { %4137 = vst [vmem:[%s6188_s18 + $0x50] sm:$0xff] %v4105_v43  ;;  %v4168_v62 = vadd.f32 %v4167_v45, %v4105_v43  ;;  %v4207_v57 = vmul.f32 %v4105_v43, %v4105_v43  ;;  %v2562_v45 = vsel %vm5330_vm7, %v4719_v26, %v2561_v33  ;;  %v2599_v43 = vunpack.c.l.b16 %v2565_v42 }
 0x24a   : > { %v2598_v60 = vunpack.c.l.b16 %v2562_v45  ;;  %v3501_v41 = vrot.slane %v3500_v54, 4  ;;  %v3505_v10 = vrot.slane %v3503_v58, 5  ;;  %v3496_v46 = vsel %vm5156_vm3, %v3491_v61, %v3495_v49 }
 0x24b   : > { %v4238_v9 = vadd.f32 %v4237_v25, %v4207_v57  ;;  %v4042_v37 = vpop.f32.mrf.mxu0  ;;  %v4946_v57 = vrot.slane %v4930_v28, 9  ;;  %v3539_v14 = vunpack.c.l.b16 %v3496_v46 }
 0x24c   : > { %v3644_v1 = vpop.f32.mrf.mxu3  ;;  %4848 = vmatmul.msk.bf16.gmra.mxu2 %vm702_vm4, %v5013_v55  ;;  %v2708_v15 = vpop.f32.mrf.mxu1  ;;  %v2615_v26 = vpack.c.b16 %v2599_v43, %v2598_v60 }
 0x24d   : > { %v3708_v25 = vadd.f32 %v3644_v1, %v3054_v20  ;;  %v2769_v59 = vadd.f32 %v2708_v15, %v5798_v21 }
 0x24f   : > { %v4106_v7 = vadd.f32 %v4042_v37, %v3708_v25  ;;  %v2993_v48 = vpop.f32.mrf.mxu2  ;;  %v5014_v37 = vld [vmem:[%s5144_s30 + $0xcc] sm:$0xff]  ;;  %v3901_v25 = vsel %vm5330_vm7, %v4946_v57, %v3900_v52 }
 0x250   : > { %v3055_v11 = vadd.f32 %v2993_v48, %v2768_v31  ;;  %v3937_v51 = vunpack.c.l.b16 %v3901_v25 }
 0x251   : > { %4138 = vst [vmem:[%s6188_s18 + $0x58] sm:$0xff] %v4106_v7  ;;  %v4169_v12 = vadd.f32 %v4168_v62, %v4106_v7  ;;  %v4208_v33 = vmul.f32 %v4106_v7, %v4106_v7  ;;  %4913 = vmatmul.msk.bf16.gmra.mxu3 %vm702_vm4, %v3555_v35  ;;  %v3506_v62 = vsel %vm5156_vm3, %v3501_v41, %v3505_v10  ;;  %v6481_v41 = vld [vmem:[#allocation3_spill] sm:$0xff] }
 0x252   : > { %v3540_v45 = vunpack.c.l.b16 %v3506_v62 }
 0x253   : > { %v4239_v38 = vadd.f32 %v4238_v9, %v4208_v33  ;;  %v4045_v55 = vpop.f32.mrf.mxu0  ;;  %v3903_v9 = vrot.slane %v4897_v0, 5 }
 0x254   : > { %v3647_v13 = vpop.f32.mrf.mxu3  ;;  %v2711_v17 = vpop.f32.mrf.mxu1  ;;  %v3556_v16 = vpack.c.b16 %v3540_v45, %v3539_v14 }
 0x255   : > { %v3709_v44 = vadd.f32 %v3647_v13, %v3055_v11  ;;  %v3904_v21 = vsel %vm5330_vm7, %v3902_v56, %v3903_v9  ;;  %v2770_v58 = vadd.f32 %v2711_v17, %v5817_v29 }
 0x256   : > { %4962 = vmatmul.msk.bf16.gmra.mxu0 %vm702_vm4, %v3953_v30  ;;  %v3938_v24 = vunpack.c.l.b16 %v3904_v21 }
 0x257   : > { %v4107_v20 = vadd.f32 %v4045_v55, %v3709_v44  ;;  %v2995_v34 = vpop.f32.mrf.mxu2  ;;  %4736 = vmatmul.msk.bf16.gmra.mxu1 %vm702_vm4, %v2615_v26 }
 0x258   : > { %v3056_v49 = vadd.f32 %v2995_v34, %v2769_v59  ;;  %v3954_v60 = vpack.c.b16 %v3938_v24, %v3937_v51 }
 0x259   : > { %4139 = vst [vmem:[%s6188_s18 + $0x60] sm:$0xff] %v4107_v20  ;;  %v4170_v6 = vadd.f32 %v4169_v12, %v4107_v20  ;;  %v4209_v1 = vmul.f32 %v4107_v20, %v4107_v20 }
 0x25b   : > { %v4240_v42 = vadd.f32 %v4239_v38, %v4209_v1  ;;  %v4047_v36 = vpop.f32.mrf.mxu0 }
 0x25c   : > { %v3649_v15 = vpop.f32.mrf.mxu3  ;;  %4849 = vmatmul.msk.bf16.gmra.mxu2 %vm702_vm4, %v5014_v37  ;;  %v2713_v0 = vpop.f32.mrf.mxu1 }
 0x25d   : > { %v3710_v35 = vadd.f32 %v3649_v15, %v3056_v49  ;;  %v2771_v29 = vadd.f32 %v2713_v0, %v6481_v41 }
 0x25f   : > { %v4108_v54 = vadd.f32 %v4047_v36, %v3710_v35  ;;  %v2998_v7 = vpop.f32.mrf.mxu2 }
 0x260   : > { %v3057_v18 = vadd.f32 %v2998_v7, %v2770_v58 }
 0x261   : > { %4140 = vst [vmem:[%s6188_s18 + $0x68] sm:$0xff] %v4108_v54  ;;  %v4171_v31 = vadd.f32 %v4170_v6, %v4108_v54  ;;  %v4210_v48 = vmul.f32 %v4108_v54, %v4108_v54  ;;  %4914 = vmatmul.msk.bf16.gmra.mxu3 %vm702_vm4, %v3556_v16 }
 0x263   : > { %v4241_v43 = vadd.f32 %v4240_v42, %v4210_v48  ;;  %v4050_v12 = vpop.f32.mrf.mxu0 }
 0x264   : > { %v3652_v33 = vpop.f32.mrf.mxu3  ;;  %v2716_v11 = vpop.f32.mrf.mxu1 }
 0x265   : > { %v3711_v61 = vadd.f32 %v3652_v33, %v3057_v18  ;;  %v2772_v62 = vadd.f32 %v2716_v11, %v5860_v5 }
 0x266   : > { %4963 = vmatmul.msk.bf16.gmra.mxu0 %vm702_vm4, %v3954_v60 }
 0x267   : > { %v4109_v30 = vadd.f32 %v4050_v12, %v3711_v61  ;;  %v3000_v10 = vpop.f32.mrf.mxu2 }
 0x268   : > { %v3058_v26 = vadd.f32 %v3000_v10, %v2771_v29 }
 0x269   : > { %4141 = vst [vmem:[%s6188_s18 + $0x70] sm:$0xff] %v4109_v30  ;;  %v4172_v38 = vadd.f32 %v4171_v31, %v4109_v30  ;;  %v4211_v55 = vmul.f32 %v4109_v30, %v4109_v30 }
 0x26b   : > { %v4242_v28 = vadd.f32 %v4241_v43, %v4211_v55  ;;  %v4052_v52 = vpop.f32.mrf.mxu0 }
 0x26c   : > { %v3654_v13 = vpop.f32.mrf.mxu3  ;;  %v2718_v17 = vpop.f32.mrf.mxu1 }
 0x26d   : > { %v3712_v44 = vadd.f32 %v3654_v13, %v3058_v26  ;;  %v2773_v49 = vadd.f32 %v2718_v17, %v5884_v22 }
 0x26f   : > { %v4110_v46 = vadd.f32 %v4052_v52, %v3712_v44  ;;  %v3003_v57 = vpop.f32.mrf.mxu2 }
 0x270   : > { %v3059_v34 = vadd.f32 %v3003_v57, %v2772_v62 }
 0x271   : > { %4142 = vst [vmem:[%s6188_s18 + $0x78] sm:$0xff] %v4110_v46  ;;  %v4173_v20 = vadd.f32 %v4172_v38, %v4110_v46  ;;  %v4212_v59 = vmul.f32 %v4110_v46, %v4110_v46 }
 0x273   : > { %v4243_v56 = vadd.f32 %v4242_v28, %v4212_v59  ;;  %v4055_v9 = vpop.f32.mrf.mxu0 }
 0x274   : > { %v3657_v37 = vpop.f32.mrf.mxu3  ;;  %v2721_v14 = vpop.f32.mrf.mxu1 }
 0x275   : > { %v3713_v6 = vadd.f32 %v3657_v37, %v3059_v34  ;;  %v2774_v51 = vadd.f32 %v2721_v14, %v5903_v19 }
 0x277   : > { %v4111_v1 = vadd.f32 %v4055_v9, %v3713_v6  ;;  %v3005_v45 = vpop.f32.mrf.mxu2 }
 0x278   : > { %v3060_v25 = vadd.f32 %v3005_v45, %v2773_v49 }
 0x279   : > { %4143 = vst [vmem:[%s6188_s18 + $0x80] sm:$0xff] %v4111_v1  ;;  %v4174_v42 = vadd.f32 %v4173_v20, %v4111_v1  ;;  %v4213_v36 = vmul.f32 %v4111_v1, %v4111_v1 }
 0x27b   : > { %v4244_v5 = vadd.f32 %v4243_v56, %v4213_v36  ;;  %v4057_v21 = vpop.f32.mrf.mxu0 }
 0x27c   : > { %v3659_v15 = vpop.f32.mrf.mxu3  ;;  %v2723_v0 = vpop.f32.mrf.mxu1 }
 0x27d   : > { %v3714_v35 = vadd.f32 %v3659_v15, %v3060_v25  ;;  %v2775_v12 = vadd.f32 %v2723_v0, %v5927_v53 }
 0x27f   : > { %v4112_v16 = vadd.f32 %v4057_v21, %v3714_v35  ;;  %v3008_v24 = vpop.f32.mrf.mxu2 }
 0x280   : > { %v3061_v7 = vadd.f32 %v3008_v24, %v2774_v51 }
 0x281   : > { %4144 = vst [vmem:[%s6188_s18 + $0x88] sm:$0xff] %v4112_v16  ;;  %v4175_v54 = vadd.f32 %v4174_v42, %v4112_v16  ;;  %v4214_v58 = vmul.f32 %v4112_v16, %v4112_v16 }
 0x283   : > { %v4245_v22 = vadd.f32 %v4244_v5, %v4214_v58  ;;  %v4060_v31 = vpop.f32.mrf.mxu0 }
 0x284   : > { %v3662_v48 = vpop.f32.mrf.mxu3  ;;  %v2726_v18 = vpop.f32.mrf.mxu1 }
 0x285   : > { %v3715_v60 = vadd.f32 %v3662_v48, %v3061_v7  ;;  %v2776_v26 = vadd.f32 %v2726_v18, %v5946_v2 }
 0x287   : > { %v4113_v43 = vadd.f32 %v4060_v31, %v3715_v60  ;;  %v3010_v33 = vpop.f32.mrf.mxu2 }
 0x288   : > { %v3062_v30 = vadd.f32 %v3010_v33, %v2775_v12 }
 0x289   : > { %4145 = vst [vmem:[%s6188_s18 + $0x90] sm:$0xff] %v4113_v43  ;;  %v4176_v11 = vadd.f32 %v4175_v54, %v4113_v43  ;;  %v4215_v61 = vmul.f32 %v4113_v43, %v4113_v43 }
 0x28b   : > { %v4246_v19 = vadd.f32 %v4245_v22, %v4215_v61  ;;  %v4062_v41 = vpop.f32.mrf.mxu0 }
 0x28c   : > { %v3664_v29 = vpop.f32.mrf.mxu3  ;;  %v2728_v10 = vpop.f32.mrf.mxu1 }
 0x28d   : > { %v3716_v38 = vadd.f32 %v3664_v29, %v3062_v30  ;;  %v2777_v59 = vadd.f32 %v2728_v10, %v5970_v40 }
 0x28f   : > { %v4114_v55 = vadd.f32 %v4062_v41, %v3716_v38  ;;  %v3013_v28 = vpop.f32.mrf.mxu2 }
 0x290   : > { %v3063_v17 = vadd.f32 %v3013_v28, %v2776_v26 }
 0x291   : > { %4146 = vst [vmem:[%s6188_s18 + $0x98] sm:$0xff] %v4114_v55  ;;  %v4177_v52 = vadd.f32 %v4176_v11, %v4114_v55  ;;  %v4216_v13 = vmul.f32 %v4114_v55, %v4114_v55 }
 0x293   : > { %v4247_v53 = vadd.f32 %v4246_v19, %v4216_v13  ;;  %v4065_v44 = vpop.f32.mrf.mxu0 }
 0x294   : > { %v3667_v46 = vpop.f32.mrf.mxu3  ;;  %v2731_v62 = vpop.f32.mrf.mxu1 }
 0x295   : > { %v3717_v57 = vadd.f32 %v3667_v46, %v3063_v17  ;;  %v2778_v42 = vadd.f32 %v2731_v62, %v5989_v8 }
 0x297   : > { %v4115_v20 = vadd.f32 %v4065_v44, %v3717_v57  ;;  %v3015_v34 = vpop.f32.mrf.mxu2 }
 0x298   : > { %v3064_v37 = vadd.f32 %v3015_v34, %v2777_v59 }
 0x299   : > { %4147 = vst [vmem:[%s6188_s18 + $0xa0] sm:$0xff] %v4115_v20  ;;  %v4178_v56 = vadd.f32 %v4177_v52, %v4115_v20  ;;  %v4217_v9 = vmul.f32 %v4115_v20, %v4115_v20 }
 0x29b   : > { %v4248_v2 = vadd.f32 %v4247_v53, %v4217_v9  ;;  %v4067_v14 = vpop.f32.mrf.mxu0 }
 0x29c   : > { %v3669_v6 = vpop.f32.mrf.mxu3  ;;  %v2733_v1 = vpop.f32.mrf.mxu1 }
 0x29d   : > { %v3718_v49 = vadd.f32 %v3669_v6, %v3064_v37  ;;  %v2779_v24 = vadd.f32 %v2733_v1, %v6013_v27 }
 0x29f   : > { %v4116_v45 = vadd.f32 %v4067_v14, %v3718_v49  ;;  %v3018_v36 = vpop.f32.mrf.mxu2 }
 0x2a0   : > { %v3065_v21 = vadd.f32 %v3018_v36, %v2778_v42 }
 0x2a1   : > { %4148 = vst [vmem:[%s6188_s18 + $0xa8] sm:$0xff] %v4116_v45  ;;  %v4179_v25 = vadd.f32 %v4178_v56, %v4116_v45  ;;  %v4218_v5 = vmul.f32 %v4116_v45, %v4116_v45 }
 0x2a3   : > { %v4249_v40 = vadd.f32 %v4248_v2, %v4218_v5  ;;  %v4070_v15 = vpop.f32.mrf.mxu0 }
 0x2a4   : > { %v3672_v0 = vpop.f32.mrf.mxu3  ;;  %v2736_v35 = vpop.f32.mrf.mxu1 }
 0x2a5   : > { %v3719_v16 = vadd.f32 %v3672_v0, %v3065_v21  ;;  %v2780_v12 = vadd.f32 %v2736_v35, %v6032_v63 }
 0x2a7   : > { %v4117_v51 = vadd.f32 %v4070_v15, %v3719_v16  ;;  %v3020_v54 = vpop.f32.mrf.mxu2 }
 0x2a8   : > { %v3066_v22 = vadd.f32 %v3020_v54, %v2779_v24 }
 0x2a9   : > { %4149 = vst [vmem:[%s6188_s18 + $0xb0] sm:$0xff] %v4117_v51  ;;  %v4180_v58 = vadd.f32 %v4179_v25, %v4117_v51  ;;  %v4219_v7 = vmul.f32 %v4117_v51, %v4117_v51 }
 0x2ab   : > { %v4250_v8 = vadd.f32 %v4249_v40, %v4219_v7  ;;  %v4072_v31 = vpop.f32.mrf.mxu0 }
 0x2ac   : > { %v3674_v48 = vpop.f32.mrf.mxu3  ;;  %v2738_v18 = vpop.f32.mrf.mxu1 }
 0x2ad   : > { %v3720_v60 = vadd.f32 %v3674_v48, %v3066_v22  ;;  %v2781_v55 = vadd.f32 %v2738_v18, %v6056_v39 }
 0x2af   : > { %v4118_v43 = vadd.f32 %v4072_v31, %v3720_v60  ;;  %v3023_v33 = vpop.f32.mrf.mxu2 }
 0x2b0   : > { %v3067_v30 = vadd.f32 %v3023_v33, %v2780_v12 }
 0x2b1   : > { %4150 = vst [vmem:[%s6188_s18 + $0xb8] sm:$0xff] %v4118_v43  ;;  %v4181_v11 = vadd.f32 %v4180_v58, %v4118_v43  ;;  %v4220_v61 = vmul.f32 %v4118_v43, %v4118_v43 }
 0x2b3   : > { %v4251_v27 = vadd.f32 %v4250_v8, %v4220_v61  ;;  %v4075_v19 = vpop.f32.mrf.mxu0 }
 0x2b4   : > { %v3677_v41 = vpop.f32.mrf.mxu3  ;;  %v2741_v29 = vpop.f32.mrf.mxu1 }
 0x2b5   : > { %v3721_v10 = vadd.f32 %v3677_v41, %v3067_v30  ;;  %v2782_v57 = vadd.f32 %v2741_v29, %v6075_v50 }
 0x2b7   : > { %v4119_v38 = vadd.f32 %v4075_v19, %v3721_v10  ;;  %v3025_v26 = vpop.f32.mrf.mxu2 }
 0x2b8   : > { %v3068_v13 = vadd.f32 %v3025_v26, %v2781_v55 }
 0x2b9   : > { %4151 = vst [vmem:[%s6188_s18 + $0xc0] sm:$0xff] %v4119_v38  ;;  %v4182_v28 = vadd.f32 %v4181_v11, %v4119_v38  ;;  %v4221_v52 = vmul.f32 %v4119_v38, %v4119_v38 }
 0x2bb   : > { %v4252_v63 = vadd.f32 %v4251_v27, %v4221_v52  ;;  %v4077_v17 = vpop.f32.mrf.mxu0 }
 0x2bc   : > { %v3679_v53 = vpop.f32.mrf.mxu3  ;;  %v2743_v44 = vpop.f32.mrf.mxu1 }
 0x2bd   : > { %v3722_v46 = vadd.f32 %v3679_v53, %v3068_v13  ;;  %v2783_v1 = vadd.f32 %v2743_v44, %v6099_v3 }
 0x2bf   : > { %v4120_v62 = vadd.f32 %v4077_v17, %v3722_v46  ;;  %v3028_v20 = vpop.f32.mrf.mxu2 }
 0x2c0   : > { %v3069_v56 = vadd.f32 %v3028_v20, %v2782_v57 }
 0x2c1   : > { %4152 = vst [vmem:[%s6188_s18 + $0xc8] sm:$0xff] %v4120_v62  ;;  %v4183_v59 = vadd.f32 %v4182_v28, %v4120_v62  ;;  %v4222_v34 = vmul.f32 %v4120_v62, %v4120_v62 }
 0x2c3   : > { %v4253_v39 = vadd.f32 %v4252_v63, %v4222_v34  ;;  %v4080_v9 = vpop.f32.mrf.mxu0 }
 0x2c4   : > { %v3682_v37 = vpop.f32.mrf.mxu3  ;;  %v2746_v14 = vpop.f32.mrf.mxu1 }
 0x2c5   : > { %v3723_v2 = vadd.f32 %v3682_v37, %v3069_v56  ;;  %v2784_v15 = vadd.f32 %v2746_v14, %v6116_v23 }
 0x2c7   : > { %v4121_v6 = vadd.f32 %v4080_v9, %v3723_v2  ;;  %v3030_v49 = vpop.f32.mrf.mxu2 }
 0x2c8   : > { %v3070_v36 = vadd.f32 %v3030_v49, %v2783_v1 }
 0x2c9   : > { %4153 = vst [vmem:[%s6188_s18 + $0xd0] sm:$0xff] %v4121_v6  ;;  %v4184_v45 = vadd.f32 %v4183_v59, %v4121_v6  ;;  %v4223_v42 = vmul.f32 %v4121_v6, %v4121_v6 }
 0x2cb   : > { %v4254_v50 = vadd.f32 %v4253_v39, %v4223_v42  ;;  %v4082_v25 = vpop.f32.mrf.mxu0 }
 0x2cc   : > { %v3684_v5 = vpop.f32.mrf.mxu3  ;;  %v2748_v35 = vpop.f32.mrf.mxu1 }
 0x2cd   : > { %v3724_v21 = vadd.f32 %v3684_v5, %v3070_v36  ;;  %v2785_v8 = vadd.f32 %v2748_v35, %v6136_v4 }
 0x2cf   : > { %v4122_v40 = vadd.f32 %v4082_v25, %v3724_v21  ;;  %v3033_v0 = vpop.f32.mrf.mxu2 }
 0x2d0   : > { %v3071_v24 = vadd.f32 %v3033_v0, %v2784_v15 }
 0x2d1   : > { %4154 = vst [vmem:[%s6188_s18 + $0xd8] sm:$0xff] %v4122_v40  ;;  %v4185_v16 = vadd.f32 %v4184_v45, %v4122_v40  ;;  %v4224_v51 = vmul.f32 %v4122_v40, %v4122_v40 }
 0x2d3   : > { %v4255_v3 = vadd.f32 %v4254_v50, %v4224_v51  ;;  %v4085_v54 = vpop.f32.mrf.mxu0 }
 0x2d4   : > { %v3687_v58 = vpop.f32.mrf.mxu3  ;;  %v2751_v23 = vpop.f32.mrf.mxu1 }
 0x2d5   : > { %v3725_v7 = vadd.f32 %v3687_v58, %v3071_v24  ;;  %v2786_v30 = vadd.f32 %v2751_v23, %v6155_v47 }
 0x2d7   : > { %v4123_v22 = vadd.f32 %v4085_v54, %v3725_v7  ;;  %v3035_v31 = vpop.f32.mrf.mxu2 }
 0x2d8   : > { %v3072_v60 = vadd.f32 %v3035_v31, %v2785_v8 }
 0x2d9   : > { %4155 = vst [vmem:[%s6188_s18 + $0xe0] sm:$0xff] %v4123_v22  ;;  %v4186_v48 = vadd.f32 %v4185_v16, %v4123_v22  ;;  %v4225_v18 = vmul.f32 %v4123_v22, %v4123_v22 }
 0x2db   : > { %v4256_v43 = vadd.f32 %v4255_v3, %v4225_v18  ;;  %v4087_v12 = vpop.f32.mrf.mxu0 }
 0x2dc   : > { %v3689_v33 = vpop.f32.mrf.mxu3  ;;  %v2753_v10 = vpop.f32.mrf.mxu1 }
 0x2dd   : > { %v3726_v11 = vadd.f32 %v3689_v33, %v3072_v60  ;;  %v2787_v52 = vadd.f32 %v2753_v10, %v6174_v32 }
 0x2df   : > { %v4124_v61 = vadd.f32 %v4087_v12, %v3726_v11  ;;  %v3038_v27 = vpop.f32.mrf.mxu2 }
 0x2e0   : > { %v3073_v29 = vadd.f32 %v3038_v27, %v2786_v30 }
 0x2e1   : > { %4156 = vst [vmem:[%s6188_s18 + $0xe8] sm:$0xff] %v4124_v61  ;;  %v4187_v19 = vadd.f32 %v4186_v48, %v4124_v61  ;;  %v4226_v41 = vmul.f32 %v4124_v61, %v4124_v61 }
 0x2e3   : > { %v4257_v4 = vadd.f32 %v4256_v43, %v4226_v41  ;;  %v4090_v38 = vpop.f32.mrf.mxu0 }
 0x2e4   : > { %v3692_v55 = vpop.f32.mrf.mxu3 }
 0x2e5   : > { %v3727_v26 = vadd.f32 %v3692_v55, %v3073_v29 }
 0x2e7   : > { %v4125_v28 = vadd.f32 %v4090_v38, %v3727_v26  ;;  %v3040_v13 = vpop.f32.mrf.mxu2 }
 0x2e8   : > { %v3074_v53 = vadd.f32 %v3040_v13, %v2787_v52 }
 0x2e9   : > { %4157 = vst [vmem:[%s6188_s18 + $0xf0] sm:$0xff] %v4125_v28  ;;  %v4188_v63 = vadd.f32 %v4187_v19, %v4125_v28  ;;  %v4227_v17 = vmul.f32 %v4125_v28, %v4125_v28 }
 0x2eb   : > { %v4258_v47 = vadd.f32 %v4257_v4, %v4227_v17  ;;  %v4092_v62 = vpop.f32.mrf.mxu0 }
 0x2ec   : > { %v3694_v44 = vpop.f32.mrf.mxu3 }
 0x2ed   : > { %v3728_v46 = vadd.f32 %v3694_v44, %v3074_v53 }
 0x2ef   : > { %v4126_v57 = vadd.f32 %v4092_v62, %v3728_v46 }
 0x2f1   : > { %4158 = vst [vmem:[%s6188_s18 + $0xf8] sm:$0xff] %v4126_v57  ;;  %v4189_v20 = vadd.f32 %v4188_v63, %v4126_v57  ;;  %v4228_v59 = vmul.f32 %v4126_v57, %v4126_v57 }
 0x2f3   : > { %v4190_v34 = vrot.slane %v4189_v20, 4  ;;  %v4259_v56 = vadd.f32 %v4258_v47, %v4228_v59 }
 0x2f5   : > { %v4191_v39 = vadd.f32 %v4190_v34, %v4189_v20  ;;  %v4260_v9 = vrot.slane %v4259_v56, 4 }
 0x2f7   : > { %v4192_v32 = vrot.slane %v4191_v39, 2  ;;  %v4261_v37 = vadd.f32 %v4260_v9, %v4259_v56 }
 0x2f9   : > { %v4193_v2 = vadd.f32 %v4192_v32, %v4191_v39  ;;  %v4262_v14 = vrot.slane %v4261_v37, 2 }
 0x2fb   : > { %v4194_v6 = vrot.slane %v4193_v2, 1  ;;  %v4263_v1 = vadd.f32 %v4262_v14, %v4261_v37 }
 0x2fd   : > { %v4195_v49 = vadd.f32 %v4194_v6, %v4193_v2  ;;  %v4264_v45 = vrot.slane %v4263_v1, 1 }
 0x2ff   : > { %4196 = vst [vmem:[%s211_s21] sm:$0x1] %v4195_v49  ;;  %v4265_v42 = vadd.f32 %v4264_v45, %v4263_v1 }
 0x301   : > { %4266 = vst [vmem:[%s214_s24] sm:$0x1] %v4265_v42 }
 0x302 PF: > { %s15_s15 = sadd.s32 1, %s5083_s15  }
 0x303   : > { %p12_p4 = scmp.ge.s32.totalorder %s15_s15, 4  }
 0x305   :  { %14 = sbr.rel (!%p12_p4) target bundleno = 1 (0x1), region = 92 }

// kernel: basic_block_forward.6
= control target key start
LH: loop header
LB: loop body
LE: loop exit
PB: predicated region body
PF: predicated region fallthrough
CT: control target
= control target key end

     0   :  { %s5719_s15 = smov 0   ;;  %s7130_s0 = inlined_call_operand.vmem [shape: bf16[2,18,18,128], index: 0, kind: input, shape index: {}]   ;;  %s7131_s1 = inlined_call_operand.vmem [shape: bf16[9,128,128], index: 1, kind: input, shape index: {}]   ;;  %s7132_s2 = inlined_call_operand.vmem [shape: f32[2,256,128], index: 2, kind: output, shape index: {0}]   ;;  %s7133_s3 = inlined_call_operand.vmem [shape: f32[2,1,128], index: 3, kind: output, shape index: {1}]   ;;  %s7134_s4 = inlined_call_operand.vmem [shape: f32[2,1,128], index: 4, kind: output, shape index: {2}]  }
   0x1 LB: > { %s4621_s16 = sadd.s32 4294967295, %s5692_s15   ;;  %p4625_p0 = scmp.ge.s32.totalorder %s5692_s15, 1  ;;  %s5692_s15 = sphi %s5719_s15, %s15_s15  }
   0x2   : > { %p167_p1 = scmp.lt.s32.totalorder %s5692_s15, 3 }
   0x4   : > { %p168_p2 = pnand %p4625_p0, %p167_p1 }
   0x6   : > { %171 = sbr.rel (%p168_p2) target bundleno = 770 (0x302), region = 28 }
   0xb   : > { %v5511_v0 = vld [vmem:[%s7131_s1 + $0x78] sm:$0xff]  ;;  %p199_p3 = scmp.lt.s32.totalorder %s4621_s16, 1  ;;  %v5510_v1 = vld [vmem:[%s7131_s1 + $0x70] sm:$0xff]  ;;  %v5509_v2 = vld [vmem:[%s7131_s1 + $0x68] sm:$0xff]  ;;  %vm279_vm0 = vsmask.f32 3328 }
   0xc   : > { %5600 = vmatpush.bf16.msra.mxu1 %v5511_v0  ;;  %5601 = vmatpush.bf16.msra.mxu2 %v5511_v0  ;;  %vm280_vm1 = vsmask.f32 7440  ;;  %v5508_v6 = vld [vmem:[%s7131_s1 + $0x60] sm:$0xff]  ;;  %v5507_v35 = vld [vmem:[%s7131_s1 + $0x58] sm:$0xff]  ;;  %v5506_v54 = vld [vmem:[%s7131_s1 + $0x50] sm:$0xff]  ;;  %vm1165_vm3 = vcmask 1042432  }
   0xd   : > { %s7144_s16 = smov (!%p199_p3, %s4621_s16), 1  ;;  %5602 = vmatpush.bf16.msra.mxu3 %v5511_v0  ;;  %795 = vmatpush.bf16.msra.mxu0 %v5511_v0  ;;  %vm5757_vm2 = vmor %vm279_vm0, %vm280_vm1  ;;  %vm1166_vm4 = vcmask 1046532  }
   0xe   : > { %s5624_s21 = smul.u32 216, %s7144_s16  ;;  %vm6057_vm5 = vmor %vm1165_vm3, %vm1166_vm4  ;;  %s5479_s27 = sshll.u32 %s7144_s16, 8 }
   0xf   : > { %s6893_s30 = scalar_lea.vmem %s7132_s2, %s5479_s27  ;;  %s211_s6 = scalar_lea.vmem %s7133_s3, %s7144_s16 }
  0x10   : > { %5603 = vmatpush.bf16.msra.mxu1 %v5510_v1  ;;  %5604 = vmatpush.bf16.msra.mxu2 %v5510_v1  ;;  %s5742_s26 = scalar_lea.vmem %s7130_s0, %s5624_s21  ;;  %s214_s9 = scalar_lea.vmem %s7134_s4, %s7144_s16 }
  0x11   : > { %5605 = vmatpush.bf16.msra.mxu3 %v5510_v1  ;;  %796 = vmatpush.bf16.msra.mxu0 %v5510_v1  ;;  %v223_v3 = vld [vmem:[%s5742_s26 + $0x30] sm:$0xf]  ;;  %v224_v4 = vld [vmem:[%s5742_s26 + $0x34] sm:$0xf]  ;;  %v267_v5 = vld [vmem:[%s5742_s26 + $0x38] sm:$0x1] }
  0x12   : > { %v379_v7 = vshrl.u32 %v223_v3, 16  ;;  %v382_v8 = vshll.u32 %v223_v3, 16  ;;  %v388_v9 = vshll.u32 %v224_v4, 16  ;;  %v392_v10 = vshrl.u32 %v224_v4, 16  ;;  %v231_v11 = vld [vmem:[%s5742_s26 + $0x60] sm:$0xf] }
  0x13   : > { %v398_v12 = vshll.u32 %v267_v5, 16  ;;  %v232_v13 = vld [vmem:[%s5742_s26 + $0x64] sm:$0xf]  ;;  %v271_v14 = vld [vmem:[%s5742_s26 + $0x68] sm:$0x1]  ;;  %v475_v15 = vshrl.u32 %v231_v11, 16 }
  0x14   : > { %5606 = vmatpush.bf16.msra.mxu1 %v5509_v2  ;;  %5607 = vmatpush.bf16.msra.mxu2 %v5509_v2  ;;  %v381_v16 = vrot.slane %v379_v7, 4  ;;  %v384_v17 = vrot.slane %v382_v8, 5  ;;  %v390_v18 = vrot.slane %v388_v9, 5  ;;  %v394_v19 = vrot.slane %v392_v10, 4  ;;  %v239_v20 = vld [vmem:[%s5742_s26 + $0x90] sm:$0xf] }
  0x15   : > { %5608 = vmatpush.bf16.msra.mxu3 %v5509_v2  ;;  %797 = vmatpush.bf16.msra.mxu0 %v5509_v2  ;;  %v400_v21 = vrot.slane %v398_v12, 5  ;;  %v477_v22 = vrot.slane %v475_v15, 4  ;;  %v478_v23 = vshll.u32 %v231_v11, 16  ;;  %v484_v24 = vshll.u32 %v232_v13, 16  ;;  %v240_v29 = vld [vmem:[%s5742_s26 + $0x94] sm:$0xf] }
  0x16   : > { %v385_v25 = vor.u32 %v384_v17, %v381_v16  ;;  %v395_v26 = vor.u32 %v394_v19, %v390_v18  ;;  %v488_v27 = vshrl.u32 %v232_v13, 16  ;;  %v494_v28 = vshll.u32 %v271_v14, 16  ;;  %v275_v41 = vld [vmem:[%s5742_s26 + $0x98] sm:$0x1]  ;;  %v215_v49 = vld [vmem:[%s5742_s26] sm:$0xf] }
  0x17   : > { %v480_v31 = vrot.slane %v478_v23, 5  ;;  %v486_v32 = vrot.slane %v484_v24, 5  ;;  %v571_v33 = vshrl.u32 %v239_v20, 16  ;;  %v574_v34 = vshll.u32 %v239_v20, 16  ;;  %v5782_v62 = vld [vmem:[%s5742_s26 + $0x4] sm:$0xf] }
  0x18   : > { %5609 = vmatpush.bf16.msra.mxu1 %v5508_v6  ;;  %5610 = vmatpush.bf16.msra.mxu2 %v5508_v6  ;;  %v386_v36 = vrot.slane %v385_v25, 4  ;;  %v396_v37 = vrot.slane %v395_v26, 4  ;;  %v490_v38 = vrot.slane %v488_v27, 4  ;;  %v496_v39 = vrot.slane %v494_v28, 5  ;;  %v5789_v4 = vld [vmem:[%s5742_s26 + $0x8] sm:$0x1] }
  0x19   : > { %5611 = vmatpush.bf16.msra.mxu3 %v5508_v6  ;;  %798 = vmatpush.bf16.msra.mxu0 %v5508_v6  ;;  %v481_v40 = vor.u32 %v480_v31, %v477_v22  ;;  %v573_v42 = vrot.slane %v571_v33, 4  ;;  %v576_v43 = vrot.slane %v574_v34, 5  ;;  %v580_v44 = vshll.u32 %v240_v29, 16  ;;  %v225_v5 = vld [vmem:[%s5742_s26 + $0x3c] sm:$0xf]  ;;  %v5505_v10 = vld [vmem:[%s7131_s1 + $0x48] sm:$0xff] }
  0x1a   : > { %v391_v45 = vsel %vm5757_vm2, %v386_v36, %v390_v18  ;;  %v401_v46 = vsel %vm5757_vm2, %v396_v37, %v400_v21  ;;  %v491_v47 = vor.u32 %v490_v38, %v486_v32  ;;  %v584_v48 = vshrl.u32 %v240_v29, 16  ;;  %v226_v15 = vld [vmem:[%s5742_s26 + $0x40] sm:$0xf]  ;;  %v268_v19 = vld [vmem:[%s5742_s26 + $0x44] sm:$0x1]  ;;  %v5519_v37 = vld [vmem:[%s7131_s1 + $0xb8] sm:$0xff] }
  0x1b   : > { %v5770_v50 = vunpack.c.l.b16 %v391_v45  ;;  %v5772_v51 = vunpack.c.l.b16 %v401_v46  ;;  %v482_v52 = vrot.slane %v481_v40, 4  ;;  %v577_v53 = vor.u32 %v576_v43, %v573_v42  ;;  %v233_v25 = vld [vmem:[%s5742_s26 + $0x6c] sm:$0xf]  ;;  %v5504_v31 = vld [vmem:[%s7131_s1 + $0x40] sm:$0xff]  ;;  %v234_v40 = vld [vmem:[%s5742_s26 + $0x70] sm:$0xf] }
  0x1c   : > { %5612 = vmatpush.bf16.msra.mxu1 %v5507_v35  ;;  %5613 = vmatpush.bf16.msra.mxu2 %v5507_v35  ;;  %v492_v55 = vrot.slane %v491_v47, 4  ;;  %v582_v56 = vrot.slane %v580_v44, 5  ;;  %v586_v57 = vrot.slane %v584_v48, 4  ;;  %v590_v58 = vshll.u32 %v275_v41, 16  ;;  %v5543_v43 = vld [vmem:[%s7131_s1 + $0xf8] sm:$0xff] }
  0x1d   : > { %5614 = vmatpush.bf16.msra.mxu3 %v5507_v35  ;;  %799 = vmatpush.bf16.msra.mxu0 %v5507_v35  ;;  %v719_v59 = vpack.c.b16 %v5772_v51, %v5770_v50  ;;  %v487_v60 = vsel %vm5757_vm2, %v482_v52, %v486_v32  ;;  %v578_v61 = vrot.slane %v577_v53, 4  ;;  %v283_v63 = vshrl.u32 %v215_v49, 16  ;;  %v272_v47 = vld [vmem:[%s5742_s26 + $0x74] sm:$0x1] }
  0x1e   : > { %v497_v0 = vsel %vm5757_vm2, %v492_v55, %v496_v39  ;;  %v5786_v1 = vunpack.c.l.b16 %v487_v60  ;;  %v587_v2 = vor.u32 %v586_v57, %v582_v56  ;;  %v592_v3 = vrot.slane %v590_v58, 5  ;;  %v5503_v57 = vld [vmem:[%s7131_s1 + $0x38] sm:$0xff] }
  0x1f   : > { %v5792_v6 = vunpack.c.l.b16 %v497_v0  ;;  %v583_v7 = vsel %vm5757_vm2, %v578_v61, %v582_v56  ;;  %v285_v8 = vrot.slane %v283_v63, 4  ;;  %v286_v9 = vshll.u32 %v215_v49, 16  ;;  %v5518_v63 = vld [vmem:[%s7131_s1 + $0xb0] sm:$0xff] }
  0x20   : > { %5615 = vmatpush.bf16.msra.mxu1 %v5506_v54  ;;  %5616 = vmatpush.bf16.msra.mxu2 %v5506_v54  ;;  %v588_v11 = vrot.slane %v587_v2, 4  ;;  %v5799_v12 = vunpack.c.l.b16 %v583_v7  ;;  %v292_v13 = vshll.u32 %v5782_v62, 16  ;;  %v296_v14 = vshrl.u32 %v5782_v62, 16 }
  0x21   : > { %5617 = vmatpush.bf16.msra.mxu3 %v5506_v54  ;;  %800 = vmatpush.bf16.msra.mxu0 %v5506_v54  ;;  %v723_v16 = vpack.c.b16 %v5792_v6, %v5786_v1  ;;  %v288_v17 = vrot.slane %v286_v9, 5  ;;  %v302_v18 = vshll.u32 %v5789_v4, 16  ;;  %v403_v20 = vshrl.u32 %v225_v5, 16  ;;  %v241_v54 = vld [vmem:[%s5742_s26 + $0x9c] sm:$0xf] }
  0x22   : > { %v593_v21 = vsel %vm5757_vm2, %v588_v11, %v592_v3  ;;  %v294_v22 = vrot.slane %v292_v13, 5  ;;  %v298_v23 = vrot.slane %v296_v14, 4  ;;  %v406_v24 = vshll.u32 %v225_v5, 16  ;;  %v5542_v3 = vld [vmem:[%s7131_s1 + $0xf0] sm:$0xff]  ;;  %v5551_v11 = vld [vmem:[%s7131_s1 + $0x138] sm:$0xff] }
  0x23   : > { %v708_v26 = vunpack.c.l.b16 %v593_v21  ;;  %v289_v27 = vor.u32 %v288_v17, %v285_v8  ;;  %v304_v28 = vrot.slane %v302_v18, 5  ;;  %v405_v29 = vrot.slane %v403_v20, 4  ;;  %v242_v8 = vld [vmem:[%s5742_s26 + $0xa0] sm:$0xf]  ;;  %v217_v17 = vld [vmem:[%s5742_s26 + $0xc] sm:$0xf] }
  0x24   : > { %5618 = vmatpush.bf16.msra.mxu1 %v5505_v10  ;;  %5619 = vmatpush.bf16.msra.mxu2 %v5505_v10  ;;  %v299_v32 = vor.u32 %v298_v23, %v294_v22  ;;  %v408_v33 = vrot.slane %v406_v24, 5  ;;  %v412_v34 = vshll.u32 %v226_v15, 16  ;;  %v416_v35 = vshrl.u32 %v226_v15, 16  ;;  %v276_v15 = vld [vmem:[%s5742_s26 + $0xa4] sm:$0x1]  ;;  %v5502_v18 = vld [vmem:[%s7131_s1 + $0x30] sm:$0xff] }
  0x25   : > { %5620 = vmatpush.bf16.msra.mxu3 %v5505_v10  ;;  %801 = vmatpush.bf16.msra.mxu0 %v5505_v10  ;;  %v727_v36 = vpack.c.b16 %v708_v26, %v5799_v12  ;;  %v290_v38 = vrot.slane %v289_v27, 4  ;;  %v422_v39 = vshll.u32 %v268_v19, 16  ;;  %v499_v41 = vshrl.u32 %v233_v25, 16  ;;  %v5517_v23 = vld [vmem:[%s7131_s1 + $0xa8] sm:$0xff]  ;;  %v5861_v27 = vld [vmem:[%s5742_s26 + $0x10] sm:$0xf] }
  0x26   : > { %v300_v42 = vrot.slane %v299_v32, 4  ;;  %v409_v44 = vor.u32 %v408_v33, %v405_v29  ;;  %v414_v45 = vrot.slane %v412_v34, 5  ;;  %v418_v46 = vrot.slane %v416_v35, 4  ;;  %v5541_v29 = vld [vmem:[%s7131_s1 + $0xe8] sm:$0xff]  ;;  %v5871_v35 = vld [vmem:[%s5742_s26 + $0x14] sm:$0x1] }
  0x27   : > { %v295_v48 = vsel %vm5757_vm2, %v290_v38, %v294_v22  ;;  %v424_v49 = vrot.slane %v422_v39, 5  ;;  %v501_v52 = vrot.slane %v499_v41, 4  ;;  %v502_v53 = vshll.u32 %v233_v25, 16  ;;  %v5501_v41 = vld [vmem:[%s7131_s1 + $0x28] sm:$0xff] }
  0x28   : > { %5621 = vmatpush.bf16.msra.mxu1 %v5504_v31  ;;  %5622 = vmatpush.bf16.msra.mxu2 %v5504_v31  ;;  %v305_v55 = vsel %vm5757_vm2, %v300_v42, %v304_v28  ;;  %v683_v56 = vunpack.c.l.b16 %v295_v48  ;;  %v410_v58 = vrot.slane %v409_v44, 4  ;;  %v419_v60 = vor.u32 %v418_v46, %v414_v45  ;;  %v227_v46 = vld [vmem:[%s5742_s26 + $0x48] sm:$0xf] }
  0x29   : > { %5623 = vmatpush.bf16.msra.mxu3 %v5504_v31  ;;  %802 = vmatpush.bf16.msra.mxu0 %v5504_v31  ;;  %v684_v61 = vunpack.c.l.b16 %v305_v55  ;;  %v504_v0 = vrot.slane %v502_v53, 5  ;;  %v508_v1 = vshll.u32 %v234_v40, 16  ;;  %v512_v2 = vshrl.u32 %v234_v40, 16  ;;  %v5516_v53 = vld [vmem:[%s7131_s1 + $0xa0] sm:$0xff] }
  0x2a   : > { %v415_v5 = vsel %vm5757_vm2, %v410_v58, %v414_v45  ;;  %v420_v6 = vrot.slane %v419_v60, 4  ;;  %v518_v7 = vshll.u32 %v272_v47, 16  ;;  %v595_v9 = vshrl.u32 %v241_v54, 16  ;;  %v5549_v60 = vld [vmem:[%s7131_s1 + $0x128] sm:$0xff] }
  0x2b   : > { %823 = vmatmul.bf16.vlgmr.msra.gmra.mxu1 %v719_v59  ;;  %843 = vmatmul.bf16.vlgmr.msra.gmra.mxu2 %v723_v16  ;;  %v715_v10 = vpack.c.b16 %v684_v61, %v683_v56  ;;  %v5846_v12 = vunpack.c.l.b16 %v415_v5  ;;  %v505_v13 = vor.u32 %v504_v0, %v501_v52  ;;  %v510_v14 = vrot.slane %v508_v1, 5  ;;  %v5500_v61 = vld [vmem:[%s7131_s1 + $0x20] sm:$0xff] }
  0x2c   : > { %1409 = vmatpush.bf16.msrb.mxu2 %v5519_v37  ;;  %863 = vmatmul.bf16.vlgmr.msra.gmra.mxu3 %v727_v36  ;;  %v425_v50 = vsel %vm5757_vm2, %v420_v6, %v424_v49  ;;  %v514_v51 = vrot.slane %v512_v2, 4  ;;  %v520_v59 = vrot.slane %v518_v7, 5  ;;  %v597_v16 = vrot.slane %v595_v9, 4  ;;  %v5550_v36 = vld [vmem:[%s7131_s1 + $0x130] sm:$0xff]  ;;  %v5900_v2 = vld [vmem:[%s5742_s26 + $0x4c] sm:$0xf] }
  0x2d   : > { %1724 = vmatpush.bf16.msrb.mxu3 %v5543_v43  ;;  %1028 = vmatpush.bf16.msrb.mxu1 %v5503_v57  ;;  %v5855_v19 = vunpack.c.l.b16 %v425_v50  ;;  %v506_v20 = vrot.slane %v505_v13, 4  ;;  %v598_v21 = vshll.u32 %v241_v54, 16  ;;  %v604_v22 = vshll.u32 %v242_v8, 16  ;;  %v5540_v54 = vld [vmem:[%s7131_s1 + $0xe0] sm:$0xff] }
  0x2e   : > { %803 = vmatmul.bf16.vlgmr.msra.gmra.mxu0 %v715_v10  ;;  %v515_v24 = vor.u32 %v514_v51, %v510_v14  ;;  %v608_v25 = vshrl.u32 %v242_v8, 16  ;;  %v614_v26 = vshll.u32 %v276_v15, 16  ;;  %v307_v28 = vshrl.u32 %v217_v17, 16  ;;  %v269_v8 = vld [vmem:[%s5742_s26 + $0x50] sm:$0x1] }
  0x2f   : > { %2406 = vmatpush.bf16.msrb.mxu0 %v5551_v11  ;;  %v720_v31 = vpack.c.b16 %v5855_v19, %v5846_v12  ;;  %v511_v32 = vsel %vm5757_vm2, %v506_v20, %v510_v14  ;;  %v600_v33 = vrot.slane %v598_v21, 5  ;;  %v606_v34 = vrot.slane %v604_v22, 5  ;;  %v235_v10 = vld [vmem:[%s5742_s26 + $0x78] sm:$0xf] }
  0x30   : > { %1410 = vmatpush.bf16.msrb.mxu2 %v5518_v63  ;;  %v516_v37 = vrot.slane %v515_v24, 4  ;;  %v5876_v38 = vunpack.c.l.b16 %v511_v32  ;;  %v610_v39 = vrot.slane %v608_v25, 4  ;;  %v616_v40 = vrot.slane %v614_v26, 5  ;;  %v5548_v24 = vld [vmem:[%s7131_s1 + $0x120] sm:$0xff]  ;;  %v236_v32 = vld [vmem:[%s5742_s26 + $0x7c] sm:$0xf] }
  0x31   : > { %1725 = vmatpush.bf16.msrb.mxu3 %v5542_v3  ;;  %1029 = vmatpush.bf16.msrb.mxu1 %v5502_v18  ;;  %v601_v42 = vor.u32 %v600_v33, %v597_v16  ;;  %v309_v43 = vrot.slane %v307_v28, 4  ;;  %v310_v44 = vshll.u32 %v217_v17, 16  ;;  %v316_v45 = vshll.u32 %v5861_v27, 16  ;;  %v5515_v17 = vld [vmem:[%s7131_s1 + $0x98] sm:$0xff]  ;;  %v273_v33 = vld [vmem:[%s5742_s26 + $0x80] sm:$0x1] }
  0x32   : > { %v521_v47 = vsel %vm5757_vm2, %v516_v37, %v520_v59  ;;  %v611_v48 = vor.u32 %v610_v39, %v606_v34  ;;  %v320_v49 = vshrl.u32 %v5861_v27, 16  ;;  %v326_v52 = vshll.u32 %v5871_v35, 16  ;;  %v5539_v18 = vld [vmem:[%s7131_s1 + $0xd8] sm:$0xff] }
  0x33   : > { %v702_v55 = vunpack.c.l.b16 %v521_v47  ;;  %v602_v56 = vrot.slane %v601_v42, 4  ;;  %v312_v57 = vrot.slane %v310_v44, 5  ;;  %v318_v58 = vrot.slane %v316_v45, 5  ;;  %2407 = vmatpush.bf16.msrb.mxu0 %v5550_v36  ;;  %v5538_v42 = vld [vmem:[%s7131_s1 + $0xd0] sm:$0xff] }
  0x34   : > { %1411 = vmatpush.bf16.msrb.mxu2 %v5517_v23  ;;  %v612_v63 = vrot.slane %v611_v48, 4  ;;  %v322_v0 = vrot.slane %v320_v49, 4  ;;  %v328_v1 = vrot.slane %v326_v52, 5  ;;  %v427_v3 = vshrl.u32 %v227_v46, 16 }
  0x35   : > { %1726 = vmatpush.bf16.msrb.mxu3 %v5541_v29  ;;  %1030 = vmatpush.bf16.msrb.mxu1 %v5501_v41  ;;  %v724_v5 = vpack.c.b16 %v702_v55, %v5876_v38  ;;  %v607_v6 = vsel %vm5757_vm2, %v602_v56, %v606_v34  ;;  %v313_v7 = vor.u32 %v312_v57, %v309_v43  ;;  %v430_v9 = vshll.u32 %v227_v46, 16  ;;  %v5499_v34 = vld [vmem:[%s7131_s1 + $0x18] sm:$0xff]  ;;  %v5514_v41 = vld [vmem:[%s7131_s1 + $0x90] sm:$0xff] }
  0x36   : > { %v617_v11 = vsel %vm5757_vm2, %v612_v63, %v616_v40  ;;  %v709_v13 = vunpack.c.l.b16 %v607_v6  ;;  %v323_v14 = vor.u32 %v322_v0, %v318_v58  ;;  %v429_v15 = vrot.slane %v427_v3, 4  ;;  %v243_v40 = vld [vmem:[%s5742_s26 + $0xa8] sm:$0xf]  ;;  %v5498_v56 = vld [vmem:[%s7131_s1 + $0x10] sm:$0xff]  ;;  %v219_v6 = vld [vmem:[%s5742_s26 + $0x18] sm:$0xf] }
  0x37   : > { %v710_v50 = vunpack.c.l.b16 %v617_v11  ;;  %v314_v51 = vrot.slane %v313_v7, 4  ;;  %2408 = vmatpush.bf16.msrb.mxu0 %v5549_v60  ;;  %v432_v59 = vrot.slane %v430_v9, 5  ;;  %v436_v16 = vshll.u32 %v5900_v2, 16  ;;  %v277_v63 = vld [vmem:[%s5742_s26 + $0xb0] sm:$0x1] }
  0x38   : > { %1412 = vmatpush.bf16.msrb.mxu2 %v5516_v53  ;;  %v324_v20 = vrot.slane %v323_v14, 4  ;;  %v440_v21 = vshrl.u32 %v5900_v2, 16  ;;  %v446_v22 = vshll.u32 %v269_v8, 16  ;;  %v523_v23 = vshrl.u32 %v235_v10, 16  ;;  %v5547_v53 = vld [vmem:[%s7131_s1 + $0x118] sm:$0xff] }
  0x39   : > { %1727 = vmatpush.bf16.msrb.mxu3 %v5540_v54  ;;  %1031 = vmatpush.bf16.msrb.mxu1 %v5500_v61  ;;  %v728_v25 = vpack.c.b16 %v710_v50, %v709_v13  ;;  %v319_v26 = vsel %vm5757_vm2, %v314_v51, %v318_v58  ;;  %v433_v28 = vor.u32 %v432_v59, %v429_v15  ;;  %v438_v29 = vrot.slane %v436_v16, 5  ;;  %v5958_v59 = vld [vmem:[%s5742_s26 + $0x1c] sm:$0xf] }
  0x3a   : > { %v329_v36 = vsel %vm5757_vm2, %v324_v20, %v328_v1  ;;  %v685_v37 = vunpack.c.l.b16 %v319_v26  ;;  %v442_v38 = vrot.slane %v440_v21, 4  ;;  %v448_v39 = vrot.slane %v446_v22, 5 }
  0x3b   : > { %828 = vmatmul.bf16.gmra.mxu1 %v720_v31  ;;  %848 = vmatmul.bf16.gmra.mxu2 %v724_v5  ;;  %v686_v43 = vunpack.c.l.b16 %v329_v36  ;;  %v434_v44 = vrot.slane %v433_v28, 4  ;;  %v525_v45 = vrot.slane %v523_v23, 4  ;;  %v526_v46 = vshll.u32 %v235_v10, 16  ;;  %v244_v31 = vld [vmem:[%s5742_s26 + $0xac] sm:$0xf] }
  0x3c   : > { %1413 = vmatpush.bf16.msrb.mxu2 %v5515_v17  ;;  %868 = vmatmul.bf16.gmra.mxu3 %v728_v25  ;;  %v443_v47 = vor.u32 %v442_v38, %v438_v29  ;;  %v532_v48 = vshll.u32 %v236_v32, 16  ;;  %v536_v49 = vshrl.u32 %v236_v32, 16  ;;  %v542_v52 = vshll.u32 %v273_v33, 16  ;;  %v5513_v17 = vld [vmem:[%s7131_s1 + $0x88] sm:$0xff]  ;;  %v229_v25 = vld [vmem:[%s5742_s26 + $0x54] sm:$0xf] }
  0x3d   : > { %1728 = vmatpush.bf16.msrb.mxu3 %v5539_v18  ;;  %2409 = vmatpush.bf16.msrb.mxu0 %v5548_v24  ;;  %v716_v54 = vpack.c.b16 %v686_v43, %v685_v37  ;;  %v439_v12 = vsel %vm5757_vm2, %v434_v44, %v438_v29  ;;  %v528_v19 = vrot.slane %v526_v46, 5  ;;  %v619_v55 = vshrl.u32 %v243_v40, 16  ;;  %v5964_v24 = vld [vmem:[%s5742_s26 + $0x20] sm:$0x1]  ;;  %v5537_v38 = vld [vmem:[%s7131_s1 + $0xc8] sm:$0xff] }
  0x3e   : > { %1032 = vmatpush.bf16.msrb.mxu1 %v5499_v34  ;;  %v444_v57 = vrot.slane %v443_v47, 4  ;;  %v5948_v58 = vunpack.c.l.b16 %v439_v12  ;;  %v534_v60 = vrot.slane %v532_v48, 5  ;;  %v538_v61 = vrot.slane %v536_v49, 4 }
  0x3f   : > { %808 = vmatmul.bf16.gmra.mxu0 %v716_v54  ;;  %v529_v0 = vor.u32 %v528_v19, %v525_v45  ;;  %v544_v1 = vrot.slane %v542_v52, 5  ;;  %v621_v3 = vrot.slane %v619_v55, 4  ;;  %v622_v5 = vshll.u32 %v243_v40, 16  ;;  %v5497_v40 = vld [vmem:[%s7131_s1 + $0x8] sm:$0xff]  ;;  %v5512_v45 = vld [vmem:[%s7131_s1 + $0x80] sm:$0xff] }
  0x40   : > { %1414 = vmatpush.bf16.msrb.mxu2 %v5514_v41  ;;  %v449_v7 = vsel %vm5757_vm2, %v444_v57, %v448_v39  ;;  %v539_v8 = vor.u32 %v538_v61, %v534_v60  ;;  %v628_v9 = vshll.u32 %v244_v31, 16  ;;  %v632_v10 = vshrl.u32 %v244_v31, 16  ;;  %v5546_v39 = vld [vmem:[%s7131_s1 + $0x110] sm:$0xff]  ;;  %v5987_v52 = vld [vmem:[%s5742_s26 + $0x58] sm:$0xf]  ;;  %v5545_v57 = vld [vmem:[%s7131_s1 + $0x108] sm:$0xff] }
  0x41   : > { %1729 = vmatpush.bf16.msrb.mxu3 %v5538_v42  ;;  %2410 = vmatpush.bf16.msrb.mxu0 %v5547_v53  ;;  %v696_v11 = vunpack.c.l.b16 %v449_v7  ;;  %v530_v13 = vrot.slane %v529_v0, 4  ;;  %v624_v14 = vrot.slane %v622_v5, 5  ;;  %v638_v15 = vshll.u32 %v277_v63, 16  ;;  %v5990_v53 = vld [vmem:[%s5742_s26 + $0x5c] sm:$0x1]  ;;  %v5496_v0 = vld [vmem:[%s7131_s1] sm:$0xff] }
  0x42   : > { %1033 = vmatpush.bf16.msrb.mxu1 %v5498_v56  ;;  %v540_v18 = vrot.slane %v539_v8, 4  ;;  %v630_v50 = vrot.slane %v628_v9, 5  ;;  %v634_v51 = vrot.slane %v632_v10, 4  ;;  %v331_v16 = vshrl.u32 %v219_v6, 16  ;;  %v237_v55 = vld [vmem:[%s5742_s26 + $0x84] sm:$0xf] }
  0x43   : > { %v721_v20 = vpack.c.b16 %v696_v11, %v5948_v58  ;;  %v535_v21 = vsel %vm5757_vm2, %v530_v13, %v534_v60  ;;  %v625_v22 = vor.u32 %v624_v14, %v621_v3  ;;  %v640_v23 = vrot.slane %v638_v15, 5  ;;  %v5536_v56 = vld [vmem:[%s7131_s1 + $0xc0] sm:$0xff]  ;;  %v238_v10 = vld [vmem:[%s5742_s26 + $0x88] sm:$0xf] }
  0x44   : > { %1415 = vmatpush.bf16.msrb.mxu2 %v5513_v17  ;;  %v545_v26 = vsel %vm5757_vm2, %v540_v18, %v544_v1  ;;  %v703_v28 = vunpack.c.l.b16 %v535_v21  ;;  %v635_v29 = vor.u32 %v634_v51, %v630_v50  ;;  %v333_v32 = vrot.slane %v331_v16, 4  ;;  %v5544_v18 = vld [vmem:[%s7131_s1 + $0x100] sm:$0xff]  ;;  %v274_v16 = vld [vmem:[%s5742_s26 + $0x8c] sm:$0x1] }
  0x45   : > { %v704_v33 = vunpack.c.l.b16 %v545_v26  ;;  %v626_v34 = vrot.slane %v625_v22, 4  ;;  %v334_v36 = vshll.u32 %v219_v6, 16  ;;  %v340_v37 = vshll.u32 %v5958_v59, 16  ;;  %1730 = vmatpush.bf16.msrb.mxu3 %v5537_v38  ;;  %2411 = vmatpush.bf16.msrb.mxu0 %v5546_v39  ;;  %v245_v22 = vld [vmem:[%s5742_s26 + $0xb4] sm:$0xf] }
  0x46   : > { %v636_v41 = vrot.slane %v635_v29, 4  ;;  %v344_v42 = vshrl.u32 %v5958_v59, 16  ;;  %v350_v43 = vshll.u32 %v5964_v24, 16  ;;  %v451_v44 = vshrl.u32 %v229_v25, 16  ;;  %1034 = vmatpush.bf16.msrb.mxu1 %v5497_v40  ;;  %v246_v39 = vld [vmem:[%s5742_s26 + $0xb8] sm:$0xf] }
  0x47   : > { %v725_v46 = vpack.c.b16 %v704_v33, %v703_v28  ;;  %v631_v47 = vsel %vm5757_vm2, %v626_v34, %v630_v50  ;;  %v336_v48 = vrot.slane %v334_v36, 5  ;;  %v342_v49 = vrot.slane %v340_v37, 5 }
  0x48   : > { %v641_v54 = vsel %vm5757_vm2, %v636_v41, %v640_v23  ;;  %v711_v12 = vunpack.c.l.b16 %v631_v47  ;;  %v346_v19 = vrot.slane %v344_v42, 4  ;;  %v352_v31 = vrot.slane %v350_v43, 5  ;;  %1416 = vmatpush.bf16.msrb.mxu2 %v5512_v45  ;;  %v278_v45 = vld [vmem:[%s5742_s26 + $0xbc] sm:$0x1] }
  0x49   : > { %v712_v58 = vunpack.c.l.b16 %v641_v54  ;;  %v337_v60 = vor.u32 %v336_v48, %v333_v32  ;;  %v453_v61 = vrot.slane %v451_v44, 4  ;;  %v454_v63 = vshll.u32 %v229_v25, 16  ;;  %1731 = vmatpush.bf16.msrb.mxu3 %v5536_v56  ;;  %2412 = vmatpush.bf16.msrb.mxu0 %v5545_v57  ;;  %v5583_v47 = vld [vmem:[%s7131_s1 + $0x1b8] sm:$0xff] }
  0x4a   : > { %v347_v1 = vor.u32 %v346_v19, %v342_v49  ;;  %v460_v3 = vshll.u32 %v5987_v52, 16  ;;  %v464_v5 = vshrl.u32 %v5987_v52, 16  ;;  %v470_v6 = vshll.u32 %v5990_v53, 16  ;;  %1035 = vmatpush.bf16.msrb.mxu1 %v5496_v0 }
  0x4b   : > { %833 = vmatmul.bf16.gmra.mxu1 %v721_v20  ;;  %853 = vmatmul.bf16.gmra.mxu2 %v725_v46  ;;  %v729_v7 = vpack.c.b16 %v712_v58, %v711_v12  ;;  %v338_v8 = vrot.slane %v337_v60, 4  ;;  %v456_v9 = vrot.slane %v454_v63, 5  ;;  %v547_v11 = vshrl.u32 %v237_v55, 16  ;;  %v221_v46 = vld [vmem:[%s5742_s26 + $0x24] sm:$0xf] }
  0x4c   : > { %v348_v13 = vrot.slane %v347_v1, 4  ;;  %v462_v14 = vrot.slane %v460_v3, 5  ;;  %v466_v15 = vrot.slane %v464_v5, 4  ;;  %v472_v17 = vrot.slane %v470_v6, 5  ;;  %3147 = vmatpush.bf16.msra.mxu2 %v5583_v47  ;;  %v5591_v6 = vld [vmem:[%s7131_s1 + $0x1f8] sm:$0xff] }
  0x4d   : > { %873 = vmatmul.bf16.gmra.mxu3 %v729_v7  ;;  %v343_v50 = vsel %vm5757_vm2, %v338_v8, %v342_v49  ;;  %v457_v51 = vor.u32 %v456_v9, %v453_v61  ;;  %v549_v20 = vrot.slane %v547_v11, 4  ;;  %v550_v21 = vshll.u32 %v237_v55, 16  ;;  %2413 = vmatpush.bf16.msrb.mxu0 %v5544_v18  ;;  %v6028_v61 = vld [vmem:[%s5742_s26 + $0x28] sm:$0xf]  ;;  %v5559_v7 = vld [vmem:[%s7131_s1 + $0x178] sm:$0xff] }
  0x4e   : > { %v353_v23 = vsel %vm5757_vm2, %v348_v13, %v352_v31  ;;  %v687_v25 = vunpack.c.l.b16 %v343_v50  ;;  %v467_v26 = vor.u32 %v466_v15, %v462_v14  ;;  %v556_v28 = vshll.u32 %v238_v10, 16  ;;  %v5599_v8 = vld [vmem:[%s7131_s1 + $0x238] sm:$0xff]  ;;  %3829 = vmatpush.bf16.msra.mxu3 %v5591_v6  ;;  %2832 = vmatpush.bf16.msra.mxu1 %v5559_v7 }
  0x4f   : > { %v688_v29 = vunpack.c.l.b16 %v353_v23  ;;  %v458_v32 = vrot.slane %v457_v51, 4  ;;  %v552_v33 = vrot.slane %v550_v21, 5  ;;  %v560_v34 = vshrl.u32 %v238_v10, 16 }
  0x50   : > { %v468_v36 = vrot.slane %v467_v26, 4  ;;  %v558_v37 = vrot.slane %v556_v28, 5  ;;  %v566_v38 = vshll.u32 %v274_v16, 16  ;;  %v643_v40 = vshrl.u32 %v245_v22, 16  ;;  %v1117_v26 = vld [vmem:[%s5742_s26] sm:$0xe] }
  0x51   : > { %v717_v41 = vpack.c.b16 %v688_v29, %v687_v25  ;;  %v463_v42 = vsel %vm5757_vm2, %v458_v32, %v462_v14  ;;  %v553_v43 = vor.u32 %v552_v33, %v549_v20  ;;  %v562_v44 = vrot.slane %v560_v34, 4  ;;  %v6042_v14 = vld [vmem:[%s5742_s26 + $0x2c] sm:$0x1]  ;;  %4255 = vmatpush.bf16.msra.mxu0 %v5599_v8 }
  0x52   : > { %v473_v48 = vsel %vm5757_vm2, %v468_v36, %v472_v17  ;;  %v697_v49 = vunpack.c.l.b16 %v463_v42  ;;  %v568_v54 = vrot.slane %v566_v38, 5  ;;  %v645_v12 = vrot.slane %v643_v40, 4  ;;  %v4981_v38 = vld [vmem:[%s5742_s26 + $0xc] sm:$0xf] }
  0x53   : > { %813 = vmatmul.bf16.gmra.mxu0 %v717_v41  ;;  %v698_v19 = vunpack.c.l.b16 %v473_v48  ;;  %v554_v31 = vrot.slane %v553_v43, 4  ;;  %v563_v55 = vor.u32 %v562_v44, %v558_v37  ;;  %v646_v56 = vshll.u32 %v245_v22, 16 }
  0x54   : > { %v652_v57 = vshll.u32 %v246_v39, 16  ;;  %v656_v58 = vshrl.u32 %v246_v39, 16  ;;  %v662_v60 = vshll.u32 %v278_v45, 16  ;;  %v355_v63 = vshrl.u32 %v221_v46, 16  ;;  %v4982_v39 = vld [vmem:[%s5742_s26 + $0x10] sm:$0xf] }
  0x55   : > { %v722_v0 = vpack.c.b16 %v698_v19, %v697_v49  ;;  %v559_v1 = vsel %vm5757_vm2, %v554_v31, %v558_v37  ;;  %v564_v3 = vrot.slane %v563_v55, 4  ;;  %v648_v5 = vrot.slane %v646_v56, 5 }
  0x56   : > { %v705_v9 = vunpack.c.l.b16 %v559_v1  ;;  %v654_v10 = vrot.slane %v652_v57, 5  ;;  %v658_v11 = vrot.slane %v656_v58, 4  ;;  %v664_v13 = vrot.slane %v662_v60, 5  ;;  %v4983_v58 = vld [vmem:[%s5742_s26 + $0x14] sm:$0x1] }
  0x57   : > { %v569_v15 = vsel %vm5757_vm2, %v564_v3, %v568_v54  ;;  %v649_v17 = vor.u32 %v648_v5, %v645_v12  ;;  %v357_v18 = vrot.slane %v355_v63, 4  ;;  %v358_v50 = vshll.u32 %v221_v46, 16 }
  0x58   : > { %v706_v51 = vunpack.c.l.b16 %v569_v15  ;;  %v659_v16 = vor.u32 %v658_v11, %v654_v10  ;;  %v364_v20 = vshll.u32 %v6028_v61, 16  ;;  %v368_v21 = vshrl.u32 %v6028_v61, 16 }
  0x59   : > { %v650_v22 = vrot.slane %v649_v17, 4  ;;  %v360_v23 = vrot.slane %v358_v50, 5  ;;  %v374_v25 = vshll.u32 %v6042_v14, 16  ;;  %v4773_v44 = vrot.slane %v1117_v26, 9  ;;  %v4984_v50 = vld [vmem:[%s5742_s26 + $0x18] sm:$0xf] }
  0x5a   : > { %v726_v28 = vpack.c.b16 %v706_v51, %v705_v9  ;;  %v660_v29 = vrot.slane %v659_v16, 4  ;;  %v366_v32 = vrot.slane %v364_v20, 5  ;;  %v370_v33 = vrot.slane %v368_v21, 4  ;;  %v5480_v51 = vld [vmem:[%s5742_s26] sm:$0xff]  ;;  %v4985_v16 = vld [vmem:[%s5742_s26 + $0x1c] sm:$0xf] }
  0x5b   : > { %838 = vmatmul.bf16.gmra.mxu1 %v722_v0  ;;  %v655_v34 = vsel %vm5757_vm2, %v650_v22, %v654_v10  ;;  %v361_v36 = vor.u32 %v360_v23, %v357_v18  ;;  %v376_v37 = vrot.slane %v374_v25, 5  ;;  %v1170_v47 = vrot.slane %v5782_v62, 5  ;;  %v1118_v21 = vld [vmem:[%s5742_s26 + $0xc] sm:$0xe] }
  0x5c   : > { %858 = vmatmul.bf16.gmra.mxu2 %v726_v28  ;;  %v665_v40 = vsel %vm5757_vm2, %v660_v29, %v664_v13  ;;  %v713_v41 = vunpack.c.l.b16 %v655_v34  ;;  %v371_v42 = vor.u32 %v370_v33, %v366_v32  ;;  %v1173_v48 = vrot.slane %v5789_v4, 5  ;;  %v5520_v34 = vld [vmem:[%s5742_s26 + $0xc] sm:$0xff] }
  0x5d   : > { %v714_v45 = vunpack.c.l.b16 %v665_v40  ;;  %v362_v46 = vrot.slane %v361_v36, 4  ;;  %v1894_v54 = vshrl.u32 %v4981_v38, 16  ;;  %v1897_v12 = vshll.u32 %v4981_v38, 16 }
  0x5e   : > { %v372_v49 = vrot.slane %v371_v42, 4  ;;  %v1903_v19 = vshll.u32 %v4982_v39, 16  ;;  %v1171_v56 = vsel %vm6057_vm5, %v4773_v44, %v1170_v47  ;;  %v1172_v57 = vrot.slane %v1170_v47, 4  ;;  %v4986_v44 = vld [vmem:[%s5742_s26 + $0x20] sm:$0x1] }
  0x5f   : > { %v730_v31 = vpack.c.b16 %v714_v45, %v713_v41  ;;  %v367_v55 = vsel %vm5757_vm2, %v362_v46, %v366_v32  ;;  %v1297_v62 = vunpack.c.l.b16 %v1171_v56  ;;  %v1896_v0 = vrot.slane %v1894_v54, 4  ;;  %v5558_v56 = vld [vmem:[%s7131_s1 + $0x170] sm:$0xff] }
  0x60   : > { %v377_v60 = vsel %vm5757_vm2, %v372_v49, %v376_v37  ;;  %v689_v63 = vunpack.c.l.b16 %v367_v55  ;;  %v1174_v1 = vsel %vm6057_vm5, %v1172_v57, %v1173_v48  ;;  %v1899_v3 = vrot.slane %v1897_v12, 5  ;;  %v5582_v48 = vld [vmem:[%s7131_s1 + $0x1b0] sm:$0xff]  ;;  %2833 = vmatpush.bf16.msra.mxu1 %v5558_v56 }
  0x61   : > { %878 = vmatmul.bf16.gmra.mxu3 %v730_v31  ;;  %v690_v4 = vunpack.c.l.b16 %v377_v60  ;;  %v1298_v5 = vunpack.c.l.b16 %v1174_v1  ;;  %v1905_v6 = vrot.slane %v1903_v19, 5  ;;  %v1907_v7 = vshrl.u32 %v4982_v39, 16  ;;  %3148 = vmatpush.bf16.msra.mxu2 %v5582_v48  ;;  %v4987_v31 = vld [vmem:[%s5742_s26 + $0x24] sm:$0xf]  ;;  %v5590_v55 = vld [vmem:[%s7131_s1 + $0x1f0] sm:$0xff] }
  0x62   : > { %v1913_v8 = vshll.u32 %v4983_v58, 16  ;;  %v1900_v10 = vor.u32 %v1899_v3, %v1896_v0  ;;  %v1177_v22 = vrot.slane %v5861_v27, 5  ;;  %v1918_v23 = vshrl.u32 %v4984_v50, 16  ;;  %v5598_v57 = vld [vmem:[%s7131_s1 + $0x230] sm:$0xff]  ;;  %3830 = vmatpush.bf16.msra.mxu3 %v5590_v55  ;;  %v1120_v48 = vld [vmem:[%s5742_s26 + $0x24] sm:$0xe] }
  0x63   : > { %v718_v9 = vpack.c.b16 %v690_v4, %v689_v63  ;;  %v1329_v11 = vpack.c.b16 %v1298_v5, %v1297_v62  ;;  %v1909_v13 = vrot.slane %v1907_v7, 4  ;;  %v1921_v25 = vshll.u32 %v4984_v50, 16  ;;  %v4988_v62 = vld [vmem:[%s5742_s26 + $0x28] sm:$0xf]  ;;  %v5481_v0 = vld [vmem:[%s5742_s26 + $0xc] sm:$0xff]  ;;  %4256 = vmatpush.bf16.msra.mxu0 %v5598_v57 }
  0x64   : > { %v1901_v15 = vrot.slane %v1900_v10, 4  ;;  %v1915_v18 = vrot.slane %v1913_v8, 5  ;;  %v1927_v29 = vshll.u32 %v4985_v16, 16  ;;  %v1931_v32 = vshrl.u32 %v4985_v16, 16 }
  0x65   : > { %818 = vmatmul.bf16.gmra.mxu0 %v718_v9  ;;  %v1910_v17 = vor.u32 %v1909_v13, %v1905_v6  ;;  %v4774_v33 = vrot.slane %v1118_v21, 9  ;;  %v1179_v38 = vrot.slane %v1177_v22, 4  ;;  %v1180_v27 = vrot.slane %v5871_v35, 5  ;;  %v4989_v21 = vld [vmem:[%s5742_s26 + $0x2c] sm:$0x1] }
  0x66   : > { %v1906_v26 = vsel %vm5757_vm2, %v1901_v15, %v1905_v6  ;;  %v1920_v39 = vrot.slane %v1918_v23, 4  ;;  %v1923_v40 = vrot.slane %v1921_v25, 5  ;;  %v1929_v41 = vrot.slane %v1927_v29, 5  ;;  %v1119_v6 = vld [vmem:[%s5742_s26 + $0x18] sm:$0xe] }
  0x67   : > { %v1911_v20 = vrot.slane %v1910_v17, 4  ;;  %v2294_v36 = vunpack.c.l.b16 %v1906_v26  ;;  %v1933_v42 = vrot.slane %v1931_v32, 4  ;;  %v1178_v46 = vsel %vm6057_vm5, %v4774_v33, %v1177_v22 }
  0x68   : > { %v1181_v47 = vsel %vm6057_vm5, %v1179_v38, %v1180_v27  ;;  %v1924_v35 = vor.u32 %v1923_v40, %v1920_v39  ;;  %v1937_v54 = vshll.u32 %v4986_v44, 16  ;;  %v1299_v12 = vunpack.c.l.b16 %v1178_v46  ;;  %v4991_v38 = vld [vmem:[%s5742_s26 + $0x34] sm:$0xf]  ;;  %v5482_v27 = vld [vmem:[%s5742_s26 + $0x18] sm:$0xff] }
  0x69   : > { %v1916_v28 = vsel %vm5757_vm2, %v1911_v20, %v1915_v18  ;;  %v1934_v49 = vor.u32 %v1933_v42, %v1929_v41  ;;  %v1300_v19 = vunpack.c.l.b16 %v1181_v47  ;;  %v1184_v1 = vrot.slane %v5958_v59, 5  ;;  %v5521_v18 = vld [vmem:[%s5742_s26 + $0x18] sm:$0xff] }
  0x6a   : > { %v2295_v37 = vunpack.c.l.b16 %v1916_v28  ;;  %v1925_v58 = vrot.slane %v1924_v35, 4  ;;  %v1939_v63 = vrot.slane %v1937_v54, 5  ;;  %v1942_v3 = vshrl.u32 %v4987_v31, 16 }
  0x6b   : > { %1036 = vmatmul.bf16.vlgmr.msrb.gmra.mxu1 %v5480_v51  ;;  %v1935_v60 = vrot.slane %v1934_v49, 4  ;;  %v1330_v4 = vpack.c.b16 %v1300_v19, %v1299_v12  ;;  %v1945_v5 = vshll.u32 %v4987_v31, 16  ;;  %v1951_v7 = vshll.u32 %v4988_v62, 16  ;;  %v5522_v31 = vld [vmem:[%s5742_s26 + $0x24] sm:$0xff] }
  0x6c   : > { %1417 = vmatmul.bf16.vlgmr.msrb.gmra.mxu2 %v1329_v11  ;;  %v2326_v45 = vpack.c.b16 %v2295_v37, %v2294_v36  ;;  %v1955_v8 = vshrl.u32 %v4988_v62, 16  ;;  %v1930_v9 = vsel %vm5757_vm2, %v1925_v58, %v1929_v41  ;;  %v1187_v11 = vrot.slane %v5964_v24, 5  ;;  %v4990_v37 = vld [vmem:[%s5742_s26 + $0x30] sm:$0xf] }
  0x6d   : > { %v1940_v10 = vsel %vm5757_vm2, %v1935_v60, %v1939_v63  ;;  %v4775_v13 = vrot.slane %v1119_v6, 9  ;;  %v1186_v59 = vrot.slane %v1184_v1, 4  ;;  %v1944_v15 = vrot.slane %v1942_v3, 4  ;;  %v4993_v6 = vld [vmem:[%s5742_s26 + $0x3c] sm:$0xf] }
  0x6e   : > { %v1947_v17 = vrot.slane %v1945_v5, 5  ;;  %v2296_v50 = vunpack.c.l.b16 %v1930_v9  ;;  %v2297_v51 = vunpack.c.l.b16 %v1940_v10  ;;  %v1953_v16 = vrot.slane %v1951_v7, 5  ;;  %v4994_v7 = vld [vmem:[%s5742_s26 + $0x40] sm:$0xf] }
  0x6f   : > { %v1957_v20 = vrot.slane %v1955_v8, 4  ;;  %v1185_v22 = vsel %vm6057_vm5, %v4775_v13, %v1184_v1  ;;  %v1188_v25 = vsel %vm6057_vm5, %v1186_v59, %v1187_v11  ;;  %v1961_v28 = vshll.u32 %v4989_v21, 16  ;;  %v5581_v1 = vld [vmem:[%s7131_s1 + $0x1a8] sm:$0xff]  ;;  %v5633_v21 = vld [vmem:[%s5742_s26 + $0x34] sm:$0xf] }
  0x70   : > { %v1948_v23 = vor.u32 %v1947_v17, %v1944_v15  ;;  %v2327_v24 = vpack.c.b16 %v2297_v51, %v2296_v50  ;;  %v1301_v29 = vunpack.c.l.b16 %v1185_v22  ;;  %v1302_v32 = vunpack.c.l.b16 %v1188_v25  ;;  %3149 = vmatpush.bf16.msra.mxu2 %v5581_v1  ;;  %v5589_v11 = vld [vmem:[%s7131_s1 + $0x1e8] sm:$0xff]  ;;  %v1122_v1 = vld [vmem:[%s5742_s26 + $0x3c] sm:$0xe] }
  0x71   : > { %1732 = vmatmul.bf16.vlgmr.msrb.gmra.mxu3 %v5520_v34  ;;  %v1958_v26 = vor.u32 %v1957_v20, %v1953_v16  ;;  %v1963_v36 = vrot.slane %v1961_v28, 5  ;;  %v1966_v41 = vshrl.u32 %v4990_v37, 16  ;;  %v1969_v42 = vshll.u32 %v4990_v37, 16  ;;  %v5557_v13 = vld [vmem:[%s7131_s1 + $0x168] sm:$0xff]  ;;  %v5634_v37 = vld [vmem:[%s5742_s26 + $0x38] sm:$0x1] }
  0x72   : > { %v1949_v33 = vrot.slane %v1948_v23, 4  ;;  %v1331_v39 = vpack.c.b16 %v1302_v32, %v1301_v29  ;;  %v1975_v46 = vshll.u32 %v4991_v38, 16  ;;  %v1979_v47 = vshrl.u32 %v4991_v38, 16  ;;  %v5597_v59 = vld [vmem:[%s7131_s1 + $0x228] sm:$0xff]  ;;  %3831 = vmatpush.bf16.msra.mxu3 %v5589_v11  ;;  %2834 = vmatpush.bf16.msra.mxu1 %v5557_v13  ;;  %v5636_v13 = vld [vmem:[%s5742_s26 + $0x44] sm:$0x1] }
  0x73   : > { %v1959_v34 = vrot.slane %v1958_v26, 4  ;;  %v1194_v54 = vrot.slane %v6042_v14, 5  ;;  %v1968_v12 = vrot.slane %v1966_v41, 4  ;;  %v1971_v19 = vrot.slane %v1969_v42, 5  ;;  %v5483_v15 = vld [vmem:[%s5742_s26 + $0x24] sm:$0xff]  ;;  %4257 = vmatpush.bf16.msra.mxu0 %v5597_v59 }
  0x74   : > { %v1954_v40 = vsel %vm5757_vm2, %v1949_v33, %v1953_v16  ;;  %v4776_v55 = vrot.slane %v1120_v48, 9  ;;  %v1977_v57 = vrot.slane %v1975_v46, 5  ;;  %v1981_v58 = vrot.slane %v1979_v47, 4  ;;  %v5523_v33 = vld [vmem:[%s5742_s26 + $0x30] sm:$0xff] }
  0x75   : > { %2414 = vmatmul.bf16.vlgmr.msrb.gmra.mxu0 %v2326_v45  ;;  %v1964_v44 = vsel %vm5757_vm2, %v1959_v34, %v1963_v36  ;;  %v1191_v45 = vrot.slane %v6028_v61, 5  ;;  %v2298_v35 = vunpack.c.l.b16 %v1954_v40  ;;  %v4992_v61 = vld [vmem:[%s5742_s26 + $0x38] sm:$0x1]  ;;  %v1972_v63 = vor.u32 %v1971_v19, %v1968_v12  ;;  %v4996_v12 = vld [vmem:[%s5742_s26 + $0x48] sm:$0xf] }
  0x76   : > { %v2299_v49 = vunpack.c.l.b16 %v1964_v44  ;;  %v1982_v14 = vor.u32 %v1981_v58, %v1977_v57  ;;  %v1990_v17 = vshrl.u32 %v4993_v6, 16  ;;  %v1999_v51 = vshll.u32 %v4994_v7, 16  ;;  %v4997_v19 = vld [vmem:[%s5742_s26 + $0x4c] sm:$0xf] }
  0x77   : > { %v1193_v56 = vrot.slane %v1191_v45, 4  ;;  %v1192_v62 = vsel %vm6057_vm5, %v4776_v55, %v1191_v45  ;;  %v1973_v8 = vrot.slane %v1972_v63, 4  ;;  %v1198_v22 = vrot.slane %v5633_v21, 5 }
  0x78   : > { %v2328_v60 = vpack.c.b16 %v2299_v49, %v2298_v35  ;;  %v1303_v3 = vunpack.c.l.b16 %v1192_v62  ;;  %v1983_v9 = vrot.slane %v1982_v14, 4  ;;  %v2003_v23 = vshrl.u32 %v4994_v7, 16  ;;  %v5635_v62 = vld [vmem:[%s5742_s26 + $0x40] sm:$0xf] }
  0x79   : > { %v1978_v16 = vsel %vm5757_vm2, %v1973_v8, %v1977_v57  ;;  %v1992_v25 = vrot.slane %v1990_v17, 4  ;;  %v2001_v32 = vrot.slane %v1999_v51, 5  ;;  %v1200_v36 = vrot.slane %v1198_v22, 4 }
  0x7a   : > { %v2300_v28 = vunpack.c.l.b16 %v1978_v16  ;;  %v1201_v38 = vrot.slane %v5634_v37, 5  ;;  %v2014_v58 = vshrl.u32 %v4996_v12, 16  ;;  %v2027_v14 = vshrl.u32 %v4997_v19, 16  ;;  %v5000_v37 = vld [vmem:[%s5742_s26 + $0x58] sm:$0xf] }
  0x7b   : > { %1041 = vmatmul.bf16.gmra.mxu1 %v5481_v0  ;;  %v1195_v0 = vsel %vm6057_vm5, %v1193_v56, %v1194_v54  ;;  %v1208_v59 = vrot.slane %v5636_v13, 5 }
  0x7c   : > { %1422 = vmatmul.bf16.gmra.mxu2 %v1330_v4  ;;  %v1985_v4 = vshll.u32 %v4992_v61, 16  ;;  %v1304_v5 = vunpack.c.l.b16 %v1195_v0  ;;  %v1202_v44 = vsel %vm6057_vm5, %v1200_v36, %v1201_v38  ;;  %v2017_v61 = vshll.u32 %v4996_v12, 16  ;;  %v5588_v38 = vld [vmem:[%s7131_s1 + $0x1e0] sm:$0xff] }
  0x7d   : > { %v1306_v35 = vunpack.c.l.b16 %v1202_v44  ;;  %v1205_v0 = vrot.slane %v5635_v62, 5  ;;  %3832 = vmatpush.bf16.msra.mxu3 %v5588_v38  ;;  %v2051_v12 = vshrl.u32 %v5000_v37, 16 }
  0x7e   : > { %v1987_v10 = vrot.slane %v1985_v4, 5  ;;  %v1332_v50 = vpack.c.b16 %v1304_v5, %v1303_v3  ;;  %v2019_v7 = vrot.slane %v2017_v61, 5 }
  0x7f   : > { %v1207_v11 = vrot.slane %v1205_v0, 4 }
  0x80   : > { %v1988_v20 = vsel %vm5757_vm2, %v1983_v9, %v1987_v10  ;;  %v5524_v9 = vld [vmem:[%s5742_s26 + $0x3c] sm:$0xff]  ;;  %v4778_v10 = vrot.slane %v1122_v1, 9 }
  0x81   : > { %1737 = vmatmul.bf16.gmra.mxu3 %v5521_v18  ;;  %v1993_v18 = vshll.u32 %v4993_v6, 16  ;;  %v2301_v29 = vunpack.c.l.b16 %v1988_v20  ;;  %v2016_v6 = vrot.slane %v2014_v58, 4 }
  0x82   : > { %v1206_v21 = vsel %vm6057_vm5, %v4778_v10, %v1205_v0 }
  0x83   : > { %v1995_v26 = vrot.slane %v1993_v18, 5  ;;  %v2329_v41 = vpack.c.b16 %v2301_v29, %v2300_v28  ;;  %v4998_v18 = vld [vmem:[%s5742_s26 + $0x50] sm:$0x1]  ;;  %v2020_v20 = vor.u32 %v2019_v7, %v2016_v6  ;;  %v1307_v28 = vunpack.c.l.b16 %v1206_v21 }
  0x85   : > { %2419 = vmatmul.bf16.gmra.mxu0 %v2327_v24  ;;  %v1121_v24 = vld [vmem:[%s5742_s26 + $0x30] sm:$0xe]  ;;  %v1996_v40 = vor.u32 %v1995_v26, %v1992_v25  ;;  %v5580_v25 = vld [vmem:[%s7131_s1 + $0x1a0] sm:$0xff] }
  0x86   : > { %v4777_v34 = vrot.slane %v1121_v24, 9  ;;  %v2033_v24 = vshll.u32 %v4998_v18, 16  ;;  %3150 = vmatpush.bf16.msra.mxu2 %v5580_v25 }
  0x87   : > { %v1997_v47 = vrot.slane %v1996_v40, 4 }
  0x88   : > { %v1199_v42 = vsel %vm6057_vm5, %v4777_v34, %v1198_v22  ;;  %v1209_v22 = vsel %vm6057_vm5, %v1207_v11, %v1208_v59  ;;  %v2035_v36 = vrot.slane %v2033_v24, 5 }
  0x89   : > { %v1305_v48 = vunpack.c.l.b16 %v1199_v42  ;;  %v2002_v55 = vsel %vm5757_vm2, %v1997_v47, %v2001_v32  ;;  %v1308_v29 = vunpack.c.l.b16 %v1209_v22  ;;  %v2047_v47 = vshll.u32 %v5000_v37, 16  ;;  %v5002_v22 = vld [vmem:[%s5742_s26 + $0x60] sm:$0xf] }
  0x8a   : > { %v2302_v3 = vunpack.c.l.b16 %v2002_v55  ;;  %v2065_v37 = vshll.u32 %v5002_v22, 16 }
  0x8b   : > { %1046 = vmatmul.bf16.gmra.mxu1 %v5482_v27  ;;  %v2005_v27 = vrot.slane %v2003_v23, 4  ;;  %v1333_v57 = vpack.c.b16 %v1306_v35, %v1305_v48  ;;  %v5596_v48 = vld [vmem:[%s7131_s1 + $0x220] sm:$0xff] }
  0x8c   : > { %1427 = vmatmul.bf16.gmra.mxu2 %v1331_v39  ;;  %v4995_v39 = vld [vmem:[%s5742_s26 + $0x44] sm:$0x1]  ;;  %4258 = vmatpush.bf16.msra.mxu0 %v5596_v48 }
  0x8d   : > { %v2006_v45 = vor.u32 %v2005_v27, %v2001_v32  ;;  %v2009_v46 = vshll.u32 %v4995_v39, 16  ;;  %v2021_v32 = vrot.slane %v2020_v20, 4  ;;  %v5556_v27 = vld [vmem:[%s7131_s1 + $0x160] sm:$0xff] }
  0x8e   : > { %2835 = vmatpush.bf16.msra.mxu1 %v5556_v27 }
  0x8f   : > { %v2007_v49 = vrot.slane %v2006_v45, 4  ;;  %v2011_v54 = vrot.slane %v2009_v46, 5  ;;  %v1334_v46 = vpack.c.b16 %v1308_v29, %v1307_v28  ;;  %v5486_v29 = vld [vmem:[%s5742_s26 + $0x48] sm:$0xff] }
  0x91   : > { %1742 = vmatmul.bf16.gmra.mxu3 %v5522_v31  ;;  %v5484_v31 = vld [vmem:[%s5742_s26 + $0x30] sm:$0xff]  ;;  %v2012_v63 = vsel %vm5757_vm2, %v2007_v49, %v2011_v54  ;;  %v1212_v54 = vrot.slane %v5900_v2, 5 }
  0x92   : > { %v2303_v5 = vunpack.c.l.b16 %v2012_v63  ;;  %v5525_v63 = vld [vmem:[%s5742_s26 + $0x48] sm:$0xff] }
  0x93   : > { %v1214_v0 = vrot.slane %v1212_v54, 4 }
  0x94   : > { %v2330_v51 = vpack.c.b16 %v2303_v5, %v2302_v3  ;;  %v2053_v3 = vrot.slane %v2051_v12, 4  ;;  %v5001_v5 = vld [vmem:[%s5742_s26 + $0x5c] sm:$0x1] }
  0x95   : > { %2424 = vmatmul.bf16.gmra.mxu0 %v2328_v60  ;;  %v2023_v60 = vshll.u32 %v4997_v19, 16  ;;  %v1123_v19 = vld [vmem:[%s5742_s26 + $0x48] sm:$0xe]  ;;  %v2057_v59 = vshll.u32 %v5001_v5, 16  ;;  %v5579_v5 = vld [vmem:[%s7131_s1 + $0x198] sm:$0xff] }
  0x96   : > { %v4779_v62 = vrot.slane %v1123_v19, 9  ;;  %3151 = vmatpush.bf16.msra.mxu2 %v5579_v5 }
  0x97   : > { %v2025_v8 = vrot.slane %v2023_v60, 5  ;;  %v2049_v60 = vrot.slane %v2047_v47, 5  ;;  %v2059_v21 = vrot.slane %v2057_v59, 5  ;;  %v5005_v59 = vld [vmem:[%s5742_s26 + $0x6c] sm:$0xf] }
  0x98   : > { %v1213_v10 = vsel %vm6057_vm5, %v4779_v62, %v1212_v54  ;;  %v5526_v54 = vld [vmem:[%s5742_s26 + $0x54] sm:$0xff] }
  0x99   : > { %v2026_v35 = vsel %vm5757_vm2, %v2021_v32, %v2025_v8  ;;  %v2054_v13 = vor.u32 %v2053_v3, %v2049_v60  ;;  %v1309_v18 = vunpack.c.l.b16 %v1213_v10 }
  0x9a   : > { %v2304_v58 = vunpack.c.l.b16 %v2026_v35  ;;  %v2067_v35 = vrot.slane %v2065_v37, 5  ;;  %v5638_v37 = vld [vmem:[%s5742_s26 + $0x64] sm:$0xf] }
  0x9b   : > { %1051 = vmatmul.bf16.gmra.mxu1 %v5483_v15  ;;  %v2029_v15 = vrot.slane %v2027_v14, 4  ;;  %v5637_v14 = vld [vmem:[%s5742_s26 + $0x50] sm:$0x1]  ;;  %v2055_v20 = vrot.slane %v2054_v13, 4 }
  0x9c   : > { %1432 = vmatmul.bf16.gmra.mxu2 %v1332_v50  ;;  %v1215_v1 = vrot.slane %v5637_v14, 5 }
  0x9d   : > { %v2030_v23 = vor.u32 %v2029_v15, %v2025_v8  ;;  %v2060_v27 = vsel %vm5757_vm2, %v2055_v20, %v2059_v21  ;;  %v5487_v20 = vld [vmem:[%s5742_s26 + $0x54] sm:$0xff]  ;;  %v5006_v21 = vld [vmem:[%s5742_s26 + $0x70] sm:$0xf] }
  0x9e   : > { %v1216_v11 = vsel %vm6057_vm5, %v1214_v0, %v1215_v1  ;;  %v2307_v47 = vunpack.c.l.b16 %v2060_v27  ;;  %v2089_v27 = vshll.u32 %v5005_v59, 16 }
  0x9f   : > { %v2031_v34 = vrot.slane %v2030_v23, 4  ;;  %v5003_v23 = vld [vmem:[%s5742_s26 + $0x64] sm:$0xf] }
  0xa0   : > { %v2071_v38 = vshll.u32 %v5003_v23, 16 }
  0xa1   : > { %1747 = vmatmul.bf16.gmra.mxu3 %v5523_v33  ;;  %v4999_v33 = vld [vmem:[%s5742_s26 + $0x54] sm:$0xf]  ;;  %v2036_v49 = vsel %vm5757_vm2, %v2031_v34, %v2035_v36  ;;  %v2062_v36 = vshrl.u32 %v5002_v22, 16 }
  0xa2   : > { %v2038_v42 = vshrl.u32 %v4999_v33, 16  ;;  %v2041_v44 = vshll.u32 %v4999_v33, 16  ;;  %v2305_v61 = vunpack.c.l.b16 %v2036_v49  ;;  %v2073_v49 = vrot.slane %v2071_v38, 5 }
  0xa3   : > { %v2064_v48 = vrot.slane %v2062_v36, 4  ;;  %v1226_v38 = vrot.slane %v5638_v37, 5 }
  0xa4   : > { %v2043_v55 = vrot.slane %v2041_v44, 5  ;;  %v2331_v8 = vpack.c.b16 %v2305_v61, %v2304_v58  ;;  %v1124_v44 = vld [vmem:[%s5742_s26 + $0x54] sm:$0xe]  ;;  %v5004_v61 = vld [vmem:[%s5742_s26 + $0x68] sm:$0x1] }
  0xa5   : > { %2429 = vmatmul.bf16.gmra.mxu0 %v2329_v41  ;;  %v5485_v41 = vld [vmem:[%s5742_s26 + $0x3c] sm:$0xff]  ;;  %v4780_v12 = vrot.slane %v1124_v44, 9  ;;  %v2068_v62 = vor.u32 %v2067_v35, %v2064_v48  ;;  %v2081_v3 = vshll.u32 %v5004_v61, 16  ;;  %v2095_v44 = vshll.u32 %v5006_v21, 16 }
  0xa6   : > { %v2091_v61 = vrot.slane %v2089_v27, 5  ;;  %v5488_v27 = vld [vmem:[%s5742_s26 + $0x60] sm:$0xff] }
  0xa7   : > { %v2069_v10 = vrot.slane %v2068_v62, 4  ;;  %v2083_v13 = vrot.slane %v2081_v3, 5 }
  0xa8   : > { %v6165_v56 = vpop.f32.mrf.mxu1 }
  0xab   : > { %v6170_v4 = vpop.f32.mrf.mxu0  ;;  %1056 = vmatmul.bf16.gmra.mxu1 %v5484_v31  ;;  %v2040_v31 = vrot.slane %v2038_v42, 4  ;;  %v2075_v42 = vshrl.u32 %v5003_v23, 16 }
  0xac   : > { %1437 = vmatmul.bf16.gmra.mxu2 %v1333_v57 }
  0xad   : > { %v2044_v7 = vor.u32 %v2043_v55, %v2040_v31  ;;  %v1222_v31 = vrot.slane %v5990_v53, 5  ;;  %v2077_v55 = vrot.slane %v2075_v42, 4  ;;  %v1125_v42 = vld [vmem:[%s5742_s26 + $0x60] sm:$0xe] }
  0xae   : > { %v6175_v17 = vpop.f32.mrf.mxu2 }
  0xaf   : > { %v6178_v50 = vpop.f32.mrf.mxu3  ;;  %v2045_v15 = vrot.slane %v2044_v7, 4  ;;  %v2078_v1 = vor.u32 %v2077_v55, %v2073_v49 }
  0xb0   : > { %v6180_v16 = vpop.f32.mrf.mxu1 }
  0xb1   : > { %1752 = vmatmul.bf16.gmra.mxu3 %v5524_v9  ;;  %v2050_v32 = vsel %vm5757_vm2, %v2045_v15, %v2049_v60  ;;  %v5587_v15 = vld [vmem:[%s7131_s1 + $0x1d8] sm:$0xff] }
  0xb2   : > { %3833 = vmatpush.bf16.msra.mxu3 %v5587_v15 }
  0xb3   : > { %v6189_v26 = vpop.f32.mrf.mxu0 }
  0xb5   : > { %2434 = vmatmul.bf16.gmra.mxu0 %v2330_v51  ;;  %v1310_v51 = vunpack.c.l.b16 %v1216_v11  ;;  %v2079_v11 = vrot.slane %v2078_v1, 4 }
  0xb6   : > { %v6199_v39 = vpop.f32.mrf.mxu2 }
  0xb7   : > { %v6201_v40 = vpop.f32.mrf.mxu3  ;;  %v1335_v34 = vpack.c.b16 %v1310_v51, %v1309_v18  ;;  %v5555_v18 = vld [vmem:[%s7131_s1 + $0x158] sm:$0xff]  ;;  %v2084_v36 = vsel %vm5757_vm2, %v2079_v11, %v2083_v13 }
  0xb8   : > { %v6204_v45 = vpop.f32.mrf.mxu1  ;;  %2836 = vmatpush.bf16.msra.mxu1 %v5555_v18  ;;  %v2309_v35 = vunpack.c.l.b16 %v2084_v36 }
  0xbb   : > { %1061 = vmatmul.bf16.gmra.mxu1 %v5485_v41  ;;  %v1219_v41 = vrot.slane %v5987_v52, 5 }
  0xbc   : > { %v6215_v57 = vpop.f32.mrf.mxu0  ;;  %1442 = vmatmul.bf16.gmra.mxu2 %v1334_v46  ;;  %v2306_v46 = vunpack.c.l.b16 %v2050_v32 }
  0xbd   : > { %v1221_v19 = vrot.slane %v1219_v41, 4  ;;  %v1220_v14 = vsel %vm6057_vm5, %v4780_v12, %v1219_v41  ;;  %v4781_v12 = vrot.slane %v1125_v42, 9 }
  0xbe   : > { %v6219_v2 = vpop.f32.mrf.mxu2  ;;  %v2332_v60 = vpack.c.b16 %v2307_v47, %v2306_v46  ;;  %v1311_v7 = vunpack.c.l.b16 %v1220_v14  ;;  %v2099_v46 = vshrl.u32 %v5006_v21, 16  ;;  %v5595_v47 = vld [vmem:[%s7131_s1 + $0x218] sm:$0xff] }
  0xbf   : > { %v6222_v6 = vpop.f32.mrf.mxu3  ;;  %v1223_v53 = vsel %vm6057_vm5, %v1221_v19, %v1222_v31  ;;  %4259 = vmatpush.bf16.msra.mxu0 %v5595_v47  ;;  %v1228_v19 = vrot.slane %v1226_v38, 4  ;;  %v5639_v31 = vld [vmem:[%s5742_s26 + $0x68] sm:$0x1]  ;;  %v1227_v5 = vsel %vm6057_vm5, %v4781_v12, %v1226_v38  ;;  %v5009_v21 = vld [vmem:[%s5742_s26 + $0x7c] sm:$0xf] }
  0xc0   : > { %v6224_v9 = vpop.f32.mrf.mxu1  ;;  %v1229_v55 = vrot.slane %v5639_v31, 5  ;;  %v2101_v62 = vrot.slane %v2099_v46, 4  ;;  %v1313_v18 = vunpack.c.l.b16 %v1227_v5  ;;  %v2119_v42 = vshll.u32 %v5009_v21, 16  ;;  %v5640_v47 = vld [vmem:[%s5742_s26 + $0x70] sm:$0xf] }
  0xc1   : > { %1757 = vmatmul.bf16.gmra.mxu3 %v5525_v63 }
  0xc4   : > { %v6232_v24 = vpop.f32.mrf.mxu0 }
  0xc5   : > { %2439 = vmatmul.bf16.gmra.mxu0 %v2331_v8  ;;  %v1312_v8 = vunpack.c.l.b16 %v1223_v53  ;;  %v5007_v53 = vld [vmem:[%s5742_s26 + $0x74] sm:$0x1] }
  0xc6   : > { %v6234_v25 = vpop.f32.mrf.mxu2  ;;  %v2105_v13 = vshll.u32 %v5007_v53, 16 }
  0xc7   : > { %v6236_v28 = vpop.f32.mrf.mxu3  ;;  %v1336_v23 = vpack.c.b16 %v1312_v8, %v1311_v7  ;;  %v1230_v7 = vsel %vm6057_vm5, %v1228_v19, %v1229_v55 }
  0xc8   : > { %v6241_v33 = vpop.f32.mrf.mxu1 }
  0xcb   : > { %1066 = vmatmul.bf16.gmra.mxu1 %v5486_v29  ;;  %v2086_v29 = vshrl.u32 %v5005_v59, 16  ;;  %v5008_v59 = vld [vmem:[%s5742_s26 + $0x78] sm:$0xf] }
  0xcc   : > { %1447 = vmatmul.bf16.gmra.mxu2 %v1335_v34  ;;  %v2074_v34 = vsel %vm5757_vm2, %v2069_v10, %v2073_v49  ;;  %v2110_v36 = vshrl.u32 %v5008_v59, 16  ;;  %v2113_v37 = vshll.u32 %v5008_v59, 16 }
  0xcd   : > { %v2308_v48 = vunpack.c.l.b16 %v2074_v34  ;;  %v2088_v49 = vrot.slane %v2086_v29, 4  ;;  %v2107_v34 = vrot.slane %v2105_v13, 5  ;;  %v5528_v13 = vld [vmem:[%s5742_s26 + $0x6c] sm:$0xff] }
  0xce   : > { %v6249_v58 = vpop.f32.mrf.mxu2  ;;  %v2112_v55 = vrot.slane %v2110_v36, 4 }
  0xcf   : > { %v2333_v1 = vpack.c.b16 %v2309_v35, %v2308_v48  ;;  %v2092_v8 = vor.u32 %v2091_v61, %v2088_v49  ;;  %v1233_v48 = vrot.slane %v5640_v47, 5  ;;  %v2115_v61 = vrot.slane %v2113_v37, 5  ;;  %v5578_v47 = vld [vmem:[%s7131_s1 + $0x190] sm:$0xff] }
  0xd0   : > { %v6252_v52 = vpop.f32.mrf.mxu0  ;;  %v6254_v63 = vpop.f32.mrf.mxu3  ;;  %3152 = vmatpush.bf16.msra.mxu2 %v5578_v47 }
  0xd1   : > { %1762 = vmatmul.bf16.gmra.mxu3 %v5526_v54  ;;  %v6256_v0 = vpop.f32.mrf.mxu1  ;;  %v5527_v54 = vld [vmem:[%s5742_s26 + $0x60] sm:$0xff] }
  0xd5   : > { %2444 = vmatmul.bf16.gmra.mxu0 %v2332_v60  ;;  %v2097_v60 = vrot.slane %v2095_v44, 5  ;;  %v2123_v44 = vshrl.u32 %v5009_v21, 16 }
  0xd6   : > { %v6272_v51 = vpop.f32.mrf.mxu2 }
  0xd7   : > { %v2102_v11 = vor.u32 %v2101_v62, %v2097_v60  ;;  %v2121_v62 = vrot.slane %v2119_v42, 5  ;;  %v2125_v53 = vrot.slane %v2123_v44, 4 }
  0xd8   : > { %v6276_v22 = vpop.f32.mrf.mxu0  ;;  %v6285_v41 = vpop.f32.mrf.mxu3 }
  0xd9   : > { %v6278_v32 = vpop.f32.mrf.mxu1  ;;  %v2103_v29 = vrot.slane %v2102_v11, 4  ;;  %v5010_v11 = vld [vmem:[%s5742_s26 + $0x80] sm:$0x1]  ;;  %v2126_v21 = vor.u32 %v2125_v53, %v2121_v62  ;;  %v5554_v53 = vld [vmem:[%s7131_s1 + $0x150] sm:$0xff] }
  0xda   : > { %2837 = vmatpush.bf16.msra.mxu1 %v5554_v53 }
  0xdb   : > { %1071 = vmatmul.bf16.gmra.mxu1 %v5487_v20  ;;  %v1314_v20 = vunpack.c.l.b16 %v1230_v7  ;;  %v2108_v31 = vsel %vm5757_vm2, %v2103_v29, %v2107_v34  ;;  %v5641_v7 = vld [vmem:[%s5742_s26 + $0x74] sm:$0x1] }
  0xdc   : > { %1452 = vmatmul.bf16.gmra.mxu2 %v1336_v23  ;;  %v2093_v23 = vrot.slane %v2092_v8, 4  ;;  %v1236_v8 = vrot.slane %v5641_v7, 5  ;;  %v5489_v7 = vld [vmem:[%s5742_s26 + $0x6c] sm:$0xff] }
  0xdd   : > { %v1337_v46 = vpack.c.b16 %v1314_v20, %v1313_v18  ;;  %v2311_v18 = vunpack.c.l.b16 %v2108_v31  ;;  %v5011_v31 = vld [vmem:[%s5742_s26 + $0x84] sm:$0xf] }
  0xde   : > { %v2098_v49 = vsel %vm5757_vm2, %v2093_v23, %v2097_v60  ;;  %v1235_v60 = vrot.slane %v1233_v48, 4  ;;  %v2129_v23 = vshll.u32 %v5010_v11, 16 }
  0xdf   : > { %v6293_v14 = vpop.f32.mrf.mxu2  ;;  %v2310_v59 = vunpack.c.l.b16 %v2098_v49 }
  0xe0   : > { %v1237_v36 = vsel %vm6057_vm5, %v1235_v60, %v1236_v8 }
  0xe1   : > { %1767 = vmatmul.bf16.gmra.mxu3 %v5527_v54  ;;  %v6296_v3 = vpop.f32.mrf.mxu1  ;;  %v1126_v54 = vld [vmem:[%s5742_s26 + $0x6c] sm:$0xe]  ;;  %v2334_v37 = vpack.c.b16 %v2311_v18, %v2310_v59  ;;  %v1316_v49 = vunpack.c.l.b16 %v1237_v36 }
  0xe2   : > { %v6302_v10 = vpop.f32.mrf.mxu0  ;;  %v4782_v5 = vrot.slane %v1126_v54, 9  ;;  %v2127_v54 = vrot.slane %v2126_v21, 4 }
  0xe4   : > { %v6305_v15 = vpop.f32.mrf.mxu3  ;;  %v1234_v34 = vsel %vm6057_vm5, %v4782_v5, %v1233_v48  ;;  %v2131_v48 = vrot.slane %v2129_v23, 5 }
  0xe5   : > { %2449 = vmatmul.bf16.gmra.mxu0 %v2333_v1 }
  0xe6   : > { %v2132_v11 = vsel %vm5757_vm2, %v2127_v54, %v2131_v48 }
  0xe7   : > { %v6308_v38 = vpop.f32.mrf.mxu2 }
  0xe9   : > { %v1037_v35 = vpop.f32.mrf.mxu1 }
  0xea   : > { %v6315_v12 = vpop.f32.mrf.mxu0  ;;  %v1038_v19 = vadd.f32 %v1037_v35, %v6170_v4  ;;  %v2116_v4 = vor.u32 %v2115_v61, %v2112_v55  ;;  %v1315_v35 = vunpack.c.l.b16 %v1234_v34  ;;  %v5012_v61 = vld [vmem:[%s5742_s26 + $0x88] sm:$0xf] }
  0xeb   : > { %1076 = vmatmul.bf16.gmra.mxu1 %v5488_v27  ;;  %v2147_v21 = vshrl.u32 %v5012_v61, 16 }
  0xec   : > { %v6320_v1 = vpop.f32.mrf.mxu3  ;;  %1457 = vmatmul.bf16.gmra.mxu2 %v1337_v46  ;;  %v2117_v46 = vrot.slane %v2116_v4, 4  ;;  %v1338_v8 = vpack.c.b16 %v1316_v49, %v1315_v35  ;;  %v2137_v4 = vshll.u32 %v5011_v31, 16 }
  0xed   : > { %v2149_v54 = vrot.slane %v2147_v21, 4 }
  0xee   : > { %v2122_v5 = vsel %vm5757_vm2, %v2117_v46, %v2121_v62  ;;  %v2139_v35 = vrot.slane %v2137_v4, 5 }
  0xef   : > { %v1418_v20 = vpop.f32.mrf.mxu2 }
  0xf0   : > { %v1498_v29 = vadd.f32 %v1418_v20, %v1038_v19  ;;  %v2143_v20 = vshll.u32 %v5012_v61, 16 }
  0xf1   : > { %1772 = vmatmul.bf16.gmra.mxu3 %v5528_v13  ;;  %v1039_v27 = vpop.f32.mrf.mxu1  ;;  %v2134_v13 = vshrl.u32 %v5011_v31, 16 }
  0xf2   : > { %v2415_v42 = vpop.f32.mrf.mxu0  ;;  %v1040_v44 = vadd.f32 %v1039_v27, %v6189_v26  ;;  %v5586_v26 = vld [vmem:[%s7131_s1 + $0x1d0] sm:$0xff]  ;;  %v2145_v49 = vrot.slane %v2143_v20, 5 }
  0xf3   : > { %3834 = vmatpush.bf16.msra.mxu3 %v5586_v26  ;;  %v5594_v27 = vld [vmem:[%s7131_s1 + $0x210] sm:$0xff]  ;;  %v2136_v47 = vrot.slane %v2134_v13, 4  ;;  %v5013_v26 = vld [vmem:[%s5742_s26 + $0x8c] sm:$0x1] }
  0xf4   : > { %v1733_v19 = vpop.f32.mrf.mxu3  ;;  %4260 = vmatpush.bf16.msra.mxu0 %v5594_v27  ;;  %v2153_v4 = vshll.u32 %v5013_v26, 16  ;;  %v5644_v26 = vld [vmem:[%s5742_s26 + $0x88] sm:$0xf] }
  0xf5   : > { %2454 = vmatmul.bf16.gmra.mxu0 %v2334_v37  ;;  %v1813_v55 = vadd.f32 %v1733_v19, %v1498_v29  ;;  %v5642_v29 = vld [vmem:[%s5742_s26 + $0x7c] sm:$0xf]  ;;  %v1127_v37 = vld [vmem:[%s5742_s26 + $0x78] sm:$0xe] }
  0xf6   : > { %v1240_v34 = vrot.slane %v5642_v29, 5  ;;  %v5529_v19 = vld [vmem:[%s5742_s26 + $0x78] sm:$0xff] }
  0xf7   : > { %v1420_v60 = vpop.f32.mrf.mxu2  ;;  %v6346_v59 = vadd.f32 %v2415_v42, %v1813_v55  ;;  %v2312_v42 = vunpack.c.l.b16 %v2122_v5  ;;  %v5643_v55 = vld [vmem:[%s5742_s26 + $0x80] sm:$0x1] }
  0xf8   : > { %v1499_v18 = vadd.f32 %v1420_v60, %v1040_v44  ;;  %v2313_v44 = vunpack.c.l.b16 %v2132_v11  ;;  %v1242_v31 = vrot.slane %v1240_v34, 4  ;;  %v1243_v61 = vrot.slane %v5643_v55, 5 }
  0xf9   : > { %v1042_v23 = vpop.f32.mrf.mxu1 }
  0xfa   : > { %v2417_v62 = vpop.f32.mrf.mxu0  ;;  %v1043_v36 = vadd.f32 %v1042_v23, %v6215_v57  ;;  %v4783_v57 = vrot.slane %v1127_v37, 9  ;;  %v2335_v60 = vpack.c.b16 %v2313_v44, %v2312_v42  ;;  %v2140_v23 = vor.u32 %v2139_v35, %v2136_v47  ;;  %v5490_v47 = vld [vmem:[%s5742_s26 + $0x78] sm:$0xff]  ;;  %v5015_v35 = vld [vmem:[%s5742_s26 + $0x94] sm:$0xf] }
  0xfb   : > { %1081 = vmatmul.bf16.gmra.mxu1 %v5489_v7  ;;  %v1244_v13 = vsel %vm6057_vm5, %v1242_v31, %v1243_v61  ;;  %v2155_v44 = vrot.slane %v2153_v4, 5 }
  0xfc   : > { %v1735_v46 = vpop.f32.mrf.mxu3  ;;  %1462 = vmatmul.bf16.gmra.mxu2 %v1338_v8  ;;  %v1241_v11 = vsel %vm6057_vm5, %v4783_v57, %v1240_v34  ;;  %v2141_v27 = vrot.slane %v2140_v23, 4  ;;  %v5014_v34 = vld [vmem:[%s5742_s26 + $0x90] sm:$0xf]  ;;  %v1128_v23 = vld [vmem:[%s5742_s26 + $0x84] sm:$0xe] }
  0xfd   : > { %v1814_v48 = vadd.f32 %v1735_v46, %v1499_v18  ;;  %v2150_v18 = vor.u32 %v2149_v54, %v2145_v49  ;;  %v2158_v57 = vshrl.u32 %v5014_v34, 16 }
  0xfe   : > { %v2146_v55 = vsel %vm5757_vm2, %v2141_v27, %v2145_v49 }
  0xff   : > { %v1423_v53 = vpop.f32.mrf.mxu2  ;;  %v6357_v5 = vadd.f32 %v2417_v62, %v1814_v48  ;;  %v1318_v62 = vunpack.c.l.b16 %v1244_v13  ;;  %v2151_v42 = vrot.slane %v2150_v18, 4  ;;  %v2314_v18 = vunpack.c.l.b16 %v2146_v55 }
 0x100   : > { %v1500_v7 = vadd.f32 %v1423_v53, %v1043_v36  ;;  %v1317_v36 = vunpack.c.l.b16 %v1241_v11  ;;  %v1247_v53 = vrot.slane %v5644_v26, 5  ;;  %v2171_v11 = vshrl.u32 %v5015_v35, 16 }
 0x101   : > { %1777 = vmatmul.bf16.gmra.mxu3 %v5529_v19  ;;  %v1044_v8 = vpop.f32.mrf.mxu1  ;;  %v2156_v61 = vsel %vm5757_vm2, %v2151_v42, %v2155_v44  ;;  %v2160_v49 = vrot.slane %v2158_v57, 4 }
 0x102   : > { %v2420_v20 = vpop.f32.mrf.mxu0  ;;  %v1045_v21 = vadd.f32 %v1044_v8, %v6232_v24  ;;  %v1339_v19 = vpack.c.b16 %v1318_v62, %v1317_v36  ;;  %v2161_v24 = vshll.u32 %v5014_v34, 16  ;;  %v2167_v8 = vshll.u32 %v5015_v35, 16  ;;  %v5016_v34 = vld [vmem:[%s5742_s26 + $0x98] sm:$0x1] }
 0x103   : > { %v2315_v4 = vunpack.c.l.b16 %v2156_v61  ;;  %v4784_v36 = vrot.slane %v1128_v23, 9  ;;  %v1249_v62 = vrot.slane %v1247_v53, 4  ;;  %v2177_v26 = vshll.u32 %v5016_v34, 16 }
 0x104   : > { %v1738_v29 = vpop.f32.mrf.mxu3  ;;  %v6378_v42 = vrot.slane %v2167_v8, 5 }
 0x105   : > { %2459 = vmatmul.bf16.gmra.mxu0 %v2335_v60  ;;  %v1815_v37 = vadd.f32 %v1738_v29, %v1500_v7  ;;  %v5530_v29 = vld [vmem:[%s5742_s26 + $0x84] sm:$0xff]  ;;  %v2336_v35 = vpack.c.b16 %v2315_v4, %v2314_v18 }
 0x106   : > { %v5553_v4 = vld [vmem:[%s7131_s1 + $0x148] sm:$0xff] }
 0x107   : > { %v1425_v46 = vpop.f32.mrf.mxu2  ;;  %v6367_v48 = vadd.f32 %v2420_v20, %v1815_v37  ;;  %v2163_v20 = vrot.slane %v2161_v24, 5  ;;  %v5645_v37 = vld [vmem:[%s5742_s26 + $0x8c] sm:$0x1]  ;;  %2838 = vmatpush.bf16.msra.mxu1 %v5553_v4 }
 0x108   : > { %v1501_v54 = vadd.f32 %v1425_v46, %v1045_v21  ;;  %v1250_v27 = vrot.slane %v5645_v37, 5 }
 0x109   : > { %v1047_v31 = vpop.f32.mrf.mxu1  ;;  %v2164_v24 = vor.u32 %v2163_v20, %v2160_v49  ;;  %v2179_v20 = vrot.slane %v2177_v26, 5 }
 0x10a   : > { %v2422_v60 = vpop.f32.mrf.mxu0  ;;  %v1048_v7 = vadd.f32 %v1047_v31, %v6252_v52  ;;  %v2173_v52 = vrot.slane %v2171_v11, 4  ;;  %v1251_v57 = vsel %vm6057_vm5, %v1249_v62, %v1250_v27  ;;  %v5491_v62 = vld [vmem:[%s5742_s26 + $0x84] sm:$0xff] }
 0x10b   : > { %1086 = vmatmul.bf16.gmra.mxu1 %v5490_v47  ;;  %v1320_v11 = vunpack.c.l.b16 %v1251_v57  ;;  %v2165_v18 = vrot.slane %v2164_v24, 4  ;;  %v1129_v57 = vld [vmem:[%s5742_s26 + $0x90] sm:$0xe] }
 0x10c   : > { %v1740_v13 = vpop.f32.mrf.mxu3  ;;  %1467 = vmatmul.bf16.gmra.mxu2 %v1339_v19  ;;  %v2174_v61 = vor.u32 %v2173_v52, %v6378_v42 }
 0x10d   : > { %v1816_v21 = vadd.f32 %v1740_v13, %v1501_v54  ;;  %v1248_v54 = vsel %vm6057_vm5, %v4784_v36, %v1247_v53  ;;  %v5018_v53 = vld [vmem:[%s5742_s26 + $0xa0] sm:$0xf] }
 0x10e   : > { %v1319_v8 = vunpack.c.l.b16 %v1248_v54  ;;  %v2175_v49 = vrot.slane %v2174_v61, 4  ;;  %v2191_v37 = vshll.u32 %v5018_v53, 16  ;;  %v2195_v27 = vshrl.u32 %v5018_v53, 16  ;;  %v5647_v53 = vld [vmem:[%s5742_s26 + $0x98] sm:$0x1] }
 0x10f   : > { %v1428_v44 = vpop.f32.mrf.mxu2  ;;  %v6381_v47 = vadd.f32 %v2422_v60, %v1816_v21  ;;  %v5577_v60 = vld [vmem:[%s7131_s1 + $0x188] sm:$0xff]  ;;  %v2170_v54 = vsel %vm5757_vm2, %v2165_v18, %v6378_v42  ;;  %v4785_v42 = vrot.slane %v1129_v57, 9 }
 0x110   : > { %v1502_v46 = vadd.f32 %v1428_v44, %v1048_v7  ;;  %v5017_v7 = vld [vmem:[%s5742_s26 + $0x9c] sm:$0xf]  ;;  %3153 = vmatpush.bf16.msra.mxu2 %v5577_v60  ;;  %v1340_v34 = vpack.c.b16 %v1320_v11, %v1319_v8  ;;  %v2180_v26 = vsel %vm5757_vm2, %v2175_v49, %v2179_v20  ;;  %v5593_v60 = vld [vmem:[%s7131_s1 + $0x208] sm:$0xff]  ;;  %v2316_v4 = vunpack.c.l.b16 %v2170_v54 }
 0x111   : > { %1782 = vmatmul.bf16.gmra.mxu3 %v5530_v29  ;;  %v1049_v19 = vpop.f32.mrf.mxu1  ;;  %v2182_v21 = vshrl.u32 %v5017_v7, 16  ;;  %v2185_v29 = vshll.u32 %v5017_v7, 16  ;;  %v2193_v7 = vrot.slane %v2191_v37, 5  ;;  %4261 = vmatpush.bf16.msra.mxu0 %v5593_v60  ;;  %v2317_v49 = vunpack.c.l.b16 %v2180_v26 }
 0x112   : > { %v2425_v31 = vpop.f32.mrf.mxu0  ;;  %v1050_v55 = vadd.f32 %v1049_v19, %v6276_v22  ;;  %v5585_v22 = vld [vmem:[%s7131_s1 + $0x1c8] sm:$0xff] }
 0x113   : > { %3835 = vmatpush.bf16.msra.mxu3 %v5585_v22  ;;  %v5531_v22 = vld [vmem:[%s5742_s26 + $0x90] sm:$0xff] }
 0x114   : > { %v1743_v23 = vpop.f32.mrf.mxu3 }
 0x115   : > { %2464 = vmatmul.bf16.gmra.mxu0 %v2336_v35  ;;  %v1817_v13 = vadd.f32 %v1743_v23, %v1502_v46  ;;  %v5646_v46 = vld [vmem:[%s5742_s26 + $0x94] sm:$0xf]  ;;  %v2197_v23 = vrot.slane %v2195_v27, 4 }
 0x116   : > { %v1254_v35 = vrot.slane %v5646_v46, 5 }
 0x117   : > { %v1430_v36 = vpop.f32.mrf.mxu2  ;;  %v6401_v52 = vadd.f32 %v2425_v31, %v1817_v13  ;;  %v2184_v31 = vrot.slane %v2182_v21, 4  ;;  %v1257_v13 = vrot.slane %v5647_v53, 5 }
 0x118   : > { %v1503_v44 = vadd.f32 %v1430_v36, %v1050_v55  ;;  %v2187_v55 = vrot.slane %v2185_v29, 5  ;;  %v1256_v11 = vrot.slane %v1254_v35, 4  ;;  %v2198_v29 = vor.u32 %v2197_v23, %v2193_v7 }
 0x119   : > { %v1052_v19 = vpop.f32.mrf.mxu1  ;;  %v1255_v37 = vsel %vm6057_vm5, %v4785_v42, %v1254_v35  ;;  %v5020_v35 = vld [vmem:[%s5742_s26 + $0xa8] sm:$0xf] }
 0x11a   : > { %v2427_v24 = vpop.f32.mrf.mxu0  ;;  %v1053_v61 = vadd.f32 %v1052_v19, %v6302_v10  ;;  %v5019_v10 = vld [vmem:[%s5742_s26 + $0xa4] sm:$0x1]  ;;  %v2188_v20 = vor.u32 %v2187_v55, %v2184_v31  ;;  %v1258_v27 = vsel %vm6057_vm5, %v1256_v11, %v1257_v13  ;;  %v1321_v26 = vunpack.c.l.b16 %v1255_v37  ;;  %v5492_v11 = vld [vmem:[%s5742_s26 + $0x90] sm:$0xff] }
 0x11b   : > { %1091 = vmatmul.bf16.gmra.mxu1 %v5491_v62  ;;  %v2201_v36 = vshll.u32 %v5019_v10, 16  ;;  %v1322_v31 = vunpack.c.l.b16 %v1258_v27  ;;  %v2206_v13 = vshrl.u32 %v5020_v35, 16 }
 0x11c   : > { %v1745_v8 = vpop.f32.mrf.mxu3  ;;  %1472 = vmatmul.bf16.gmra.mxu2 %v1340_v34  ;;  %v2189_v57 = vrot.slane %v2188_v20, 4 }
 0x11d   : > { %v1818_v18 = vadd.f32 %v1745_v8, %v1503_v44  ;;  %v2337_v44 = vpack.c.b16 %v2317_v49, %v2316_v4  ;;  %v2203_v55 = vrot.slane %v2201_v36, 5  ;;  %v5021_v8 = vld [vmem:[%s5742_s26 + $0xac] sm:$0xf]  ;;  %v1341_v53 = vpack.c.b16 %v1322_v31, %v1321_v26  ;;  %v5532_v26 = vld [vmem:[%s5742_s26 + $0x9c] sm:$0xff] }
 0x11e   : > { %v2215_v4 = vshll.u32 %v5021_v8, 16  ;;  %v2219_v49 = vshrl.u32 %v5021_v8, 16 }
 0x11f   : > { %v1433_v21 = vpop.f32.mrf.mxu2  ;;  %v6421_v34 = vadd.f32 %v2427_v24, %v1818_v18  ;;  %v2194_v24 = vsel %vm5757_vm2, %v2189_v57, %v2193_v7  ;;  %v1130_v7 = vld [vmem:[%s5742_s26 + $0x9c] sm:$0xe] }
 0x120   : > { %v1504_v62 = vadd.f32 %v1433_v21, %v1053_v61  ;;  %v2199_v61 = vrot.slane %v2198_v29, 4  ;;  %v5648_v21 = vld [vmem:[%s5742_s26 + $0xa0] sm:$0xf]  ;;  %v4786_v31 = vrot.slane %v1130_v7, 9  ;;  %v5023_v7 = vld [vmem:[%s5742_s26 + $0xb4] sm:$0xf] }
 0x121   : > { %1787 = vmatmul.bf16.gmra.mxu3 %v5531_v22  ;;  %v1054_v46 = vpop.f32.mrf.mxu1  ;;  %v2209_v22 = vshll.u32 %v5020_v35, 16  ;;  %v1261_v29 = vrot.slane %v5648_v21, 5 }
 0x122   : > { %v2430_v19 = vpop.f32.mrf.mxu0  ;;  %v1055_v54 = vadd.f32 %v1054_v46, %v6315_v12  ;;  %v2204_v12 = vsel %vm5757_vm2, %v2199_v61, %v2203_v55  ;;  %v5649_v55 = vld [vmem:[%s5742_s26 + $0xa4] sm:$0x1] }
 0x123   : > { %v2319_v37 = vunpack.c.l.b16 %v2204_v12  ;;  %v2211_v46 = vrot.slane %v2209_v22, 5  ;;  %v1263_v61 = vrot.slane %v1261_v29, 4 }
 0x124   : > { %v1748_v60 = vpop.f32.mrf.mxu3 }
 0x125   : > { %2469 = vmatmul.bf16.gmra.mxu0 %v2337_v44  ;;  %v1819_v23 = vadd.f32 %v1748_v60, %v1504_v62  ;;  %v2318_v62 = vunpack.c.l.b16 %v2194_v24  ;;  %v2208_v44 = vrot.slane %v2206_v13, 4  ;;  %v1264_v60 = vrot.slane %v5649_v55, 5 }
 0x126   : > { %v1262_v13 = vsel %vm6057_vm5, %v4786_v31, %v1261_v29  ;;  %v5024_v31 = vld [vmem:[%s5742_s26 + $0xb8] sm:$0xf]  ;;  %v2233_v55 = vshll.u32 %v5023_v7, 16 }
 0x127   : > { %v1435_v42 = vpop.f32.mrf.mxu2  ;;  %v6431_v10 = vadd.f32 %v2430_v19, %v1819_v23  ;;  %v2217_v19 = vrot.slane %v2215_v4, 5  ;;  %v5022_v23 = vld [vmem:[%s5742_s26 + $0xb0] sm:$0x1]  ;;  %v1323_v21 = vunpack.c.l.b16 %v1262_v13  ;;  %v1131_v13 = vld [vmem:[%s5742_s26 + $0xa8] sm:$0xe] }
 0x128   : > { %v1505_v18 = vadd.f32 %v1435_v42, %v1055_v54  ;;  %v2221_v54 = vrot.slane %v2219_v49, 4  ;;  %v2338_v42 = vpack.c.b16 %v2319_v37, %v2318_v62  ;;  %v2225_v4 = vshll.u32 %v5022_v23, 16 }
 0x129   : > { %v1057_v20 = vpop.f32.mrf.mxu1 }
 0x12a   : > { %v2432_v36 = vpop.f32.mrf.mxu0  ;;  %v1058_v35 = vadd.f32 %v1057_v20, %v6165_v56  ;;  %v2222_v22 = vor.u32 %v2221_v54, %v2217_v19  ;;  %v5576_v56 = vld [vmem:[%s7131_s1 + $0x180] sm:$0xff] }
 0x12b   : > { %1096 = vmatmul.bf16.gmra.mxu1 %v5492_v11  ;;  %v2212_v11 = vor.u32 %v2211_v46, %v2208_v44  ;;  %3154 = vmatpush.bf16.msra.mxu2 %v5576_v56  ;;  %v5584_v44 = vld [vmem:[%s7131_s1 + $0x1c0] sm:$0xff]  ;;  %v2235_v56 = vrot.slane %v2233_v55, 5 }
 0x12c   : > { %v1750_v27 = vpop.f32.mrf.mxu3  ;;  %1477 = vmatmul.bf16.gmra.mxu2 %v1341_v53  ;;  %v2223_v37 = vrot.slane %v2222_v22, 4  ;;  %v5552_v46 = vld [vmem:[%s7131_s1 + $0x140] sm:$0xff]  ;;  %3836 = vmatpush.bf16.msra.mxu3 %v5584_v44  ;;  %v2243_v22 = vshrl.u32 %v5024_v31, 16 }
 0x12d   : > { %v1820_v57 = vadd.f32 %v1750_v27, %v1505_v18  ;;  %v1265_v18 = vsel %vm6057_vm5, %v1263_v61, %v1264_v60  ;;  %v2213_v29 = vrot.slane %v2212_v11, 4  ;;  %v2227_v27 = vrot.slane %v2225_v4, 5  ;;  %2839 = vmatpush.bf16.msra.mxu1 %v5552_v46  ;;  %v5592_v4 = vld [vmem:[%s7131_s1 + $0x200] sm:$0xff] }
 0x12e   : > { %v2230_v61 = vshrl.u32 %v5023_v7, 16  ;;  %4262 = vmatpush.bf16.msra.mxu0 %v5592_v4  ;;  %v5533_v7 = vld [vmem:[%s5742_s26 + $0xa8] sm:$0xff]  ;;  %v5026_v4 = vld [vmem:[%s5742_s26 + $0xc0] sm:$0xf] }
 0x12f   : > { %v1438_v8 = vpop.f32.mrf.mxu2  ;;  %v6439_v12 = vadd.f32 %v2432_v36, %v1820_v57  ;;  %v1324_v36 = vunpack.c.l.b16 %v1265_v18  ;;  %v2239_v18 = vshll.u32 %v5024_v31, 16 }
 0x130   : > { %v1506_v24 = vadd.f32 %v1438_v8, %v1058_v35 }
 0x131   : > { %1792 = vmatmul.bf16.gmra.mxu3 %v5532_v26  ;;  %v1059_v53 = vpop.f32.mrf.mxu1  ;;  %v5493_v26 = vld [vmem:[%s5742_s26 + $0x9c] sm:$0xff]  ;;  %v1342_v23 = vpack.c.b16 %v1324_v36, %v1323_v21  ;;  %v2241_v46 = vrot.slane %v2239_v18, 5 }
 0x132   : > { %v2435_v49 = vpop.f32.mrf.mxu0  ;;  %v1060_v54 = vadd.f32 %v1059_v53, %v6180_v16  ;;  %v5650_v16 = vld [vmem:[%s5742_s26 + $0xac] sm:$0xf] }
 0x133   : > { %v1268_v11 = vrot.slane %v5650_v16, 5 }
 0x134   : > { %v1753_v20 = vpop.f32.mrf.mxu3 }
 0x135   : > { %2474 = vmatmul.bf16.gmra.mxu0 %v2338_v42  ;;  %v1821_v62 = vadd.f32 %v1753_v20, %v1506_v24  ;;  %v2218_v42 = vsel %vm5757_vm2, %v2213_v29, %v2217_v19  ;;  %v2228_v24 = vsel %vm5757_vm2, %v2223_v37, %v2227_v27  ;;  %v1270_v29 = vrot.slane %v1268_v11, 4  ;;  %v5651_v37 = vld [vmem:[%s5742_s26 + $0xb0] sm:$0x1] }
 0x136   : > { %v2320_v20 = vunpack.c.l.b16 %v2218_v42  ;;  %v2321_v21 = vunpack.c.l.b16 %v2228_v24  ;;  %v1271_v27 = vrot.slane %v5651_v37, 5  ;;  %v2254_v37 = vshrl.u32 %v5026_v4, 16 }
 0x137   : > { %v1440_v57 = vpop.f32.mrf.mxu2  ;;  %v6458_v60 = vadd.f32 %v2435_v49, %v1821_v62  ;;  %v2232_v49 = vrot.slane %v2230_v61, 4  ;;  %v4787_v62 = vrot.slane %v1131_v13, 9 }
 0x138   : > { %v1507_v35 = vadd.f32 %v1440_v57, %v1060_v54  ;;  %v2245_v54 = vrot.slane %v2243_v22, 4 }
 0x139   : > { %v1062_v8 = vpop.f32.mrf.mxu1  ;;  %v2236_v31 = vor.u32 %v2235_v56, %v2232_v49  ;;  %v1269_v42 = vsel %vm6057_vm5, %v4787_v62, %v1268_v11  ;;  %v5027_v56 = vld [vmem:[%s5742_s26 + $0xc4] sm:$0xf]  ;;  %v5494_v62 = vld [vmem:[%s5742_s26 + $0xa8] sm:$0xff] }
 0x13a   : > { %v2437_v53 = vpop.f32.mrf.mxu0  ;;  %v1063_v44 = vadd.f32 %v1062_v8, %v6204_v45  ;;  %v1272_v45 = vsel %vm6057_vm5, %v1270_v29, %v1271_v27  ;;  %v2246_v24 = vor.u32 %v2245_v54, %v2241_v46  ;;  %v1325_v22 = vunpack.c.l.b16 %v1269_v42 }
 0x13b   : > { %1101 = vmatmul.bf16.gmra.mxu1 %v5493_v26  ;;  %v5025_v26 = vld [vmem:[%s5742_s26 + $0xbc] sm:$0x1]  ;;  %v2237_v13 = vrot.slane %v2236_v31, 4  ;;  %v2257_v27 = vshll.u32 %v5026_v4, 16  ;;  %v2267_v31 = vshrl.u32 %v5027_v56, 16 }
 0x13c   : > { %v1755_v19 = vpop.f32.mrf.mxu3  ;;  %1482 = vmatmul.bf16.gmra.mxu2 %v1342_v23  ;;  %v2249_v16 = vshll.u32 %v5025_v26, 16  ;;  %v2263_v26 = vshll.u32 %v5027_v56, 16 }
 0x13d   : > { %v1822_v36 = vadd.f32 %v1755_v19, %v1507_v35  ;;  %v2339_v35 = vpack.c.b16 %v2321_v21, %v2320_v20  ;;  %v5652_v19 = vld [vmem:[%s5742_s26 + $0x10] sm:$0xf]  ;;  %v2247_v21 = vrot.slane %v2246_v24, 4  ;;  %v2242_v29 = vsel %vm5757_vm2, %v2237_v13, %v2241_v46 }
 0x13e   : > { %v2593_v20 = vrot.slane %v5652_v19, 5  ;;  %v2256_v13 = vrot.slane %v2254_v37, 4  ;;  %v2269_v56 = vrot.slane %v2267_v31, 4 }
 0x13f   : > { %v1443_v57 = vpop.f32.mrf.mxu2  ;;  %v6473_v55 = vadd.f32 %v2437_v53, %v1822_v36  ;;  %v1326_v53 = vunpack.c.l.b16 %v1272_v45  ;;  %v2251_v36 = vrot.slane %v2249_v16, 5  ;;  %v5654_v45 = vld [vmem:[%s5742_s26 + $0x14] sm:$0x1] }
 0x140   : > { %v1508_v61 = vadd.f32 %v1443_v57, %v1063_v44  ;;  %v2595_v42 = vrot.slane %v2593_v20, 4  ;;  %v2596_v24 = vrot.slane %v5654_v45, 5 }
 0x141   : > { %7139 = vst [vmem:[#allocation2_spill] sm:$0xff] %v6473_v55  ;;  %1797 = vmatmul.bf16.gmra.mxu3 %v5533_v7  ;;  %v1064_v23 = vpop.f32.mrf.mxu1  ;;  %v1343_v57 = vpack.c.b16 %v1326_v53, %v1325_v22  ;;  %v2252_v46 = vsel %vm5757_vm2, %v2247_v21, %v2251_v36  ;;  %v5077_v22 = vld [vmem:[%s5742_s26 + $0xc] sm:$0xe]  ;;  %v5028_v21 = vld [vmem:[%s5742_s26 + $0xc8] sm:$0x1] }
 0x142   : > { %v2440_v8 = vpop.f32.mrf.mxu0  ;;  %v1065_v11 = vadd.f32 %v1064_v23, %v6224_v9  ;;  %v5653_v9 = vld [vmem:[%s5742_s26 + $0xb8] sm:$0xf]  ;;  %v5093_v19 = vrot.slane %v5077_v22, 9 }
 0x143   : > { %v1275_v23 = vrot.slane %v5653_v9, 5  ;;  %v2323_v9 = vunpack.c.l.b16 %v2252_v46 }
 0x144   : > { %v1758_v18 = vpop.f32.mrf.mxu3 }
 0x145   : > { %2479 = vmatmul.bf16.gmra.mxu0 %v2339_v35  ;;  %v1823_v49 = vadd.f32 %v1758_v18, %v1508_v61  ;;  %v1132_v35 = vld [vmem:[%s5742_s26 + $0xb4] sm:$0xe]  ;;  %v2259_v18 = vrot.slane %v2257_v27, 5  ;;  %v1277_v45 = vrot.slane %v1275_v23, 4 }
 0x146   : > { %v4788_v4 = vrot.slane %v1132_v35, 9  ;;  %v2273_v35 = vshll.u32 %v5028_v21, 16  ;;  %v5495_v21 = vld [vmem:[%s5742_s26 + $0xb4] sm:$0xff] }
 0x147   : > { %v1445_v7 = vpop.f32.mrf.mxu2  ;;  %v6486_v44 = vadd.f32 %v2440_v8, %v1823_v49  ;;  %v2322_v8 = vunpack.c.l.b16 %v2242_v29  ;;  %v2265_v49 = vrot.slane %v2263_v26, 5  ;;  %v2597_v29 = vsel %vm6057_vm5, %v2595_v42, %v2596_v24  ;;  %v5301_v42 = vld [vmem:[%s5742_s26 + $0x18] sm:$0xf] }
 0x148   : > { %v1509_v54 = vadd.f32 %v1445_v7, %v1065_v11  ;;  %v5534_v7 = vld [vmem:[%s5742_s26 + $0xb4] sm:$0xff]  ;;  %v2260_v27 = vor.u32 %v2259_v18, %v2256_v13  ;;  %v1276_v31 = vsel %vm6057_vm5, %v4788_v4, %v1275_v23  ;;  %v6512_v18 = vld [vmem:[%s5742_s26 + $0x1c] sm:$0xf] }
 0x149   : > { %7140 = vst [vmem:[#allocation3_spill] sm:$0xff] %v6486_v44  ;;  %v1067_v61 = vpop.f32.mrf.mxu1  ;;  %v5655_v44 = vld [vmem:[%s5742_s26 + $0xbc] sm:$0x1]  ;;  %v1327_v22 = vunpack.c.l.b16 %v1276_v31 }
 0x14a   : > { %v2442_v16 = vpop.f32.mrf.mxu0  ;;  %v1278_v55 = vrot.slane %v5655_v44, 5  ;;  %v1068_v36 = vadd.f32 %v1067_v61, %v6241_v33  ;;  %v2270_v44 = vor.u32 %v2269_v56, %v2265_v49  ;;  %v2340_v33 = vpack.c.b16 %v2323_v9, %v2322_v8 }
 0x14b   : > { %1106 = vmatmul.bf16.gmra.mxu1 %v5494_v62  ;;  %v2594_v62 = vsel %vm6057_vm5, %v5093_v19, %v2593_v20  ;;  %v2275_v19 = vrot.slane %v2273_v35, 5  ;;  %v3317_v8 = vshrl.u32 %v5301_v42, 16  ;;  %v3320_v9 = vshll.u32 %v5301_v42, 16  ;;  %v5303_v35 = vld [vmem:[%s5742_s26 + $0x20] sm:$0x1] }
 0x14c   : > { %v1760_v53 = vpop.f32.mrf.mxu3  ;;  %1487 = vmatmul.bf16.gmra.mxu2 %v1343_v57  ;;  %v2720_v57 = vunpack.c.l.b16 %v2594_v62  ;;  %v1279_v20 = vsel %vm6057_vm5, %v1277_v45, %v1278_v55  ;;  %v2271_v56 = vrot.slane %v2270_v44, 4  ;;  %v3326_v55 = vshll.u32 %v6512_v18, 16 }
 0x14d   : > { %v1824_v11 = vadd.f32 %v1760_v53, %v1509_v54  ;;  %v2721_v54 = vunpack.c.l.b16 %v2597_v29  ;;  %v2261_v53 = vrot.slane %v2260_v27, 4  ;;  %v1328_v4 = vunpack.c.l.b16 %v1279_v20 }
 0x14e   : > { %v2276_v27 = vsel %vm5757_vm2, %v2271_v56, %v2275_v19  ;;  %v3328_v31 = vrot.slane %v3326_v55, 5  ;;  %v5304_v56 = vld [vmem:[%s5742_s26 + $0x24] sm:$0xf] }
 0x14f   : > { %v1448_v37 = vpop.f32.mrf.mxu2  ;;  %v6506_v46 = vpack.c.b16 %v2721_v54, %v2720_v57  ;;  %v6509_v24 = vadd.f32 %v2442_v16, %v1824_v11  ;;  %v3330_v16 = vshrl.u32 %v6512_v18, 16  ;;  %v1344_v29 = vpack.c.b16 %v1328_v4, %v1327_v22 }
 0x150   : > { %v1510_v26 = vadd.f32 %v1448_v37, %v1068_v36  ;;  %v2266_v37 = vsel %vm5757_vm2, %v2261_v53, %v2265_v49  ;;  %v3319_v54 = vrot.slane %v3317_v8, 4  ;;  %v2325_v20 = vunpack.c.l.b16 %v2276_v27 }
 0x151   : > { %1802 = vmatmul.bf16.gmra.mxu3 %v5534_v7  ;;  %v1069_v61 = vpop.f32.mrf.mxu1  ;;  %v3332_v44 = vrot.slane %v3330_v16, 4  ;;  %v3336_v53 = vshll.u32 %v5303_v35, 16  ;;  %v3344_v27 = vshll.u32 %v5304_v56, 16 }
 0x152   : > { %v2445_v13 = vpop.f32.mrf.mxu0  ;;  %v1070_v11 = vadd.f32 %v1069_v61, %v6256_v0  ;;  %v2324_v61 = vunpack.c.l.b16 %v2266_v37  ;;  %v3341_v37 = vshrl.u32 %v5304_v56, 16  ;;  %v5656_v56 = vld [vmem:[%s5742_s26 + $0x1c] sm:$0xf] }
 0x153   : > { %v3333_v22 = vor.u32 %v3332_v44, %v3328_v31 }
 0x154   : > { %v1763_v23 = vpop.f32.mrf.mxu3  ;;  %v2341_v19 = vpack.c.b16 %v2325_v20, %v2324_v61  ;;  %v4019_v20 = vrot.slane %v5303_v35, 5 }
 0x155   : > { %2484 = vmatmul.bf16.gmra.mxu0 %v2340_v33  ;;  %v1825_v7 = vadd.f32 %v1763_v23, %v1510_v26  ;;  %v3322_v26 = vrot.slane %v3320_v9, 5  ;;  %v3334_v16 = vrot.slane %v3333_v22, 4 }
 0x157   : > { %v1450_v45 = vpop.f32.mrf.mxu2  ;;  %v6518_v36 = vadd.f32 %v2445_v13, %v1825_v7  ;;  %v5535_v13 = vld [vmem:[%s5742_s26 + $0xc0] sm:$0xff]  ;;  %v3323_v49 = vor.u32 %v3322_v26, %v3319_v54  ;;  %v6529_v7 = vld [vmem:[%s5742_s26 + $0x28] sm:$0xf] }
 0x158   : > { %v1511_v62 = vadd.f32 %v1450_v45, %v1070_v11  ;;  %v3338_v11 = vrot.slane %v3336_v53, 5 }
 0x159   : > { %v1072_v57 = vpop.f32.mrf.mxu1  ;;  %v3324_v55 = vrot.slane %v3323_v49, 4  ;;  %v3346_v49 = vrot.slane %v3344_v27, 5 }
 0x15a   : > { %v2447_v0 = vpop.f32.mrf.mxu0  ;;  %v1073_v23 = vadd.f32 %v1072_v57, %v6278_v32  ;;  %v3350_v32 = vshll.u32 %v6529_v7, 16  ;;  %v3354_v57 = vshrl.u32 %v6529_v7, 16 }
 0x15b   : > { %1111 = vmatmul.bf16.gmra.mxu1 %v5495_v21  ;;  %v3329_v44 = vsel %vm5757_vm2, %v3324_v55, %v3328_v31  ;;  %v5560_v31 = vld [vmem:[%s5742_s26 + $0x18] sm:$0xff] }
 0x15c   : > { %v1765_v33 = vpop.f32.mrf.mxu3  ;;  %1492 = vmatmul.bf16.gmra.mxu2 %v1344_v29  ;;  %v4016_v29 = vrot.slane %v6512_v18, 5  ;;  %v6542_v22 = vrot.slane %v3350_v32, 5  ;;  %v3356_v53 = vrot.slane %v3354_v57, 4 }
 0x15d   : > { %v1826_v42 = vadd.f32 %v1765_v33, %v1511_v62  ;;  %v5397_v62 = vld [vmem:[%s5742_s26 + $0x18] sm:$0xe] }
 0x15e   : > { %v5413_v33 = vrot.slane %v5397_v62, 9  ;;  %v4018_v61 = vrot.slane %v4016_v29, 4 }
 0x15f   : > { %v1453_v4 = vpop.f32.mrf.mxu2  ;;  %v6531_v45 = vadd.f32 %v2447_v0, %v1826_v42  ;;  %v3339_v0 = vsel %vm5757_vm2, %v3334_v16, %v3338_v11  ;;  %v3343_v42 = vrot.slane %v3341_v37, 4  ;;  %v5078_v16 = vld [vmem:[%s5742_s26 + $0x18] sm:$0xe]  ;;  %v3357_v37 = vor.u32 %v3356_v53, %v6542_v22 }
 0x160   : > { %v1512_v8 = vadd.f32 %v1453_v4, %v1073_v23  ;;  %v4017_v11 = vsel %vm6057_vm5, %v5413_v33, %v4016_v29  ;;  %v4020_v62 = vsel %vm6057_vm5, %v4018_v61, %v4019_v20  ;;  %v5094_v57 = vrot.slane %v5078_v16, 9  ;;  %v5307_v16 = vld [vmem:[%s5742_s26 + $0x30] sm:$0xf] }
 0x161   : > { %1807 = vmatmul.bf16.gmra.mxu3 %v5535_v13  ;;  %v1074_v9 = vpop.f32.mrf.mxu1  ;;  %v4143_v29 = vunpack.c.l.b16 %v4017_v11  ;;  %v4144_v33 = vunpack.c.l.b16 %v4020_v62  ;;  %v6571_v11 = vld [vmem:[%s5742_s26 + $0x34] sm:$0xf] }
 0x162   : > { %v2450_v21 = vpop.f32.mrf.mxu0  ;;  %v1075_v18 = vadd.f32 %v1074_v9, %v6296_v3  ;;  %v3717_v3 = vunpack.c.l.b16 %v3329_v44  ;;  %v3718_v9 = vunpack.c.l.b16 %v3339_v0 }
 0x164   : > { %v1768_v54 = vpop.f32.mrf.mxu3 }
 0x165   : > { %2489 = vmatmul.bf16.gmra.mxu0 %v2341_v19  ;;  %v1827_v26 = vadd.f32 %v1768_v54, %v1512_v8  ;;  %v2600_v19 = vrot.slane %v5656_v56, 5  ;;  %v6549_v8 = vld [vmem:[%s5742_s26 + $0x2c] sm:$0x1]  ;;  %v5398_v56 = vld [vmem:[%s5742_s26 + $0x24] sm:$0xe] }
 0x166   : > { %v3360_v27 = vshll.u32 %v6549_v8, 16 }
 0x167   : > { %v1455_v13 = vpop.f32.mrf.mxu2  ;;  %v6544_v23 = vadd.f32 %v2450_v21, %v1827_v26  ;;  %v3347_v21 = vor.u32 %v3346_v49, %v3343_v42  ;;  %v2602_v54 = vrot.slane %v2600_v19, 4  ;;  %v5657_v26 = vld [vmem:[%s5742_s26 + $0x20] sm:$0x1]  ;;  %v3358_v42 = vrot.slane %v3357_v37, 4 }
 0x168   : > { %v1513_v4 = vadd.f32 %v1455_v13, %v1075_v18  ;;  %v2603_v44 = vrot.slane %v5657_v26, 5  ;;  %v3749_v18 = vpack.c.b16 %v3718_v9, %v3717_v3  ;;  %v3362_v13 = vrot.slane %v3360_v27, 5 }
 0x169   : > { %v1077_v55 = vpop.f32.mrf.mxu1  ;;  %v3348_v20 = vrot.slane %v3347_v21, 4  ;;  %v2601_v53 = vsel %vm6057_vm5, %v5094_v57, %v2600_v19  ;;  %v4175_v3 = vpack.c.b16 %v4144_v33, %v4143_v29  ;;  %v5414_v37 = vrot.slane %v5398_v56, 9 }
 0x16a   : > { %v2452_v35 = vpop.f32.mrf.mxu0  ;;  %v1078_v61 = vadd.f32 %v1077_v55, %v6175_v17  ;;  %v2722_v62 = vunpack.c.l.b16 %v2601_v53  ;;  %v3365_v57 = vshrl.u32 %v5307_v16, 16  ;;  %v4026_v26 = vrot.slane %v6549_v8, 5  ;;  %v5079_v53 = vld [vmem:[%s5742_s26 + $0x24] sm:$0xe] }
 0x16b   : > { %2840 = vmatmul.bf16.vlgmr.msra.gmra.mxu1 %v6506_v46  ;;  %v3353_v19 = vsel %vm5757_vm2, %v3348_v20, %v6542_v22 }
 0x16c   : > { %v1770_v32 = vpop.f32.mrf.mxu3  ;;  %3155 = vmatmul.bf16.vlgmr.msra.gmra.mxu2 %v5560_v31  ;;  %v2604_v31 = vsel %vm6057_vm5, %v2602_v54, %v2603_v44  ;;  %v3374_v44 = vshll.u32 %v6571_v11, 16  ;;  %v3719_v33 = vunpack.c.l.b16 %v3353_v19  ;;  %v3367_v8 = vrot.slane %v3365_v57, 4 }
 0x16d   : > { %v1828_v0 = vadd.f32 %v1770_v32, %v1513_v4  ;;  %v4023_v4 = vrot.slane %v6529_v7, 5  ;;  %v2723_v21 = vunpack.c.l.b16 %v2604_v31  ;;  %v3363_v7 = vsel %vm5757_vm2, %v3358_v42, %v3362_v13  ;;  %v5561_v13 = vld [vmem:[%s5742_s26 + $0x24] sm:$0xff] }
 0x16f   : > { %v1458_v46 = vpop.f32.mrf.mxu2  ;;  %v6568_v17 = vadd.f32 %v2452_v35, %v1828_v0  ;;  %v4025_v32 = vrot.slane %v4023_v4, 4  ;;  %v3368_v35 = vshll.u32 %v5307_v16, 16  ;;  %v3378_v0 = vshrl.u32 %v6571_v11, 16 }
 0x170   : > { %v1514_v49 = vadd.f32 %v1458_v46, %v1078_v61  ;;  %v2753_v29 = vpack.c.b16 %v2723_v21, %v2722_v62  ;;  %v5658_v61 = vld [vmem:[%s5742_s26 + $0x28] sm:$0xf]  ;;  %v5095_v21 = vrot.slane %v5079_v53, 9 }
 0x171   : > { %3837 = vmatmul.bf16.vlgmr.msra.gmra.mxu3 %v3749_v18  ;;  %v1079_v9 = vpop.f32.mrf.mxu1  ;;  %v2607_v46 = vrot.slane %v5658_v61, 5  ;;  %v3370_v31 = vrot.slane %v3368_v35, 5  ;;  %v3380_v16 = vrot.slane %v3378_v0, 4  ;;  %v5310_v61 = vld [vmem:[%s5742_s26 + $0x3c] sm:$0xf] }
 0x172   : > { %v2455_v55 = vpop.f32.mrf.mxu0  ;;  %v1080_v22 = vadd.f32 %v1079_v9, %v6199_v39  ;;  %v4027_v39 = vsel %vm6057_vm5, %v4025_v32, %v4026_v26  ;;  %v6591_v9 = vrot.slane %v3374_v44, 5 }
 0x173   : > { %v2609_v19 = vrot.slane %v2607_v46, 4 }
 0x174   : > { %v1773_v27 = vpop.f32.mrf.mxu3  ;;  %v3381_v26 = vor.u32 %v3380_v16, %v6591_v9  ;;  %v5399_v16 = vld [vmem:[%s5742_s26 + $0x30] sm:$0xe] }
 0x175   : > { %4263 = vmatmul.bf16.vlgmr.msra.gmra.mxu0 %v4175_v3  ;;  %v1829_v54 = vadd.f32 %v1773_v27, %v1514_v49  ;;  %v3720_v49 = vunpack.c.l.b16 %v3363_v7  ;;  %v4024_v3 = vsel %vm6057_vm5, %v5414_v37, %v4023_v4  ;;  %v5659_v27 = vld [vmem:[%s5742_s26 + $0x2c] sm:$0x1]  ;;  %v4146_v4 = vunpack.c.l.b16 %v4027_v39 }
 0x176   : > { %v2610_v7 = vrot.slane %v5659_v27, 5  ;;  %v4145_v35 = vunpack.c.l.b16 %v4024_v3  ;;  %v3371_v37 = vor.u32 %v3370_v31, %v3367_v8 }
 0x177   : > { %v1460_v18 = vpop.f32.mrf.mxu2  ;;  %v6583_v20 = vadd.f32 %v2455_v55, %v1829_v54  ;;  %v6594_v55 = vld [vmem:[%s5742_s26 + $0x38] sm:$0x1]  ;;  %v3750_v32 = vpack.c.b16 %v3720_v49, %v3719_v33  ;;  %v3382_v49 = vrot.slane %v3381_v26, 4 }
 0x178   : > { %v1515_v42 = vadd.f32 %v1460_v18, %v1080_v22  ;;  %v3384_v44 = vshll.u32 %v6594_v55, 16  ;;  %v2608_v18 = vsel %vm6057_vm5, %v5095_v21, %v2607_v46  ;;  %v3372_v8 = vrot.slane %v3371_v37, 4 }
 0x179   : > { %v1082_v56 = vpop.f32.mrf.mxu1  ;;  %v2724_v46 = vunpack.c.l.b16 %v2608_v18  ;;  %v3389_v21 = vshrl.u32 %v5310_v61, 16  ;;  %v4033_v26 = vrot.slane %v6594_v55, 5 }
 0x17a   : > { %v2457_v62 = vpop.f32.mrf.mxu0  ;;  %v1083_v0 = vadd.f32 %v1082_v56, %v6219_v2  ;;  %v3386_v31 = vrot.slane %v3384_v44, 5  ;;  %v4030_v2 = vrot.slane %v6571_v11, 5 }
 0x17b   : > { %2845 = vmatmul.bf16.gmra.mxu1 %v2753_v29  ;;  %v2611_v29 = vsel %vm6057_vm5, %v2609_v19, %v2610_v7  ;;  %v3392_v19 = vshll.u32 %v5310_v61, 16  ;;  %v3391_v44 = vrot.slane %v3389_v21, 4 }
 0x17c   : > { %v1775_v57 = vpop.f32.mrf.mxu3  ;;  %3160 = vmatmul.bf16.gmra.mxu2 %v5561_v13  ;;  %v4176_v13 = vpack.c.b16 %v4146_v4, %v4145_v35  ;;  %v2725_v39 = vunpack.c.l.b16 %v2611_v29  ;;  %v3377_v35 = vsel %vm5757_vm2, %v3372_v8, %v6591_v9  ;;  %v5415_v4 = vrot.slane %v5399_v16, 9 }
 0x17d   : > { %v1830_v54 = vadd.f32 %v1775_v57, %v1515_v42  ;;  %v6606_v42 = vld [vmem:[%s5742_s26 + $0x40] sm:$0xf]  ;;  %v4032_v37 = vrot.slane %v4030_v2, 4 }
 0x17e   : > { %v3398_v27 = vshll.u32 %v6606_v42, 16  ;;  %v3402_v7 = vshrl.u32 %v6606_v42, 16 }
 0x17f   : > { %v1463_v22 = vpop.f32.mrf.mxu2  ;;  %v6609_v56 = vadd.f32 %v2457_v62, %v1830_v54  ;;  %v3387_v62 = vsel %vm5757_vm2, %v3382_v49, %v3386_v31  ;;  %v6628_v49 = vld [vmem:[%s5742_s26 + $0x44] sm:$0x1]  ;;  %v4034_v16 = vsel %vm6057_vm5, %v4032_v37, %v4033_v26 }
 0x180   : > { %v1516_v53 = vadd.f32 %v1463_v22, %v1083_v0  ;;  %v3394_v22 = vrot.slane %v3392_v19, 5  ;;  %v6621_v9 = vrot.slane %v3398_v27, 5  ;;  %v3404_v18 = vrot.slane %v3402_v7, 4 }
 0x181   : > { %3842 = vmatmul.bf16.gmra.mxu3 %v3750_v32  ;;  %v1084_v33 = vpop.f32.mrf.mxu1  ;;  %v2754_v32 = vpack.c.b16 %v2725_v39, %v2724_v46  ;;  %v3722_v31 = vunpack.c.l.b16 %v3387_v62  ;;  %v5080_v46 = vld [vmem:[%s5742_s26 + $0x30] sm:$0xe]  ;;  %v4031_v39 = vsel %vm6057_vm5, %v5415_v4, %v4030_v2  ;;  %v3408_v19 = vshll.u32 %v6628_v49, 16 }
 0x182   : > { %v2460_v3 = vpop.f32.mrf.mxu0  ;;  %v1085_v54 = vadd.f32 %v1084_v33, %v6234_v25  ;;  %v3721_v33 = vunpack.c.l.b16 %v3377_v35  ;;  %v3405_v21 = vor.u32 %v3404_v18, %v6621_v9  ;;  %v5096_v7 = vrot.slane %v5080_v46, 9  ;;  %v5661_v35 = vld [vmem:[%s5742_s26 + $0x38] sm:$0x1]  ;;  %v5313_v46 = vld [vmem:[%s5742_s26 + $0x48] sm:$0xf] }
 0x183   : > { %v4147_v2 = vunpack.c.l.b16 %v4031_v39  ;;  %v4148_v4 = vunpack.c.l.b16 %v4034_v16  ;;  %v6649_v39 = vld [vmem:[%s5742_s26 + $0x4c] sm:$0xf] }
 0x184   : > { %v1778_v57 = vpop.f32.mrf.mxu3 }
 0x185   : > { %4268 = vmatmul.bf16.gmra.mxu0 %v4176_v13  ;;  %v1831_v11 = vadd.f32 %v1778_v57, %v1516_v53  ;;  %v5562_v13 = vld [vmem:[%s5742_s26 + $0x30] sm:$0xff] }
 0x186   : > { %v5660_v53 = vld [vmem:[%s5742_s26 + $0x34] sm:$0xf] }
 0x187   : > { %v1465_v0 = vpop.f32.mrf.mxu2  ;;  %v6623_v29 = vadd.f32 %v2460_v3, %v1831_v11  ;;  %v2614_v8 = vrot.slane %v5660_v53, 5  ;;  %v3395_v3 = vor.u32 %v3394_v22, %v3391_v44  ;;  %v2617_v11 = vrot.slane %v5661_v35, 5  ;;  %v5400_v53 = vld [vmem:[%s5742_s26 + $0x3c] sm:$0xe] }
 0x188   : > { %v1517_v61 = vadd.f32 %v1465_v0, %v1085_v54  ;;  %v3751_v54 = vpack.c.b16 %v3722_v31, %v3721_v33  ;;  %v3406_v44 = vrot.slane %v3405_v21, 4  ;;  %v3410_v0 = vrot.slane %v3408_v19, 5 }
 0x189   : > { %v1087_v25 = vpop.f32.mrf.mxu1  ;;  %v2616_v57 = vrot.slane %v2614_v8, 4  ;;  %v3396_v26 = vrot.slane %v3395_v3, 4  ;;  %v2615_v18 = vsel %vm6057_vm5, %v5096_v7, %v2614_v8  ;;  %v4177_v33 = vpack.c.b16 %v4148_v4, %v4147_v2 }
 0x18a   : > { %v2462_v55 = vpop.f32.mrf.mxu0  ;;  %v1088_v37 = vadd.f32 %v1087_v25, %v6249_v58  ;;  %v2726_v16 = vunpack.c.l.b16 %v2615_v18  ;;  %v5416_v21 = vrot.slane %v5400_v53, 9  ;;  %v3413_v7 = vshrl.u32 %v5313_v46, 16  ;;  %v5081_v18 = vld [vmem:[%s5742_s26 + $0x3c] sm:$0xe] }
 0x18b   : > { %2850 = vmatmul.bf16.gmra.mxu1 %v2754_v32  ;;  %v3401_v8 = vsel %vm5757_vm2, %v3396_v26, %v6621_v9  ;;  %v4040_v35 = vrot.slane %v6628_v49, 5 }
 0x18c   : > { %v1780_v27 = vpop.f32.mrf.mxu3  ;;  %3165 = vmatmul.bf16.gmra.mxu2 %v5562_v13  ;;  %v2618_v13 = vsel %vm6057_vm5, %v2616_v57, %v2617_v11  ;;  %v3422_v11 = vshll.u32 %v6649_v39, 16  ;;  %v3723_v4 = vunpack.c.l.b16 %v3401_v8  ;;  %v3415_v49 = vrot.slane %v3413_v7, 4 }
 0x18d   : > { %v1832_v62 = vadd.f32 %v1780_v27, %v1517_v61  ;;  %v4037_v61 = vrot.slane %v6606_v42, 5  ;;  %v2727_v3 = vunpack.c.l.b16 %v2618_v13  ;;  %v3411_v42 = vsel %vm5757_vm2, %v3406_v44, %v3410_v0  ;;  %v5563_v0 = vld [vmem:[%s5742_s26 + $0x3c] sm:$0xff] }
 0x18f   : > { %v1468_v32 = vpop.f32.mrf.mxu2  ;;  %v6646_v58 = vadd.f32 %v2462_v55, %v1832_v62  ;;  %v4039_v27 = vrot.slane %v4037_v61, 4  ;;  %v3416_v55 = vshll.u32 %v5313_v46, 16  ;;  %v3426_v62 = vshrl.u32 %v6649_v39, 16 }
 0x190   : > { %v1518_v22 = vadd.f32 %v1468_v32, %v1088_v37  ;;  %v2755_v2 = vpack.c.b16 %v2727_v3, %v2726_v16  ;;  %v5662_v37 = vld [vmem:[%s5742_s26 + $0x40] sm:$0xf]  ;;  %v5097_v3 = vrot.slane %v5081_v18, 9 }
 0x191   : > { %3847 = vmatmul.bf16.gmra.mxu3 %v3751_v54  ;;  %v1089_v31 = vpop.f32.mrf.mxu1  ;;  %v2621_v32 = vrot.slane %v5662_v37, 5  ;;  %v3418_v13 = vrot.slane %v3416_v55, 5  ;;  %v3428_v46 = vrot.slane %v3426_v62, 4  ;;  %v5316_v37 = vld [vmem:[%s5742_s26 + $0x54] sm:$0xf] }
 0x192   : > { %v2465_v25 = vpop.f32.mrf.mxu0  ;;  %v1090_v9 = vadd.f32 %v1089_v31, %v6272_v51  ;;  %v4041_v51 = vsel %vm6057_vm5, %v4039_v27, %v4040_v35  ;;  %v6669_v31 = vrot.slane %v3422_v11, 5 }
 0x193   : > { %v2623_v8 = vrot.slane %v2621_v32, 4 }
 0x194   : > { %v1783_v19 = vpop.f32.mrf.mxu3  ;;  %v3429_v35 = vor.u32 %v3428_v46, %v6669_v31  ;;  %v5401_v46 = vld [vmem:[%s5742_s26 + $0x48] sm:$0xe] }
 0x195   : > { %4273 = vmatmul.bf16.gmra.mxu0 %v4177_v33  ;;  %v1833_v57 = vadd.f32 %v1783_v19, %v1518_v22  ;;  %v3724_v22 = vunpack.c.l.b16 %v3411_v42  ;;  %v4038_v33 = vsel %vm6057_vm5, %v5416_v21, %v4037_v61  ;;  %v5663_v19 = vld [vmem:[%s5742_s26 + $0x44] sm:$0x1]  ;;  %v4150_v61 = vunpack.c.l.b16 %v4041_v51 }
 0x196   : > { %v2624_v42 = vrot.slane %v5663_v19, 5  ;;  %v4149_v55 = vunpack.c.l.b16 %v4038_v33  ;;  %v3419_v21 = vor.u32 %v3418_v13, %v3415_v49 }
 0x197   : > { %v1470_v54 = vpop.f32.mrf.mxu2  ;;  %v6661_v26 = vadd.f32 %v2465_v25, %v1833_v57  ;;  %v6672_v25 = vld [vmem:[%s5742_s26 + $0x50] sm:$0x1]  ;;  %v3752_v27 = vpack.c.b16 %v3724_v22, %v3723_v4  ;;  %v3430_v22 = vrot.slane %v3429_v35, 4 }
 0x198   : > { %v1519_v44 = vadd.f32 %v1470_v54, %v1090_v9  ;;  %v3432_v11 = vshll.u32 %v6672_v25, 16  ;;  %v2622_v54 = vsel %vm6057_vm5, %v5097_v3, %v2621_v32  ;;  %v3420_v49 = vrot.slane %v3419_v21, 4 }
 0x199   : > { %v1092_v53 = vpop.f32.mrf.mxu1  ;;  %v2728_v32 = vunpack.c.l.b16 %v2622_v54  ;;  %v3437_v3 = vshrl.u32 %v5316_v37, 16  ;;  %v4047_v35 = vrot.slane %v6672_v25, 5 }
 0x19a   : > { %v2467_v16 = vpop.f32.mrf.mxu0  ;;  %v1093_v62 = vadd.f32 %v1092_v53, %v6293_v14  ;;  %v3434_v13 = vrot.slane %v3432_v11, 5  ;;  %v4044_v14 = vrot.slane %v6649_v39, 5 }
 0x19b   : > { %2855 = vmatmul.bf16.gmra.mxu1 %v2755_v2  ;;  %v2625_v2 = vsel %vm6057_vm5, %v2623_v8, %v2624_v42  ;;  %v3440_v8 = vshll.u32 %v5316_v37, 16  ;;  %v3439_v11 = vrot.slane %v3437_v3, 4 }
 0x19c   : > { %v1785_v7 = vpop.f32.mrf.mxu3  ;;  %3170 = vmatmul.bf16.gmra.mxu2 %v5563_v0  ;;  %v4178_v0 = vpack.c.b16 %v4150_v61, %v4149_v55  ;;  %v2729_v51 = vunpack.c.l.b16 %v2625_v2  ;;  %v3425_v55 = vsel %vm5757_vm2, %v3420_v49, %v6669_v31  ;;  %v5417_v61 = vrot.slane %v5401_v46, 9 }
 0x19d   : > { %v1834_v57 = vadd.f32 %v1785_v7, %v1519_v44  ;;  %v6684_v44 = vld [vmem:[%s5742_s26 + $0x58] sm:$0xf]  ;;  %v4046_v21 = vrot.slane %v4044_v14, 4 }
 0x19e   : > { %v3446_v19 = vshll.u32 %v6684_v44, 16  ;;  %v3450_v42 = vshrl.u32 %v6684_v44, 16 }
 0x19f   : > { %v1473_v9 = vpop.f32.mrf.mxu2  ;;  %v6687_v53 = vadd.f32 %v2467_v16, %v1834_v57  ;;  %v3435_v16 = vsel %vm5757_vm2, %v3430_v22, %v3434_v13  ;;  %v6706_v22 = vld [vmem:[%s5742_s26 + $0x5c] sm:$0x1]  ;;  %v4048_v46 = vsel %vm6057_vm5, %v4046_v21, %v4047_v35 }
 0x1a0   : > { %v1520_v18 = vadd.f32 %v1473_v9, %v1093_v62  ;;  %v3442_v9 = vrot.slane %v3440_v8, 5  ;;  %v6699_v31 = vrot.slane %v3446_v19, 5  ;;  %v3452_v54 = vrot.slane %v3450_v42, 4 }
 0x1a1   : > { %3852 = vmatmul.bf16.gmra.mxu3 %v3752_v27  ;;  %v1094_v4 = vpop.f32.mrf.mxu1  ;;  %v2756_v27 = vpack.c.b16 %v2729_v51, %v2728_v32  ;;  %v3726_v13 = vunpack.c.l.b16 %v3435_v16  ;;  %v5082_v32 = vld [vmem:[%s5742_s26 + $0x48] sm:$0xe]  ;;  %v4045_v51 = vsel %vm6057_vm5, %v5417_v61, %v4044_v14  ;;  %v3456_v8 = vshll.u32 %v6706_v22, 16 }
 0x1a2   : > { %v2470_v33 = vpop.f32.mrf.mxu0  ;;  %v1095_v57 = vadd.f32 %v1094_v4, %v6308_v38  ;;  %v3725_v4 = vunpack.c.l.b16 %v3425_v55  ;;  %v3453_v3 = vor.u32 %v3452_v54, %v6699_v31  ;;  %v5098_v42 = vrot.slane %v5082_v32, 9  ;;  %v5665_v55 = vld [vmem:[%s5742_s26 + $0x50] sm:$0x1]  ;;  %v5319_v32 = vld [vmem:[%s5742_s26 + $0x60] sm:$0xf] }
 0x1a3   : > { %v4151_v14 = vunpack.c.l.b16 %v4045_v51  ;;  %v4152_v61 = vunpack.c.l.b16 %v4048_v46  ;;  %v6727_v51 = vld [vmem:[%s5742_s26 + $0x64] sm:$0xf] }
 0x1a4   : > { %v1788_v7 = vpop.f32.mrf.mxu3 }
 0x1a5   : > { %4278 = vmatmul.bf16.gmra.mxu0 %v4178_v0  ;;  %v1835_v39 = vadd.f32 %v1788_v7, %v1520_v18  ;;  %v5564_v0 = vld [vmem:[%s5742_s26 + $0x48] sm:$0xff] }
 0x1a6   : > { %v5664_v18 = vld [vmem:[%s5742_s26 + $0x4c] sm:$0xf] }
 0x1a7   : > { %v1475_v62 = vpop.f32.mrf.mxu2  ;;  %v6701_v2 = vadd.f32 %v2470_v33, %v1835_v39  ;;  %v2628_v49 = vrot.slane %v5664_v18, 5  ;;  %v3443_v33 = vor.u32 %v3442_v9, %v3439_v11  ;;  %v2631_v39 = vrot.slane %v5665_v55, 5  ;;  %v5402_v18 = vld [vmem:[%s5742_s26 + $0x54] sm:$0xe] }
 0x1a8   : > { %v1521_v37 = vadd.f32 %v1475_v62, %v1095_v57  ;;  %v3753_v57 = vpack.c.b16 %v3726_v13, %v3725_v4  ;;  %v3454_v11 = vrot.slane %v3453_v3, 4  ;;  %v3458_v62 = vrot.slane %v3456_v8, 5 }
 0x1a9   : > { %v1097_v38 = vpop.f32.mrf.mxu1  ;;  %v2630_v7 = vrot.slane %v2628_v49, 4  ;;  %v3444_v35 = vrot.slane %v3443_v33, 4  ;;  %v2629_v54 = vsel %vm6057_vm5, %v5098_v42, %v2628_v49  ;;  %v4179_v4 = vpack.c.b16 %v4152_v61, %v4151_v14 }
 0x1aa   : > { %v2472_v25 = vpop.f32.mrf.mxu0  ;;  %v1098_v21 = vadd.f32 %v1097_v38, %v6178_v50  ;;  %v2730_v46 = vunpack.c.l.b16 %v2629_v54  ;;  %v5418_v3 = vrot.slane %v5402_v18, 9  ;;  %v3461_v42 = vshrl.u32 %v5319_v32, 16  ;;  %v5083_v54 = vld [vmem:[%s5742_s26 + $0x54] sm:$0xe] }
 0x1ab   : > { %2860 = vmatmul.bf16.gmra.mxu1 %v2756_v27  ;;  %v3449_v49 = vsel %vm5757_vm2, %v3444_v35, %v6699_v31  ;;  %v4054_v55 = vrot.slane %v6706_v22, 5 }
 0x1ac   : > { %v1790_v19 = vpop.f32.mrf.mxu3  ;;  %3175 = vmatmul.bf16.gmra.mxu2 %v5564_v0  ;;  %v2632_v0 = vsel %vm6057_vm5, %v2630_v7, %v2631_v39  ;;  %v3470_v39 = vshll.u32 %v6727_v51, 16  ;;  %v3727_v61 = vunpack.c.l.b16 %v3449_v49  ;;  %v3463_v22 = vrot.slane %v3461_v42, 4 }
 0x1ad   : > { %v1836_v16 = vadd.f32 %v1790_v19, %v1521_v37  ;;  %v4051_v37 = vrot.slane %v6684_v44, 5  ;;  %v2731_v33 = vunpack.c.l.b16 %v2632_v0  ;;  %v3459_v44 = vsel %vm5757_vm2, %v3454_v11, %v3458_v62  ;;  %v5565_v62 = vld [vmem:[%s5742_s26 + $0x54] sm:$0xff] }
 0x1af   : > { %v1478_v27 = vpop.f32.mrf.mxu2  ;;  %v6724_v50 = vadd.f32 %v2472_v25, %v1836_v16  ;;  %v4053_v19 = vrot.slane %v4051_v37, 4  ;;  %v3464_v25 = vshll.u32 %v5319_v32, 16  ;;  %v3474_v16 = vshrl.u32 %v6727_v51, 16 }
 0x1b0   : > { %v1522_v9 = vadd.f32 %v1478_v27, %v1098_v21  ;;  %v2757_v14 = vpack.c.b16 %v2731_v33, %v2730_v46  ;;  %v5666_v21 = vld [vmem:[%s5742_s26 + $0x58] sm:$0xf]  ;;  %v5099_v33 = vrot.slane %v5083_v54, 9 }
 0x1b1   : > { %3857 = vmatmul.bf16.gmra.mxu3 %v3753_v57  ;;  %v1099_v13 = vpop.f32.mrf.mxu1  ;;  %v2635_v27 = vrot.slane %v5666_v21, 5  ;;  %v3466_v0 = vrot.slane %v3464_v25, 5  ;;  %v3476_v32 = vrot.slane %v3474_v16, 4  ;;  %v5322_v21 = vld [vmem:[%s5742_s26 + $0x6c] sm:$0xf] }
 0x1b2   : > { %v2475_v38 = vpop.f32.mrf.mxu0  ;;  %v1100_v31 = vadd.f32 %v1099_v13, %v6201_v40  ;;  %v4055_v40 = vsel %vm6057_vm5, %v4053_v19, %v4054_v55  ;;  %v6747_v13 = vrot.slane %v3470_v39, 5 }
 0x1b3   : > { %v2637_v49 = vrot.slane %v2635_v27, 4 }
 0x1b4   : > { %v1793_v8 = vpop.f32.mrf.mxu3  ;;  %v3477_v55 = vor.u32 %v3476_v32, %v6747_v13  ;;  %v5403_v32 = vld [vmem:[%s5742_s26 + $0x60] sm:$0xe] }
 0x1b5   : > { %4283 = vmatmul.bf16.gmra.mxu0 %v4179_v4  ;;  %v1837_v7 = vadd.f32 %v1793_v8, %v1522_v9  ;;  %v3728_v9 = vunpack.c.l.b16 %v3459_v44  ;;  %v4052_v4 = vsel %vm6057_vm5, %v5418_v3, %v4051_v37  ;;  %v5667_v8 = vld [vmem:[%s5742_s26 + $0x5c] sm:$0x1]  ;;  %v4154_v37 = vunpack.c.l.b16 %v4055_v40 }
 0x1b6   : > { %v2638_v44 = vrot.slane %v5667_v8, 5  ;;  %v4153_v25 = vunpack.c.l.b16 %v4052_v4  ;;  %v3467_v3 = vor.u32 %v3466_v0, %v3463_v22 }
 0x1b7   : > { %v1480_v57 = vpop.f32.mrf.mxu2  ;;  %v6739_v35 = vadd.f32 %v2475_v38, %v1837_v7  ;;  %v6750_v38 = vld [vmem:[%s5742_s26 + $0x68] sm:$0x1]  ;;  %v3754_v19 = vpack.c.b16 %v3728_v9, %v3727_v61  ;;  %v3478_v9 = vrot.slane %v3477_v55, 4 }
 0x1b8   : > { %v1523_v11 = vadd.f32 %v1480_v57, %v1100_v31  ;;  %v3480_v39 = vshll.u32 %v6750_v38, 16  ;;  %v2636_v57 = vsel %vm6057_vm5, %v5099_v33, %v2635_v27  ;;  %v3468_v22 = vrot.slane %v3467_v3, 4 }
 0x1b9   : > { %v1102_v18 = vpop.f32.mrf.mxu1  ;;  %v2732_v27 = vunpack.c.l.b16 %v2636_v57  ;;  %v3485_v33 = vshrl.u32 %v5322_v21, 16  ;;  %v4061_v55 = vrot.slane %v6750_v38, 5 }
 0x1ba   : > { %v2477_v46 = vpop.f32.mrf.mxu0  ;;  %v1103_v16 = vadd.f32 %v1102_v18, %v6222_v6  ;;  %v3482_v0 = vrot.slane %v3480_v39, 5  ;;  %v4058_v6 = vrot.slane %v6727_v51, 5 }
 0x1bb   : > { %2865 = vmatmul.bf16.gmra.mxu1 %v2757_v14  ;;  %v2639_v14 = vsel %vm6057_vm5, %v2637_v49, %v2638_v44  ;;  %v3488_v49 = vshll.u32 %v5322_v21, 16  ;;  %v3487_v39 = vrot.slane %v3485_v33, 4 }
 0x1bc   : > { %v1795_v42 = vpop.f32.mrf.mxu3  ;;  %3180 = vmatmul.bf16.gmra.mxu2 %v5565_v62  ;;  %v4180_v62 = vpack.c.b16 %v4154_v37, %v4153_v25  ;;  %v2733_v40 = vunpack.c.l.b16 %v2639_v14  ;;  %v3473_v25 = vsel %vm5757_vm2, %v3468_v22, %v6747_v13  ;;  %v5419_v37 = vrot.slane %v5403_v32, 9 }
 0x1bd   : > { %v1838_v7 = vadd.f32 %v1795_v42, %v1523_v11  ;;  %v6762_v11 = vld [vmem:[%s5742_s26 + $0x70] sm:$0xf]  ;;  %v4060_v3 = vrot.slane %v4058_v6, 4 }
 0x1be   : > { %v3494_v8 = vshll.u32 %v6762_v11, 16  ;;  %v3498_v44 = vshrl.u32 %v6762_v11, 16 }
 0x1bf   : > { %v1483_v31 = vpop.f32.mrf.mxu2  ;;  %v6765_v18 = vadd.f32 %v2477_v46, %v1838_v7  ;;  %v3483_v46 = vsel %vm5757_vm2, %v3478_v9, %v3482_v0  ;;  %v6784_v9 = vld [vmem:[%s5742_s26 + $0x74] sm:$0x1]  ;;  %v4062_v32 = vsel %vm6057_vm5, %v4060_v3, %v4061_v55 }
 0x1c0   : > { %v1524_v54 = vadd.f32 %v1483_v31, %v1103_v16  ;;  %v3490_v31 = vrot.slane %v3488_v49, 5  ;;  %v6777_v13 = vrot.slane %v3494_v8, 5  ;;  %v3500_v57 = vrot.slane %v3498_v44, 4 }
 0x1c1   : > { %3862 = vmatmul.bf16.gmra.mxu3 %v3754_v19  ;;  %v1104_v61 = vpop.f32.mrf.mxu1  ;;  %v2758_v19 = vpack.c.b16 %v2733_v40, %v2732_v27  ;;  %v3730_v0 = vunpack.c.l.b16 %v3483_v46  ;;  %v5084_v27 = vld [vmem:[%s5742_s26 + $0x60] sm:$0xe]  ;;  %v4059_v40 = vsel %vm6057_vm5, %v5419_v37, %v4058_v6  ;;  %v3504_v49 = vshll.u32 %v6784_v9, 16 }
 0x1c2   : > { %v2480_v4 = vpop.f32.mrf.mxu0  ;;  %v1105_v7 = vadd.f32 %v1104_v61, %v6236_v28  ;;  %v3729_v61 = vunpack.c.l.b16 %v3473_v25  ;;  %v3501_v33 = vor.u32 %v3500_v57, %v6777_v13  ;;  %v5100_v44 = vrot.slane %v5084_v27, 9  ;;  %v5669_v25 = vld [vmem:[%s5742_s26 + $0x68] sm:$0x1]  ;;  %v5325_v27 = vld [vmem:[%s5742_s26 + $0x78] sm:$0xf] }
 0x1c3   : > { %v4155_v6 = vunpack.c.l.b16 %v4059_v40  ;;  %v4156_v37 = vunpack.c.l.b16 %v4062_v32  ;;  %v6805_v40 = vld [vmem:[%s5742_s26 + $0x7c] sm:$0xf] }
 0x1c4   : > { %v1798_v42 = vpop.f32.mrf.mxu3 }
 0x1c5   : > { %4288 = vmatmul.bf16.gmra.mxu0 %v4180_v62  ;;  %v1839_v51 = vadd.f32 %v1798_v42, %v1524_v54  ;;  %v5566_v62 = vld [vmem:[%s5742_s26 + $0x60] sm:$0xff] }
 0x1c6   : > { %v5668_v54 = vld [vmem:[%s5742_s26 + $0x64] sm:$0xf] }
 0x1c7   : > { %v1485_v16 = vpop.f32.mrf.mxu2  ;;  %v6779_v14 = vadd.f32 %v2480_v4, %v1839_v51  ;;  %v2642_v22 = vrot.slane %v5668_v54, 5  ;;  %v3491_v4 = vor.u32 %v3490_v31, %v3487_v39  ;;  %v2645_v51 = vrot.slane %v5669_v25, 5  ;;  %v5404_v54 = vld [vmem:[%s5742_s26 + $0x6c] sm:$0xe] }
 0x1c8   : > { %v1525_v21 = vadd.f32 %v1485_v16, %v1105_v7  ;;  %v3755_v7 = vpack.c.b16 %v3730_v0, %v3729_v61  ;;  %v3502_v39 = vrot.slane %v3501_v33, 4  ;;  %v3506_v16 = vrot.slane %v3504_v49, 5 }
 0x1c9   : > { %v1107_v28 = vpop.f32.mrf.mxu1  ;;  %v2644_v42 = vrot.slane %v2642_v22, 4  ;;  %v3492_v55 = vrot.slane %v3491_v4, 4  ;;  %v2643_v57 = vsel %vm6057_vm5, %v5100_v44, %v2642_v22  ;;  %v4181_v61 = vpack.c.b16 %v4156_v37, %v4155_v6 }
 0x1ca   : > { %v2482_v38 = vpop.f32.mrf.mxu0  ;;  %v1108_v3 = vadd.f32 %v1107_v28, %v6254_v63  ;;  %v2734_v32 = vunpack.c.l.b16 %v2643_v57  ;;  %v5420_v33 = vrot.slane %v5404_v54, 9  ;;  %v3509_v44 = vshrl.u32 %v5325_v27, 16  ;;  %v5085_v57 = vld [vmem:[%s5742_s26 + $0x6c] sm:$0xe] }
 0x1cb   : > { %2870 = vmatmul.bf16.gmra.mxu1 %v2758_v19  ;;  %v3497_v22 = vsel %vm5757_vm2, %v3492_v55, %v6777_v13  ;;  %v4068_v25 = vrot.slane %v6784_v9, 5 }
 0x1cc   : > { %v1800_v8 = vpop.f32.mrf.mxu3  ;;  %3185 = vmatmul.bf16.gmra.mxu2 %v5566_v62  ;;  %v2646_v62 = vsel %vm6057_vm5, %v2644_v42, %v2645_v51  ;;  %v3518_v51 = vshll.u32 %v6805_v40, 16  ;;  %v3731_v37 = vunpack.c.l.b16 %v3497_v22  ;;  %v3511_v9 = vrot.slane %v3509_v44, 4 }
 0x1cd   : > { %v1840_v46 = vadd.f32 %v1800_v8, %v1525_v21  ;;  %v4065_v21 = vrot.slane %v6762_v11, 5  ;;  %v2735_v4 = vunpack.c.l.b16 %v2646_v62  ;;  %v3507_v11 = vsel %vm5757_vm2, %v3502_v39, %v3506_v16  ;;  %v5567_v16 = vld [vmem:[%s5742_s26 + $0x6c] sm:$0xff] }
 0x1cf   : > { %v1488_v19 = vpop.f32.mrf.mxu2  ;;  %v6802_v63 = vadd.f32 %v2482_v38, %v1840_v46  ;;  %v4067_v8 = vrot.slane %v4065_v21, 4  ;;  %v3512_v38 = vshll.u32 %v5325_v27, 16  ;;  %v3522_v46 = vshrl.u32 %v6805_v40, 16 }
 0x1d0   : > { %v1526_v31 = vadd.f32 %v1488_v19, %v1108_v3  ;;  %v2759_v6 = vpack.c.b16 %v2735_v4, %v2734_v32  ;;  %v5670_v3 = vld [vmem:[%s5742_s26 + $0x70] sm:$0xf]  ;;  %v6826_v4 = vld [vmem:[%s5742_s26 + $0x80] sm:$0x1] }
 0x1d1   : > { %3867 = vmatmul.bf16.gmra.mxu3 %v3755_v7  ;;  %v1109_v0 = vpop.f32.mrf.mxu1  ;;  %v2649_v19 = vrot.slane %v5670_v3, 5  ;;  %v3514_v62 = vrot.slane %v3512_v38, 5  ;;  %v3524_v27 = vrot.slane %v3522_v46, 4  ;;  %v5328_v3 = vld [vmem:[%s5742_s26 + $0x84] sm:$0xf] }
 0x1d2   : > { %v2485_v28 = vpop.f32.mrf.mxu0  ;;  %v1110_v13 = vadd.f32 %v1109_v0, %v6285_v41  ;;  %v4069_v41 = vsel %vm6057_vm5, %v4067_v8, %v4068_v25  ;;  %v3520_v0 = vrot.slane %v3518_v51, 5  ;;  %v3528_v25 = vshll.u32 %v6826_v4, 16 }
 0x1d3   : > { %v2651_v22 = vrot.slane %v2649_v19, 4 }
 0x1d4   : > { %v1803_v49 = vpop.f32.mrf.mxu3  ;;  %v3525_v8 = vor.u32 %v3524_v27, %v3520_v0  ;;  %v5405_v27 = vld [vmem:[%s5742_s26 + $0x78] sm:$0xe] }
 0x1d5   : > { %4293 = vmatmul.bf16.gmra.mxu0 %v4181_v61  ;;  %v1841_v42 = vadd.f32 %v1803_v49, %v1526_v31  ;;  %v3732_v31 = vunpack.c.l.b16 %v3507_v11  ;;  %v4066_v61 = vsel %vm6057_vm5, %v5420_v33, %v4065_v21  ;;  %v5671_v49 = vld [vmem:[%s5742_s26 + $0x74] sm:$0x1]  ;;  %v3515_v21 = vor.u32 %v3514_v62, %v3511_v9  ;;  %v6837_v9 = vld [vmem:[%s5742_s26 + $0x88] sm:$0xf] }
 0x1d6   : > { %v2652_v11 = vrot.slane %v5671_v49, 5  ;;  %v4157_v38 = vunpack.c.l.b16 %v4066_v61  ;;  %v3542_v49 = vshll.u32 %v6837_v9, 16 }
 0x1d7   : > { %v1490_v7 = vpop.f32.mrf.mxu2  ;;  %v6817_v55 = vadd.f32 %v2485_v28, %v1841_v42  ;;  %v5101_v28 = vrot.slane %v5085_v57, 9  ;;  %v4158_v42 = vunpack.c.l.b16 %v4069_v41  ;;  %v3516_v61 = vrot.slane %v3515_v21, 4 }
 0x1d8   : > { %v1527_v39 = vadd.f32 %v1490_v7, %v1110_v13  ;;  %v3756_v13 = vpack.c.b16 %v3732_v31, %v3731_v37  ;;  %v3530_v31 = vrot.slane %v3528_v25, 5 }
 0x1d9   : > { %v1112_v54 = vpop.f32.mrf.mxu1  ;;  %v2650_v7 = vsel %vm6057_vm5, %v5101_v28, %v2649_v19  ;;  %v3533_v28 = vshrl.u32 %v5328_v3, 16 }
 0x1da   : > { %v2487_v32 = vpop.f32.mrf.mxu0  ;;  %v1113_v51 = vadd.f32 %v1112_v54, %v6305_v15  ;;  %v4072_v15 = vrot.slane %v6805_v40, 5  ;;  %v2736_v19 = vunpack.c.l.b16 %v2650_v7 }
 0x1db   : > { %2875 = vmatmul.bf16.gmra.mxu1 %v2759_v6  ;;  %v2653_v6 = vsel %vm6057_vm5, %v2651_v22, %v2652_v11  ;;  %v3536_v22 = vshll.u32 %v5328_v3, 16  ;;  %v3546_v11 = vshrl.u32 %v6837_v9, 16  ;;  %v3535_v25 = vrot.slane %v3533_v28, 4 }
 0x1dc   : > { %v1805_v44 = vpop.f32.mrf.mxu3  ;;  %3190 = vmatmul.bf16.gmra.mxu2 %v5567_v16  ;;  %v4182_v16 = vpack.c.b16 %v4158_v42, %v4157_v38  ;;  %v2737_v41 = vunpack.c.l.b16 %v2653_v6  ;;  %v3521_v38 = vsel %vm5757_vm2, %v3516_v61, %v3520_v0  ;;  %v5421_v42 = vrot.slane %v5405_v27, 9 }
 0x1dd   : > { %v1842_v33 = vadd.f32 %v1805_v44, %v1527_v39  ;;  %v3526_v39 = vrot.slane %v3525_v8, 4  ;;  %v4074_v21 = vrot.slane %v4072_v15, 4  ;;  %v4075_v8 = vrot.slane %v6826_v4, 5 }
 0x1de   : > { %v6851_v0 = vrot.slane %v3542_v49, 5  ;;  %v3548_v7 = vrot.slane %v3546_v11, 4 }
 0x1df   : > { %v1493_v46 = vpop.f32.mrf.mxu2  ;;  %v6840_v62 = vadd.f32 %v2487_v32, %v1842_v33  ;;  %v3531_v32 = vsel %vm5757_vm2, %v3526_v39, %v3530_v31  ;;  %v5086_v31 = vld [vmem:[%s5742_s26 + $0x78] sm:$0xe]  ;;  %v4076_v27 = vsel %vm6057_vm5, %v4074_v21, %v4075_v8 }
 0x1e0   : > { %v1528_v57 = vadd.f32 %v1493_v46, %v1113_v51  ;;  %v3538_v46 = vrot.slane %v3536_v22, 5  ;;  %v3549_v28 = vor.u32 %v3548_v7, %v6851_v0  ;;  %v5102_v49 = vrot.slane %v5086_v31, 9 }
 0x1e1   : > { %3872 = vmatmul.bf16.gmra.mxu3 %v3756_v13  ;;  %v1114_v37 = vpop.f32.mrf.mxu1  ;;  %v2760_v13 = vpack.c.b16 %v2737_v41, %v2736_v19  ;;  %v6859_v19 = vld [vmem:[%s5742_s26 + $0x8c] sm:$0x1]  ;;  %v4073_v41 = vsel %vm6057_vm5, %v5421_v42, %v4072_v15  ;;  %v4160_v42 = vunpack.c.l.b16 %v4076_v27 }
 0x1e2   : > { %v2490_v54 = vpop.f32.mrf.mxu0  ;;  %v1115_v33 = vadd.f32 %v1114_v37, %v6320_v1  ;;  %v3733_v1 = vunpack.c.l.b16 %v3521_v38  ;;  %v3734_v37 = vunpack.c.l.b16 %v3531_v32  ;;  %v4159_v15 = vunpack.c.l.b16 %v4073_v41  ;;  %v6879_v41 = vld [vmem:[%s5742_s26 + $0x94] sm:$0xf] }
 0x1e4   : > { %v1808_v44 = vpop.f32.mrf.mxu3 }
 0x1e5   : > { %4298 = vmatmul.bf16.gmra.mxu0 %v4182_v16  ;;  %v1843_v40 = vadd.f32 %v1808_v44, %v1528_v57  ;;  %v5568_v16 = vld [vmem:[%s5742_s26 + $0x78] sm:$0xff]  ;;  %v5673_v44 = vld [vmem:[%s5742_s26 + $0x80] sm:$0x1] }
 0x1e6   : > { %v5672_v57 = vld [vmem:[%s5742_s26 + $0x7c] sm:$0xf]  ;;  %v2659_v38 = vrot.slane %v5673_v44, 5 }
 0x1e7   : > { %v1495_v51 = vpop.f32.mrf.mxu2  ;;  %v6853_v6 = vadd.f32 %v2490_v54, %v1843_v40  ;;  %v2656_v61 = vrot.slane %v5672_v57, 5  ;;  %v3539_v54 = vor.u32 %v3538_v46, %v3535_v25  ;;  %v3552_v40 = vshll.u32 %v6859_v19, 16 }
 0x1e8   : > { %v1529_v3 = vadd.f32 %v1495_v51, %v1115_v33  ;;  %v3757_v33 = vpack.c.b16 %v3734_v37, %v3733_v1  ;;  %v3550_v25 = vrot.slane %v3549_v28, 4  ;;  %v5331_v51 = vld [vmem:[%s5742_s26 + $0x90] sm:$0xf]  ;;  %v4183_v57 = vpack.c.b16 %v4160_v42, %v4159_v15 }
 0x1e9   : > { %v2841_v39 = vpop.f32.mrf.mxu1  ;;  %v2658_v11 = vrot.slane %v2656_v61, 4  ;;  %v3540_v8 = vrot.slane %v3539_v54, 4  ;;  %v2657_v46 = vsel %vm6057_vm5, %v5102_v49, %v2656_v61  ;;  %v3557_v27 = vshrl.u32 %v5331_v51, 16 }
 0x1ea   : > { %v2492_v4 = vpop.f32.mrf.mxu0  ;;  %v2921_v21 = vadd.f32 %v2841_v39, %v6346_v59  ;;  %v5406_v59 = vld [vmem:[%s5742_s26 + $0x84] sm:$0xe]  ;;  %v3560_v54 = vshll.u32 %v5331_v51, 16  ;;  %v2738_v61 = vunpack.c.l.b16 %v2657_v46 }
 0x1eb   : > { %2880 = vmatmul.bf16.gmra.mxu1 %v2760_v13  ;;  %v2660_v7 = vsel %vm6057_vm5, %v2658_v11, %v2659_v38  ;;  %v5422_v11 = vrot.slane %v5406_v59, 9  ;;  %v4082_v38 = vrot.slane %v6859_v19, 5 }
 0x1ec   : > { %v1810_v22 = vpop.f32.mrf.mxu3  ;;  %3195 = vmatmul.bf16.gmra.mxu2 %v5568_v16  ;;  %v3554_v16 = vrot.slane %v3552_v40, 5  ;;  %v2739_v28 = vunpack.c.l.b16 %v2660_v7  ;;  %v3566_v40 = vshll.u32 %v6879_v41, 16 }
 0x1ed   : > { %v1844_v32 = vadd.f32 %v1810_v22, %v1529_v3  ;;  %v4079_v3 = vrot.slane %v6837_v9, 5  ;;  %v3545_v9 = vsel %vm5757_vm2, %v3540_v8, %v6851_v0  ;;  %v3559_v0 = vrot.slane %v3557_v27, 4  ;;  %v5674_v8 = vld [vmem:[%s5742_s26 + $0x88] sm:$0xf] }
 0x1ee   : > { %v3555_v49 = vsel %vm5757_vm2, %v3550_v25, %v3554_v16  ;;  %v2663_v19 = vrot.slane %v5674_v8, 5  ;;  %v5569_v25 = vld [vmem:[%s5742_s26 + $0x84] sm:$0xff]  ;;  %v3735_v51 = vunpack.c.l.b16 %v3545_v9  ;;  %v5333_v9 = vld [vmem:[%s5742_s26 + $0x98] sm:$0x1]  ;;  %v5407_v8 = vld [vmem:[%s5742_s26 + $0x90] sm:$0xe] }
 0x1ef   : > { %v3156_v13 = vpop.f32.mrf.mxu2  ;;  %v6876_v39 = vadd.f32 %v2492_v4, %v1844_v32  ;;  %v4081_v4 = vrot.slane %v4079_v3, 4  ;;  %v3570_v32 = vshrl.u32 %v6879_v41, 16  ;;  %v3736_v46 = vunpack.c.l.b16 %v3555_v49  ;;  %v5087_v16 = vld [vmem:[%s5742_s26 + $0x84] sm:$0xe] }
 0x1f0   : > { %v3236_v1 = vadd.f32 %v3156_v13, %v2921_v21  ;;  %v2761_v13 = vpack.c.b16 %v2739_v28, %v2738_v61  ;;  %v4080_v7 = vsel %vm6057_vm5, %v5422_v11, %v4079_v3  ;;  %v2665_v61 = vrot.slane %v2663_v19, 4  ;;  %v5675_v28 = vld [vmem:[%s5742_s26 + $0x8c] sm:$0x1] }
 0x1f1   : > { %3877 = vmatmul.bf16.gmra.mxu3 %v3757_v33  ;;  %v2843_v37 = vpop.f32.mrf.mxu1  ;;  %v3562_v33 = vrot.slane %v3560_v54, 5  ;;  %v4083_v59 = vsel %vm6057_vm5, %v4081_v4, %v4082_v38  ;;  %v5103_v54 = vrot.slane %v5087_v16, 9  ;;  %v4161_v3 = vunpack.c.l.b16 %v4080_v7 }
 0x1f2   : > { %v4264_v31 = vpop.f32.mrf.mxu0  ;;  %v2922_v42 = vadd.f32 %v2843_v37, %v6357_v5  ;;  %v3568_v5 = vrot.slane %v3566_v40, 5  ;;  %v3572_v37 = vrot.slane %v3570_v32, 4  ;;  %v4162_v11 = vunpack.c.l.b16 %v4083_v59 }
 0x1f3   : > { %v3563_v27 = vor.u32 %v3562_v33, %v3559_v0  ;;  %v3576_v40 = vshll.u32 %v5333_v9, 16  ;;  %v4086_v16 = vrot.slane %v6879_v41, 5 }
 0x1f4   : > { %v3838_v22 = vpop.f32.mrf.mxu3  ;;  %v3573_v4 = vor.u32 %v3572_v37, %v3568_v5  ;;  %v4184_v7 = vpack.c.b16 %v4162_v11, %v4161_v3  ;;  %v6916_v37 = vld [vmem:[%s5742_s26 + $0xa0] sm:$0xf]  ;;  %v4089_v11 = vrot.slane %v5333_v9, 5 }
 0x1f5   : > { %4303 = vmatmul.bf16.gmra.mxu0 %v4183_v57  ;;  %v3918_v44 = vadd.f32 %v3838_v22, %v3236_v1  ;;  %v2666_v22 = vrot.slane %v5675_v28, 5  ;;  %v3564_v38 = vrot.slane %v3563_v27, 4 }
 0x1f7   : > { %v4344_v15 = vadd.f32 %v4264_v31, %v3918_v44  ;;  %v3158_v21 = vpop.f32.mrf.mxu2 }
 0x1f8   : > { %v3237_v57 = vadd.f32 %v3158_v21, %v2922_v42  ;;  %v3758_v42 = vpack.c.b16 %v3736_v46, %v3735_v51  ;;  %v2664_v21 = vsel %vm6057_vm5, %v5103_v54, %v2663_v19  ;;  %v5334_v51 = vld [vmem:[%s5742_s26 + $0x9c] sm:$0xf]  ;;  %v3578_v54 = vrot.slane %v3576_v40, 5 }
 0x1f9   : > { %4376 = vst [vmem:[%s6893_s30] sm:$0xff] %v4344_v15  ;;  %v2846_v1 = vpop.f32.mrf.mxu1  ;;  %v2740_v19 = vunpack.c.l.b16 %v2664_v21  ;;  %v3581_v41 = vshrl.u32 %v5334_v51, 16 }
 0x1fa   : > { %v4266_v31 = vpop.f32.mrf.mxu0  ;;  %v2923_v0 = vadd.f32 %v2846_v1, %v6367_v48  ;;  %v3574_v1 = vrot.slane %v3573_v4, 4 }
 0x1fb   : > { %2885 = vmatmul.bf16.gmra.mxu1 %v2761_v13  ;;  %v2667_v13 = vsel %vm6057_vm5, %v2665_v61, %v2666_v22  ;;  %v5423_v61 = vrot.slane %v5407_v8, 9  ;;  %v3569_v22 = vsel %vm5757_vm2, %v3564_v38, %v3568_v5  ;;  %v3583_v21 = vrot.slane %v3581_v41, 4  ;;  %v5570_v8 = vld [vmem:[%s5742_s26 + $0x90] sm:$0xff] }
 0x1fc   : > { %v3840_v49 = vpop.f32.mrf.mxu3  ;;  %3200 = vmatmul.bf16.gmra.mxu2 %v5569_v25  ;;  %v4446_v25 = vmul.f32 %v4344_v15, %v4344_v15  ;;  %v2741_v27 = vunpack.c.l.b16 %v2667_v13 }
 0x1fd   : > { %v3919_v44 = vadd.f32 %v3840_v49, %v3237_v57  ;;  %v3584_v49 = vshll.u32 %v5334_v51, 16  ;;  %v4087_v5 = vsel %vm6057_vm5, %v5423_v61, %v4086_v16 }
 0x1fe   : > { %v2762_v40 = vpack.c.b16 %v2741_v27, %v2740_v19 }
 0x1ff   : > { %v4345_v32 = vadd.f32 %v4266_v31, %v3919_v44  ;;  %v3161_v33 = vpop.f32.mrf.mxu2  ;;  %v3590_v44 = vshll.u32 %v6916_v37, 16  ;;  %v3586_v13 = vrot.slane %v3584_v49, 5 }
 0x200   : > { %v3238_v59 = vadd.f32 %v3161_v33, %v2923_v0  ;;  %v3737_v0 = vunpack.c.l.b16 %v3569_v22  ;;  %v4163_v22 = vunpack.c.l.b16 %v4087_v5 }
 0x201   : > { %4377 = vst [vmem:[%s6893_s30 + $0x8] sm:$0xff] %v4345_v32  ;;  %v4408_v46 = vadd.f32 %v4345_v32, %v4344_v15  ;;  %v4447_v57 = vmul.f32 %v4345_v32, %v4345_v32  ;;  %3882 = vmatmul.bf16.gmra.mxu3 %v3758_v42  ;;  %v2848_v48 = vpop.f32.mrf.mxu1  ;;  %v4088_v15 = vrot.slane %v4086_v16, 4  ;;  %v3594_v42 = vshrl.u32 %v6916_v37, 16 }
 0x202   : > { %v4269_v31 = vpop.f32.mrf.mxu0  ;;  %v3579_v32 = vsel %vm5757_vm2, %v3574_v1, %v3578_v54  ;;  %v2924_v33 = vadd.f32 %v2848_v48, %v6381_v47  ;;  %v5088_v48 = vld [vmem:[%s5742_s26 + $0x90] sm:$0xe]  ;;  %v6934_v54 = vld [vmem:[%s5742_s26 + $0xa4] sm:$0x1]  ;;  %v3587_v49 = vor.u32 %v3586_v13, %v3583_v21  ;;  %v5337_v21 = vld [vmem:[%s5742_s26 + $0xa8] sm:$0xf] }
 0x203   : > { %v4478_v28 = vadd.f32 %v4447_v57, %v4446_v25  ;;  %v4090_v25 = vsel %vm6057_vm5, %v4088_v15, %v4089_v11  ;;  %v3592_v57 = vrot.slane %v3590_v44, 5  ;;  %v3738_v47 = vunpack.c.l.b16 %v3579_v32 }
 0x204   : > { %v3843_v3 = vpop.f32.mrf.mxu3  ;;  %v4164_v41 = vunpack.c.l.b16 %v4090_v25  ;;  %v5104_v15 = vrot.slane %v5088_v48, 9 }
 0x205   : > { %4308 = vmatmul.bf16.gmra.mxu0 %v4184_v7  ;;  %v3920_v4 = vadd.f32 %v3843_v3, %v3238_v59  ;;  %v5676_v7 = vld [vmem:[%s5742_s26 + $0x94] sm:$0xf]  ;;  %v3596_v59 = vrot.slane %v3594_v42, 4  ;;  %v3759_v32 = vpack.c.b16 %v3738_v47, %v3737_v0  ;;  %v4093_v0 = vrot.slane %v6916_v37, 5  ;;  %v6948_v47 = vld [vmem:[%s5742_s26 + $0xac] sm:$0xf] }
 0x206   : > { %v2670_v51 = vrot.slane %v5676_v7, 5 }
 0x207   : > { %v4346_v38 = vadd.f32 %v4269_v31, %v3920_v4  ;;  %v3163_v9 = vpop.f32.mrf.mxu2  ;;  %v3597_v42 = vor.u32 %v3596_v59, %v3592_v57 }
 0x208   : > { %v3239_v16 = vadd.f32 %v3163_v9, %v2924_v33  ;;  %v2672_v11 = vrot.slane %v2670_v51, 4  ;;  %v3588_v9 = vrot.slane %v3587_v49, 4  ;;  %v2671_v13 = vsel %vm6057_vm5, %v5104_v15, %v2670_v51 }
 0x209   : > { %4378 = vst [vmem:[%s6893_s30 + $0x10] sm:$0xff] %v4346_v38  ;;  %v4409_v1 = vadd.f32 %v4408_v46, %v4346_v38  ;;  %v4448_v19 = vmul.f32 %v4346_v38, %v4346_v38  ;;  %v2851_v31 = vpop.f32.mrf.mxu1  ;;  %v5677_v46 = vld [vmem:[%s5742_s26 + $0x98] sm:$0x1]  ;;  %v3600_v38 = vshll.u32 %v6934_v54, 16  ;;  %v3598_v25 = vrot.slane %v3597_v42, 4 }
 0x20a   : > { %v4271_v27 = vpop.f32.mrf.mxu0  ;;  %v2673_v44 = vrot.slane %v5677_v46, 5  ;;  %v4095_v15 = vrot.slane %v4093_v0, 4  ;;  %v3614_v46 = vshll.u32 %v6948_v47, 16  ;;  %v3618_v42 = vshrl.u32 %v6948_v47, 16 }
 0x20b   : > { %v4479_v61 = vadd.f32 %v4478_v28, %v4448_v19  ;;  %2890 = vmatmul.bf16.gmra.mxu1 %v2762_v40  ;;  %v2925_v28 = vadd.f32 %v2851_v31, %v6401_v52  ;;  %v4185_v40 = vpack.c.b16 %v4164_v41, %v4163_v22  ;;  %v5408_v31 = vld [vmem:[%s5742_s26 + $0x9c] sm:$0xe]  ;;  %v3608_v22 = vshll.u32 %v5337_v21, 16 }
 0x20c   : > { %v3845_v3 = vpop.f32.mrf.mxu3  ;;  %3205 = vmatmul.bf16.gmra.mxu2 %v5570_v8  ;;  %v2674_v8 = vsel %vm6057_vm5, %v2672_v11, %v2673_v44  ;;  %v2742_v41 = vunpack.c.l.b16 %v2671_v13  ;;  %v4096_v11 = vrot.slane %v6934_v54, 5  ;;  %v5678_v54 = vld [vmem:[%s5742_s26 + $0xa0] sm:$0xf] }
 0x20d   : > { %v3921_v4 = vadd.f32 %v3845_v3, %v3239_v16  ;;  %v3602_v16 = vrot.slane %v3600_v38, 5  ;;  %v2743_v49 = vunpack.c.l.b16 %v2674_v8  ;;  %v3593_v3 = vsel %vm5757_vm2, %v3588_v9, %v3592_v57 }
 0x20e   : > { %v2677_v9 = vrot.slane %v5678_v54, 5  ;;  %v4097_v8 = vsel %vm6057_vm5, %v4095_v15, %v4096_v11  ;;  %v4100_v54 = vrot.slane %v6948_v47, 5 }
 0x20f   : > { %v4347_v33 = vadd.f32 %v4271_v27, %v3921_v4  ;;  %v3166_v5 = vpop.f32.mrf.mxu2  ;;  %v3605_v27 = vshrl.u32 %v5337_v21, 16  ;;  %v3739_v4 = vunpack.c.l.b16 %v3593_v3  ;;  %v5571_v21 = vld [vmem:[%s5742_s26 + $0x9c] sm:$0xff] }
 0x210   : > { %v3240_v52 = vadd.f32 %v3166_v5, %v2925_v28  ;;  %v2763_v5 = vpack.c.b16 %v2743_v49, %v2742_v41  ;;  %v2679_v49 = vrot.slane %v2677_v9, 4 }
 0x211   : > { %4379 = vst [vmem:[%s6893_s30 + $0x18] sm:$0xff] %v4347_v33  ;;  %v4410_v7 = vadd.f32 %v4409_v1, %v4347_v33  ;;  %v4449_v59 = vmul.f32 %v4347_v33, %v4347_v33  ;;  %3887 = vmatmul.bf16.gmra.mxu3 %v3759_v32  ;;  %v2853_v19 = vpop.f32.mrf.mxu1  ;;  %v5424_v1 = vrot.slane %v5408_v31, 9  ;;  %v3607_v57 = vrot.slane %v3605_v27, 4 }
 0x212   : > { %v4274_v48 = vpop.f32.mrf.mxu0  ;;  %v3610_v32 = vrot.slane %v3608_v22, 5  ;;  %v2926_v33 = vadd.f32 %v2853_v19, %v6421_v34  ;;  %v3620_v31 = vrot.slane %v3618_v42, 4 }
 0x213   : > { %v4480_v51 = vadd.f32 %v4479_v61, %v4449_v59  ;;  %v3603_v61 = vsel %vm5757_vm2, %v3598_v25, %v3602_v16  ;;  %v4094_v13 = vsel %vm6057_vm5, %v5424_v1, %v4093_v0  ;;  %v5089_v25 = vld [vmem:[%s5742_s26 + $0x9c] sm:$0xe]  ;;  %v3616_v59 = vrot.slane %v3614_v46, 5  ;;  %v5679_v0 = vld [vmem:[%s5742_s26 + $0xa4] sm:$0x1] }
 0x214   : > { %v3848_v37 = vpop.f32.mrf.mxu3  ;;  %v3611_v27 = vor.u32 %v3610_v32, %v3607_v57  ;;  %v5105_v41 = vrot.slane %v5089_v25, 9  ;;  %v2680_v3 = vrot.slane %v5679_v0, 5  ;;  %v4165_v15 = vunpack.c.l.b16 %v4094_v13 }
 0x215   : > { %4313 = vmatmul.bf16.gmra.mxu0 %v4185_v40  ;;  %v3922_v44 = vadd.f32 %v3848_v37, %v3240_v52  ;;  %v3740_v40 = vunpack.c.l.b16 %v3603_v61  ;;  %v5339_v37 = vld [vmem:[%s5742_s26 + $0xb0] sm:$0x1] }
 0x216   : > { %v3612_v61 = vrot.slane %v3611_v27, 4  ;;  %v3624_v42 = vshll.u32 %v5339_v37, 16  ;;  %v4103_v0 = vrot.slane %v5339_v37, 5 }
 0x217   : > { %v4348_v38 = vadd.f32 %v4274_v48, %v3922_v44  ;;  %v3168_v28 = vpop.f32.mrf.mxu2  ;;  %v3760_v46 = vpack.c.b16 %v3740_v40, %v3739_v4  ;;  %v3621_v44 = vor.u32 %v3620_v31, %v3616_v59 }
 0x218   : > { %v3241_v34 = vadd.f32 %v3168_v28, %v2926_v33  ;;  %v2681_v33 = vsel %vm6057_vm5, %v2679_v49, %v2680_v3  ;;  %v5409_v28 = vld [vmem:[%s5742_s26 + $0xa8] sm:$0xe]  ;;  %v3617_v27 = vsel %vm5757_vm2, %v3612_v61, %v3616_v59 }
 0x219   : > { %4380 = vst [vmem:[%s6893_s30 + $0x20] sm:$0xff] %v4348_v38  ;;  %v4411_v52 = vadd.f32 %v4410_v7, %v4348_v38  ;;  %v4450_v16 = vmul.f32 %v4348_v38, %v4348_v38  ;;  %v2856_v19 = vpop.f32.mrf.mxu1  ;;  %v4166_v7 = vunpack.c.l.b16 %v4097_v8  ;;  %v2678_v38 = vsel %vm6057_vm5, %v5105_v41, %v2677_v9 }
 0x21a   : > { %v4276_v48 = vpop.f32.mrf.mxu0  ;;  %v3622_v25 = vrot.slane %v3621_v44, 4  ;;  %v2745_v9 = vunpack.c.l.b16 %v2681_v33  ;;  %v5425_v31 = vrot.slane %v5409_v28, 9 }
 0x21b   : > { %v4481_v22 = vadd.f32 %v4480_v51, %v4450_v16  ;;  %2895 = vmatmul.bf16.gmra.mxu1 %v2763_v5  ;;  %v2927_v51 = vadd.f32 %v2856_v19, %v6431_v10  ;;  %v4186_v5 = vpack.c.b16 %v4166_v7, %v4165_v15  ;;  %v6978_v10 = vld [vmem:[%s5742_s26 + $0xb8] sm:$0xf]  ;;  %v3626_v19 = vrot.slane %v3624_v42, 5 }
 0x21c   : > { %v3850_v1 = vpop.f32.mrf.mxu3  ;;  %3210 = vmatmul.bf16.gmra.mxu2 %v5571_v21  ;;  %v5340_v21 = vld [vmem:[%s5742_s26 + $0xb4] sm:$0xf]  ;;  %v3638_v3 = vshll.u32 %v6978_v10, 16  ;;  %v4101_v59 = vsel %vm6057_vm5, %v5425_v31, %v4100_v54 }
 0x21d   : > { %v3923_v11 = vadd.f32 %v3850_v1, %v3241_v34  ;;  %v2744_v34 = vunpack.c.l.b16 %v2678_v38  ;;  %v3629_v47 = vshrl.u32 %v5340_v21, 16  ;;  %v3632_v41 = vshll.u32 %v5340_v21, 16 }
 0x21e   : > { %v3642_v1 = vshrl.u32 %v6978_v10, 16  ;;  %v3640_v33 = vrot.slane %v3638_v3, 5 }
 0x21f   : > { %v4349_v57 = vadd.f32 %v4276_v48, %v3923_v11  ;;  %v3171_v32 = vpop.f32.mrf.mxu2  ;;  %v2764_v7 = vpack.c.b16 %v2745_v9, %v2744_v34  ;;  %v3741_v11 = vunpack.c.l.b16 %v3617_v27  ;;  %v3631_v61 = vrot.slane %v3629_v47, 4 }
 0x220   : > { %v3242_v13 = vadd.f32 %v3171_v32, %v2927_v51  ;;  %v3634_v42 = vrot.slane %v3632_v41, 5  ;;  %v5680_v32 = vld [vmem:[%s5742_s26 + $0xac] sm:$0xf]  ;;  %v3644_v28 = vrot.slane %v3642_v1, 4  ;;  %v4167_v34 = vunpack.c.l.b16 %v4101_v59  ;;  %v5343_v59 = vld [vmem:[%s5742_s26 + $0xc0] sm:$0xf] }
 0x221   : > { %4381 = vst [vmem:[%s6893_s30 + $0x28] sm:$0xff] %v4349_v57  ;;  %v4412_v4 = vadd.f32 %v4411_v52, %v4349_v57  ;;  %v4451_v40 = vmul.f32 %v4349_v57, %v4349_v57  ;;  %3892 = vmatmul.bf16.gmra.mxu3 %v3760_v46  ;;  %v2858_v8 = vpop.f32.mrf.mxu1  ;;  %v4102_v52 = vrot.slane %v4100_v54, 4  ;;  %v5572_v57 = vld [vmem:[%s5742_s26 + $0xa8] sm:$0xff]  ;;  %v2684_v38 = vrot.slane %v5680_v32, 5  ;;  %v5410_v32 = vld [vmem:[%s5742_s26 + $0xb4] sm:$0xe] }
 0x222   : > { %v4279_v16 = vpop.f32.mrf.mxu0  ;;  %v2928_v44 = vadd.f32 %v2858_v8, %v6439_v12 }
 0x223   : > { %v4482_v48 = vadd.f32 %v4481_v22, %v4451_v40  ;;  %v3627_v22 = vsel %vm5757_vm2, %v3622_v25, %v3626_v19  ;;  %v4104_v51 = vsel %vm6057_vm5, %v4102_v52, %v4103_v0  ;;  %v6996_v25 = vld [vmem:[%s5742_s26 + $0xbc] sm:$0x1]  ;;  %v3635_v19 = vor.u32 %v3634_v42, %v3631_v61 }
 0x224   : > { %v3853_v49 = vpop.f32.mrf.mxu3  ;;  %v3742_v12 = vunpack.c.l.b16 %v3627_v22  ;;  %v4168_v9 = vunpack.c.l.b16 %v4104_v51  ;;  %v2686_v47 = vrot.slane %v2684_v38, 4  ;;  %v3648_v3 = vshll.u32 %v6996_v25, 16 }
 0x225   : > { %4318 = vmatmul.bf16.gmra.mxu0 %v4186_v5  ;;  %v3924_v15 = vadd.f32 %v3853_v49, %v3242_v13  ;;  %v5090_v13 = vld [vmem:[%s5742_s26 + $0xa8] sm:$0xe]  ;;  %v3645_v49 = vor.u32 %v3644_v28, %v3640_v33  ;;  %v3636_v22 = vrot.slane %v3635_v19, 4  ;;  %v7010_v28 = vld [vmem:[%s5742_s26 + $0xc4] sm:$0xf] }
 0x226   : > { %v5106_v27 = vrot.slane %v5090_v13, 9  ;;  %v3761_v0 = vpack.c.b16 %v3742_v12, %v3741_v11  ;;  %v4107_v11 = vrot.slane %v6978_v10, 5  ;;  %v3650_v51 = vrot.slane %v3648_v3, 5 }
 0x227   : > { %v4350_v46 = vadd.f32 %v4279_v16, %v3924_v15  ;;  %v3173_v37 = vpop.f32.mrf.mxu2  ;;  %v4187_v15 = vpack.c.b16 %v4168_v9, %v4167_v34  ;;  %v4110_v9 = vrot.slane %v6996_v25, 5  ;;  %v3662_v19 = vshll.u32 %v7010_v28, 16  ;;  %v5682_v25 = vld [vmem:[%s5742_s26 + $0xb8] sm:$0xf] }
 0x228   : > { %v3243_v54 = vadd.f32 %v3173_v37, %v2928_v44  ;;  %v3646_v37 = vrot.slane %v3645_v49, 4  ;;  %v4109_v34 = vrot.slane %v4107_v11, 4  ;;  %v7141_v49 = vld [vmem:[#allocation2_spill] sm:$0xff] }
 0x229   : > { %4382 = vst [vmem:[%s6893_s30 + $0x30] sm:$0xff] %v4350_v46  ;;  %v4413_v5 = vadd.f32 %v4412_v4, %v4350_v46  ;;  %v4452_v21 = vmul.f32 %v4350_v46, %v4350_v46  ;;  %v2861_v40 = vpop.f32.mrf.mxu1  ;;  %v5681_v4 = vld [vmem:[%s5742_s26 + $0xb0] sm:$0x1]  ;;  %v2685_v46 = vsel %vm6057_vm5, %v5106_v27, %v2684_v38  ;;  %v3666_v27 = vshrl.u32 %v7010_v28, 16 }
 0x22a   : > { %v4281_v8 = vpop.f32.mrf.mxu0  ;;  %v2687_v41 = vrot.slane %v5681_v4, 5  ;;  %v2746_v12 = vunpack.c.l.b16 %v2685_v46  ;;  %v3664_v46 = vrot.slane %v3662_v19, 5 }
 0x22b   : > { %v4483_v16 = vadd.f32 %v4482_v48, %v4452_v21  ;;  %2900 = vmatmul.bf16.gmra.mxu1 %v2764_v7  ;;  %v2929_v48 = vadd.f32 %v2861_v40, %v6458_v60  ;;  %v3656_v40 = vshll.u32 %v5343_v59, 16 }
 0x22c   : > { %v3855_v31 = vpop.f32.mrf.mxu3  ;;  %3215 = vmatmul.bf16.gmra.mxu2 %v5572_v57  ;;  %v2688_v44 = vsel %vm6057_vm5, %v2686_v47, %v2687_v41 }
 0x22d   : > { %v3925_v52 = vadd.f32 %v3855_v31, %v3243_v54  ;;  %v3653_v54 = vshrl.u32 %v5343_v59, 16  ;;  %v2747_v13 = vunpack.c.l.b16 %v2688_v44  ;;  %v3658_v4 = vrot.slane %v3656_v40, 5  ;;  %v5091_v59 = vld [vmem:[%s5742_s26 + $0xb4] sm:$0xe] }
 0x22f   : > { %v4351_v1 = vadd.f32 %v4281_v8, %v3925_v52  ;;  %v3176_v7 = vpop.f32.mrf.mxu2  ;;  %v3641_v8 = vsel %vm5757_vm2, %v3636_v22, %v3640_v33  ;;  %v3655_v33 = vrot.slane %v3653_v54, 4  ;;  %v2765_v3 = vpack.c.b16 %v2747_v13, %v2746_v12  ;;  %v5345_v13 = vld [vmem:[%s5742_s26 + $0xc8] sm:$0x1] }
 0x230   : > { %v3244_v60 = vadd.f32 %v3176_v7, %v2929_v48  ;;  %v3743_v47 = vunpack.c.l.b16 %v3641_v8  ;;  %v5573_v48 = vld [vmem:[%s5742_s26 + $0xb4] sm:$0xff]  ;;  %v4111_v22 = vsel %vm6057_vm5, %v4109_v34, %v4110_v9  ;;  %v5107_v54 = vrot.slane %v5091_v59, 9 }
 0x231   : > { %4383 = vst [vmem:[%s6893_s30 + $0x38] sm:$0xff] %v4351_v1  ;;  %v4414_v61 = vadd.f32 %v4413_v5, %v4351_v1  ;;  %v4453_v42 = vmul.f32 %v4351_v1, %v4351_v1  ;;  %3897 = vmatmul.bf16.gmra.mxu3 %v3761_v0  ;;  %v2863_v57 = vpop.f32.mrf.mxu1  ;;  %v5426_v5 = vrot.slane %v5410_v32, 9  ;;  %v2691_v1 = vrot.slane %v5682_v25, 5 }
 0x232   : > { %v4284_v21 = vpop.f32.mrf.mxu0  ;;  %v2930_v52 = vadd.f32 %v2863_v57, %v7141_v49  ;;  %v3668_v57 = vrot.slane %v3666_v27, 4  ;;  %v3659_v32 = vor.u32 %v3658_v4, %v3655_v33  ;;  %v5411_v49 = vld [vmem:[%s5742_s26 + $0xc0] sm:$0xe] }
 0x233   : > { %v4484_v38 = vadd.f32 %v4483_v16, %v4453_v42  ;;  %v3651_v16 = vsel %vm5757_vm2, %v3646_v37, %v3650_v51  ;;  %v4108_v7 = vsel %vm6057_vm5, %v5426_v5, %v4107_v11  ;;  %v2693_v40 = vrot.slane %v2691_v1, 4  ;;  %v5683_v11 = vld [vmem:[%s5742_s26 + $0xbc] sm:$0x1] }
 0x234   : > { %v3858_v10 = vpop.f32.mrf.mxu3  ;;  %v2694_v12 = vrot.slane %v5683_v11, 5  ;;  %v3669_v9 = vor.u32 %v3668_v57, %v3664_v46  ;;  %v3660_v19 = vrot.slane %v3659_v32, 4  ;;  %v2692_v4 = vsel %vm6057_vm5, %v5107_v54, %v2691_v1 }
 0x235   : > { %4323 = vmatmul.bf16.gmra.mxu0 %v4187_v15  ;;  %v3926_v31 = vadd.f32 %v3858_v10, %v3244_v60  ;;  %v3744_v15 = vunpack.c.l.b16 %v3651_v16  ;;  %v4169_v10 = vunpack.c.l.b16 %v4108_v7 }
 0x236   : > { %v3670_v7 = vrot.slane %v3669_v9, 4 }
 0x237   : > { %v4352_v41 = vadd.f32 %v4284_v21, %v3926_v31  ;;  %v3178_v0 = vpop.f32.mrf.mxu2  ;;  %v3762_v34 = vpack.c.b16 %v3744_v15, %v3743_v47  ;;  %v3672_v31 = vshll.u32 %v5345_v13, 16 }
 0x238   : > { %v3245_v42 = vadd.f32 %v3178_v0, %v2930_v52  ;;  %v4114_v0 = vrot.slane %v7010_v28, 5 }
 0x239   : > { %4384 = vst [vmem:[%s6893_s30 + $0x40] sm:$0xff] %v4352_v41  ;;  %v4415_v44 = vadd.f32 %v4414_v61, %v4352_v41  ;;  %v4454_v37 = vmul.f32 %v4352_v41, %v4352_v41  ;;  %v2866_v60 = vpop.f32.mrf.mxu1  ;;  %v4170_v61 = vunpack.c.l.b16 %v4111_v22  ;;  %v2695_v41 = vsel %vm6057_vm5, %v2693_v40, %v2694_v12  ;;  %v7040_v22 = vld [vmem:[%s5742_s26 + $0xd0] sm:$0xf] }
 0x23a   : > { %v4286_v51 = vpop.f32.mrf.mxu0  ;;  %v2749_v1 = vunpack.c.l.b16 %v2695_v41  ;;  %v4117_v40 = vrot.slane %v5345_v13, 5  ;;  %v3686_v11 = vshll.u32 %v7040_v22, 16  ;;  %v3690_v12 = vshrl.u32 %v7040_v22, 16 }
 0x23b   : > { %v4485_v21 = vadd.f32 %v4484_v38, %v4454_v37  ;;  %2905 = vmatmul.bf16.gmra.mxu1 %v2765_v3  ;;  %v7142_v38 = vld [vmem:[#allocation3_spill] sm:$0xff]  ;;  %v4188_v52 = vpack.c.b16 %v4170_v61, %v4169_v10  ;;  %v2748_v37 = vunpack.c.l.b16 %v2692_v4 }
 0x23c   : > { %v3860_v8 = vpop.f32.mrf.mxu3  ;;  %3220 = vmatmul.bf16.gmra.mxu2 %v5573_v48  ;;  %v2931_v27 = vadd.f32 %v2866_v60, %v7142_v38  ;;  %v5346_v3 = vld [vmem:[%s5742_s26 + $0xcc] sm:$0xf]  ;;  %v5427_v60 = vrot.slane %v5411_v49, 9  ;;  %v5684_v38 = vld [vmem:[%s5742_s26 + $0xc4] sm:$0xf]  ;;  %v3688_v4 = vrot.slane %v3686_v11, 5 }
 0x23d   : > { %v3927_v5 = vadd.f32 %v3860_v8, %v3245_v42  ;;  %v3674_v42 = vrot.slane %v3672_v31, 5  ;;  %v3677_v28 = vshrl.u32 %v5346_v3, 16  ;;  %v3680_v32 = vshll.u32 %v5346_v3, 16  ;;  %v5574_v31 = vld [vmem:[%s5742_s26 + $0xc0] sm:$0xff] }
 0x23e   : > { %v2766_v10 = vpack.c.b16 %v2749_v1, %v2748_v37  ;;  %v4115_v61 = vsel %vm6057_vm5, %v5427_v60, %v4114_v0  ;;  %v3692_v41 = vrot.slane %v3690_v12, 4 }
 0x23f   : > { %v4353_v16 = vadd.f32 %v4286_v51, %v3927_v5  ;;  %v3181_v33 = vpop.f32.mrf.mxu2  ;;  %v3665_v51 = vsel %vm5757_vm2, %v3660_v19, %v3664_v46  ;;  %v3679_v9 = vrot.slane %v3677_v28, 4  ;;  %v3682_v19 = vrot.slane %v3680_v32, 5 }
 0x240   : > { %v3246_v48 = vadd.f32 %v3181_v33, %v2931_v27  ;;  %v3745_v46 = vunpack.c.l.b16 %v3665_v51  ;;  %v2698_v27 = vrot.slane %v5684_v38, 5  ;;  %v7056_v33 = vld [vmem:[%s5742_s26 + $0xd4] sm:$0x1]  ;;  %v3693_v32 = vor.u32 %v3692_v41, %v3688_v4 }
 0x241   : > { %4385 = vst [vmem:[%s6893_s30 + $0x48] sm:$0xff] %v4353_v16  ;;  %v4416_v47 = vadd.f32 %v4415_v44, %v4353_v16  ;;  %v4455_v25 = vmul.f32 %v4353_v16, %v4353_v16  ;;  %3902 = vmatmul.bf16.gmra.mxu3 %v3762_v34  ;;  %v2868_v15 = vpop.f32.mrf.mxu1  ;;  %v4116_v44 = vrot.slane %v4114_v0, 4  ;;  %v3683_v37 = vor.u32 %v3682_v19, %v3679_v9  ;;  %v5412_v19 = vld [vmem:[%s5742_s26 + $0xcc] sm:$0xe] }
 0x242   : > { %v4289_v59 = vpop.f32.mrf.mxu0  ;;  %v2932_v13 = vadd.f32 %v2868_v15, %v6509_v24  ;;  %v4171_v15 = vunpack.c.l.b16 %v4115_v61  ;;  %v3696_v1 = vshll.u32 %v7056_v33, 16  ;;  %v2700_v51 = vrot.slane %v2698_v27, 4 }
 0x243   : > { %v4486_v57 = vadd.f32 %v4485_v21, %v4455_v25  ;;  %v3675_v21 = vsel %vm5757_vm2, %v3670_v7, %v3674_v42  ;;  %v4118_v16 = vsel %vm6057_vm5, %v4116_v44, %v4117_v40  ;;  %v5092_v25 = vld [vmem:[%s5742_s26 + $0xc0] sm:$0xe]  ;;  %v3694_v61 = vrot.slane %v3693_v32, 4 }
 0x244   : > { %v3863_v54 = vpop.f32.mrf.mxu3  ;;  %v3746_v3 = vunpack.c.l.b16 %v3675_v21  ;;  %v5108_v60 = vrot.slane %v5092_v25, 9  ;;  %v4124_v25 = vrot.slane %v7056_v33, 5 }
 0x245   : > { %4328 = vmatmul.bf16.gmra.mxu0 %v4188_v52  ;;  %v3928_v8 = vadd.f32 %v3863_v54, %v3246_v48 }
 0x246   : > { %v3763_v44 = vpack.c.b16 %v3746_v3, %v3745_v46 }
 0x247   : > { %v4354_v5 = vadd.f32 %v4289_v59, %v3928_v8  ;;  %v3183_v34 = vpop.f32.mrf.mxu2  ;;  %v4172_v59 = vunpack.c.l.b16 %v4118_v16  ;;  %v3684_v8 = vrot.slane %v3683_v37, 4 }
 0x248   : > { %v3247_v0 = vadd.f32 %v3183_v34, %v2932_v13 }
 0x249   : > { %4386 = vst [vmem:[%s6893_s30 + $0x50] sm:$0xff] %v4354_v5  ;;  %v4417_v49 = vadd.f32 %v4416_v47, %v4354_v5  ;;  %v4456_v52 = vmul.f32 %v4354_v5, %v4354_v5  ;;  %v2871_v24 = vpop.f32.mrf.mxu1  ;;  %v5685_v47 = vld [vmem:[%s5742_s26 + $0xc8] sm:$0x1]  ;;  %v3698_v5 = vrot.slane %v3696_v1, 5 }
 0x24a   : > { %v4291_v48 = vpop.f32.mrf.mxu0  ;;  %v2701_v28 = vrot.slane %v5685_v47, 5  ;;  %v2933_v11 = vadd.f32 %v2871_v24, %v6518_v36  ;;  %v4121_v36 = vrot.slane %v7040_v22, 5 }
 0x24b   : > { %v4487_v7 = vadd.f32 %v4486_v57, %v4456_v52  ;;  %2910 = vmatmul.bf16.gmra.mxu1 %v2766_v10  ;;  %v4189_v57 = vpack.c.b16 %v4172_v59, %v4171_v15  ;;  %v2699_v10 = vsel %vm6057_vm5, %v5108_v60, %v2698_v27  ;;  %v3689_v52 = vsel %vm5757_vm2, %v3684_v8, %v3688_v4  ;;  %v5575_v59 = vld [vmem:[%s5742_s26 + $0xcc] sm:$0xff] }
 0x24c   : > { %v3865_v42 = vpop.f32.mrf.mxu3  ;;  %3225 = vmatmul.bf16.gmra.mxu2 %v5574_v31  ;;  %v2702_v21 = vsel %vm6057_vm5, %v2700_v51, %v2701_v28  ;;  %v2750_v38 = vunpack.c.l.b16 %v2699_v10  ;;  %v3699_v24 = vsel %vm5757_vm2, %v3694_v61, %v3698_v5  ;;  %v4123_v3 = vrot.slane %v4121_v36, 4 }
 0x24d   : > { %v3929_v54 = vadd.f32 %v3865_v42, %v3247_v0  ;;  %v2751_v41 = vunpack.c.l.b16 %v2702_v21  ;;  %v5428_v0 = vrot.slane %v5412_v19, 9  ;;  %v3747_v37 = vunpack.c.l.b16 %v3689_v52 }
 0x24e   : > { %v3748_v1 = vunpack.c.l.b16 %v3699_v24  ;;  %v4125_v33 = vsel %vm6057_vm5, %v4123_v3, %v4124_v25 }
 0x24f   : > { %v4355_v40 = vadd.f32 %v4291_v48, %v3929_v54  ;;  %v3186_v12 = vpop.f32.mrf.mxu2  ;;  %v4122_v4 = vsel %vm6057_vm5, %v5428_v0, %v4121_v36  ;;  %v4174_v54 = vunpack.c.l.b16 %v4125_v33 }
 0x250   : > { %v3248_v46 = vadd.f32 %v3186_v12, %v2933_v11  ;;  %v4173_v32 = vunpack.c.l.b16 %v4122_v4 }
 0x251   : > { %4387 = vst [vmem:[%s6893_s30 + $0x58] sm:$0xff] %v4355_v40  ;;  %v4418_v13 = vadd.f32 %v4417_v49, %v4355_v40  ;;  %v4457_v34 = vmul.f32 %v4355_v40, %v4355_v40  ;;  %3907 = vmatmul.bf16.gmra.mxu3 %v3763_v44  ;;  %v2873_v9 = vpop.f32.mrf.mxu1  ;;  %v3764_v40 = vpack.c.b16 %v3748_v1, %v3747_v37 }
 0x252   : > { %v4294_v31 = vpop.f32.mrf.mxu0  ;;  %v2934_v48 = vadd.f32 %v2873_v9, %v6531_v45  ;;  %v4190_v8 = vpack.c.b16 %v4174_v54, %v4173_v32 }
 0x253   : > { %v4488_v16 = vadd.f32 %v4487_v7, %v4457_v34  ;;  %v2767_v7 = vpack.c.b16 %v2751_v41, %v2750_v38 }
 0x254   : > { %v3868_v27 = vpop.f32.mrf.mxu3 }
 0x255   : > { %4333 = vmatmul.bf16.gmra.mxu0 %v4189_v57  ;;  %v3930_v49 = vadd.f32 %v3868_v27, %v3248_v46 }
 0x257   : > { %v4356_v22 = vadd.f32 %v4294_v31, %v3930_v49  ;;  %v3188_v15 = vpop.f32.mrf.mxu2 }
 0x258   : > { %v3249_v51 = vadd.f32 %v3188_v15, %v2934_v48 }
 0x259   : > { %4388 = vst [vmem:[%s6893_s30 + $0x60] sm:$0xff] %v4356_v22  ;;  %v4419_v42 = vadd.f32 %v4418_v13, %v4356_v22  ;;  %v4458_v60 = vmul.f32 %v4356_v22, %v4356_v22  ;;  %v2876_v30 = vpop.f32.mrf.mxu1 }
 0x25a   : > { %v4296_v47 = vpop.f32.mrf.mxu0  ;;  %v2935_v57 = vadd.f32 %v2876_v30, %v6544_v23 }
 0x25b   : > { %v4489_v28 = vadd.f32 %v4488_v16, %v4458_v60  ;;  %2915 = vmatmul.bf16.gmra.mxu1 %v2767_v7 }
 0x25c   : > { %v3870_v45 = vpop.f32.mrf.mxu3  ;;  %3230 = vmatmul.bf16.gmra.mxu2 %v5575_v59 }
 0x25d   : > { %v3931_v44 = vadd.f32 %v3870_v45, %v3249_v51 }
 0x25f   : > { %v4357_v11 = vadd.f32 %v4296_v47, %v3931_v44  ;;  %v3191_v12 = vpop.f32.mrf.mxu2 }
 0x260   : > { %v3250_v43 = vadd.f32 %v3191_v12, %v2935_v57 }
 0x261   : > { %4389 = vst [vmem:[%s6893_s30 + $0x68] sm:$0xff] %v4357_v11  ;;  %v4420_v10 = vadd.f32 %v4419_v42, %v4357_v11  ;;  %v4459_v21 = vmul.f32 %v4357_v11, %v4357_v11  ;;  %3912 = vmatmul.bf16.gmra.mxu3 %v3764_v40  ;;  %v2878_v61 = vpop.f32.mrf.mxu1 }
 0x262   : > { %v4299_v5 = vpop.f32.mrf.mxu0  ;;  %v2936_v19 = vadd.f32 %v2878_v61, %v6568_v17 }
 0x263   : > { %v4490_v13 = vadd.f32 %v4489_v28, %v4459_v21 }
 0x264   : > { %v3873_v34 = vpop.f32.mrf.mxu3 }
 0x265   : > { %4338 = vmatmul.bf16.gmra.mxu0 %v4190_v8  ;;  %v3932_v46 = vadd.f32 %v3873_v34, %v3250_v43 }
 0x267   : > { %v4358_v9 = vadd.f32 %v4299_v5, %v3932_v46  ;;  %v3193_v36 = vpop.f32.mrf.mxu2 }
 0x268   : > { %v3251_v16 = vadd.f32 %v3193_v36, %v2936_v19 }
 0x269   : > { %4390 = vst [vmem:[%s6893_s30 + $0x70] sm:$0xff] %v4358_v9  ;;  %v4421_v23 = vadd.f32 %v4420_v10, %v4358_v9  ;;  %v4460_v31 = vmul.f32 %v4358_v9, %v4358_v9  ;;  %v2881_v38 = vpop.f32.mrf.mxu1 }
 0x26a   : > { %v4301_v41 = vpop.f32.mrf.mxu0  ;;  %v2937_v24 = vadd.f32 %v2881_v38, %v6583_v20 }
 0x26b   : > { %v4491_v27 = vadd.f32 %v4490_v13, %v4460_v31 }
 0x26c   : > { %v3875_v52 = vpop.f32.mrf.mxu3 }
 0x26d   : > { %v3933_v0 = vadd.f32 %v3875_v52, %v3251_v16 }
 0x26f   : > { %v4359_v49 = vadd.f32 %v4301_v41, %v3933_v0  ;;  %v3196_v3 = vpop.f32.mrf.mxu2 }
 0x270   : > { %v3252_v48 = vadd.f32 %v3196_v3, %v2937_v24 }
 0x271   : > { %4391 = vst [vmem:[%s6893_s30 + $0x78] sm:$0xff] %v4359_v49  ;;  %v4422_v25 = vadd.f32 %v4421_v23, %v4359_v49  ;;  %v4461_v22 = vmul.f32 %v4359_v49, %v4359_v49  ;;  %v2883_v17 = vpop.f32.mrf.mxu1 }
 0x272   : > { %v4304_v15 = vpop.f32.mrf.mxu0  ;;  %v2938_v4 = vadd.f32 %v2883_v17, %v6609_v56 }
 0x273   : > { %v4492_v7 = vadd.f32 %v4491_v27, %v4461_v22 }
 0x274   : > { %v3878_v59 = vpop.f32.mrf.mxu3 }
 0x275   : > { %v3934_v37 = vadd.f32 %v3878_v59, %v3252_v48 }
 0x277   : > { %v4360_v1 = vadd.f32 %v4304_v15, %v3934_v37  ;;  %v3198_v42 = vpop.f32.mrf.mxu2 }
 0x278   : > { %v3253_v30 = vadd.f32 %v3198_v42, %v2938_v4 }
 0x279   : > { %4392 = vst [vmem:[%s6893_s30 + $0x80] sm:$0xff] %v4360_v1  ;;  %v4423_v60 = vadd.f32 %v4422_v25, %v4360_v1  ;;  %v4462_v51 = vmul.f32 %v4360_v1, %v4360_v1  ;;  %v2886_v20 = vpop.f32.mrf.mxu1 }
 0x27a   : > { %v4306_v33 = vpop.f32.mrf.mxu0  ;;  %v2939_v54 = vadd.f32 %v2886_v20, %v6623_v29 }
 0x27b   : > { %v4493_v47 = vadd.f32 %v4492_v7, %v4462_v51 }
 0x27c   : > { %v3880_v28 = vpop.f32.mrf.mxu3 }
 0x27d   : > { %v3935_v45 = vadd.f32 %v3880_v28, %v3253_v30 }
 0x27f   : > { %v4361_v32 = vadd.f32 %v4306_v33, %v3935_v45  ;;  %v3201_v44 = vpop.f32.mrf.mxu2 }
 0x280   : > { %v3254_v57 = vadd.f32 %v3201_v44, %v2939_v54 }
 0x281   : > { %4393 = vst [vmem:[%s6893_s30 + $0x88] sm:$0xff] %v4361_v32  ;;  %v4424_v40 = vadd.f32 %v4423_v60, %v4361_v32  ;;  %v4463_v11 = vmul.f32 %v4361_v32, %v4361_v32  ;;  %v2888_v56 = vpop.f32.mrf.mxu1 }
 0x282   : > { %v4309_v12 = vpop.f32.mrf.mxu0  ;;  %v2940_v61 = vadd.f32 %v2888_v56, %v6646_v58 }
 0x283   : > { %v4494_v8 = vadd.f32 %v4493_v47, %v4463_v11 }
 0x284   : > { %v3883_v10 = vpop.f32.mrf.mxu3 }
 0x285   : > { %v3936_v21 = vadd.f32 %v3883_v10, %v3254_v57 }
 0x287   : > { %v4362_v43 = vadd.f32 %v4309_v12, %v3936_v21  ;;  %v3203_v5 = vpop.f32.mrf.mxu2 }
 0x288   : > { %v3255_v46 = vadd.f32 %v3203_v5, %v2940_v61 }
 0x289   : > { %4394 = vst [vmem:[%s6893_s30 + $0x90] sm:$0xff] %v4362_v43  ;;  %v4425_v13 = vadd.f32 %v4424_v40, %v4362_v43  ;;  %v4464_v34 = vmul.f32 %v4362_v43, %v4362_v43  ;;  %v2891_v29 = vpop.f32.mrf.mxu1 }
 0x28a   : > { %v4311_v9 = vpop.f32.mrf.mxu0  ;;  %v2941_v16 = vadd.f32 %v2891_v29, %v6661_v26 }
 0x28b   : > { %v4495_v19 = vadd.f32 %v4494_v8, %v4464_v34 }
 0x28c   : > { %v3885_v36 = vpop.f32.mrf.mxu3 }
 0x28d   : > { %v3937_v23 = vadd.f32 %v3885_v36, %v3255_v46 }
 0x28f   : > { %v4363_v31 = vadd.f32 %v4311_v9, %v3937_v23  ;;  %v3206_v38 = vpop.f32.mrf.mxu2 }
 0x290   : > { %v3256_v52 = vadd.f32 %v3206_v38, %v2941_v16 }
 0x291   : > { %4395 = vst [vmem:[%s6893_s30 + $0x98] sm:$0xff] %v4363_v31  ;;  %v4426_v41 = vadd.f32 %v4425_v13, %v4363_v31  ;;  %v4465_v27 = vmul.f32 %v4363_v31, %v4363_v31  ;;  %v2893_v58 = vpop.f32.mrf.mxu1 }
 0x292   : > { %v4314_v0 = vpop.f32.mrf.mxu0  ;;  %v2942_v22 = vadd.f32 %v2893_v58, %v6687_v53 }
 0x293   : > { %v4496_v49 = vadd.f32 %v4495_v19, %v4465_v27 }
 0x294   : > { %v3888_v24 = vpop.f32.mrf.mxu3 }
 0x295   : > { %v3938_v3 = vadd.f32 %v3888_v24, %v3256_v52 }
 0x297   : > { %v4364_v25 = vadd.f32 %v4314_v0, %v3938_v3  ;;  %v3208_v48 = vpop.f32.mrf.mxu2 }
 0x298   : > { %v3257_v7 = vadd.f32 %v3208_v48, %v2942_v22 }
 0x299   : > { %4396 = vst [vmem:[%s6893_s30 + $0xa0] sm:$0xff] %v4364_v25  ;;  %v4427_v17 = vadd.f32 %v4426_v41, %v4364_v25  ;;  %v4466_v15 = vmul.f32 %v4364_v25, %v4364_v25  ;;  %v2896_v26 = vpop.f32.mrf.mxu1 }
 0x29a   : > { %v4316_v59 = vpop.f32.mrf.mxu0  ;;  %v2943_v60 = vadd.f32 %v2896_v26, %v6701_v2 }
 0x29b   : > { %v4497_v37 = vadd.f32 %v4496_v49, %v4466_v15 }
 0x29c   : > { %v3890_v1 = vpop.f32.mrf.mxu3 }
 0x29d   : > { %v3939_v4 = vadd.f32 %v3890_v1, %v3257_v7 }
 0x29f   : > { %v4365_v42 = vadd.f32 %v4316_v59, %v3939_v4  ;;  %v3211_v51 = vpop.f32.mrf.mxu2 }
 0x2a0   : > { %v3258_v33 = vadd.f32 %v3211_v51, %v2943_v60 }
 0x2a1   : > { %4397 = vst [vmem:[%s6893_s30 + $0xa8] sm:$0xff] %v4365_v42  ;;  %v4428_v30 = vadd.f32 %v4427_v17, %v4365_v42  ;;  %v4467_v20 = vmul.f32 %v4365_v42, %v4365_v42  ;;  %v2898_v53 = vpop.f32.mrf.mxu1 }
 0x2a2   : > { %v4319_v47 = vpop.f32.mrf.mxu0  ;;  %v2944_v44 = vadd.f32 %v2898_v53, %v6724_v50 }
 0x2a3   : > { %v4498_v28 = vadd.f32 %v4497_v37, %v4467_v20 }
 0x2a4   : > { %v3893_v45 = vpop.f32.mrf.mxu3 }
 0x2a5   : > { %v3940_v32 = vadd.f32 %v3893_v45, %v3258_v33 }
 0x2a7   : > { %v4366_v54 = vadd.f32 %v4319_v47, %v3940_v32  ;;  %v3213_v40 = vpop.f32.mrf.mxu2 }
 0x2a8   : > { %v3259_v56 = vadd.f32 %v3213_v40, %v2944_v44 }
 0x2a9   : > { %4398 = vst [vmem:[%s6893_s30 + $0xb0] sm:$0xff] %v4366_v54  ;;  %v4429_v11 = vadd.f32 %v4428_v30, %v4366_v54  ;;  %v4468_v57 = vmul.f32 %v4366_v54, %v4366_v54  ;;  %v2901_v2 = vpop.f32.mrf.mxu1 }
 0x2aa   : > { %v4321_v12 = vpop.f32.mrf.mxu0  ;;  %v2945_v61 = vadd.f32 %v2901_v2, %v6739_v35 }
 0x2ab   : > { %v4499_v8 = vadd.f32 %v4498_v28, %v4468_v57 }
 0x2ac   : > { %v3895_v10 = vpop.f32.mrf.mxu3 }
 0x2ad   : > { %v3941_v21 = vadd.f32 %v3895_v10, %v3259_v56 }
 0x2af   : > { %v4367_v43 = vadd.f32 %v4321_v12, %v3941_v21  ;;  %v3216_v5 = vpop.f32.mrf.mxu2 }
 0x2b0   : > { %v3260_v46 = vadd.f32 %v3216_v5, %v2945_v61 }
 0x2b1   : > { %4399 = vst [vmem:[%s6893_s30 + $0xb8] sm:$0xff] %v4367_v43  ;;  %v4430_v13 = vadd.f32 %v4429_v11, %v4367_v43  ;;  %v4469_v34 = vmul.f32 %v4367_v43, %v4367_v43  ;;  %v2903_v50 = vpop.f32.mrf.mxu1 }
 0x2b2   : > { %v4324_v29 = vpop.f32.mrf.mxu0  ;;  %v2946_v31 = vadd.f32 %v2903_v50, %v6765_v18 }
 0x2b3   : > { %v4500_v9 = vadd.f32 %v4499_v8, %v4469_v34 }
 0x2b4   : > { %v3898_v19 = vpop.f32.mrf.mxu3 }
 0x2b5   : > { %v3942_v36 = vadd.f32 %v3898_v19, %v3260_v46 }
 0x2b7   : > { %v4368_v23 = vadd.f32 %v4324_v29, %v3942_v36  ;;  %v3218_v16 = vpop.f32.mrf.mxu2 }
 0x2b8   : > { %v3261_v27 = vadd.f32 %v3218_v16, %v2946_v31 }
 0x2b9   : > { %4400 = vst [vmem:[%s6893_s30 + $0xc0] sm:$0xff] %v4368_v23  ;;  %v4431_v38 = vadd.f32 %v4430_v13, %v4368_v23  ;;  %v4470_v41 = vmul.f32 %v4368_v23, %v4368_v23  ;;  %v2906_v35 = vpop.f32.mrf.mxu1 }
 0x2ba   : > { %v4326_v52 = vpop.f32.mrf.mxu0  ;;  %v2947_v3 = vadd.f32 %v2906_v35, %v6779_v14 }
 0x2bb   : > { %v4501_v58 = vadd.f32 %v4500_v9, %v4470_v41 }
 0x2bc   : > { %v3900_v0 = vpop.f32.mrf.mxu3 }
 0x2bd   : > { %v3943_v49 = vadd.f32 %v3900_v0, %v3261_v27 }
 0x2bf   : > { %v4369_v24 = vadd.f32 %v4326_v52, %v3943_v49  ;;  %v3221_v25 = vpop.f32.mrf.mxu2 }
 0x2c0   : > { %v3262_v17 = vadd.f32 %v3221_v25, %v2947_v3 }
 0x2c1   : > { %4401 = vst [vmem:[%s6893_s30 + $0xc8] sm:$0xff] %v4369_v24  ;;  %v4432_v22 = vadd.f32 %v4431_v38, %v4369_v24  ;;  %v4471_v48 = vmul.f32 %v4369_v24, %v4369_v24  ;;  %v2908_v18 = vpop.f32.mrf.mxu1 }
 0x2c2   : > { %v4329_v15 = vpop.f32.mrf.mxu0  ;;  %v2948_v1 = vadd.f32 %v2908_v18, %v6802_v63 }
 0x2c3   : > { %v4502_v7 = vadd.f32 %v4501_v58, %v4471_v48 }
 0x2c4   : > { %v3903_v26 = vpop.f32.mrf.mxu3 }
 0x2c5   : > { %v3944_v59 = vadd.f32 %v3903_v26, %v3262_v17 }
 0x2c7   : > { %v4370_v37 = vadd.f32 %v4329_v15, %v3944_v59  ;;  %v3223_v4 = vpop.f32.mrf.mxu2 }
 0x2c8   : > { %v3263_v51 = vadd.f32 %v3223_v4, %v2948_v1 }
 0x2c9   : > { %4402 = vst [vmem:[%s6893_s30 + $0xd0] sm:$0xff] %v4370_v37  ;;  %v4433_v42 = vadd.f32 %v4432_v22, %v4370_v37  ;;  %v4472_v60 = vmul.f32 %v4370_v37, %v4370_v37  ;;  %v2911_v14 = vpop.f32.mrf.mxu1 }
 0x2ca   : > { %v4331_v30 = vpop.f32.mrf.mxu0  ;;  %v2949_v28 = vadd.f32 %v2911_v14, %v6817_v55 }
 0x2cb   : > { %v4503_v20 = vadd.f32 %v4502_v7, %v4472_v60 }
 0x2cc   : > { %v3905_v33 = vpop.f32.mrf.mxu3 }
 0x2cd   : > { %v3945_v53 = vadd.f32 %v3905_v33, %v3263_v51 }
 0x2cf   : > { %v4371_v47 = vadd.f32 %v4331_v30, %v3945_v53  ;;  %v3226_v45 = vpop.f32.mrf.mxu2 }
 0x2d0   : > { %v3264_v44 = vadd.f32 %v3226_v45, %v2949_v28 }
 0x2d1   : > { %4403 = vst [vmem:[%s6893_s30 + $0xd8] sm:$0xff] %v4371_v47  ;;  %v4434_v32 = vadd.f32 %v4433_v42, %v4371_v47  ;;  %v4473_v54 = vmul.f32 %v4371_v47, %v4371_v47  ;;  %v2913_v63 = vpop.f32.mrf.mxu1 }
 0x2d2   : > { %v4334_v40 = vpop.f32.mrf.mxu0  ;;  %v2950_v12 = vadd.f32 %v2913_v63, %v6840_v62 }
 0x2d3   : > { %v4504_v11 = vadd.f32 %v4503_v20, %v4473_v54 }
 0x2d4   : > { %v3908_v57 = vpop.f32.mrf.mxu3 }
 0x2d5   : > { %v3946_v56 = vadd.f32 %v3908_v57, %v3264_v44 }
 0x2d7   : > { %v4372_v2 = vadd.f32 %v4334_v40, %v3946_v56  ;;  %v3228_v8 = vpop.f32.mrf.mxu2 }
 0x2d8   : > { %v3265_v43 = vadd.f32 %v3228_v8, %v2950_v12 }
 0x2d9   : > { %4404 = vst [vmem:[%s6893_s30 + $0xe0] sm:$0xff] %v4372_v2  ;;  %v4435_v10 = vadd.f32 %v4434_v32, %v4372_v2  ;;  %v4474_v21 = vmul.f32 %v4372_v2, %v4372_v2  ;;  %v2916_v55 = vpop.f32.mrf.mxu1 }
 0x2da   : > { %v4336_v61 = vpop.f32.mrf.mxu0  ;;  %v2951_v50 = vadd.f32 %v2916_v55, %v6853_v6 }
 0x2db   : > { %v4505_v5 = vadd.f32 %v4504_v11, %v4474_v21 }
 0x2dc   : > { %v3910_v13 = vpop.f32.mrf.mxu3 }
 0x2dd   : > { %v3947_v34 = vadd.f32 %v3910_v13, %v3265_v43 }
 0x2df   : > { %v4373_v46 = vadd.f32 %v4336_v61, %v3947_v34  ;;  %v3231_v29 = vpop.f32.mrf.mxu2 }
 0x2e0   : > { %v3266_v36 = vadd.f32 %v3231_v29, %v2951_v50 }
 0x2e1   : > { %4405 = vst [vmem:[%s6893_s30 + $0xe8] sm:$0xff] %v4373_v46  ;;  %v4436_v9 = vadd.f32 %v4435_v10, %v4373_v46  ;;  %v4475_v19 = vmul.f32 %v4373_v46, %v4373_v46  ;;  %v2918_v23 = vpop.f32.mrf.mxu1 }
 0x2e2   : > { %v4339_v31 = vpop.f32.mrf.mxu0  ;;  %v2952_v27 = vadd.f32 %v2918_v23, %v6876_v39 }
 0x2e3   : > { %v4506_v62 = vadd.f32 %v4505_v5, %v4475_v19 }
 0x2e4   : > { %v3913_v16 = vpop.f32.mrf.mxu3 }
 0x2e5   : > { %v3948_v38 = vadd.f32 %v3913_v16, %v3266_v36 }
 0x2e7   : > { %v4374_v41 = vadd.f32 %v4339_v31, %v3948_v38  ;;  %v3233_v35 = vpop.f32.mrf.mxu2 }
 0x2e8   : > { %v3267_v0 = vadd.f32 %v3233_v35, %v2952_v27 }
 0x2e9   : > { %4406 = vst [vmem:[%s6893_s30 + $0xf0] sm:$0xff] %v4374_v41  ;;  %v4437_v52 = vadd.f32 %v4436_v9, %v4374_v41  ;;  %v4476_v58 = vmul.f32 %v4374_v41, %v4374_v41 }
 0x2ea   : > { %v4341_v3 = vpop.f32.mrf.mxu0 }
 0x2eb   : > { %v4507_v6 = vadd.f32 %v4506_v62, %v4476_v58 }
 0x2ec   : > { %v3915_v49 = vpop.f32.mrf.mxu3 }
 0x2ed   : > { %v3949_v24 = vadd.f32 %v3915_v49, %v3267_v0 }
 0x2ef   : > { %v4375_v25 = vadd.f32 %v4341_v3, %v3949_v24 }
 0x2f1   : > { %4407 = vst [vmem:[%s6893_s30 + $0xf8] sm:$0xff] %v4375_v25  ;;  %v4438_v22 = vadd.f32 %v4437_v52, %v4375_v25  ;;  %v4477_v48 = vmul.f32 %v4375_v25, %v4375_v25 }
 0x2f3   : > { %v4439_v17 = vrot.slane %v4438_v22, 4  ;;  %v4508_v18 = vadd.f32 %v4507_v6, %v4477_v48 }
 0x2f5   : > { %v4440_v15 = vadd.f32 %v4439_v17, %v4438_v22  ;;  %v4509_v7 = vrot.slane %v4508_v18, 4 }
 0x2f7   : > { %v4441_v39 = vrot.slane %v4440_v15, 2  ;;  %v4510_v26 = vadd.f32 %v4509_v7, %v4508_v18 }
 0x2f9   : > { %v4442_v59 = vadd.f32 %v4441_v39, %v4440_v15  ;;  %v4511_v37 = vrot.slane %v4510_v26, 2 }
 0x2fb   : > { %v4443_v1 = vrot.slane %v4442_v59, 1  ;;  %v4512_v4 = vadd.f32 %v4511_v37, %v4510_v26 }
 0x2fd   : > { %v4444_v42 = vadd.f32 %v4443_v1, %v4442_v59  ;;  %v4513_v60 = vrot.slane %v4512_v4, 1 }
 0x2ff   : > { %4445 = vst [vmem:[%s211_s6] sm:$0x1] %v4444_v42  ;;  %v4514_v51 = vadd.f32 %v4513_v60, %v4512_v4 }
 0x301   : > { %4515 = vst [vmem:[%s214_s9] sm:$0x1] %v4514_v51 }
 0x302 PF: > { %s15_s15 = sadd.s32 1, %s5692_s15  }
 0x303   : > { %p12_p4 = scmp.ge.s32.totalorder %s15_s15, 4  }
 0x305   :  { %14 = sbr.rel (!%p12_p4) target bundleno = 1 (0x1), region = 92 }

</bundles_post_ra>
